<compile_context>
chip_gen: v5e
topology: v5e:2x2
jax: 0.10.0
libtpu: 0.0.40
codegen_flags: <defaults>
</compile_context>

<pallas_src>
import functools

import jax
import jax.numpy as jnp
from jax.experimental import pallas as pl
from jax.experimental.pallas import tpu as pltpu

EPS = 1e-5
LANE = 128


def _round_up(x, m):
    return (x + m - 1) // m * m


def _pick_row_tile(Ho, Wo, max_rows=1024):
    """Rows-per-tile th with th | Ho and (th*Wo) % 8 == 0; th*Wo as large as
    possible but <= max_rows (falls back to the smallest valid th)."""
    divisors = [d for d in range(1, Ho + 1) if Ho % d == 0 and (d * Wo) % 8 == 0]
    if not divisors:
        return None
    under = [d for d in divisors if d * Wo <= max_rows]
    return max(under) if under else min(divisors)


def _pick_spatial_tile(S, max_tile=2048):
    """Largest multiple of 128 dividing S (<= max_tile); else full S."""
    best = None
    for t in range(128, min(S, max_tile) + 1, 128):
        if S % t == 0:
            best = t
    return best if best is not None else S


# ----------------------------------------------------------------------------
# Pallas kernels
# ----------------------------------------------------------------------------
def _fused_conv_stats_kernel(img_ref, w_ref, out_ref, psum_ref, pssq_ref, *, th, Wo):
    """Fused im2col + 3x3 conv (9 accumulating MXU matmuls) + per-tile stats.

    img_ref : (Hp, Wp, Cin_p) zero-padded NHWC image (resident per image).
    w_ref   : (9, Cin_p, Cp) tap weights (resident across the grid).
    out_ref : (th*Wo, Cp) bf16 conv tile.
    psum_ref / pssq_ref : (8, Cp) per-tile channel sum / sum-of-squares.
    """
    j = pl.program_id(1)
    start = j * th                       # first padded row needed by this tile
    if th % 8 == 0:
        start = pl.multiple_of(start, 8)

    slab = img_ref[pl.ds(start, th + 2), :, :]          # (th+2, Wp, Cin_p) bf16
    rows = th * Wo
    cin_p = slab.shape[-1]
    cp = out_ref.shape[-1]

    acc = jnp.zeros((rows, cp), jnp.float32)
    for dx in range(3):                                  # 3 sublane shifts only
        shifted = slab[:, dx:dx + Wo, :]                 # (th+2, Wo, Cin_p)
        for dy in range(3):                              # free major-dim slices
            a = shifted[dy:dy + th].reshape(rows, cin_p)
            acc = acc + jnp.dot(a, w_ref[dy * 3 + dx],
                                preferred_element_type=jnp.float32)

    out_ref[...] = acc.astype(out_ref.dtype)             # bf16 intermediate

    row_sum = jnp.sum(acc, axis=0, keepdims=True)        # (1, Cp) f32
    row_ssq = jnp.sum(acc * acc, axis=0, keepdims=True)  # (1, Cp) f32
    psum_ref[...] = jnp.broadcast_to(row_sum, psum_ref.shape)
    pssq_ref[...] = jnp.broadcast_to(row_ssq, pssq_ref.shape)


def _bn_relu_transpose_kernel(x_ref, scale_ref, shift_ref, o_ref, *, c_keep):
    """Precomputed-BN affine + ReLU; stores a lane-dense (C, spatial) tile."""
    x = x_ref[...].astype(jnp.float32)                   # (tile2, Cp)
    y = jnp.maximum(x * scale_ref[...] + shift_ref[...], 0.0)
    yt = y.T                                             # (Cp, tile2)
    o_ref[...] = yt[:c_keep, :].astype(o_ref.dtype)      # (C8, tile2)


# ----------------------------------------------------------------------------
# JAX glue (layout plumbing + tiny stat reduction only)
# ----------------------------------------------------------------------------
def _bilinear_upsample_x2(x):
    """PyTorch F.interpolate(scale_factor=2, mode='bilinear', align_corners=False)."""
    def up_axis(a, axis):
        in_size = a.shape[axis]
        out_size = 2 * in_size
        dst = jnp.arange(out_size, dtype=jnp.float32)
        src = jnp.maximum((dst + 0.5) * 0.5 - 0.5, 0.0)
        i0 = jnp.floor(src).astype(jnp.int32)
        i1 = jnp.minimum(i0 + 1, in_size - 1)
        w1 = src - i0.astype(jnp.float32)
        w0 = 1.0 - w1
        shape = [1] * a.ndim
        shape[axis] = out_size
        x0 = jnp.take(a, i0, axis=axis)
        x1 = jnp.take(a, i1, axis=axis)
        return x0 * w0.reshape(shape) + x1 * w1.reshape(shape)

    x = up_axis(x, 2)
    x = up_axis(x, 3)
    return x


# ----------------------------------------------------------------------------
# Forward pass
# ----------------------------------------------------------------------------
@jax.jit
def upconv_forward(x, weight, bias, gamma, beta):
    del bias  # Conv bias before BatchNorm (batch statistics) cancels in (x - mean).
              # NOTE: only valid in training-mode BN; an eval/running-stats path
              # would need the bias back.

    N, Cin, H, W = x.shape
    Cout = weight.shape[0]
    Ho, Wo = 2 * H, 2 * W
    Hp, Wp = Ho + 2, Wo + 2           # +1 halo on each side (conv padding = 1)
    S = Ho * Wo
    M = N * S
    # Contraction (channel) padding: multiples of 8 keep sublane alignment; a
    # very small Cin is padded to one full 128-lane tile (well-trodden MXU path,
    # and the activation is tiny there anyway).
    Cin_p = _round_up(Cin, 8) if Cin >= 64 else LANE
    Cp = _round_up(Cout, LANE)        # lane-dense matmul N dim / bf16 intermediate
    C8 = _round_up(Cout, 8)           # BN output channel dim (sublane axis)

    th = _pick_row_tile(Ho, Wo)
    assert th is not None, "Ho*Wo must admit a row tile with (th*Wo) % 8 == 0"
    rows = th * Wo                    # matmul M per grid step (>= 256 on real layers)
    n_row_tiles = Ho // th
    tile2 = _pick_spatial_tile(S)     # kernel-2 spatial tile (independent of th)
    tiles2 = S // tile2

    # ---- XLA glue: bilinear x2 upsample (f32), NHWC bf16, zero-pad halo+channels ----
    x_up = _bilinear_upsample_x2(x.astype(jnp.float32))              # (N,Cin,Ho,Wo)
    xh = jnp.transpose(x_up, (0, 2, 3, 1)).astype(jnp.bfloat16)      # (N,Ho,Wo,Cin)
    xh = jnp.pad(xh, ((0, 0), (1, 1), (1, 1), (0, Cin_p - Cin)))     # (N,Hp,Wp,Cin_p)

    # Tap weights: w_taps[dy*3+dx, ci, co] = weight[co, ci, dy, dx]
    w_taps = jnp.transpose(weight.astype(jnp.float32), (2, 3, 1, 0)).reshape(9, Cin, Cout)
    w_taps = jnp.pad(w_taps, ((0, 0), (0, Cin_p - Cin), (0, Cp - Cout))).astype(jnp.bfloat16)

    g2 = jnp.pad(gamma.reshape(1, Cout).astype(jnp.float32), ((0, 0), (0, Cp - Cout)))
    b2 = jnp.pad(beta.reshape(1, Cout).astype(jnp.float32), ((0, 0), (0, Cp - Cout)))

    # Explicit VMEM budget for kernel 1 (v5e 16 MiB / v6e+v7x 32 MiB scoped default).
    ws = (2 * Hp * Wp * Cin_p * 2            # resident image block (double-buffered)
          + 2 * 9 * Cin_p * Cp * 2           # resident tap weights
          + 2 * rows * Cp * 2                # bf16 conv tile output
          + 4 * 8 * Cp * 4 * 2               # partial stats outputs
          + rows * Cp * 4                    # f32 accumulator
          + 4 * (th + 2) * Wp * Cin_p * 2)   # halo slab + shifted tap copies
    vmem_limit = int(min(64 * 2 ** 20, max(32 * 2 ** 20, 2 * ws)))

    # ---- Pallas kernel 1: fused im2col + 3x3 conv + per-tile channel stats ----
    conv_out, psum, pssq = pl.pallas_call(
        functools.partial(_fused_conv_stats_kernel, th=th, Wo=Wo),
        out_shape=(
            jax.ShapeDtypeStruct((M, Cp), jnp.bfloat16),             # bf16 intermediate
            jax.ShapeDtypeStruct((8 * N * n_row_tiles, Cp), jnp.float32),
            jax.ShapeDtypeStruct((8 * N * n_row_tiles, Cp), jnp.float32),
        ),
        grid=(N, n_row_tiles),
        in_specs=[
            # Whole padded image resident per image n (index ignores j -> DMA'd once per n).
            pl.BlockSpec((None, Hp, Wp, Cin_p), lambda n, j: (n, 0, 0, 0)),
            pl.BlockSpec((9, Cin_p, Cp), lambda n, j: (0, 0, 0)),    # resident weights
        ],
        out_specs=(
            pl.BlockSpec((rows, Cp), lambda n, j: (n * n_row_tiles + j, 0)),
            pl.BlockSpec((8, Cp), lambda n, j: (n * n_row_tiles + j, 0)),
            pl.BlockSpec((8, Cp), lambda n, j: (n * n_row_tiles + j, 0)),
        ),
        compiler_params=pltpu.CompilerParams(
            dimension_semantics=("parallel", "parallel"),
            vmem_limit_bytes=vmem_limit),
    )(xh, w_taps)

    # ---- Tiny XLA op: cross-tile stat reduction + BN scale/shift precompute ----
    # NOTE: stats come from the f32 accumulator but are applied to the
    # bf16-rounded intermediate (within bf16 noise).
    inv_m = 1.0 / float(M)
    csum = jnp.sum(psum[::8], axis=0, keepdims=True)                 # (1, Cp)
    cssq = jnp.sum(pssq[::8], axis=0, keepdims=True)                 # (1, Cp)
    mean = csum * inv_m
    var = jnp.maximum(cssq * inv_m - mean * mean, 0.0)
    scale = g2 * jax.lax.rsqrt(var + EPS)
    shift = b2 - mean * scale

    # ---- Pallas kernel 2: fma + ReLU + transpose, NCHW-ordered lane-dense output ----
    bn = pl.pallas_call(
        functools.partial(_bn_relu_transpose_kernel, c_keep=C8),
        out_shape=jax.ShapeDtypeStruct((N, C8, S), x.dtype),
        grid=(N, tiles2),
        in_specs=[
            pl.BlockSpec((tile2, Cp), lambda n, j: (n * tiles2 + j, 0)),
            pl.BlockSpec((1, Cp), lambda n, j: (0, 0)),
            pl.BlockSpec((1, Cp), lambda n, j: (0, 0)),
        ],
        out_specs=pl.BlockSpec((None, C8, tile2), lambda n, j: (n, 0, j)),
        compiler_params=pltpu.CompilerParams(
            dimension_semantics=("parallel", "parallel")),
    )(conv_out, scale, shift)

    out = bn if C8 == Cout else bn[:, :Cout, :]
    return out.reshape(N, Cout, Ho, Wo)


# ----------------------------------------------------------------------------
# Pure-JAX reference (f32, HIGHEST precision) for correctness check
# ----------------------------------------------------------------------------
def _reference(x, weight, bias, gamma, beta):
    x_up = _bilinear_upsample_x2(x.astype(jnp.float32))
    conv = jax.lax.conv_general_dilated(
        x_up, weight.astype(jnp.float32),
        window_strides=(1, 1), padding=((1, 1), (1, 1)),
        dimension_numbers=("NCHW", "OIHW", "NCHW"),
        precision=jax.lax.Precision.HIGHEST,
    ) + bias.reshape(1, -1, 1, 1)
    mean = jnp.mean(conv, axis=(0, 2, 3), keepdims=True)
    var = jnp.mean((conv - mean) ** 2, axis=(0, 2, 3), keepdims=True)
    y = (conv - mean) * jax.lax.rsqrt(var + EPS)
    y = y * gamma.reshape(1, -1, 1, 1) + beta.reshape(1, -1, 1, 1)
    return jnp.maximum(y, 0.0)


if __name__ == "__main__":
    key = jax.random.PRNGKey(0)
    kx, kw, kb, kg, kbe = jax.random.split(key, 5)

    N, Cin, H, W = 2, 4, 16, 16
    Cout = 8

    x = jax.random.normal(kx, (N, Cin, H, W), jnp.float32)
    weight = 0.1 * jax.random.normal(kw, (Cout, Cin, 3, 3), jnp.float32)
    bias = 0.1 * jax.random.normal(kb, (Cout,), jnp.float32)
    gamma = 1.0 + 0.1 * jax.random.normal(kg, (Cout,), jnp.float32)
    beta = 0.1 * jax.random.normal(kbe, (Cout,), jnp.float32)

    out = upconv_forward(x, weight, bias, gamma, beta)
    out = jax.block_until_ready(out)

    assert out.shape == (N, Cout, 2 * H, 2 * W), out.shape

    ref = _reference(x, weight, bias, gamma, beta)
    max_err = float(jnp.max(jnp.abs(out - ref)))
    # bf16 MXU operands + bf16 intermediate (f32 accumulation/stats) introduce
    # ~1e-2 abs error after BatchNorm scaling vs. the f32 HIGHEST reference.
    assert max_err < 3e-2, f"max abs error too large: {max_err}"

    print("KERNEL_OK")
</pallas_src>

<mosaic_0001>
module attributes {stable_mosaic.version = 11 : i64} {
  func.func @_fused_conv_stats_kernel(%arg0: i32, %arg1: i32, %arg2: memref<1x34x34x128xbf16, #tpu.memory_space<vmem>>, %arg3: memref<9x128x128xbf16, #tpu.memory_space<vmem>>, %arg4: memref<1024x128xbf16, #tpu.memory_space<vmem>>, %arg5: memref<8x128xf32, #tpu.memory_space<vmem>>, %arg6: memref<8x128xf32, #tpu.memory_space<vmem>>) attributes {dimension_semantics = [#tpu.dimension_semantics<parallel>, #tpu.dimension_semantics<parallel>], iteration_bounds = array<i64: 2, 1>, scalar_prefetch = 0 : i64, scratch_operands = 0 : i64, tpu.core_type = #tpu.core_type<tc>, window_params = [{transform_indices = @transform_0, window_bounds = array<i64: 1, 34, 34, 128>}, {pipeline_mode = #tpu.pipeline_mode<synchronous>, transform_indices = @transform_1, window_bounds = array<i64: 9, 128, 128>}, {transform_indices = @transform_2, window_bounds = array<i64: 1024, 128>}, {transform_indices = @transform_3, window_bounds = array<i64: 8, 128>}, {transform_indices = @transform_4, window_bounds = array<i64: 8, 128>}]} {
    %c32_i32 = arith.constant 32 : i32
    %0 = arith.muli %arg1, %c32_i32 : i32
    %1 = tpu.assume_multiple %0, 8 : i32
    %c0 = arith.constant 0 : index
    %2 = arith.index_cast %1 : i32 to index
    %c0_0 = arith.constant 0 : index
    %c0_1 = arith.constant 0 : index
    %3 = vector.load %arg2[%c0, %2, %c0_0, %c0_1] : memref<1x34x34x128xbf16, #tpu.memory_space<vmem>>, vector<1x34x34x128xbf16>
    %4 = vector.shape_cast %3 : vector<1x34x34x128xbf16> to vector<34x34x128xbf16>
    %cst = arith.constant 0.000000e+00 : f32
    %5 = vector.broadcast %cst : f32 to vector<1024x128xf32>
    %6 = vector.extract_strided_slice %4 {offsets = [0, 0, 0], sizes = [34, 32, 128], strides = [1, 1, 1]} : vector<34x34x128xbf16> to vector<34x32x128xbf16>
    %7 = vector.extract_strided_slice %6 {offsets = [0, 0, 0], sizes = [32, 32, 128], strides = [1, 1, 1]} : vector<34x32x128xbf16> to vector<32x32x128xbf16>
    %8 = vector.shape_cast %7 : vector<32x32x128xbf16> to vector<1024x128xbf16>
    %c0_2 = arith.constant 0 : index
    %c0_3 = arith.constant 0 : index
    %c0_4 = arith.constant 0 : index
    %9 = vector.load %arg3[%c0_2, %c0_3, %c0_4] : memref<9x128x128xbf16, #tpu.memory_space<vmem>>, vector<1x128x128xbf16>
    %10 = vector.shape_cast %9 : vector<1x128x128xbf16> to vector<128x128xbf16>
    %cst_5 = arith.constant dense<0.000000e+00> : vector<1024x128xf32>
    %11 = tpu.matmul %8, %10, %cst_5 {dimension_numbers = #tpu.dot_dimension_numbers<[1], [0], [0], [1], [0, 0, 1, 1], [], []>} : vector<1024x128xbf16>, vector<128x128xbf16>, vector<1024x128xf32> -> vector<1024x128xf32>
    %12 = arith.addf %5, %11 : vector<1024x128xf32>
    %13 = vector.extract_strided_slice %6 {offsets = [1, 0, 0], sizes = [32, 32, 128], strides = [1, 1, 1]} : vector<34x32x128xbf16> to vector<32x32x128xbf16>
    %14 = vector.shape_cast %13 : vector<32x32x128xbf16> to vector<1024x128xbf16>
    %c3 = arith.constant 3 : index
    %c0_6 = arith.constant 0 : index
    %c0_7 = arith.constant 0 : index
    %15 = vector.load %arg3[%c3, %c0_6, %c0_7] : memref<9x128x128xbf16, #tpu.memory_space<vmem>>, vector<1x128x128xbf16>
    %16 = vector.shape_cast %15 : vector<1x128x128xbf16> to vector<128x128xbf16>
    %cst_8 = arith.constant dense<0.000000e+00> : vector<1024x128xf32>
    %17 = tpu.matmul %14, %16, %cst_8 {dimension_numbers = #tpu.dot_dimension_numbers<[1], [0], [0], [1], [0, 0, 1, 1], [], []>} : vector<1024x128xbf16>, vector<128x128xbf16>, vector<1024x128xf32> -> vector<1024x128xf32>
    %18 = arith.addf %12, %17 : vector<1024x128xf32>
    %19 = vector.extract_strided_slice %6 {offsets = [2, 0, 0], sizes = [32, 32, 128], strides = [1, 1, 1]} : vector<34x32x128xbf16> to vector<32x32x128xbf16>
    %20 = vector.shape_cast %19 : vector<32x32x128xbf16> to vector<1024x128xbf16>
    %c6 = arith.constant 6 : index
    %c0_9 = arith.constant 0 : index
    %c0_10 = arith.constant 0 : index
    %21 = vector.load %arg3[%c6, %c0_9, %c0_10] : memref<9x128x128xbf16, #tpu.memory_space<vmem>>, vector<1x128x128xbf16>
    %22 = vector.shape_cast %21 : vector<1x128x128xbf16> to vector<128x128xbf16>
    %cst_11 = arith.constant dense<0.000000e+00> : vector<1024x128xf32>
    %23 = tpu.matmul %20, %22, %cst_11 {dimension_numbers = #tpu.dot_dimension_numbers<[1], [0], [0], [1], [0, 0, 1, 1], [], []>} : vector<1024x128xbf16>, vector<128x128xbf16>, vector<1024x128xf32> -> vector<1024x128xf32>
    %24 = arith.addf %18, %23 : vector<1024x128xf32>
    %25 = vector.extract_strided_slice %4 {offsets = [0, 1, 0], sizes = [34, 32, 128], strides = [1, 1, 1]} : vector<34x34x128xbf16> to vector<34x32x128xbf16>
    %26 = vector.extract_strided_slice %25 {offsets = [0, 0, 0], sizes = [32, 32, 128], strides = [1, 1, 1]} : vector<34x32x128xbf16> to vector<32x32x128xbf16>
    %27 = vector.shape_cast %26 : vector<32x32x128xbf16> to vector<1024x128xbf16>
    %c1 = arith.constant 1 : index
    %c0_12 = arith.constant 0 : index
    %c0_13 = arith.constant 0 : index
    %28 = vector.load %arg3[%c1, %c0_12, %c0_13] : memref<9x128x128xbf16, #tpu.memory_space<vmem>>, vector<1x128x128xbf16>
    %29 = vector.shape_cast %28 : vector<1x128x128xbf16> to vector<128x128xbf16>
    %cst_14 = arith.constant dense<0.000000e+00> : vector<1024x128xf32>
    %30 = tpu.matmul %27, %29, %cst_14 {dimension_numbers = #tpu.dot_dimension_numbers<[1], [0], [0], [1], [0, 0, 1, 1], [], []>} : vector<1024x128xbf16>, vector<128x128xbf16>, vector<1024x128xf32> -> vector<1024x128xf32>
    %31 = arith.addf %24, %30 : vector<1024x128xf32>
    %32 = vector.extract_strided_slice %25 {offsets = [1, 0, 0], sizes = [32, 32, 128], strides = [1, 1, 1]} : vector<34x32x128xbf16> to vector<32x32x128xbf16>
    %33 = vector.shape_cast %32 : vector<32x32x128xbf16> to vector<1024x128xbf16>
    %c4 = arith.constant 4 : index
    %c0_15 = arith.constant 0 : index
    %c0_16 = arith.constant 0 : index
    %34 = vector.load %arg3[%c4, %c0_15, %c0_16] : memref<9x128x128xbf16, #tpu.memory_space<vmem>>, vector<1x128x128xbf16>
    %35 = vector.shape_cast %34 : vector<1x128x128xbf16> to vector<128x128xbf16>
    %cst_17 = arith.constant dense<0.000000e+00> : vector<1024x128xf32>
    %36 = tpu.matmul %33, %35, %cst_17 {dimension_numbers = #tpu.dot_dimension_numbers<[1], [0], [0], [1], [0, 0, 1, 1], [], []>} : vector<1024x128xbf16>, vector<128x128xbf16>, vector<1024x128xf32> -> vector<1024x128xf32>
    %37 = arith.addf %31, %36 : vector<1024x128xf32>
    %38 = vector.extract_strided_slice %25 {offsets = [2, 0, 0], sizes = [32, 32, 128], strides = [1, 1, 1]} : vector<34x32x128xbf16> to vector<32x32x128xbf16>
    %39 = vector.shape_cast %38 : vector<32x32x128xbf16> to vector<1024x128xbf16>
    %c7 = arith.constant 7 : index
    %c0_18 = arith.constant 0 : index
    %c0_19 = arith.constant 0 : index
    %40 = vector.load %arg3[%c7, %c0_18, %c0_19] : memref<9x128x128xbf16, #tpu.memory_space<vmem>>, vector<1x128x128xbf16>
    %41 = vector.shape_cast %40 : vector<1x128x128xbf16> to vector<128x128xbf16>
    %cst_20 = arith.constant dense<0.000000e+00> : vector<1024x128xf32>
    %42 = tpu.matmul %39, %41, %cst_20 {dimension_numbers = #tpu.dot_dimension_numbers<[1], [0], [0], [1], [0, 0, 1, 1], [], []>} : vector<1024x128xbf16>, vector<128x128xbf16>, vector<1024x128xf32> -> vector<1024x128xf32>
    %43 = arith.addf %37, %42 : vector<1024x128xf32>
    %44 = vector.extract_strided_slice %4 {offsets = [0, 2, 0], sizes = [34, 32, 128], strides = [1, 1, 1]} : vector<34x34x128xbf16> to vector<34x32x128xbf16>
    %45 = vector.extract_strided_slice %44 {offsets = [0, 0, 0], sizes = [32, 32, 128], strides = [1, 1, 1]} : vector<34x32x128xbf16> to vector<32x32x128xbf16>
    %46 = vector.shape_cast %45 : vector<32x32x128xbf16> to vector<1024x128xbf16>
    %c2 = arith.constant 2 : index
    %c0_21 = arith.constant 0 : index
    %c0_22 = arith.constant 0 : index
    %47 = vector.load %arg3[%c2, %c0_21, %c0_22] : memref<9x128x128xbf16, #tpu.memory_space<vmem>>, vector<1x128x128xbf16>
    %48 = vector.shape_cast %47 : vector<1x128x128xbf16> to vector<128x128xbf16>
    %cst_23 = arith.constant dense<0.000000e+00> : vector<1024x128xf32>
    %49 = tpu.matmul %46, %48, %cst_23 {dimension_numbers = #tpu.dot_dimension_numbers<[1], [0], [0], [1], [0, 0, 1, 1], [], []>} : vector<1024x128xbf16>, vector<128x128xbf16>, vector<1024x128xf32> -> vector<1024x128xf32>
    %50 = arith.addf %43, %49 : vector<1024x128xf32>
    %51 = vector.extract_strided_slice %44 {offsets = [1, 0, 0], sizes = [32, 32, 128], strides = [1, 1, 1]} : vector<34x32x128xbf16> to vector<32x32x128xbf16>
    %52 = vector.shape_cast %51 : vector<32x32x128xbf16> to vector<1024x128xbf16>
    %c5 = arith.constant 5 : index
    %c0_24 = arith.constant 0 : index
    %c0_25 = arith.constant 0 : index
    %53 = vector.load %arg3[%c5, %c0_24, %c0_25] : memref<9x128x128xbf16, #tpu.memory_space<vmem>>, vector<1x128x128xbf16>
    %54 = vector.shape_cast %53 : vector<1x128x128xbf16> to vector<128x128xbf16>
    %cst_26 = arith.constant dense<0.000000e+00> : vector<1024x128xf32>
    %55 = tpu.matmul %52, %54, %cst_26 {dimension_numbers = #tpu.dot_dimension_numbers<[1], [0], [0], [1], [0, 0, 1, 1], [], []>} : vector<1024x128xbf16>, vector<128x128xbf16>, vector<1024x128xf32> -> vector<1024x128xf32>
    %56 = arith.addf %50, %55 : vector<1024x128xf32>
    %57 = vector.extract_strided_slice %44 {offsets = [2, 0, 0], sizes = [32, 32, 128], strides = [1, 1, 1]} : vector<34x32x128xbf16> to vector<32x32x128xbf16>
    %58 = vector.shape_cast %57 : vector<32x32x128xbf16> to vector<1024x128xbf16>
    %c8 = arith.constant 8 : index
    %c0_27 = arith.constant 0 : index
    %c0_28 = arith.constant 0 : index
    %59 = vector.load %arg3[%c8, %c0_27, %c0_28] : memref<9x128x128xbf16, #tpu.memory_space<vmem>>, vector<1x128x128xbf16>
    %60 = vector.shape_cast %59 : vector<1x128x128xbf16> to vector<128x128xbf16>
    %cst_29 = arith.constant dense<0.000000e+00> : vector<1024x128xf32>
    %61 = tpu.matmul %58, %60, %cst_29 {dimension_numbers = #tpu.dot_dimension_numbers<[1], [0], [0], [1], [0, 0, 1, 1], [], []>} : vector<1024x128xbf16>, vector<128x128xbf16>, vector<1024x128xf32> -> vector<1024x128xf32>
    %62 = arith.addf %56, %61 : vector<1024x128xf32>
    %63 = arith.truncf %62 : vector<1024x128xf32> to vector<1024x128xbf16>
    %c0_30 = arith.constant 0 : index
    %c0_31 = arith.constant 0 : index
    %64 = vector.load %arg4[%c0_30, %c0_31] : memref<1024x128xbf16, #tpu.memory_space<vmem>>, vector<1024x128xbf16>
    tpu.vector_store %arg4[%c0_30, %c0_31], %63 {strides = array<i32>} : memref<1024x128xbf16, #tpu.memory_space<vmem>>, vector<1024x128xbf16>,
    %cst_32 = arith.constant dense<0.000000e+00> : vector<128xf32>
    %65 = vector.multi_reduction <add>, %62, %cst_32 [0] : vector<1024x128xf32> to vector<128xf32>
    %66 = vector.shape_cast %65 : vector<128xf32> to vector<1x128xf32>
    %67 = arith.mulf %62, %62 : vector<1024x128xf32>
    %cst_33 = arith.constant dense<0.000000e+00> : vector<128xf32>
    %68 = vector.multi_reduction <add>, %67, %cst_33 [0] : vector<1024x128xf32> to vector<128xf32>
    %69 = vector.shape_cast %68 : vector<128xf32> to vector<1x128xf32>
    %70 = vector.shape_cast %66 : vector<1x128xf32> to vector<1x128xf32>
    %71 = vector.broadcast %70 : vector<1x128xf32> to vector<8x128xf32>
    %c0_34 = arith.constant 0 : index
    %c0_35 = arith.constant 0 : index
    %72 = vector.load %arg5[%c0_34, %c0_35] : memref<8x128xf32, #tpu.memory_space<vmem>>, vector<8x128xf32>
    tpu.vector_store %arg5[%c0_34, %c0_35], %71 {strides = array<i32>} : memref<8x128xf32, #tpu.memory_space<vmem>>, vector<8x128xf32>,
    %73 = vector.shape_cast %69 : vector<1x128xf32> to vector<1x128xf32>
    %74 = vector.broadcast %73 : vector<1x128xf32> to vector<8x128xf32>
    %c0_36 = arith.constant 0 : index
    %c0_37 = arith.constant 0 : index
    %75 = vector.load %arg6[%c0_36, %c0_37] : memref<8x128xf32, #tpu.memory_space<vmem>>, vector<8x128xf32>
    tpu.vector_store %arg6[%c0_36, %c0_37], %74 {strides = array<i32>} : memref<8x128xf32, #tpu.memory_space<vmem>>, vector<8x128xf32>,
    return
  }
  func.func @transform_0(%arg0: i32, %arg1: i32) -> (i32, i32, i32, i32) {
    %c0_i32 = arith.constant 0 : i32
    %c0_i32_0 = arith.constant 0 : i32
    %c0_i32_1 = arith.constant 0 : i32
    %c0_i32_2 = arith.constant 0 : i32
    return %arg0, %c0_i32, %c0_i32_0, %c0_i32_1 : i32, i32, i32, i32
  }
  func.func @transform_1(%arg0: i32, %arg1: i32) -> (i32, i32, i32) {
    %c0_i32 = arith.constant 0 : i32
    %c0_i32_0 = arith.constant 0 : i32
    %c0_i32_1 = arith.constant 0 : i32
    %c0_i32_2 = arith.constant 0 : i32
    return %c0_i32, %c0_i32_0, %c0_i32_1 : i32, i32, i32
  }
  func.func @transform_2(%arg0: i32, %arg1: i32) -> (i32, i32) {
    %c1_i32 = arith.constant 1 : i32
    %0 = arith.muli %arg0, %c1_i32 : i32
    %1 = arith.addi %0, %arg1 : i32
    %c0_i32 = arith.constant 0 : i32
    %c0_i32_0 = arith.constant 0 : i32
    return %1, %c0_i32 : i32, i32
  }
  func.func @transform_3(%arg0: i32, %arg1: i32) -> (i32, i32) {
    %c1_i32 = arith.constant 1 : i32
    %0 = arith.muli %arg0, %c1_i32 : i32
    %1 = arith.addi %0, %arg1 : i32
    %c0_i32 = arith.constant 0 : i32
    %c0_i32_0 = arith.constant 0 : i32
    return %1, %c0_i32 : i32, i32
  }
  func.func @transform_4(%arg0: i32, %arg1: i32) -> (i32, i32) {
    %c1_i32 = arith.constant 1 : i32
    %0 = arith.muli %arg0, %c1_i32 : i32
    %1 = arith.addi %0, %arg1 : i32
    %c0_i32 = arith.constant 0 : i32
    %c0_i32_0 = arith.constant 0 : i32
    return %1, %c0_i32 : i32, i32
  }
}

module attributes {stable_mosaic.version = 11 : i64} {
  func.func @_bn_relu_transpose_kernel(%arg0: i32, %arg1: i32, %arg2: memref<1024x128xbf16, #tpu.memory_space<vmem>>, %arg3: memref<1x128xf32, #tpu.memory_space<vmem>>, %arg4: memref<1x128xf32, #tpu.memory_space<vmem>>, %arg5: memref<1x8x1024xf32, #tpu.memory_space<vmem>>) attributes {dimension_semantics = [#tpu.dimension_semantics<parallel>, #tpu.dimension_semantics<parallel>], iteration_bounds = array<i64: 2, 1>, scalar_prefetch = 0 : i64, scratch_operands = 0 : i64, tpu.core_type = #tpu.core_type<tc>, window_params = [{transform_indices = @transform_0, window_bounds = array<i64: 1024, 128>}, {pipeline_mode = #tpu.pipeline_mode<synchronous>, transform_indices = @transform_1, window_bounds = array<i64: 1, 128>}, {pipeline_mode = #tpu.pipeline_mode<synchronous>, transform_indices = @transform_2, window_bounds = array<i64: 1, 128>}, {transform_indices = @transform_3, window_bounds = array<i64: 1, 8, 1024>}]} {
    %c0 = arith.constant 0 : index
    %c0_0 = arith.constant 0 : index
    %0 = vector.load %arg2[%c0, %c0_0] : memref<1024x128xbf16, #tpu.memory_space<vmem>>, vector<1024x128xbf16>
    %1 = arith.extf %0 : vector<1024x128xbf16> to vector<1024x128xf32>
    %c0_1 = arith.constant 0 : index
    %c0_2 = arith.constant 0 : index
    %2 = vector.load %arg3[%c0_1, %c0_2] : memref<1x128xf32, #tpu.memory_space<vmem>>, vector<1x128xf32>
    %3 = vector.broadcast %2 : vector<1x128xf32> to vector<1024x128xf32>
    %4 = arith.mulf %1, %3 : vector<1024x128xf32>
    %c0_3 = arith.constant 0 : index
    %c0_4 = arith.constant 0 : index
    %5 = vector.load %arg4[%c0_3, %c0_4] : memref<1x128xf32, #tpu.memory_space<vmem>>, vector<1x128xf32>
    %6 = vector.broadcast %5 : vector<1x128xf32> to vector<1024x128xf32>
    %7 = arith.addf %4, %6 : vector<1024x128xf32>
    %cst = arith.constant 0.000000e+00 : f32
    %8 = vector.broadcast %cst : f32 to vector<1024x128xf32>
    %9 = arith.maximumf %7, %8 : vector<1024x128xf32>
    %10 = tpu.transpose %9, [1, 0] : vector<1024x128xf32> -> vector<128x1024xf32>
    %11 = vector.extract_strided_slice %10 {offsets = [0, 0], sizes = [8, 1024], strides = [1, 1]} : vector<128x1024xf32> to vector<8x1024xf32>
    %c0_5 = arith.constant 0 : index
    %c0_6 = arith.constant 0 : index
    %c0_7 = arith.constant 0 : index
    %12 = vector.load %arg5[%c0_5, %c0_6, %c0_7] : memref<1x8x1024xf32, #tpu.memory_space<vmem>>, vector<1x8x1024xf32>
    %13 = vector.shape_cast %12 : vector<1x8x1024xf32> to vector<8x1024xf32>
    %14 = vector.shape_cast %11 : vector<8x1024xf32> to vector<1x8x1024xf32>
    tpu.vector_store %arg5[%c0_5, %c0_6, %c0_7], %14 {strides = array<i32>} : memref<1x8x1024xf32, #tpu.memory_space<vmem>>, vector<1x8x1024xf32>,
    return
  }
  func.func @transform_0(%arg0: i32, %arg1: i32) -> (i32, i32) {
    %c1_i32 = arith.constant 1 : i32
    %0 = arith.muli %arg0, %c1_i32 : i32
    %1 = arith.addi %0, %arg1 : i32
    %c0_i32 = arith.constant 0 : i32
    %c0_i32_0 = arith.constant 0 : i32
    return %1, %c0_i32 : i32, i32
  }
  func.func @transform_1(%arg0: i32, %arg1: i32) -> (i32, i32) {
    %c0_i32 = arith.constant 0 : i32
    %c0_i32_0 = arith.constant 0 : i32
    %c0_i32_1 = arith.constant 0 : i32
    return %c0_i32, %c0_i32_0 : i32, i32
  }
  func.func @transform_2(%arg0: i32, %arg1: i32) -> (i32, i32) {
    %c0_i32 = arith.constant 0 : i32
    %c0_i32_0 = arith.constant 0 : i32
    %c0_i32_1 = arith.constant 0 : i32
    return %c0_i32, %c0_i32_0 : i32, i32
  }
  func.func @transform_3(%arg0: i32, %arg1: i32) -> (i32, i32, i32) {
    %c0_i32 = arith.constant 0 : i32
    %c0_i32_0 = arith.constant 0 : i32
    return %arg0, %c0_i32, %arg1 : i32, i32, i32
  }
}

</mosaic_0001>

<bundles_post_ra>
// kernel: upconv_forward.3
= control target key start
LH: loop header
LB: loop body
LE: loop exit
PB: predicated region body
PF: predicated region fallthrough
CT: control target
= control target key end

     0   :  { %s1599_s12 = smov 0   ;;  %s1601_s13 = smov 0   ;;  %s1989_s0 = inlined_call_operand.vmem [shape: bf16[2048,128], index: 0, kind: input, shape index: {}]   ;;  %s1990_s1 = inlined_call_operand.vmem [shape: f32[1,128], index: 1, kind: input, shape index: {}]   ;;  %s1991_s2 = inlined_call_operand.vmem [shape: f32[1,128], index: 2, kind: input, shape index: {}]   ;;  %s1992_s3 = inlined_call_operand.vmem [shape: f32[2,8,1024], index: 3, kind: output, shape index: {}]  }
   0x1   :  { %s1603_s14 = smov 0  }
   0x2 LB: > { %s25_s15 = sadd.s32 1, %s1573_s13  ;;  %p1200_p0 = scmp.ge.s32.totalorder %s1577_s14, 1  ;;  %s1577_s14 = sphi %s1603_s14, %s13_s14   ;;  %s1573_s13 = sphi %s1601_s13, %s1994_s13   ;;  %s1569_s12 = sphi %s1599_s12, %s1993_s12  }
   0x3   : > { %p27_p1 = scmp.ge.s32.totalorder %s25_s15, 2  ;;  %p156_p2 = scmp.lt.s32.totalorder %s1577_s14, 3 }
   0x5   : > { %s1996_s15 = smov (%p27_p1, %s25_s15), 0  ;;  %p157_p3 = pnand %p1200_p0, %p156_p2 }
   0x6   : > { %s1201_s16 = sshll.u32 (!%p157_p3), %s1569_s12, 7  ;;  %p194_p5 = scmp.lt.s32.totalorder (!%p157_p3), %s1569_s12, 1 }
   0x7   : > { %160 = sbr.rel (%p157_p3) target bundleno = 447 (0x1bf), region = 32  ;;  %p187_p4 = scmp.lt.s32.totalorder (!%p157_p3), %s1201_s16, 255 }
   0xc   : > { %s1998_s16 = smov (!%p187_p4, %s1201_s16), 255  ;;  %v1628_v0 = vld [vmem:[%s1990_s1] ss:$0 sm:$0xff]  ;;  %s2000_s12 = smov (!%p194_p5, %s1569_s12), 1 }
   0xd   : > { %s1202_s17 = sshll.u32 %s1998_s16, 2  ;;  %v1635_v4 = vld [vmem:[%s1991_s2] ss:$0 sm:$0xff]  ;;  %s1207_s29 = sshll.u32 %s2000_s12, 6 }
   0xe   : > { %s1623_s20 = scalar_lea.vmem %s1989_s0, %s1202_s17  ;;  %s1951_s5 = scalar_lea.vmem %s1992_s3, %s1207_s29 }
   0xf   : > { %v1471_v1 = vld [vmem:[%s1623_s20 + $0x40] sm:$0xff]   ;;  %v1472_v14 = vld [vmem:[%s1623_s20 + $0x48] sm:$0xff]   ;;  %v1473_v34 = vld [vmem:[%s1623_s20 + $0x50] sm:$0xff]  }
  0x10   : > { %v1209_v2 = vld [vmem:[%s1623_s20] sm:$0xff]   ;;  %v1242_v3 = vunpack.c.l.bf16 %v1471_v1  ;;  %v1243_v6 = vunpack.c.h.bf16 %v1471_v1  ;;  %v1464_v15 = vld [vmem:[%s1623_s20 + $0x8] sm:$0xff]   ;;  %v1246_v20 = vunpack.c.l.bf16 %v1472_v14  ;;  %v1247_v28 = vunpack.c.h.bf16 %v1472_v14  ;;  %v1465_v35 = vld [vmem:[%s1623_s20 + $0x10] sm:$0xff]  }
  0x11   : > { %v1210_v5 = vunpack.c.l.bf16 %v1209_v2  ;;  %v1211_v7 = vunpack.c.h.bf16 %v1209_v2  ;;  %v1214_v21 = vunpack.c.l.bf16 %v1464_v15  ;;  %v1215_v29 = vunpack.c.h.bf16 %v1464_v15  ;;  %v1474_v52 = vld [vmem:[%s1623_s20 + $0x58] sm:$0xff]  }
  0x12   : > { %v479_v8 = vmul.f32 %v1628_v0, %v1242_v3  ;;  %v480_v12 = vmul.f32 %v1628_v0, %v1243_v6  ;;  %v481_v24 = vmul.f32 %v1628_v0, %v1246_v20  ;;  %v482_v32 = vmul.f32 %v1628_v0, %v1247_v28  ;;  %v1466_v53 = vld [vmem:[%s1623_s20 + $0x18] sm:$0xff]  }
  0x13   : > { %v463_v9 = vmul.f32 %v1628_v0, %v1210_v5  ;;  %v464_v13 = vmul.f32 %v1628_v0, %v1211_v7  ;;  %v465_v25 = vmul.f32 %v1628_v0, %v1214_v21  ;;  %v466_v33 = vmul.f32 %v1628_v0, %v1215_v29 }
  0x14   : > { %v611_v10 = vadd.f32 %v1635_v4, %v479_v8  ;;  %v612_v18 = vadd.f32 %v1635_v4, %v480_v12  ;;  %v613_v26 = vadd.f32 %v1635_v4, %v481_v24  ;;  %v614_v36 = vadd.f32 %v1635_v4, %v482_v32  ;;  %v1475_v8 = vld [vmem:[%s1623_s20 + $0x60] sm:$0xff]  }
  0x15   : > { %v595_v11 = vadd.f32 %v1635_v4, %v463_v9  ;;  %v596_v19 = vadd.f32 %v1635_v4, %v464_v13  ;;  %v597_v27 = vadd.f32 %v1635_v4, %v465_v25  ;;  %v598_v37 = vadd.f32 %v1635_v4, %v466_v33  ;;  %v1467_v9 = vld [vmem:[%s1623_s20 + $0x20] sm:$0xff]  }
  0x16   : > { %v739_v16 = vmax.f32 %v611_v10, 0.0  ;;  %v740_v22 = vmax.f32 %v612_v18, 0.0  ;;  %v741_v30 = vmax.f32 %v613_v26, 0.0  ;;  %v1250_v38 = vunpack.c.l.bf16 %v1473_v34  ;;  %v1476_v26 = vld [vmem:[%s1623_s20 + $0x68] sm:$0xff]  }
  0x17   : > { %v723_v17 = vmax.f32 %v595_v11, 0.0  ;;  %v724_v23 = vmax.f32 %v596_v19, 0.0  ;;  %v725_v31 = vmax.f32 %v597_v27, 0.0  ;;  %v1218_v39 = vunpack.c.l.bf16 %v1465_v35  ;;  %v1468_v27 = vld [vmem:[%s1623_s20 + $0x28] sm:$0xff]  }
  0x18   : > { %883 = vxpose.xlu1.b32.start [1/16] (narrow) %v739_v16, 8  ;;  %v742_v40 = vmax.f32 %v614_v36, 0.0  ;;  %v726_v41 = vmax.f32 %v598_v37, 0.0  ;;  %v483_v42 = vmul.f32 %v1628_v0, %v1250_v38  ;;  %v1251_v46 = vunpack.c.h.bf16 %v1473_v34 }
  0x19   : > { %851 = vxpose.xlu0.b32.start [1/16] (narrow) %v723_v17, 8  ;;  %v467_v43 = vmul.f32 %v1628_v0, %v1218_v39  ;;  %v1219_v47 = vunpack.c.h.bf16 %v1465_v35  ;;  %v1254_v56 = vunpack.c.l.bf16 %v1474_v52  ;;  %v1222_v57 = vunpack.c.l.bf16 %v1466_v53 }
  0x1a   : > { %v615_v44 = vadd.f32 %v1635_v4, %v483_v42  ;;  %v484_v50 = vmul.f32 %v1628_v0, %v1251_v46  ;;  %v1255_v1 = vunpack.c.h.bf16 %v1474_v52  ;;  %v1223_v2 = vunpack.c.h.bf16 %v1466_v53 }
  0x1b   : > { %v599_v45 = vadd.f32 %v1635_v4, %v467_v43  ;;  %v468_v51 = vmul.f32 %v1628_v0, %v1219_v47  ;;  %v485_v60 = vmul.f32 %v1628_v0, %v1254_v56  ;;  %v469_v61 = vmul.f32 %v1628_v0, %v1222_v57 }
  0x1c   : > { %v743_v48 = vmax.f32 %v615_v44, 0.0  ;;  %v616_v54 = vadd.f32 %v1635_v4, %v484_v50  ;;  %v486_v6 = vmul.f32 %v1628_v0, %v1255_v1  ;;  %v470_v7 = vmul.f32 %v1628_v0, %v1223_v2  ;;  %v1477_v44 = vld [vmem:[%s1623_s20 + $0x70] sm:$0xff]  }
  0x1d   : > { %v727_v49 = vmax.f32 %v599_v45, 0.0  ;;  %v600_v55 = vadd.f32 %v1635_v4, %v468_v51  ;;  %v617_v62 = vadd.f32 %v1635_v4, %v485_v60  ;;  %v601_v63 = vadd.f32 %v1635_v4, %v469_v61  ;;  %v1469_v45 = vld [vmem:[%s1623_s20 + $0x30] sm:$0xff]  }
  0x1e   : > { %v744_v58 = vmax.f32 %v616_v54, 0.0  ;;  %v618_v10 = vadd.f32 %v1635_v4, %v486_v6  ;;  %v602_v11 = vadd.f32 %v1635_v4, %v470_v7  ;;  %v1258_v12 = vunpack.c.l.bf16 %v1475_v8  ;;  %v1479_v6 = vld [vmem:[%s1623_s20 + $0x80] sm:$0xff]  }
  0x1f   : > { %v728_v59 = vmax.f32 %v600_v55, 0.0  ;;  %v745_v3 = vmax.f32 %v617_v62, 0.0  ;;  %v729_v5 = vmax.f32 %v601_v63, 0.0  ;;  %v1226_v13 = vunpack.c.l.bf16 %v1467_v9  ;;  %v1478_v62 = vld [vmem:[%s1623_s20 + $0x78] sm:$0xff]  }
  0x20   : > { %884 = vxpose.xlu1.b32.cont [2/16] (narrow) %v740_v22, 8  ;;  %v746_v14 = vmax.f32 %v618_v10, 0.0  ;;  %v730_v15 = vmax.f32 %v602_v11, 0.0  ;;  %v487_v16 = vmul.f32 %v1628_v0, %v1258_v12  ;;  %v1259_v20 = vunpack.c.h.bf16 %v1475_v8  ;;  %v1470_v63 = vld [vmem:[%s1623_s20 + $0x38] sm:$0xff]  }
  0x21   : > { %852 = vxpose.xlu0.b32.cont [2/16] (narrow) %v724_v23, 8  ;;  %v471_v17 = vmul.f32 %v1628_v0, %v1226_v13  ;;  %v1227_v21 = vunpack.c.h.bf16 %v1467_v9  ;;  %v1263_v38 = vunpack.c.h.bf16 %v1476_v26  ;;  %v1231_v39 = vunpack.c.h.bf16 %v1468_v27 }
  0x22   : > { %v619_v18 = vadd.f32 %v1635_v4, %v487_v16  ;;  %v488_v24 = vmul.f32 %v1628_v0, %v1259_v20  ;;  %v1267_v56 = vunpack.c.h.bf16 %v1477_v44  ;;  %v1235_v57 = vunpack.c.h.bf16 %v1469_v45 }
  0x23   : > { %v603_v19 = vadd.f32 %v1635_v4, %v471_v17  ;;  %v472_v25 = vmul.f32 %v1628_v0, %v1227_v21  ;;  %v490_v42 = vmul.f32 %v1628_v0, %v1263_v38  ;;  %v474_v43 = vmul.f32 %v1628_v0, %v1231_v39 }
  0x24   : > { %v747_v22 = vmax.f32 %v619_v18, 0.0  ;;  %v620_v28 = vadd.f32 %v1635_v4, %v488_v24  ;;  %v492_v60 = vmul.f32 %v1628_v0, %v1267_v56  ;;  %v476_v61 = vmul.f32 %v1628_v0, %v1235_v57  ;;  %v1495_v24 = vld [vmem:[%s1623_s20 + $0x100] sm:$0xff]  }
  0x25   : > { %v731_v23 = vmax.f32 %v603_v19, 0.0  ;;  %v604_v29 = vadd.f32 %v1635_v4, %v472_v25  ;;  %v622_v46 = vadd.f32 %v1635_v4, %v490_v42  ;;  %v606_v47 = vadd.f32 %v1635_v4, %v474_v43  ;;  %v1487_v25 = vld [vmem:[%s1623_s20 + $0xc0] sm:$0xff]  }
  0x26   : > { %v748_v32 = vmax.f32 %v620_v28, 0.0  ;;  %v624_v1 = vadd.f32 %v1635_v4, %v492_v60  ;;  %v608_v2 = vadd.f32 %v1635_v4, %v476_v61  ;;  %v1274_v7 = vunpack.c.l.bf16 %v1479_v6  ;;  %v1481_v60 = vld [vmem:[%s1623_s20 + $0x90] sm:$0xff]  }
  0x27   : > { %v732_v33 = vmax.f32 %v604_v29, 0.0  ;;  %v750_v50 = vmax.f32 %v622_v46, 0.0  ;;  %v734_v51 = vmax.f32 %v606_v47, 0.0  ;;  %v1271_v16 = vunpack.c.h.bf16 %v1478_v62 }
  0x28   : > { %885 = vxpose.xlu1.b32.cont [3/16] (narrow) %v741_v30, 8  ;;  %v1262_v30 = vunpack.c.l.bf16 %v1476_v26  ;;  %v752_v8 = vmax.f32 %v624_v1, 0.0  ;;  %v736_v9 = vmax.f32 %v608_v2, 0.0  ;;  %v495_v12 = vmul.f32 %v1628_v0, %v1274_v7 }
  0x29   : > { %853 = vxpose.xlu0.b32.cont [3/16] (narrow) %v725_v31, 8  ;;  %v1230_v31 = vunpack.c.l.bf16 %v1468_v27  ;;  %v1239_v17 = vunpack.c.h.bf16 %v1470_v63  ;;  %v1275_v19 = vunpack.c.h.bf16 %v1479_v6  ;;  %v1307_v43 = vunpack.c.h.bf16 %v1487_v25 }
  0x2a   : > { %v489_v34 = vmul.f32 %v1628_v0, %v1262_v30  ;;  %v627_v13 = vadd.f32 %v1635_v4, %v495_v12  ;;  %v1338_v30 = vunpack.c.l.bf16 %v1495_v24  ;;  %v1282_v61 = vunpack.c.l.bf16 %v1481_v60 }
  0x2b   : > { %v473_v35 = vmul.f32 %v1628_v0, %v1230_v31  ;;  %v496_v26 = vmul.f32 %v1628_v0, %v1275_v19  ;;  %v1306_v31 = vunpack.c.l.bf16 %v1487_v25  ;;  %v1482_v25 = vld [vmem:[%s1623_s20 + $0x98] sm:$0xff]  }
  0x2c   : > { %v621_v36 = vadd.f32 %v1635_v4, %v489_v34  ;;  %v755_v18 = vmax.f32 %v627_v13, 0.0 }
  0x2d   : > { %v605_v37 = vadd.f32 %v1635_v4, %v473_v35  ;;  %v628_v27 = vadd.f32 %v1635_v4, %v496_v26  ;;  %v511_v38 = vmul.f32 %v1628_v0, %v1306_v31  ;;  %v1286_v26 = vunpack.c.l.bf16 %v1482_v25 }
  0x2e   : > { %915 = vxpose.xlu2.b32.start [1/16] (narrow) %v755_v18, 8 }
  0x2f   : > { %v501_v31 = vmul.f32 %v1628_v0, %v1286_v26 }
  0x30   : > { %886 = vxpose.xlu1.b32.cont [4/16] (narrow) %v742_v40, 8  ;;  %v749_v40 = vmax.f32 %v621_v36, 0.0 }
  0x31   : > { %854 = vxpose.xlu0.b32.cont [4/16] (narrow) %v726_v41, 8  ;;  %v733_v41 = vmax.f32 %v605_v37, 0.0  ;;  %v527_v37 = vmul.f32 %v1628_v0, %v1338_v30 }
  0x33   : > { %v659_v42 = vadd.f32 %v1635_v4, %v527_v37 }
  0x35   : > { %v787_v47 = vmax.f32 %v659_v42, 0.0 }
  0x38   : > { %887 = vxpose.xlu1.b32.cont [5/16] (narrow) %v743_v48, 8  ;;  %v1266_v48 = vunpack.c.l.bf16 %v1477_v44  ;;  %v643_v44 = vadd.f32 %v1635_v4, %v511_v38  ;;  %v1287_v38 = vunpack.c.h.bf16 %v1482_v25 }
  0x39   : > { %855 = vxpose.xlu0.b32.cont [5/16] (narrow) %v727_v49, 8  ;;  %v1234_v49 = vunpack.c.l.bf16 %v1469_v45 }
  0x3a   : > { %v491_v52 = vmul.f32 %v1628_v0, %v1266_v48  ;;  %v771_v48 = vmax.f32 %v643_v44, 0.0  ;;  %v1490_v44 = vld [vmem:[%s1623_s20 + $0xd8] sm:$0xff]  }
  0x3b   : > { %v475_v53 = vmul.f32 %v1628_v0, %v1234_v49 }
  0x3c   : > { %v623_v54 = vadd.f32 %v1635_v4, %v491_v52  ;;  %v1488_v52 = vld [vmem:[%s1623_s20 + $0xc8] sm:$0xff]  }
  0x3d   : > { %v607_v55 = vadd.f32 %v1635_v4, %v475_v53 }
  0x40   : > { %888 = vxpose.xlu1.b32.cont [6/16] (narrow) %v744_v58, 8  ;;  %v751_v58 = vmax.f32 %v623_v54, 0.0 }
  0x41   : > { %856 = vxpose.xlu0.b32.cont [6/16] (narrow) %v728_v59, 8  ;;  %v735_v59 = vmax.f32 %v607_v55, 0.0 }
  0x48   : > { %889 = vxpose.xlu1.b32.cont [7/16] (narrow) %v745_v3, 8  ;;  %v1270_v3 = vunpack.c.l.bf16 %v1478_v62 }
  0x49   : > { %857 = vxpose.xlu0.b32.cont [7/16] (narrow) %v729_v5, 8  ;;  %v1238_v5 = vunpack.c.l.bf16 %v1470_v63 }
  0x4a   : > { %v493_v10 = vmul.f32 %v1628_v0, %v1270_v3  ;;  %v499_v3 = vmul.f32 %v1628_v0, %v1282_v61 }
  0x4b   : > { %v477_v11 = vmul.f32 %v1628_v0, %v1238_v5 }
  0x4c   : > { %v631_v5 = vadd.f32 %v1635_v4, %v499_v3 }
  0x50   : > { %890 = vxpose.xlu1.b32.cont [8/16] (narrow) %v746_v14, 8  ;;  %v625_v14 = vadd.f32 %v1635_v4, %v493_v10  ;;  %v759_v10 = vmax.f32 %v631_v5, 0.0 }
  0x51   : > { %858 = vxpose.xlu0.b32.cont [8/16] (narrow) %v730_v15, 8  ;;  %v609_v15 = vadd.f32 %v1635_v4, %v477_v11  ;;  %v1283_v11 = vunpack.c.h.bf16 %v1481_v60 }
  0x52   : > { %v753_v20 = vmax.f32 %v625_v14, 0.0 }
  0x53   : > { %v737_v21 = vmax.f32 %v609_v15, 0.0  ;;  %v500_v18 = vmul.f32 %v1628_v0, %v1283_v11 }
  0x55   : > { %v632_v19 = vadd.f32 %v1635_v4, %v500_v18 }
  0x58   : > { %891 = vxpose.xlu1.b32.cont [9/16] (narrow) %v747_v22, 8  ;;  %v494_v22 = vmul.f32 %v1628_v0, %v1271_v16  ;;  %v1497_v16 = vld [vmem:[%s1623_s20 + $0x110] sm:$0xff]  }
  0x59   : > { %859 = vxpose.xlu0.b32.cont [9/16] (narrow) %v731_v23, 8  ;;  %v478_v23 = vmul.f32 %v1628_v0, %v1239_v17  ;;  %v1489_v17 = vld [vmem:[%s1623_s20 + $0xd0] sm:$0xff]  }
  0x5a   : > { %v626_v28 = vadd.f32 %v1635_v4, %v494_v22  ;;  %v1346_v22 = vunpack.c.l.bf16 %v1497_v16 }
  0x5b   : > { %v610_v29 = vadd.f32 %v1635_v4, %v478_v23  ;;  %v1314_v23 = vunpack.c.l.bf16 %v1489_v17 }
  0x5c   : > { %v754_v35 = vmax.f32 %v626_v28, 0.0 }
  0x5d   : > { %v738_v36 = vmax.f32 %v610_v29, 0.0  ;;  %v531_v29 = vmul.f32 %v1628_v0, %v1346_v22  ;;  %v515_v30 = vmul.f32 %v1628_v0, %v1314_v23 }
  0x60   : > { %892 = vxpose.xlu1.b32.cont [10/16] (narrow) %v748_v32, 8  ;;  %v756_v32 = vmax.f32 %v628_v27, 0.0 }
  0x61   : > { %860 = vxpose.xlu0.b32.cont [10/16] (narrow) %v732_v33, 8  ;;  %v1480_v33 = vld [vmem:[%s1623_s20 + $0x88] sm:$0xff]  }
  0x62   : > { %916 = vxpose.xlu2.b32.cont [2/16] (narrow) %v756_v32, 8  ;;  %v1278_v34 = vunpack.c.l.bf16 %v1480_v33  ;;  %v1279_v46 = vunpack.c.h.bf16 %v1480_v33  ;;  %v633_v32 = vadd.f32 %v1635_v4, %v501_v31  ;;  %v663_v33 = vadd.f32 %v1635_v4, %v531_v29 }
  0x64   : > { %v497_v39 = vmul.f32 %v1628_v0, %v1278_v34  ;;  %v498_v53 = vmul.f32 %v1628_v0, %v1279_v46  ;;  %v647_v34 = vadd.f32 %v1635_v4, %v515_v30  ;;  %v761_v37 = vmax.f32 %v633_v32, 0.0 }
  0x66   : > { %v630_v54 = vadd.f32 %v1635_v4, %v498_v53 }
  0x68   : > { %893 = vxpose.xlu1.b32.cont [11/16] (narrow) %v749_v40, 8  ;;  %v629_v40 = vadd.f32 %v1635_v4, %v497_v39  ;;  %v791_v39 = vmax.f32 %v663_v33, 0.0 }
  0x69   : > { %861 = vxpose.xlu0.b32.cont [11/16] (narrow) %v733_v41, 8  ;;  %v1339_v41 = vunpack.c.h.bf16 %v1495_v24  ;;  %v760_v24 = vmax.f32 %v632_v19, 0.0 }
  0x6a   : > { %v757_v45 = vmax.f32 %v629_v40, 0.0  ;;  %v775_v40 = vmax.f32 %v647_v34, 0.0 }
  0x6b   : > { %v528_v49 = vmul.f32 %v1628_v0, %v1339_v41 }
  0x6c   : > { %917 = vxpose.xlu2.b32.cont [3/16] (narrow) %v757_v45, 8  ;;  %v502_v45 = vmul.f32 %v1628_v0, %v1287_v38 }
  0x6d   : > { %v660_v55 = vadd.f32 %v1635_v4, %v528_v49 }
  0x6e   : > { %v634_v46 = vadd.f32 %v1635_v4, %v502_v45 }
  0x6f   : > { %v788_v62 = vmax.f32 %v660_v55, 0.0 }
  0x70   : > { %894 = vxpose.xlu1.b32.cont [12/16] (narrow) %v750_v50, 8  ;;  %v512_v50 = vmul.f32 %v1628_v0, %v1307_v43  ;;  %v1498_v43 = vld [vmem:[%s1623_s20 + $0x118] sm:$0xff]  }
  0x71   : > { %862 = vxpose.xlu0.b32.cont [12/16] (narrow) %v734_v51, 8  ;;  %v1496_v51 = vld [vmem:[%s1623_s20 + $0x108] sm:$0xff]   ;;  %v1350_v49 = vunpack.c.l.bf16 %v1498_v43 }
  0x72   : > { %v644_v56 = vadd.f32 %v1635_v4, %v512_v50  ;;  %v1342_v57 = vunpack.c.l.bf16 %v1496_v51  ;;  %v1318_v50 = vunpack.c.l.bf16 %v1490_v44 }
  0x74   : > { %v772_v63 = vmax.f32 %v644_v56, 0.0  ;;  %v529_v1 = vmul.f32 %v1628_v0, %v1342_v57  ;;  %v533_v56 = vmul.f32 %v1628_v0, %v1350_v49  ;;  %v517_v57 = vmul.f32 %v1628_v0, %v1318_v50 }
  0x76   : > { %v661_v6 = vadd.f32 %v1635_v4, %v529_v1  ;;  %v665_v60 = vadd.f32 %v1635_v4, %v533_v56  ;;  %v649_v61 = vadd.f32 %v1635_v4, %v517_v57 }
  0x78   : > { %895 = vxpose.xlu1.b32.cont [13/16] (narrow) %v751_v58, 8  ;;  %v1310_v58 = vunpack.c.l.bf16 %v1488_v52  ;;  %v789_v12 = vmax.f32 %v661_v6, 0.0  ;;  %v793_v3 = vmax.f32 %v665_v60, 0.0  ;;  %v777_v5 = vmax.f32 %v649_v61, 0.0 }
  0x79   : > { %863 = vxpose.xlu0.b32.cont [13/16] (narrow) %v735_v59, 8  ;;  %v758_v59 = vmax.f32 %v630_v54, 0.0 }
  0x7a   : > { %v513_v2 = vmul.f32 %v1628_v0, %v1310_v58 }
  0x7b   : > { %918 = vxpose.xlu2.b32.cont [4/16] (narrow) %v758_v59, 8 }
  0x7c   : > { %v645_v7 = vadd.f32 %v1635_v4, %v513_v2 }
  0x7e   : > { %v773_v13 = vmax.f32 %v645_v7, 0.0 }
  0x80   : > { %896 = vxpose.xlu1.b32.cont [14/16] (narrow) %v752_v8, 8  ;;  %v1343_v8 = vunpack.c.h.bf16 %v1496_v51  ;;  %v762_v51 = vmax.f32 %v634_v46, 0.0 }
  0x81   : > { %864 = vxpose.xlu0.b32.cont [14/16] (narrow) %v736_v9, 8  ;;  %v1311_v9 = vunpack.c.h.bf16 %v1488_v52  ;;  %v1483_v52 = vld [vmem:[%s1623_s20 + $0xa0] sm:$0xff]  }
  0x82   : > { %v530_v14 = vmul.f32 %v1628_v0, %v1343_v8  ;;  %v1290_v53 = vunpack.c.l.bf16 %v1483_v52  ;;  %v1291_v2 = vunpack.c.h.bf16 %v1483_v52  ;;  %v1499_v8 = vld [vmem:[%s1623_s20 + $0x120] sm:$0xff]  }
  0x83   : > { %919 = vxpose.xlu2.b32.cont [5/16] (narrow) %v759_v10, 8  ;;  %v514_v15 = vmul.f32 %v1628_v0, %v1311_v9  ;;  %v1491_v9 = vld [vmem:[%s1623_s20 + $0xe0] sm:$0xff]  }
  0x84   : > { %v503_v58 = vmul.f32 %v1628_v0, %v1290_v53  ;;  %v504_v10 = vmul.f32 %v1628_v0, %v1291_v2 }
  0x86   : > { %v635_v59 = vadd.f32 %v1635_v4, %v503_v58  ;;  %v636_v11 = vadd.f32 %v1635_v4, %v504_v10 }
  0x88   : > { %897 = vxpose.xlu1.b32.cont [15/16] (narrow) %v753_v20, 8  ;;  %v662_v20 = vadd.f32 %v1635_v4, %v530_v14  ;;  %v763_v1 = vmax.f32 %v635_v59, 0.0  ;;  %v1354_v14 = vunpack.c.l.bf16 %v1499_v8 }
  0x89   : > { %865 = vxpose.xlu0.b32.cont [15/16] (narrow) %v737_v21, 8  ;;  %v646_v21 = vadd.f32 %v1635_v4, %v514_v15  ;;  %v1322_v15 = vunpack.c.l.bf16 %v1491_v9 }
  0x8a   : > { %v790_v27 = vmax.f32 %v662_v20, 0.0 }
  0x8b   : > { %920 = vxpose.xlu2.b32.cont [6/16] (narrow) %v760_v24, 8  ;;  %v774_v28 = vmax.f32 %v646_v21, 0.0  ;;  %v535_v21 = vmul.f32 %v1628_v0, %v1354_v14  ;;  %v519_v22 = vmul.f32 %v1628_v0, %v1322_v15 }
  0x8d   : > { %v667_v25 = vadd.f32 %v1635_v4, %v535_v21  ;;  %v651_v26 = vadd.f32 %v1635_v4, %v519_v22 }
  0x8f   : > { %v795_v31 = vmax.f32 %v667_v25, 0.0  ;;  %v779_v32 = vmax.f32 %v651_v26, 0.0 }
  0x90   : > { %898 = vxpose.xlu1.b32.end [16/16] (narrow) %v754_v35, 8  ;;  %v1347_v35 = vunpack.c.h.bf16 %v1497_v16  ;;  %v764_v16 = vmax.f32 %v636_v11, 0.0 }
  0x91   : > { %866 = vxpose.xlu0.b32.end [16/16] (narrow) %v738_v36, 8  ;;  %v1315_v36 = vunpack.c.h.bf16 %v1489_v17  ;;  %v1484_v17 = vld [vmem:[%s1623_s20 + $0xa8] sm:$0xff]  }
  0x92   : > { %v532_v41 = vmul.f32 %v1628_v0, %v1347_v35  ;;  %v1294_v18 = vunpack.c.l.bf16 %v1484_v17  ;;  %v1295_v30 = vunpack.c.h.bf16 %v1484_v17  ;;  %v1500_v35 = vld [vmem:[%s1623_s20 + $0x128] sm:$0xff]  }
  0x93   : > { %921 = vxpose.xlu2.b32.cont [7/16] (narrow) %v761_v37, 8  ;;  %v516_v42 = vmul.f32 %v1628_v0, %v1315_v36  ;;  %v1492_v36 = vld [vmem:[%s1623_s20 + $0xe8] sm:$0xff]  }
  0x94   : > { %v505_v23 = vmul.f32 %v1628_v0, %v1294_v18  ;;  %v506_v37 = vmul.f32 %v1628_v0, %v1295_v30 }
  0x96   : > { %v637_v24 = vadd.f32 %v1635_v4, %v505_v23  ;;  %v638_v38 = vadd.f32 %v1635_v4, %v506_v37 }
  0x98   : > { %979 = vxpose.xlu1.b32.start [1/16] (narrow) %v787_v47, 8  ;;  %v664_v47 = vadd.f32 %v1635_v4, %v532_v41  ;;  %v765_v29 = vmax.f32 %v637_v24, 0.0  ;;  %v1358_v41 = vunpack.c.l.bf16 %v1500_v35 }
  0x99   : > { %947 = vxpose.xlu0.b32.start [1/16] (narrow) %v771_v48, 8  ;;  %v648_v48 = vadd.f32 %v1635_v4, %v516_v42  ;;  %v1326_v42 = vunpack.c.l.bf16 %v1492_v36 }
  0x9a   : > { %v792_v54 = vmax.f32 %v664_v47, 0.0 }
  0x9b   : > { %922 = vxpose.xlu2.b32.cont [8/16] (narrow) %v762_v51, 8  ;;  %v776_v55 = vmax.f32 %v648_v48, 0.0  ;;  %v537_v48 = vmul.f32 %v1628_v0, %v1358_v41  ;;  %v521_v49 = vmul.f32 %v1628_v0, %v1326_v42 }
  0x9d   : > { %v669_v52 = vadd.f32 %v1635_v4, %v537_v48  ;;  %v653_v53 = vadd.f32 %v1635_v4, %v521_v49 }
  0x9f   : > { %v797_v58 = vmax.f32 %v669_v52, 0.0  ;;  %v781_v59 = vmax.f32 %v653_v53, 0.0 }
  0xa0   : > { %980 = vxpose.xlu1.b32.cont [2/16] (narrow) %v788_v62, 8  ;;  %v1351_v62 = vunpack.c.h.bf16 %v1498_v43  ;;  %v766_v43 = vmax.f32 %v638_v38, 0.0 }
  0xa1   : > { %948 = vxpose.xlu0.b32.cont [2/16] (narrow) %v772_v63, 8  ;;  %v1319_v63 = vunpack.c.h.bf16 %v1490_v44  ;;  %v1485_v44 = vld [vmem:[%s1623_s20 + $0xb0] sm:$0xff]  }
  0xa2   : > { %v534_v6 = vmul.f32 %v1628_v0, %v1351_v62  ;;  %v1298_v45 = vunpack.c.l.bf16 %v1485_v44  ;;  %v1299_v57 = vunpack.c.h.bf16 %v1485_v44  ;;  %v1501_v62 = vld [vmem:[%s1623_s20 + $0x130] sm:$0xff]  }
  0xa3   : > { %923 = vxpose.xlu2.b32.cont [9/16] (narrow) %v763_v1, 8  ;;  %v518_v7 = vmul.f32 %v1628_v0, %v1319_v63  ;;  %v1493_v63 = vld [vmem:[%s1623_s20 + $0xf0] sm:$0xff]  }
  0xa4   : > { %v507_v50 = vmul.f32 %v1628_v0, %v1298_v45  ;;  %v508_v1 = vmul.f32 %v1628_v0, %v1299_v57 }
  0xa6   : > { %v639_v51 = vadd.f32 %v1635_v4, %v507_v50  ;;  %v640_v2 = vadd.f32 %v1635_v4, %v508_v1 }
  0xa8   : > { %981 = vxpose.xlu1.b32.cont [3/16] (narrow) %v789_v12, 8  ;;  %v666_v12 = vadd.f32 %v1635_v4, %v534_v6  ;;  %v767_v56 = vmax.f32 %v639_v51, 0.0  ;;  %v1362_v6 = vunpack.c.l.bf16 %v1501_v62 }
  0xa9   : > { %949 = vxpose.xlu0.b32.cont [3/16] (narrow) %v773_v13, 8  ;;  %v650_v13 = vadd.f32 %v1635_v4, %v518_v7  ;;  %v1330_v7 = vunpack.c.l.bf16 %v1493_v63 }
  0xaa   : > { %v794_v19 = vmax.f32 %v666_v12, 0.0 }
  0xab   : > { %924 = vxpose.xlu2.b32.cont [10/16] (narrow) %v764_v16, 8  ;;  %v778_v20 = vmax.f32 %v650_v13, 0.0  ;;  %v539_v13 = vmul.f32 %v1628_v0, %v1362_v6  ;;  %v523_v14 = vmul.f32 %v1628_v0, %v1330_v7 }
  0xad   : > { %v671_v17 = vadd.f32 %v1635_v4, %v539_v13  ;;  %v655_v18 = vadd.f32 %v1635_v4, %v523_v14 }
  0xaf   : > { %v799_v23 = vmax.f32 %v671_v17, 0.0  ;;  %v783_v24 = vmax.f32 %v655_v18, 0.0 }
  0xb0   : > { %982 = vxpose.xlu1.b32.cont [4/16] (narrow) %v790_v27, 8  ;;  %v1355_v27 = vunpack.c.h.bf16 %v1499_v8  ;;  %v768_v8 = vmax.f32 %v640_v2, 0.0 }
  0xb1   : > { %950 = vxpose.xlu0.b32.cont [4/16] (narrow) %v774_v28, 8  ;;  %v1323_v28 = vunpack.c.h.bf16 %v1491_v9  ;;  %v1486_v9 = vld [vmem:[%s1623_s20 + $0xb8] sm:$0xff]  }
  0xb2   : > { %v536_v33 = vmul.f32 %v1628_v0, %v1355_v27  ;;  %v1302_v10 = vunpack.c.l.bf16 %v1486_v9  ;;  %v1303_v22 = vunpack.c.h.bf16 %v1486_v9  ;;  %v1502_v27 = vld [vmem:[%s1623_s20 + $0x138] sm:$0xff]  }
  0xb3   : > { %925 = vxpose.xlu2.b32.cont [11/16] (narrow) %v765_v29, 8  ;;  %v520_v34 = vmul.f32 %v1628_v0, %v1323_v28  ;;  %v1494_v28 = vld [vmem:[%s1623_s20 + $0xf8] sm:$0xff]  }
  0xb4   : > { %v509_v15 = vmul.f32 %v1628_v0, %v1302_v10  ;;  %v510_v29 = vmul.f32 %v1628_v0, %v1303_v22 }
  0xb6   : > { %v641_v16 = vadd.f32 %v1635_v4, %v509_v15  ;;  %v642_v30 = vadd.f32 %v1635_v4, %v510_v29 }
  0xb8   : > { %983 = vxpose.xlu1.b32.cont [5/16] (narrow) %v791_v39, 8  ;;  %v668_v39 = vadd.f32 %v1635_v4, %v536_v33  ;;  %v769_v21 = vmax.f32 %v641_v16, 0.0  ;;  %v1366_v33 = vunpack.c.l.bf16 %v1502_v27 }
  0xb9   : > { %951 = vxpose.xlu0.b32.cont [5/16] (narrow) %v775_v40, 8  ;;  %v652_v40 = vadd.f32 %v1635_v4, %v520_v34  ;;  %v1334_v34 = vunpack.c.l.bf16 %v1494_v28 }
  0xba   : > { %v796_v46 = vmax.f32 %v668_v39, 0.0 }
  0xbb   : > { %926 = vxpose.xlu2.b32.cont [12/16] (narrow) %v766_v43, 8  ;;  %v780_v47 = vmax.f32 %v652_v40, 0.0  ;;  %v541_v40 = vmul.f32 %v1628_v0, %v1366_v33  ;;  %v525_v41 = vmul.f32 %v1628_v0, %v1334_v34 }
  0xbd   : > { %v673_v44 = vadd.f32 %v1635_v4, %v541_v40  ;;  %v657_v45 = vadd.f32 %v1635_v4, %v525_v41 }
  0xbf   : > { %v801_v50 = vmax.f32 %v673_v44, 0.0  ;;  %v785_v51 = vmax.f32 %v657_v45, 0.0 }
  0xc0   : > { %984 = vxpose.xlu1.b32.cont [6/16] (narrow) %v792_v54, 8  ;;  %v1359_v54 = vunpack.c.h.bf16 %v1500_v35  ;;  %v770_v35 = vmax.f32 %v642_v30, 0.0 }
  0xc1   : > { %952 = vxpose.xlu0.b32.cont [6/16] (narrow) %v776_v55, 8  ;;  %v1327_v55 = vunpack.c.h.bf16 %v1492_v36  ;;  %v1503_v36 = vld [vmem:[%s1623_s20 + $0x140] sm:$0xff]  }
  0xc2   : > { %v538_v60 = vmul.f32 %v1628_v0, %v1359_v54  ;;  %v1370_v37 = vunpack.c.l.bf16 %v1503_v36  ;;  %v1371_v48 = vunpack.c.h.bf16 %v1503_v36  ;;  %v1519_v54 = vld [vmem:[%s1623_s20 + $0x1c0] sm:$0xff]  }
  0xc3   : > { %927 = vxpose.xlu2.b32.cont [13/16] (narrow) %v767_v56, 8  ;;  %v522_v61 = vmul.f32 %v1628_v0, %v1327_v55  ;;  %v1511_v55 = vld [vmem:[%s1623_s20 + $0x180] sm:$0xff]   ;;  %v1435_v9 = vunpack.c.h.bf16 %v1519_v54 }
  0xc4   : > { %v543_v42 = vmul.f32 %v1628_v0, %v1370_v37  ;;  %v544_v56 = vmul.f32 %v1628_v0, %v1371_v48 }
  0xc5   : > { %v576_v17 = vmul.f32 %v1628_v0, %v1435_v9 }
  0xc6   : > { %v675_v43 = vadd.f32 %v1635_v4, %v543_v42  ;;  %v676_v57 = vadd.f32 %v1635_v4, %v544_v56 }
  0xc8   : > { %985 = vxpose.xlu1.b32.cont [7/16] (narrow) %v793_v3, 8  ;;  %v670_v3 = vadd.f32 %v1635_v4, %v538_v60  ;;  %v803_v49 = vmax.f32 %v675_v43, 0.0  ;;  %v1434_v60 = vunpack.c.l.bf16 %v1519_v54 }
  0xc9   : > { %953 = vxpose.xlu0.b32.cont [7/16] (narrow) %v777_v5, 8  ;;  %v654_v5 = vadd.f32 %v1635_v4, %v522_v61  ;;  %v1402_v61 = vunpack.c.l.bf16 %v1511_v55 }
  0xca   : > { %v798_v11 = vmax.f32 %v670_v3, 0.0 }
  0xcb   : > { %928 = vxpose.xlu2.b32.cont [14/16] (narrow) %v768_v8, 8  ;;  %v782_v12 = vmax.f32 %v654_v5, 0.0  ;;  %v575_v5 = vmul.f32 %v1628_v0, %v1434_v60  ;;  %v559_v6 = vmul.f32 %v1628_v0, %v1402_v61 }
  0xcd   : > { %v707_v10 = vadd.f32 %v1635_v4, %v575_v5 }
  0xcf   : > { %v835_v15 = vmax.f32 %v707_v10, 0.0 }
  0xd0   : > { %986 = vxpose.xlu1.b32.cont [8/16] (narrow) %v794_v19, 8  ;;  %v1363_v19 = vunpack.c.h.bf16 %v1501_v62  ;;  %v804_v62 = vmax.f32 %v676_v57, 0.0 }
  0xd1   : > { %954 = vxpose.xlu0.b32.cont [8/16] (narrow) %v778_v20, 8  ;;  %v1331_v20 = vunpack.c.h.bf16 %v1493_v63  ;;  %v1504_v63 = vld [vmem:[%s1623_s20 + $0x148] sm:$0xff]  }
  0xd2   : > { %v540_v25 = vmul.f32 %v1628_v0, %v1363_v19  ;;  %v1374_v1 = vunpack.c.l.bf16 %v1504_v63  ;;  %v1375_v14 = vunpack.c.h.bf16 %v1504_v63  ;;  %v1520_v19 = vld [vmem:[%s1623_s20 + $0x1c8] sm:$0xff]  }
  0xd3   : > { %929 = vxpose.xlu2.b32.cont [15/16] (narrow) %v769_v21, 8  ;;  %v524_v26 = vmul.f32 %v1628_v0, %v1331_v20  ;;  %v1512_v20 = vld [vmem:[%s1623_s20 + $0x188] sm:$0xff]  }
  0xd4   : > { %v545_v7 = vmul.f32 %v1628_v0, %v1374_v1  ;;  %v546_v21 = vmul.f32 %v1628_v0, %v1375_v14 }
  0xd6   : > { %v677_v8 = vadd.f32 %v1635_v4, %v545_v7  ;;  %v678_v22 = vadd.f32 %v1635_v4, %v546_v21 }
  0xd8   : > { %987 = vxpose.xlu1.b32.cont [9/16] (narrow) %v795_v31, 8  ;;  %v672_v31 = vadd.f32 %v1635_v4, %v540_v25  ;;  %v805_v13 = vmax.f32 %v677_v8, 0.0  ;;  %v1438_v25 = vunpack.c.l.bf16 %v1520_v19 }
  0xd9   : > { %955 = vxpose.xlu0.b32.cont [9/16] (narrow) %v779_v32, 8  ;;  %v656_v32 = vadd.f32 %v1635_v4, %v524_v26  ;;  %v1406_v26 = vunpack.c.l.bf16 %v1512_v20 }
  0xda   : > { %v800_v38 = vmax.f32 %v672_v31, 0.0 }
  0xdb   : > { %930 = vxpose.xlu2.b32.end [16/16] (narrow) %v770_v35, 8  ;;  %v784_v39 = vmax.f32 %v656_v32, 0.0  ;;  %v577_v32 = vmul.f32 %v1628_v0, %v1438_v25  ;;  %v561_v33 = vmul.f32 %v1628_v0, %v1406_v26 }
  0xdd   : > { %v709_v36 = vadd.f32 %v1635_v4, %v577_v32  ;;  %v693_v37 = vadd.f32 %v1635_v4, %v561_v33 }
  0xdf   : > { %v837_v42 = vmax.f32 %v709_v36, 0.0  ;;  %v821_v43 = vmax.f32 %v693_v37, 0.0 }
  0xe0   : > { %988 = vxpose.xlu1.b32.cont [10/16] (narrow) %v796_v46, 8  ;;  %v1367_v46 = vunpack.c.h.bf16 %v1502_v27  ;;  %v806_v27 = vmax.f32 %v678_v22, 0.0 }
  0xe1   : > { %956 = vxpose.xlu0.b32.cont [10/16] (narrow) %v780_v47, 8  ;;  %v1335_v47 = vunpack.c.h.bf16 %v1494_v28  ;;  %v1505_v28 = vld [vmem:[%s1623_s20 + $0x150] sm:$0xff]  }
  0xe2   : > { %v542_v52 = vmul.f32 %v1628_v0, %v1367_v46  ;;  %v1378_v29 = vunpack.c.l.bf16 %v1505_v28  ;;  %v1379_v41 = vunpack.c.h.bf16 %v1505_v28  ;;  %v1521_v46 = vld [vmem:[%s1623_s20 + $0x1d0] sm:$0xff]  }
  0xe3   : > { %1011 = vxpose.xlu2.b32.start [1/16] (narrow) %v803_v49, 8  ;;  %v526_v53 = vmul.f32 %v1628_v0, %v1335_v47  ;;  %v1513_v47 = vld [vmem:[%s1623_s20 + $0x190] sm:$0xff]  }
  0xe4   : > { %v547_v34 = vmul.f32 %v1628_v0, %v1378_v29  ;;  %v548_v48 = vmul.f32 %v1628_v0, %v1379_v41 }
  0xe6   : > { %v679_v35 = vadd.f32 %v1635_v4, %v547_v34  ;;  %v680_v49 = vadd.f32 %v1635_v4, %v548_v48 }
  0xe8   : > { %989 = vxpose.xlu1.b32.cont [11/16] (narrow) %v797_v58, 8  ;;  %v674_v58 = vadd.f32 %v1635_v4, %v542_v52  ;;  %v807_v40 = vmax.f32 %v679_v35, 0.0  ;;  %v1442_v52 = vunpack.c.l.bf16 %v1521_v46  ;;  %v808_v54 = vmax.f32 %v680_v49, 0.0 }
  0xe9   : > { %957 = vxpose.xlu0.b32.cont [11/16] (narrow) %v781_v59, 8  ;;  %v658_v59 = vadd.f32 %v1635_v4, %v526_v53  ;;  %v1410_v53 = vunpack.c.l.bf16 %v1513_v47 }
  0xea   : > { %v802_v2 = vmax.f32 %v674_v58, 0.0 }
  0xeb   : > { %1012 = vxpose.xlu2.b32.cont [2/16] (narrow) %v804_v62, 8  ;;  %v786_v3 = vmax.f32 %v658_v59, 0.0 }
  0xf0   : > { %990 = vxpose.xlu1.b32.cont [12/16] (narrow) %v798_v11, 8  ;;  %v1403_v11 = vunpack.c.h.bf16 %v1511_v55  ;;  %v1506_v55 = vld [vmem:[%s1623_s20 + $0x158] sm:$0xff]  }
  0xf1   : > { %958 = vxpose.xlu0.b32.cont [12/16] (narrow) %v782_v12, 8  ;;  %v691_v12 = vadd.f32 %v1635_v4, %v559_v6  ;;  %v1382_v56 = vunpack.c.l.bf16 %v1506_v55  ;;  %v1383_v6 = vunpack.c.h.bf16 %v1506_v55 }
  0xf2   : > { %v560_v18 = vmul.f32 %v1628_v0, %v1403_v11  ;;  %v1522_v11 = vld [vmem:[%s1623_s20 + $0x1d8] sm:$0xff]  }
  0xf3   : > { %1013 = vxpose.xlu2.b32.cont [3/16] (narrow) %v805_v13, 8  ;;  %v819_v16 = vmax.f32 %v691_v12, 0.0  ;;  %v1514_v12 = vld [vmem:[%s1623_s20 + $0x198] sm:$0xff]  }
  0xf8   : > { %991 = vxpose.xlu1.b32.cont [13/16] (narrow) %v799_v23, 8  ;;  %v708_v23 = vadd.f32 %v1635_v4, %v576_v17  ;;  %v1446_v17 = vunpack.c.l.bf16 %v1522_v11 }
  0xf9   : > { %959 = vxpose.xlu0.b32.cont [13/16] (narrow) %v783_v24, 8  ;;  %v692_v24 = vadd.f32 %v1635_v4, %v560_v18  ;;  %v1414_v18 = vunpack.c.l.bf16 %v1514_v12 }
  0xfa   : > { %v836_v30 = vmax.f32 %v708_v23, 0.0 }
  0xfb   : > { %1014 = vxpose.xlu2.b32.cont [4/16] (narrow) %v806_v27, 8  ;;  %v820_v31 = vmax.f32 %v692_v24, 0.0 }
 0x100   : > { %992 = vxpose.xlu1.b32.cont [14/16] (narrow) %v800_v38, 8  ;;  %v1439_v38 = vunpack.c.h.bf16 %v1520_v19 }
 0x101   : > { %960 = vxpose.xlu0.b32.cont [14/16] (narrow) %v784_v39, 8  ;;  %v1407_v39 = vunpack.c.h.bf16 %v1512_v20  ;;  %v1507_v20 = vld [vmem:[%s1623_s20 + $0x160] sm:$0xff]  }
 0x102   : > { %v578_v44 = vmul.f32 %v1628_v0, %v1439_v38  ;;  %v1386_v21 = vunpack.c.l.bf16 %v1507_v20  ;;  %v1387_v33 = vunpack.c.h.bf16 %v1507_v20  ;;  %v1523_v38 = vld [vmem:[%s1623_s20 + $0x1e0] sm:$0xff]  }
 0x103   : > { %1015 = vxpose.xlu2.b32.cont [5/16] (narrow) %v807_v40, 8  ;;  %v562_v45 = vmul.f32 %v1628_v0, %v1407_v39  ;;  %v1876_v0 = vld [vmem:[%s1990_s1] ss:$0 sm:$0xff] }
 0x104   : > { %v579_v59 = vmul.f32 %v1876_v0, %v1442_v52  ;;  %v563_v60 = vmul.f32 %v1876_v0, %v1410_v53  ;;  %v549_v61 = vmul.f32 %v1876_v0, %v1382_v56  ;;  %v550_v13 = vmul.f32 %v1876_v0, %v1383_v6  ;;  %v1515_v39 = vld [vmem:[%s1623_s20 + $0x1a0] sm:$0xff]  }
 0x105   : > { %v581_v24 = vmul.f32 %v1876_v0, %v1446_v17  ;;  %v565_v25 = vmul.f32 %v1876_v0, %v1414_v18  ;;  %v551_v26 = vmul.f32 %v1876_v0, %v1386_v21  ;;  %v552_v40 = vmul.f32 %v1876_v0, %v1387_v33 }
 0x108   : > { %993 = vxpose.xlu1.b32.cont [15/16] (narrow) %v801_v50, 8  ;;  %v710_v50 = vadd.f32 %v1635_v4, %v578_v44  ;;  %v1450_v44 = vunpack.c.l.bf16 %v1523_v38 }
 0x109   : > { %961 = vxpose.xlu0.b32.cont [15/16] (narrow) %v785_v51, 8  ;;  %v694_v51 = vadd.f32 %v1635_v4, %v562_v45  ;;  %v1884_v4 = vld [vmem:[%s1991_s2] ss:$0 sm:$0xff]  ;;  %v1418_v45 = vunpack.c.l.bf16 %v1515_v39 }
 0x10a   : > { %v838_v57 = vmax.f32 %v710_v50, 0.0  ;;  %v681_v62 = vadd.f32 %v1884_v4, %v549_v61  ;;  %v711_v63 = vadd.f32 %v1884_v4, %v579_v59  ;;  %v695_v1 = vadd.f32 %v1884_v4, %v563_v60 }
 0x10b   : > { %1016 = vxpose.xlu2.b32.cont [6/16] (narrow) %v808_v54, 8  ;;  %v822_v58 = vmax.f32 %v694_v51, 0.0  ;;  %v682_v14 = vadd.f32 %v1884_v4, %v550_v13  ;;  %v683_v27 = vadd.f32 %v1884_v4, %v551_v26  ;;  %v713_v28 = vadd.f32 %v1884_v4, %v581_v24 }
 0x10c   : > { %v809_v5 = vmax.f32 %v681_v62, 0.0  ;;  %v839_v7 = vmax.f32 %v711_v63, 0.0  ;;  %v823_v8 = vmax.f32 %v695_v1, 0.0  ;;  %v697_v29 = vadd.f32 %v1884_v4, %v565_v25 }
 0x10d   : > { %v810_v19 = vmax.f32 %v682_v14, 0.0  ;;  %v811_v32 = vmax.f32 %v683_v27, 0.0  ;;  %v841_v34 = vmax.f32 %v713_v28, 0.0  ;;  %v684_v41 = vadd.f32 %v1884_v4, %v552_v40 }
 0x10e   : > { %v825_v35 = vmax.f32 %v697_v29, 0.0  ;;  %v583_v51 = vmul.f32 %v1876_v0, %v1450_v44  ;;  %v567_v52 = vmul.f32 %v1876_v0, %v1418_v45 }
 0x110   : > { %994 = vxpose.xlu1.b32.end [16/16] (narrow) %v802_v2, 8  ;;  %v1443_v2 = vunpack.c.h.bf16 %v1521_v46  ;;  %v812_v46 = vmax.f32 %v684_v41, 0.0  ;;  %v715_v55 = vadd.f32 %v1884_v4, %v583_v51  ;;  %v699_v56 = vadd.f32 %v1884_v4, %v567_v52  ;;  %v899_v52 = vpop.trf.xlu1 }
 0x111   : > { %962 = vxpose.xlu0.b32.end [16/16] (narrow) %v786_v3, 8  ;;  %v1411_v3 = vunpack.c.h.bf16 %v1513_v47  ;;  %v1508_v47 = vld [vmem:[%s1623_s20 + $0x168] sm:$0xff]   ;;  %1108 = vst [vmem:[%s1951_s5 + $0x8] sm:$0xff] %v899_v52 }
 0x112   : > { %v580_v9 = vmul.f32 %v1876_v0, %v1443_v2  ;;  %v1390_v48 = vunpack.c.l.bf16 %v1508_v47  ;;  %v1391_v60 = vunpack.c.h.bf16 %v1508_v47  ;;  %v843_v61 = vmax.f32 %v715_v55, 0.0  ;;  %v1524_v2 = vld [vmem:[%s1623_s20 + $0x1e8] sm:$0xff]   ;;  %v931_v55 = vpop.trf.xlu2 }
 0x113   : > { %1017 = vxpose.xlu2.b32.cont [7/16] (narrow) %v809_v5, 8  ;;  %v564_v10 = vmul.f32 %v1876_v0, %v1411_v3  ;;  %v827_v62 = vmax.f32 %v699_v56, 0.0  ;;  %v1516_v3 = vld [vmem:[%s1623_s20 + $0x1a8] sm:$0xff]   ;;  %1109 = vst [vmem:[%s1951_s5 + $0x10] sm:$0xff] %v931_v55 }
 0x114   : > { %v553_v53 = vmul.f32 %v1876_v0, %v1390_v48  ;;  %v554_v5 = vmul.f32 %v1876_v0, %v1391_v60 }
 0x116   : > { %v685_v54 = vadd.f32 %v1884_v4, %v553_v53  ;;  %v686_v6 = vadd.f32 %v1884_v4, %v554_v5  ;;  %v867_v53 = vpop.trf.xlu0 }
 0x117   : > { %1107 = vst [vmem:[%s1951_s5] sm:$0xff] %v867_v53 }
 0x118   : > { %1075 = vxpose.xlu1.b32.start [1/16] (narrow) %v835_v15, 8  ;;  %v712_v15 = vadd.f32 %v1884_v4, %v580_v9  ;;  %v813_v59 = vmax.f32 %v685_v54, 0.0  ;;  %v1454_v9 = vunpack.c.l.bf16 %v1524_v2 }
 0x119   : > { %1043 = vxpose.xlu0.b32.start [1/16] (narrow) %v819_v16, 8  ;;  %v696_v16 = vadd.f32 %v1884_v4, %v564_v10  ;;  %v1422_v10 = vunpack.c.l.bf16 %v1516_v3 }
 0x11a   : > { %v840_v22 = vmax.f32 %v712_v15, 0.0 }
 0x11b   : > { %1018 = vxpose.xlu2.b32.cont [8/16] (narrow) %v810_v19, 8  ;;  %v824_v23 = vmax.f32 %v696_v16, 0.0  ;;  %v585_v16 = vmul.f32 %v1876_v0, %v1454_v9  ;;  %v569_v17 = vmul.f32 %v1876_v0, %v1422_v10 }
 0x11d   : > { %v717_v20 = vadd.f32 %v1884_v4, %v585_v16  ;;  %v701_v21 = vadd.f32 %v1884_v4, %v569_v17 }
 0x11f   : > { %v845_v26 = vmax.f32 %v717_v20, 0.0  ;;  %v829_v27 = vmax.f32 %v701_v21, 0.0 }
 0x120   : > { %1076 = vxpose.xlu1.b32.cont [2/16] (narrow) %v836_v30, 8  ;;  %v1447_v30 = vunpack.c.h.bf16 %v1522_v11  ;;  %v814_v11 = vmax.f32 %v686_v6, 0.0 }
 0x121   : > { %1044 = vxpose.xlu0.b32.cont [2/16] (narrow) %v820_v31, 8  ;;  %v1415_v31 = vunpack.c.h.bf16 %v1514_v12  ;;  %v1509_v12 = vld [vmem:[%s1623_s20 + $0x170] sm:$0xff]  }
 0x122   : > { %v582_v36 = vmul.f32 %v1876_v0, %v1447_v30  ;;  %v1394_v13 = vunpack.c.l.bf16 %v1509_v12  ;;  %v1395_v25 = vunpack.c.h.bf16 %v1509_v12  ;;  %v1525_v30 = vld [vmem:[%s1623_s20 + $0x1f0] sm:$0xff]  }
 0x123   : > { %1019 = vxpose.xlu2.b32.cont [9/16] (narrow) %v811_v32, 8  ;;  %v566_v37 = vmul.f32 %v1876_v0, %v1415_v31  ;;  %v1517_v31 = vld [vmem:[%s1623_s20 + $0x1b0] sm:$0xff]   ;;  %v1458_v33 = vunpack.c.l.bf16 %v1525_v30 }
 0x124   : > { %v555_v18 = vmul.f32 %v1876_v0, %v1394_v13  ;;  %v556_v32 = vmul.f32 %v1876_v0, %v1395_v25 }
 0x125   : > { %v587_v40 = vmul.f32 %v1876_v0, %v1458_v33 }
 0x126   : > { %v687_v19 = vadd.f32 %v1884_v4, %v555_v18 }
 0x128   : > { %1077 = vxpose.xlu1.b32.cont [3/16] (narrow) %v837_v42, 8  ;;  %v714_v42 = vadd.f32 %v1884_v4, %v582_v36  ;;  %v815_v24 = vmax.f32 %v687_v19, 0.0 }
 0x129   : > { %1045 = vxpose.xlu0.b32.cont [3/16] (narrow) %v821_v43, 8  ;;  %v698_v43 = vadd.f32 %v1884_v4, %v566_v37  ;;  %v1426_v37 = vunpack.c.l.bf16 %v1517_v31 }
 0x12a   : > { %v842_v49 = vmax.f32 %v714_v42, 0.0 }
 0x12b   : > { %1020 = vxpose.xlu2.b32.cont [10/16] (narrow) %v812_v46, 8  ;;  %v826_v50 = vmax.f32 %v698_v43, 0.0  ;;  %v571_v44 = vmul.f32 %v1876_v0, %v1426_v37  ;;  %v719_v46 = vadd.f32 %v1884_v4, %v587_v40 }
 0x12d   : > { %v703_v48 = vadd.f32 %v1884_v4, %v571_v44 }
 0x130   : > { %1078 = vxpose.xlu1.b32.cont [4/16] (narrow) %v838_v57, 8  ;;  %v1451_v57 = vunpack.c.h.bf16 %v1523_v38 }
 0x131   : > { %1046 = vxpose.xlu0.b32.cont [4/16] (narrow) %v822_v58, 8  ;;  %v1419_v58 = vunpack.c.h.bf16 %v1515_v39  ;;  %v1510_v39 = vld [vmem:[%s1623_s20 + $0x178] sm:$0xff]  }
 0x132   : > { %v584_v63 = vmul.f32 %v1876_v0, %v1451_v57  ;;  %v1398_v41 = vunpack.c.l.bf16 %v1510_v39  ;;  %v1399_v51 = vunpack.c.h.bf16 %v1510_v39  ;;  %v847_v57 = vmax.f32 %v719_v46, 0.0 }
 0x133   : > { %1021 = vxpose.xlu2.b32.cont [11/16] (narrow) %v813_v59, 8  ;;  %v568_v1 = vmul.f32 %v1876_v0, %v1419_v58  ;;  %v831_v58 = vmax.f32 %v703_v48, 0.0 }
 0x134   : > { %v557_v45 = vmul.f32 %v1876_v0, %v1398_v41  ;;  %v558_v56 = vmul.f32 %v1876_v0, %v1399_v51 }
 0x136   : > { %v689_v47 = vadd.f32 %v1884_v4, %v557_v45 }
 0x138   : > { %1079 = vxpose.xlu1.b32.cont [5/16] (narrow) %v839_v7, 8  ;;  %v716_v7 = vadd.f32 %v1884_v4, %v584_v63  ;;  %v817_v54 = vmax.f32 %v689_v47, 0.0  ;;  %v1518_v63 = vld [vmem:[%s1623_s20 + $0x1b8] sm:$0xff]  }
 0x139   : > { %1047 = vxpose.xlu0.b32.cont [5/16] (narrow) %v823_v8, 8  ;;  %v700_v8 = vadd.f32 %v1884_v4, %v568_v1  ;;  %v1430_v6 = vunpack.c.l.bf16 %v1518_v63  ;;  %v1431_v16 = vunpack.c.h.bf16 %v1518_v63 }
 0x13a   : > { %v844_v14 = vmax.f32 %v716_v7, 0.0 }
 0x13b   : > { %1022 = vxpose.xlu2.b32.cont [12/16] (narrow) %v814_v11, 8  ;;  %v828_v15 = vmax.f32 %v700_v8, 0.0  ;;  %v573_v12 = vmul.f32 %v1876_v0, %v1430_v6  ;;  %v574_v20 = vmul.f32 %v1876_v0, %v1431_v16 }
 0x13c   : > { %v995_v7 = vpop.trf.xlu1 }
 0x13d   : > { %v963_v8 = vpop.trf.xlu0  ;;  %1111 = vst [vmem:[%s1951_s5 + $0x20] sm:$0xff] %v995_v7 }
 0x13e   : > { %1110 = vst [vmem:[%s1951_s5 + $0x18] sm:$0xff] %v963_v8 }
 0x140   : > { %1080 = vxpose.xlu1.b32.cont [6/16] (narrow) %v840_v22, 8  ;;  %v1455_v22 = vunpack.c.h.bf16 %v1524_v2 }
 0x141   : > { %1048 = vxpose.xlu0.b32.cont [6/16] (narrow) %v824_v23, 8  ;;  %v1423_v23 = vunpack.c.h.bf16 %v1516_v3 }
 0x142   : > { %v586_v28 = vmul.f32 %v1876_v0, %v1455_v22  ;;  %v706_v22 = vadd.f32 %v1884_v4, %v574_v20 }
 0x143   : > { %1023 = vxpose.xlu2.b32.cont [13/16] (narrow) %v815_v24, 8  ;;  %v570_v29 = vmul.f32 %v1876_v0, %v1423_v23 }
 0x144   : > { %v834_v24 = vmax.f32 %v706_v22, 0.0 }
 0x145   : > { %v702_v36 = vadd.f32 %v1884_v4, %v570_v29 }
 0x147   : > { %v830_v43 = vmax.f32 %v702_v36, 0.0 }
 0x148   : > { %1081 = vxpose.xlu1.b32.cont [7/16] (narrow) %v841_v34, 8  ;;  %v688_v34 = vadd.f32 %v1884_v4, %v556_v32 }
 0x149   : > { %1049 = vxpose.xlu0.b32.cont [7/16] (narrow) %v825_v35, 8  ;;  %v718_v35 = vadd.f32 %v1884_v4, %v586_v28 }
 0x14a   : > { %v816_v38 = vmax.f32 %v688_v34, 0.0 }
 0x14b   : > { %v846_v42 = vmax.f32 %v718_v35, 0.0 }
 0x14c   : > { %1024 = vxpose.xlu2.b32.cont [14/16] (narrow) %v816_v38, 8 }
 0x150   : > { %1082 = vxpose.xlu1.b32.cont [8/16] (narrow) %v842_v49, 8  ;;  %v1459_v49 = vunpack.c.h.bf16 %v1525_v30 }
 0x151   : > { %1050 = vxpose.xlu0.b32.cont [8/16] (narrow) %v826_v50, 8  ;;  %v1427_v50 = vunpack.c.h.bf16 %v1517_v31 }
 0x152   : > { %v588_v59 = vmul.f32 %v1876_v0, %v1459_v49 }
 0x153   : > { %v572_v60 = vmul.f32 %v1876_v0, %v1427_v50 }
 0x154   : > { %1025 = vxpose.xlu2.b32.cont [15/16] (narrow) %v817_v54, 8  ;;  %v720_v2 = vadd.f32 %v1884_v4, %v588_v59 }
 0x155   : > { %v704_v3 = vadd.f32 %v1884_v4, %v572_v60 }
 0x156   : > { %v848_v9 = vmax.f32 %v720_v2, 0.0 }
 0x157   : > { %v832_v10 = vmax.f32 %v704_v3, 0.0 }
 0x158   : > { %1083 = vxpose.xlu1.b32.cont [9/16] (narrow) %v843_v61, 8  ;;  %v690_v61 = vadd.f32 %v1884_v4, %v558_v56 }
 0x159   : > { %1051 = vxpose.xlu0.b32.cont [9/16] (narrow) %v827_v62, 8  ;;  %v1526_v62 = vld [vmem:[%s1623_s20 + $0x1f8] sm:$0xff]  }
 0x15a   : > { %v818_v1 = vmax.f32 %v690_v61, 0.0  ;;  %v1462_v5 = vunpack.c.l.bf16 %v1526_v62 }
 0x15c   : > { %1026 = vxpose.xlu2.b32.end [16/16] (narrow) %v818_v1, 8  ;;  %v589_v11 = vmul.f32 %v1876_v0, %v1462_v5 }
 0x15e   : > { %v721_v13 = vadd.f32 %v1884_v4, %v589_v11 }
 0x160   : > { %1084 = vxpose.xlu1.b32.cont [10/16] (narrow) %v844_v14, 8  ;;  %v705_v14 = vadd.f32 %v1884_v4, %v573_v12  ;;  %v849_v17 = vmax.f32 %v721_v13, 0.0 }
 0x161   : > { %1052 = vxpose.xlu0.b32.cont [10/16] (narrow) %v828_v15, 8  ;;  %v1463_v15 = vunpack.c.h.bf16 %v1526_v62 }
 0x162   : > { %v833_v18 = vmax.f32 %v705_v14, 0.0 }
 0x163   : > { %v590_v19 = vmul.f32 %v1876_v0, %v1463_v15 }
 0x165   : > { %v722_v21 = vadd.f32 %v1884_v4, %v590_v19 }
 0x167   : > { %v850_v23 = vmax.f32 %v722_v21, 0.0 }
 0x168   : > { %1085 = vxpose.xlu1.b32.cont [11/16] (narrow) %v845_v26, 8 }
 0x169   : > { %1053 = vxpose.xlu0.b32.cont [11/16] (narrow) %v829_v27, 8 }
 0x170   : > { %1086 = vxpose.xlu1.b32.cont [12/16] (narrow) %v846_v42, 8 }
 0x171   : > { %1054 = vxpose.xlu0.b32.cont [12/16] (narrow) %v830_v43, 8 }
 0x178   : > { %1087 = vxpose.xlu1.b32.cont [13/16] (narrow) %v847_v57, 8 }
 0x179   : > { %1055 = vxpose.xlu0.b32.cont [13/16] (narrow) %v831_v58, 8 }
 0x17d   : > { %v1027_v25 = vpop.trf.xlu2 }
 0x17e   : > { %1112 = vst [vmem:[%s1951_s5 + $0x28] sm:$0xff] %v1027_v25 }
 0x180   : > { %1088 = vxpose.xlu1.b32.cont [14/16] (narrow) %v848_v9, 8 }
 0x181   : > { %1056 = vxpose.xlu0.b32.cont [14/16] (narrow) %v832_v10, 8 }
 0x188   : > { %1089 = vxpose.xlu1.b32.cont [15/16] (narrow) %v849_v17, 8 }
 0x189   : > { %1057 = vxpose.xlu0.b32.cont [15/16] (narrow) %v833_v18, 8 }
 0x190   : > { %1090 = vxpose.xlu1.b32.end [16/16] (narrow) %v850_v23, 8 }
 0x191   : > { %1058 = vxpose.xlu0.b32.end [16/16] (narrow) %v834_v24, 8 }
 0x1bc   : > { %v1091_v26 = vpop.trf.xlu1 }
 0x1bd   : > { %v1059_v27 = vpop.trf.xlu0  ;;  %1114 = vst [vmem:[%s1951_s5 + $0x38] sm:$0xff] %v1091_v26 }
 0x1be   : > { %1113 = vst [vmem:[%s1951_s5 + $0x30] sm:$0xff] %v1059_v27 }
 0x1bf PF: > { %s13_s14 = sadd.s32 1, %s1577_s14   ;;  %s1993_s12 = smov %s1573_s13 }
 0x1c0   : > { %p10_p6 = scmp.ge.s32.totalorder %s13_s14, 4   ;;  %s1994_s13 = smov %s1996_s15 }
 0x1c2   :  { %12 = sbr.rel (!%p10_p6) target bundleno = 2 (0x2), region = 62 }

// kernel: upconv_forward.2
= control target key start
LH: loop header
LB: loop body
LE: loop exit
PB: predicated region body
PF: predicated region fallthrough
CT: control target
= control target key end

     0   :  { %s10160_s15 = smov 0   ;;  %s10162_s16 = smov 0   ;;  %s13184_s0 = inlined_call_operand.vmem [shape: bf16[2,34,34,128], index: 0, kind: input, shape index: {}]   ;;  %s13185_s1 = inlined_call_operand.vmem [shape: bf16[9,128,128], index: 1, kind: input, shape index: {}]   ;;  %s13186_s2 = inlined_call_operand.vmem [shape: bf16[2048,128], index: 2, kind: output, shape index: {0}]   ;;  %s13187_s3 = inlined_call_operand.vmem [shape: f32[16,128], index: 3, kind: output, shape index: {1}]   ;;  %s13188_s4 = inlined_call_operand.vmem [shape: f32[16,128], index: 4, kind: output, shape index: {2}]  }
   0x1   :  { %s10164_s17 = smov 0  }
   0x2 LB: > { %s27_s18 = sadd.s32 1, %s10129_s16  ;;  %p8586_p0 = scmp.ge.s32.totalorder %s10133_s17, 1  ;;  %s10133_s17 = sphi %s10164_s17, %s15_s17   ;;  %s10129_s16 = sphi %s10162_s16, %s13726_s16   ;;  %s10125_s15 = sphi %s10160_s15, %s13725_s15  }
   0x3   : > { %p29_p1 = scmp.ge.s32.totalorder %s27_s18, 2  ;;  %p185_p2 = scmp.lt.s32.totalorder %s10133_s17, 3 }
   0x5   : > { %s13728_s18 = smov (%p29_p1, %s27_s18), 0  ;;  %p186_p3 = pnand %p8586_p0, %p185_p2 }
   0x7   : > { %189 = sbr.rel (%p186_p3) target bundleno = 2495 (0x9bf), region = 28 }
   0xc   : > { %v9399_v0 = vld [vmem:[%s13185_s1 + $0xf8] sm:$0xff]  ;;  %v9398_v1 = vld [vmem:[%s13185_s1 + $0xf0] sm:$0xff]  ;;  %v9397_v2 = vld [vmem:[%s13185_s1 + $0xe8] sm:$0xff]  ;;  %p222_p4 = scmp.lt.s32.totalorder %s10125_s15, 1  ;;  %vm2138_vm0 = vsmask.f32 3328 }
   0xd   : > { %9839 = vmatpush.bf16.msra.mxu1 %v9399_v0  ;;  %9840 = vmatpush.bf16.msra.mxu2 %v9399_v0  ;;  %v9396_v3 = vld [vmem:[%s13185_s1 + $0xe0] sm:$0xff]  ;;  %v9395_v4 = vld [vmem:[%s13185_s1 + $0xd8] sm:$0xff]  ;;  %v9394_v5 = vld [vmem:[%s13185_s1 + $0xd0] sm:$0xff]  ;;  %vm2139_vm1 = vsmask.f32 7440  ;;  %vm5507_vm3 = vcmask 1042432  }
   0xe   : > { %9841 = vmatpush.bf16.msra.mxu3 %v9399_v0  ;;  %886 = vmatpush.bf16.msra.mxu0 %v9399_v0  ;;  %s10200_s5 = scalar_select %p222_p4, %s10125_s15, 1  ;;  %v9393_v6 = vld [vmem:[%s13185_s1 + $0xc8] sm:$0xff]  ;;  %v9392_v7 = vld [vmem:[%s13185_s1 + $0xc0] sm:$0xff]  ;;  %v9407_v8 = vld [vmem:[%s13185_s1 + $0x1b8] sm:$0xff]  ;;  %vm5508_vm4 = vcmask 1046532  }
   0xf   : > { %v9415_v9 = vld [vmem:[%s13185_s1 + $0x78] sm:$0xff]  ;;  %v9406_v16 = vld [vmem:[%s13185_s1 + $0x1b0] sm:$0xff]  ;;  %v9405_v28 = vld [vmem:[%s13185_s1 + $0x1a8] sm:$0xff]  ;;  %s8588_s26 = sshll.u32 %s10125_s15, 7 }
  0x10   : > { %s9863_s8 = smul.u32 680, %s10200_s5  ;;  %v9391_v14 = vld [vmem:[%s13185_s1 + $0x38] sm:$0xff]  ;;  %v9414_v17 = vld [vmem:[%s13185_s1 + $0x70] sm:$0xff]  ;;  %v9413_v29 = vld [vmem:[%s13185_s1 + $0x68] sm:$0xff]  ;;  %p229_p5 = scmp.lt.s32.totalorder %s8588_s26, 255 }
  0x11   : > { %9842 = vmatpush.bf16.msra.mxu1 %v9398_v1  ;;  %9843 = vmatpush.bf16.msra.mxu2 %v9398_v1  ;;  %v9423_v15 = vld [vmem:[%s13185_s1 + $0x138] sm:$0xff]  ;;  %v9390_v18 = vld [vmem:[%s13185_s1 + $0x30] sm:$0xff]  ;;  %v9389_v30 = vld [vmem:[%s13185_s1 + $0x28] sm:$0xff] }
  0x12   : > { %9844 = vmatpush.bf16.msra.mxu3 %v9398_v1  ;;  %887 = vmatpush.bf16.msra.mxu0 %v9398_v1  ;;  %s10212_s13 = scalar_lea.vmem %s13184_s0, %s9863_s8  ;;  %v9422_v19 = vld [vmem:[%s13185_s1 + $0x130] sm:$0xff]  ;;  %v9421_v31 = vld [vmem:[%s13185_s1 + $0x128] sm:$0xff]  ;;  %v9404_v40 = vld [vmem:[%s13185_s1 + $0x1a0] sm:$0xff]  ;;  %s13730_s26 = smov (!%p229_p5, %s8588_s26), 255 }
  0x13   : > { %v9334_v10 = vld [vmem:[%s10212_s13 + $0xb4] sm:$0xff]  ;;  %v9335_v20 = vld [vmem:[%s10212_s13 + $0xbc] sm:$0xff]  ;;  %v9336_v24 = vld [vmem:[%s10212_s13 + $0xc8] sm:$0xff]  ;;  %s8589_s15 = sshll.u32 %s13730_s26, 2 }
  0x14   : > { %v9350_v11 = vld [vmem:[%s10212_s13 + $0x154] sm:$0xff]  ;;  %v9351_v21 = vld [vmem:[%s10212_s13 + $0x15c] sm:$0xff]  ;;  %v9352_v25 = vld [vmem:[%s10212_s13 + $0x168] sm:$0xff]  ;;  %s12280_s29 = scalar_lea.vmem %s13186_s2, %s8589_s15 }
  0x15   : > { %9845 = vmatpush.bf16.msra.mxu1 %v9397_v2  ;;  %9846 = vmatpush.bf16.msra.mxu2 %v9397_v2  ;;  %v9366_v12 = vld [vmem:[%s10212_s13 + $0x1f4] sm:$0xff]  ;;  %v9367_v22 = vld [vmem:[%s10212_s13 + $0x1fc] sm:$0xff]  ;;  %v9368_v26 = vld [vmem:[%s10212_s13 + $0x208] sm:$0xff] }
  0x16   : > { %9847 = vmatpush.bf16.msra.mxu3 %v9397_v2  ;;  %888 = vmatpush.bf16.msra.mxu0 %v9397_v2  ;;  %v10224_v13 = vld [vmem:[%s10212_s13 + $0x14] sm:$0xff]  ;;  %v10249_v23 = vld [vmem:[%s10212_s13 + $0x1c] sm:$0xff]  ;;  %v10256_v27 = vld [vmem:[%s10212_s13 + $0x28] sm:$0xff] }
  0x17   : > { %v9337_v32 = vld [vmem:[%s10212_s13 + $0xd0] sm:$0xff]  ;;  %v9338_v36 = vld [vmem:[%s10212_s13 + $0xdc] sm:$0xff]  ;;  %v9339_v44 = vld [vmem:[%s10212_s13 + $0xe4] sm:$0xff] }
  0x18   : > { %v9353_v33 = vld [vmem:[%s10212_s13 + $0x170] sm:$0xff]  ;;  %v9354_v37 = vld [vmem:[%s10212_s13 + $0x17c] sm:$0xff]  ;;  %v9355_v45 = vld [vmem:[%s10212_s13 + $0x184] sm:$0xff] }
  0x19   : > { %9848 = vmatpush.bf16.msra.mxu1 %v9396_v3  ;;  %9849 = vmatpush.bf16.msra.mxu2 %v9396_v3  ;;  %v9369_v34 = vld [vmem:[%s10212_s13 + $0x210] sm:$0xff]  ;;  %v9370_v38 = vld [vmem:[%s10212_s13 + $0x21c] sm:$0xff]  ;;  %v9371_v46 = vld [vmem:[%s10212_s13 + $0x224] sm:$0xff] }
  0x1a   : > { %9850 = vmatpush.bf16.msra.mxu3 %v9396_v3  ;;  %889 = vmatpush.bf16.msra.mxu0 %v9396_v3  ;;  %v10275_v35 = vld [vmem:[%s10212_s13 + $0x30] sm:$0xff]  ;;  %v10282_v39 = vld [vmem:[%s10212_s13 + $0x3c] sm:$0xff]  ;;  %v10301_v47 = vld [vmem:[%s10212_s13 + $0x44] sm:$0xff] }
  0x1b   : > { %v9412_v41 = vld [vmem:[%s13185_s1 + $0x60] sm:$0xff]  ;;  %v9340_v48 = vld [vmem:[%s10212_s13 + $0xf0] sm:$0xff]  ;;  %v9403_v52 = vld [vmem:[%s13185_s1 + $0x198] sm:$0xff] }
  0x1c   : > { %v9388_v42 = vld [vmem:[%s13185_s1 + $0x20] sm:$0xff]  ;;  %v9356_v49 = vld [vmem:[%s10212_s13 + $0x190] sm:$0xff]  ;;  %v9411_v53 = vld [vmem:[%s13185_s1 + $0x58] sm:$0xff] }
  0x1d   : > { %9851 = vmatpush.bf16.msra.mxu1 %v9395_v4  ;;  %9852 = vmatpush.bf16.msra.mxu2 %v9395_v4  ;;  %v9420_v43 = vld [vmem:[%s13185_s1 + $0x120] sm:$0xff]  ;;  %v9372_v50 = vld [vmem:[%s10212_s13 + $0x230] sm:$0xff]  ;;  %v9387_v54 = vld [vmem:[%s13185_s1 + $0x18] sm:$0xff] }
  0x1e   : > { %9853 = vmatpush.bf16.msra.mxu3 %v9395_v4  ;;  %890 = vmatpush.bf16.msra.mxu0 %v9395_v4  ;;  %v10308_v51 = vld [vmem:[%s10212_s13 + $0x50] sm:$0xff]  ;;  %v9419_v55 = vld [vmem:[%s13185_s1 + $0x118] sm:$0xff]  ;;  %v9342_v60 = vld [vmem:[%s10212_s13 + $0x104] sm:$0xff] }
  0x1f   : > { %v9341_v56 = vld [vmem:[%s10212_s13 + $0xf8] sm:$0xff]  ;;  %v9358_v61 = vld [vmem:[%s10212_s13 + $0x1a4] sm:$0xff]  ;;  %v9402_v2 = vld [vmem:[%s13185_s1 + $0x190] sm:$0xff] }
  0x20   : > { %v9357_v57 = vld [vmem:[%s10212_s13 + $0x198] sm:$0xff]  ;;  %v9374_v63 = vld [vmem:[%s10212_s13 + $0x244] sm:$0xff]  ;;  %v9410_v3 = vld [vmem:[%s13185_s1 + $0x50] sm:$0xff] }
  0x21   : > { %9854 = vmatpush.bf16.msra.mxu1 %v9394_v5  ;;  %9855 = vmatpush.bf16.msra.mxu2 %v9394_v5  ;;  %v9373_v58 = vld [vmem:[%s10212_s13 + $0x238] sm:$0xff]  ;;  %v10336_v0 = vld [vmem:[%s10212_s13 + $0x64] sm:$0xff]  ;;  %vm10547_vm2 = vmor %vm2138_vm0, %vm2139_vm1 }
  0x22   : > { %9856 = vmatpush.bf16.msra.mxu3 %v9394_v5  ;;  %891 = vmatpush.bf16.msra.mxu0 %v9394_v5  ;;  %v10327_v59 = vld [vmem:[%s10212_s13 + $0x58] sm:$0xff]  ;;  %vm12042_vm5 = vmor %vm5507_vm3, %vm5508_vm4 }
  0x25   : > { %9857 = vmatpush.bf16.msra.mxu1 %v9393_v6  ;;  %9858 = vmatpush.bf16.msra.mxu2 %v9393_v6 }
  0x26   : > { %9859 = vmatpush.bf16.msra.mxu3 %v9393_v6  ;;  %892 = vmatpush.bf16.msra.mxu0 %v9393_v6  ;;  %v9386_v6 = vld [vmem:[%s13185_s1 + $0x10] sm:$0xff] }
  0x29   : > { %9860 = vmatpush.bf16.msra.mxu1 %v9392_v7  ;;  %9861 = vmatpush.bf16.msra.mxu2 %v9392_v7 }
  0x2a   : > { %9862 = vmatpush.bf16.msra.mxu3 %v9392_v7  ;;  %893 = vmatpush.bf16.msra.mxu0 %v9392_v7 }
  0x2c   : > { %974 = vmatmul.bf16.vlgmr.msra.gmra.mxu1 %v9334_v10  ;;  %1054 = vmatmul.bf16.vlgmr.msra.gmra.mxu2 %v9350_v11 }
  0x2d   : > { %1681 = vmatpush.bf16.msrb.mxu2 %v9407_v8  ;;  %1134 = vmatmul.bf16.vlgmr.msra.gmra.mxu3 %v9366_v12  ;;  %v9343_v12 = vld [vmem:[%s10212_s13 + $0x10c] sm:$0xff] }
  0x2e   : > { %3870 = vmatpush.bf16.msrb.mxu3 %v9415_v9  ;;  %894 = vmatmul.bf16.vlgmr.msra.gmra.mxu0 %v10224_v13  ;;  %v9418_v9 = vld [vmem:[%s13185_s1 + $0x110] sm:$0xff] }
  0x2f   : > { %1275 = vmatpush.bf16.msrb.mxu1 %v9391_v14  ;;  %4444 = vmatpush.bf16.msrb.mxu0 %v9423_v15  ;;  %v9359_v14 = vld [vmem:[%s10212_s13 + $0x1ac] sm:$0xff] }
  0x31   : > { %1682 = vmatpush.bf16.msrb.mxu2 %v9406_v16  ;;  %v9375_v16 = vld [vmem:[%s10212_s13 + $0x24c] sm:$0xff] }
  0x32   : > { %3871 = vmatpush.bf16.msrb.mxu3 %v9414_v17  ;;  %v10371_v17 = vld [vmem:[%s10212_s13 + $0x6c] sm:$0xff] }
  0x33   : > { %1276 = vmatpush.bf16.msrb.mxu1 %v9390_v18  ;;  %4445 = vmatpush.bf16.msrb.mxu0 %v9422_v19 }
  0x35   : > { %1683 = vmatpush.bf16.msrb.mxu2 %v9405_v28  ;;  %v9360_v28 = vld [vmem:[%s10212_s13 + $0x1b8] sm:$0xff] }
  0x36   : > { %3872 = vmatpush.bf16.msrb.mxu3 %v9413_v29 }
  0x37   : > { %1277 = vmatpush.bf16.msrb.mxu1 %v9389_v30  ;;  %4446 = vmatpush.bf16.msrb.mxu0 %v9421_v31  ;;  %v9376_v30 = vld [vmem:[%s10212_s13 + $0x258] sm:$0xff] }
  0x38   : > { %v10394_v31 = vld [vmem:[%s10212_s13 + $0x78] sm:$0xff] }
  0x39   : > { %1684 = vmatpush.bf16.msrb.mxu2 %v9404_v40 }
  0x3a   : > { %3873 = vmatpush.bf16.msrb.mxu3 %v9412_v41 }
  0x3b   : > { %1278 = vmatpush.bf16.msrb.mxu1 %v9388_v42  ;;  %4447 = vmatpush.bf16.msrb.mxu0 %v9420_v43  ;;  %v9417_v42 = vld [vmem:[%s13185_s1 + $0x108] sm:$0xff] }
  0x3c   : > { %979 = vmatmul.bf16.gmra.mxu1 %v9335_v20  ;;  %1059 = vmatmul.bf16.gmra.mxu2 %v9351_v21 }
  0x3d   : > { %1139 = vmatmul.bf16.gmra.mxu3 %v9367_v22  ;;  %1685 = vmatpush.bf16.msrb.mxu2 %v9403_v52 }
  0x3e   : > { %899 = vmatmul.bf16.gmra.mxu0 %v10249_v23  ;;  %3874 = vmatpush.bf16.msrb.mxu3 %v9411_v53 }
  0x3f   : > { %1279 = vmatpush.bf16.msrb.mxu1 %v9387_v54  ;;  %4448 = vmatpush.bf16.msrb.mxu0 %v9419_v55 }
  0x41   : > { %1686 = vmatpush.bf16.msrb.mxu2 %v9402_v2  ;;  %v9378_v2 = vld [vmem:[%s10212_s13 + $0x26c] sm:$0xff] }
  0x42   : > { %3875 = vmatpush.bf16.msrb.mxu3 %v9410_v3  ;;  %v10452_v3 = vld [vmem:[%s10212_s13 + $0x8c] sm:$0xff] }
  0x43   : > { %1280 = vmatpush.bf16.msrb.mxu1 %v9386_v6  ;;  %4449 = vmatpush.bf16.msrb.mxu0 %v9418_v9  ;;  %v9400_v9 = vld [vmem:[%s13185_s1 + $0x180] sm:$0xff] }
  0x47   : > { %4450 = vmatpush.bf16.msrb.mxu0 %v9417_v42  ;;  %v9347_v42 = vld [vmem:[%s10212_s13 + $0x134] sm:$0xff] }
  0x4c   : > { %984 = vmatmul.bf16.gmra.mxu1 %v9336_v24  ;;  %1064 = vmatmul.bf16.gmra.mxu2 %v9352_v25 }
  0x4d   : > { %1144 = vmatmul.bf16.gmra.mxu3 %v9368_v26  ;;  %v9344_v26 = vld [vmem:[%s10212_s13 + $0x118] sm:$0xff] }
  0x4e   : > { %904 = vmatmul.bf16.gmra.mxu0 %v10256_v27 }
  0x5c   : > { %989 = vmatmul.bf16.gmra.mxu1 %v9337_v32  ;;  %1069 = vmatmul.bf16.gmra.mxu2 %v9353_v33  ;;  %v9401_v33 = vld [vmem:[%s13185_s1 + $0x188] sm:$0xff] }
  0x5d   : > { %1149 = vmatmul.bf16.gmra.mxu3 %v9369_v34  ;;  %v9409_v34 = vld [vmem:[%s13185_s1 + $0x48] sm:$0xff]  ;;  %1687 = vmatpush.bf16.msrb.mxu2 %v9401_v33  ;;  %v9416_v33 = vld [vmem:[%s13185_s1 + $0x100] sm:$0xff] }
  0x5e   : > { %909 = vmatmul.bf16.gmra.mxu0 %v10275_v35  ;;  %3876 = vmatpush.bf16.msrb.mxu3 %v9409_v34 }
  0x5f   : > { %4451 = vmatpush.bf16.msrb.mxu0 %v9416_v33 }
  0x61   : > { %1688 = vmatpush.bf16.msrb.mxu2 %v9400_v9 }
  0x6c   : > { %994 = vmatmul.bf16.gmra.mxu1 %v9338_v36  ;;  %1074 = vmatmul.bf16.gmra.mxu2 %v9354_v37 }
  0x6d   : > { %1154 = vmatmul.bf16.gmra.mxu3 %v9370_v38  ;;  %v9385_v38 = vld [vmem:[%s13185_s1 + $0x8] sm:$0xff] }
  0x6e   : > { %914 = vmatmul.bf16.gmra.mxu0 %v10282_v39  ;;  %1281 = vmatpush.bf16.msrb.mxu1 %v9385_v38 }
  0x7c   : > { %999 = vmatmul.bf16.gmra.mxu1 %v9339_v44  ;;  %1079 = vmatmul.bf16.gmra.mxu2 %v9355_v45  ;;  %v9345_v45 = vld [vmem:[%s10212_s13 + $0x120] sm:$0xff] }
  0x7d   : > { %1159 = vmatmul.bf16.gmra.mxu3 %v9371_v46  ;;  %v9361_v46 = vld [vmem:[%s10212_s13 + $0x1c0] sm:$0xff] }
  0x7e   : > { %919 = vmatmul.bf16.gmra.mxu0 %v10301_v47 }
  0x8c   : > { %1004 = vmatmul.bf16.gmra.mxu1 %v9340_v48  ;;  %1084 = vmatmul.bf16.gmra.mxu2 %v9356_v49  ;;  %v9377_v49 = vld [vmem:[%s10212_s13 + $0x260] sm:$0xff] }
  0x8d   : > { %1164 = vmatmul.bf16.gmra.mxu3 %v9372_v50  ;;  %v10429_v50 = vld [vmem:[%s10212_s13 + $0x80] sm:$0xff] }
  0x8e   : > { %924 = vmatmul.bf16.gmra.mxu0 %v10308_v51 }
  0x9c   : > { %1009 = vmatmul.bf16.gmra.mxu1 %v9341_v56  ;;  %1089 = vmatmul.bf16.gmra.mxu2 %v9357_v57 }
  0x9d   : > { %1169 = vmatmul.bf16.gmra.mxu3 %v9373_v58 }
  0x9e   : > { %929 = vmatmul.bf16.gmra.mxu0 %v10327_v59 }
  0xa9   : > { %v10332_v62 = vpop.f32.mrf.mxu1 }
  0xab   : > { %v10338_v1 = vpop.f32.mrf.mxu0 }
  0xac   : > { %1014 = vmatmul.bf16.gmra.mxu1 %v9342_v60  ;;  %1094 = vmatmul.bf16.gmra.mxu2 %v9358_v61  ;;  %v9346_v60 = vld [vmem:[%s10212_s13 + $0x12c] sm:$0xff] }
  0xad   : > { %1174 = vmatmul.bf16.gmra.mxu3 %v9374_v63  ;;  %v9362_v61 = vld [vmem:[%s10212_s13 + $0x1cc] sm:$0xff] }
  0xae   : > { %934 = vmatmul.bf16.gmra.mxu0 %v10336_v0 }
  0xaf   : > { %v10347_v4 = vpop.f32.mrf.mxu2 }
  0xb0   : > { %13231 = vst [vmem:[#allocation2_spill] sm:$0xff] %v10347_v4  ;;  %v10349_v5 = vpop.f32.mrf.mxu3  ;;  %v9365_v4 = vld [vmem:[%s10212_s13 + $0x1e8] sm:$0xff] }
  0xb1   : > { %13232 = vst [vmem:[#allocation3_spill] sm:$0xff] %v10349_v5  ;;  %v10354_v7 = vpop.f32.mrf.mxu1  ;;  %v9431_v5 = vld [vmem:[%s13185_s1 + $0x1f8] sm:$0xff] }
  0xb2   : > { %13233 = vst [vmem:[#allocation4_spill] sm:$0xff] %v10354_v7 }
  0xb3   : > { %v10356_v8 = vpop.f32.mrf.mxu0 }
  0xb7   : > { %v10361_v10 = vpop.f32.mrf.mxu2 }
  0xb8   : > { %13234 = vst [vmem:[#allocation5_spill] sm:$0xff] %v10361_v10  ;;  %v10363_v11 = vpop.f32.mrf.mxu3  ;;  %v9349_v10 = vld [vmem:[%s10212_s13 + $0x148] sm:$0xff] }
  0xb9   : > { %13235 = vst [vmem:[#allocation6_spill] sm:$0xff] %v10363_v11  ;;  %v10367_v15 = vpop.f32.mrf.mxu1 }
  0xba   : > { %13236 = vst [vmem:[#allocation7_spill] sm:$0xff] %v10367_v15 }
  0xbb   : > { %v10373_v18 = vpop.f32.mrf.mxu0 }
  0xbc   : > { %1019 = vmatmul.bf16.gmra.mxu1 %v9343_v12  ;;  %1099 = vmatmul.bf16.gmra.mxu2 %v9359_v14  ;;  %v9408_v12 = vld [vmem:[%s13185_s1 + $0x40] sm:$0xff] }
  0xbd   : > { %1179 = vmatmul.bf16.gmra.mxu3 %v9375_v16 }
  0xbe   : > { %939 = vmatmul.bf16.gmra.mxu0 %v10371_v17  ;;  %3877 = vmatpush.bf16.msrb.mxu3 %v9408_v12 }
  0xbf   : > { %v10376_v19 = vpop.f32.mrf.mxu2 }
  0xc0   : > { %13237 = vst [vmem:[#allocation8_spill] sm:$0xff] %v10376_v19  ;;  %v10378_v20 = vpop.f32.mrf.mxu3 }
  0xc1   : > { %13238 = vst [vmem:[#allocation9_spill] sm:$0xff] %v10378_v20  ;;  %v10380_v21 = vpop.f32.mrf.mxu1  ;;  %v257_v20 = vld [vmem:[%s10212_s13 + $0x18] sm:$0xf] }
  0xc2   : > { %13239 = vst [vmem:[#allocation10_spill] sm:$0xff] %v10380_v21 }
  0xc3   : > { %v10382_v22 = vpop.f32.mrf.mxu0 }
  0xc7   : > { %v10384_v24 = vpop.f32.mrf.mxu2 }
  0xc8   : > { %13240 = vst [vmem:[#allocation11_spill] sm:$0xff] %v10384_v24  ;;  %v10386_v25 = vpop.f32.mrf.mxu3 }
  0xc9   : > { %13241 = vst [vmem:[#allocation12_spill] sm:$0xff] %v10386_v25  ;;  %v10390_v29 = vpop.f32.mrf.mxu1 }
  0xca   : > { %13242 = vst [vmem:[#allocation13_spill] sm:$0xff] %v10390_v29 }
  0xcb   : > { %v10396_v32 = vpop.f32.mrf.mxu0 }
  0xcc   : > { %1024 = vmatmul.bf16.gmra.mxu1 %v9344_v26  ;;  %1104 = vmatmul.bf16.gmra.mxu2 %v9360_v28  ;;  %v9384_v26 = vld [vmem:[%s13185_s1] sm:$0xff] }
  0xcd   : > { %1184 = vmatmul.bf16.gmra.mxu3 %v9376_v30  ;;  %1282 = vmatpush.bf16.msrb.mxu1 %v9384_v26 }
  0xce   : > { %944 = vmatmul.bf16.gmra.mxu0 %v10394_v31 }
  0xcf   : > { %v10405_v36 = vpop.f32.mrf.mxu2 }
  0xd0   : > { %13243 = vst [vmem:[#allocation14_spill] sm:$0xff] %v10405_v36  ;;  %v10407_v37 = vpop.f32.mrf.mxu3 }
  0xd1   : > { %13244 = vst [vmem:[#allocation15_spill] sm:$0xff] %v10407_v37  ;;  %v10412_v40 = vpop.f32.mrf.mxu1  ;;  %v256_v37 = vld [vmem:[%s10212_s13 + $0x14] sm:$0xf]  ;;  %5018 = vmatpush.bf16.msra.mxu1 %v9431_v5  ;;  %v258_v5 = vld [vmem:[%s10212_s13 + $0x1c] sm:$0xf] }
  0xd2   : > { %13245 = vst [vmem:[#allocation16_spill] sm:$0xff] %v10412_v40 }
  0xd3   : > { %v10414_v41 = vpop.f32.mrf.mxu0 }
  0xd7   : > { %v10419_v43 = vpop.f32.mrf.mxu2 }
  0xd8   : > { %13246 = vst [vmem:[#allocation17_spill] sm:$0xff] %v10419_v43  ;;  %v10421_v44 = vpop.f32.mrf.mxu3 }
  0xd9   : > { %13247 = vst [vmem:[#allocation18_spill] sm:$0xff] %v10421_v44  ;;  %v10425_v48 = vpop.f32.mrf.mxu1  ;;  %v9439_v44 = vld [vmem:[%s13185_s1 + $0xb8] sm:$0xff] }
  0xda   : > { %13248 = vst [vmem:[#allocation19_spill] sm:$0xff] %v10425_v48  ;;  %6247 = vmatpush.bf16.msra.mxu2 %v9439_v44  ;;  %v2195_v44 = vshll.u32 %v257_v20, 16  ;;  %v260_v48 = vld [vmem:[%s10212_s13 + $0x24] sm:$0x1] }
  0xdb   : > { %v10431_v52 = vpop.f32.mrf.mxu0 }
  0xdc   : > { %1029 = vmatmul.bf16.gmra.mxu1 %v9345_v45  ;;  %1109 = vmatmul.bf16.gmra.mxu2 %v9361_v46  ;;  %v9363_v45 = vld [vmem:[%s10212_s13 + $0x1d4] sm:$0xff]  ;;  %v2197_v36 = vrot.slane %v2195_v44, 5 }
  0xdd   : > { %1189 = vmatmul.bf16.gmra.mxu3 %v9377_v49  ;;  %v9379_v49 = vld [vmem:[%s10212_s13 + $0x274] sm:$0xff] }
  0xde   : > { %949 = vmatmul.bf16.gmra.mxu0 %v10429_v50 }
  0xdf   : > { %v10434_v53 = vpop.f32.mrf.mxu2 }
  0xe0   : > { %13249 = vst [vmem:[#allocation20_spill] sm:$0xff] %v10434_v53  ;;  %v10436_v54 = vpop.f32.mrf.mxu3 }
  0xe1   : > { %13250 = vst [vmem:[#allocation21_spill] sm:$0xff] %v10436_v54  ;;  %v10438_v55 = vpop.f32.mrf.mxu1  ;;  %v252_v54 = vld [vmem:[%s10212_s13 + $0x4] sm:$0xf] }
  0xe2   : > { %13251 = vst [vmem:[#allocation22_spill] sm:$0xff] %v10438_v55  ;;  %v2155_v11 = vshrl.u32 %v252_v54, 16 }
  0xe3   : > { %v10440_v56 = vpop.f32.mrf.mxu0 }
  0xe7   : > { %v10442_v57 = vpop.f32.mrf.mxu2 }
  0xe8   : > { %13252 = vst [vmem:[#allocation23_spill] sm:$0xff] %v10442_v57  ;;  %v10444_v58 = vpop.f32.mrf.mxu3  ;;  %v2157_v57 = vrot.slane %v2155_v11, 4  ;;  %v9381_v11 = vld [vmem:[%s10212_s13 + $0x288] sm:$0xff] }
  0xe9   : > { %13253 = vst [vmem:[#allocation24_spill] sm:$0xff] %v10444_v58  ;;  %v10448_v63 = vpop.f32.mrf.mxu1 }
  0xea   : > { %13254 = vst [vmem:[#allocation25_spill] sm:$0xff] %v10448_v63 }
  0xeb   : > { %v10454_v6 = vpop.f32.mrf.mxu0 }
  0xec   : > { %1034 = vmatmul.bf16.gmra.mxu1 %v9346_v60  ;;  %1114 = vmatmul.bf16.gmra.mxu2 %v9362_v61  ;;  %v9331_v60 = vld [vmem:[%s10212_s13 + $0x94] sm:$0xff] }
  0xed   : > { %1194 = vmatmul.bf16.gmra.mxu3 %v9378_v2 }
  0xee   : > { %954 = vmatmul.bf16.gmra.mxu0 %v10452_v3 }
  0xef   : > { %v10463_v14 = vpop.f32.mrf.mxu2 }
  0xf0   : > { %13255 = vst [vmem:[#allocation26_spill] sm:$0xff] %v10463_v14  ;;  %v10465_v16 = vpop.f32.mrf.mxu3 }
  0xf1   : > { %13256 = vst [vmem:[#allocation27_spill] sm:$0xff] %v10465_v16  ;;  %v10470_v28 = vpop.f32.mrf.mxu1  ;;  %v9348_v16 = vld [vmem:[%s10212_s13 + $0x140] sm:$0xff] }
  0xf2   : > { %13257 = vst [vmem:[#allocation28_spill] sm:$0xff] %v10470_v28 }
  0xf3   : > { %v10472_v30 = vpop.f32.mrf.mxu0 }
  0xf7   : > { %v10477_v34 = vpop.f32.mrf.mxu2 }
  0xf8   : > { %13258 = vst [vmem:[#allocation29_spill] sm:$0xff] %v10477_v34  ;;  %v10479_v38 = vpop.f32.mrf.mxu3  ;;  %v2189_v34 = vshll.u32 %v256_v37, 16 }
  0xf9   : > { %13259 = vst [vmem:[#allocation30_spill] sm:$0xff] %v10479_v38  ;;  %v10483_v46 = vpop.f32.mrf.mxu1 }
  0xfa   : > { %13260 = vst [vmem:[#allocation31_spill] sm:$0xff] %v10483_v46  ;;  %v2191_v43 = vrot.slane %v2189_v34, 5 }
  0xfb   : > { %v10487_v61 = vpop.f32.mrf.mxu0 }
  0xfc   : > { %1039 = vmatmul.bf16.gmra.mxu1 %v9347_v42  ;;  %1119 = vmatmul.bf16.gmra.mxu2 %v9363_v45  ;;  %v9364_v42 = vld [vmem:[%s10212_s13 + $0x1e0] sm:$0xff] }
  0xfd   : > { %1199 = vmatmul.bf16.gmra.mxu3 %v9379_v49  ;;  %v9380_v49 = vld [vmem:[%s10212_s13 + $0x280] sm:$0xff] }
  0xfe   : > { %959 = vmatmul.bf16.gmra.mxu0 %v9331_v60  ;;  %v9332_v60 = vld [vmem:[%s10212_s13 + $0xa0] sm:$0xff] }
  0xff   : > { %v10489_v2 = vpop.f32.mrf.mxu2 }
 0x100   : > { %13261 = vst [vmem:[#allocation32_spill] sm:$0xff] %v10489_v2  ;;  %v10491_v9 = vpop.f32.mrf.mxu3  ;;  %v2186_v2 = vshrl.u32 %v256_v37, 16  ;;  %v253_v37 = vld [vmem:[%s10212_s13 + $0x8] sm:$0xf] }
 0x101   : > { %13262 = vst [vmem:[#allocation33_spill] sm:$0xff] %v10491_v9  ;;  %v10493_v12 = vpop.f32.mrf.mxu1  ;;  %v251_v9 = vld [vmem:[%s10212_s13] sm:$0xf] }
 0x102   : > { %13263 = vst [vmem:[#allocation34_spill] sm:$0xff] %v10493_v12  ;;  %v2188_v53 = vrot.slane %v2186_v2, 4  ;;  %v2205_v2 = vshll.u32 %v258_v5, 16 }
 0x103   : > { %v10495_v26 = vpop.f32.mrf.mxu0 }
 0x107   : > { %v10497_v33 = vpop.f32.mrf.mxu2 }
 0x108   : > { %13264 = vst [vmem:[#allocation35_spill] sm:$0xff] %v10497_v33  ;;  %v10499_v38 = vpop.f32.mrf.mxu3 }
 0x109   : > { %13265 = vst [vmem:[#allocation36_spill] sm:$0xff] %v10499_v38  ;;  %v10503_v45 = vpop.f32.mrf.mxu1  ;;  %v9447_v38 = vld [vmem:[%s13185_s1 + $0x178] sm:$0xff] }
 0x10a   : > { %13266 = vst [vmem:[#allocation37_spill] sm:$0xff] %v10503_v45  ;;  %6791 = vmatpush.bf16.msra.mxu3 %v9447_v38  ;;  %v2199_v38 = vshrl.u32 %v257_v20, 16  ;;  %v2192_v45 = vor.u32 %v2191_v43, %v2188_v53 }
 0x10b   : > { %v10507_v58 = vpop.f32.mrf.mxu0 }
 0x10c   : > { %1044 = vmatmul.bf16.gmra.mxu1 %v9348_v16  ;;  %1124 = vmatmul.bf16.gmra.mxu2 %v9364_v42  ;;  %v2142_v42 = vshrl.u32 %v251_v9, 16  ;;  %v2201_v24 = vrot.slane %v2199_v38, 4  ;;  %v2193_v43 = vrot.slane %v2192_v45, 4  ;;  %v2165_v45 = vshrl.u32 %v253_v37, 16 }
 0x10d   : > { %1204 = vmatmul.bf16.gmra.mxu3 %v9380_v49  ;;  %v2145_v49 = vshll.u32 %v251_v9, 16 }
 0x10e   : > { %964 = vmatmul.bf16.gmra.mxu0 %v9332_v60  ;;  %v2151_v60 = vshll.u32 %v252_v54, 16  ;;  %v9455_v54 = vld [vmem:[%s13185_s1 + $0x238] sm:$0xff]  ;;  %v2144_v9 = vrot.slane %v2142_v42, 4  ;;  %v2202_v34 = vor.u32 %v2201_v24, %v2197_v36  ;;  %v2167_v46 = vrot.slane %v2165_v45, 4 }
 0x10f   : > { %v10518_v25 = vpop.f32.mrf.mxu2  ;;  %7335 = vmatpush.bf16.msra.mxu0 %v9455_v54  ;;  %v9333_v54 = vld [vmem:[%s10212_s13 + $0xa8] sm:$0xff] }
 0x110   : > { %13267 = vst [vmem:[#allocation38_spill] sm:$0xff] %v10518_v25  ;;  %v10521_v16 = vpop.f32.mrf.mxu3  ;;  %v2153_v25 = vrot.slane %v2151_v60, 5  ;;  %v2203_v53 = vrot.slane %v2202_v34, 4 }
 0x111   : > { %13268 = vst [vmem:[#allocation39_spill] sm:$0xff] %v10521_v16  ;;  %v10526_v33 = vpop.f32.mrf.mxu1  ;;  %v2147_v16 = vrot.slane %v2145_v49, 5  ;;  %v2161_v49 = vshll.u32 %v253_v37, 16  ;;  %v255_v37 = vld [vmem:[%s10212_s13 + $0x10] sm:$0x1] }
 0x112   : > { %13269 = vst [vmem:[#allocation40_spill] sm:$0xff] %v10526_v33  ;;  %v2158_v42 = vor.u32 %v2157_v57, %v2153_v25  ;;  %v13273_v57 = vmov 0 }
 0x113   : > { %v10528_v14 = vpop.f32.mrf.mxu0  ;;  %v2148_v33 = vor.u32 %v2147_v16, %v2144_v9  ;;  %v2163_v16 = vrot.slane %v2161_v49, 5  ;;  %v13274_v57 = vsel %vm10547_vm2, 4294967295, %v13273_v57  ;;  %v2207_v9 = vrot.slane %v2205_v2, 5 }
 0x114   : > { %v2159_v38 = vrot.slane %v2158_v42, 4  ;;  %13275 = vst [vmem:[#allocation44_spill] sm:$0xff] %v13274_v57  ;;  %v2198_v42 = vsel %vm10547_vm2, %v2193_v43, %v2197_v36  ;;  %v2209_v2 = vshrl.u32 %v258_v5, 16  ;;  %v9316_v5 = vld [vmem:[%s10212_s13] sm:$0xff]  ;;  %v9955_v57 = vld [vmem:[%s10212_s13 + $0xc] sm:$0xf] }
 0x115   : > { %v2149_v44 = vrot.slane %v2148_v33, 4  ;;  %v2208_v34 = vsel %vm10547_vm2, %v2203_v53, %v2207_v9 }
 0x116   : > { %v2211_v28 = vrot.slane %v2209_v2, 4 }
 0x117   : > { %v10534_v20 = vpop.f32.mrf.mxu2 }
 0x118   : > { %13270 = vst [vmem:[#allocation41_spill] sm:$0xff] %v10534_v20  ;;  %v10537_v19 = vpop.f32.mrf.mxu3 }
 0x119   : > { %13271 = vst [vmem:[#allocation42_spill] sm:$0xff] %v10537_v19  ;;  %v10541_v60 = vpop.f32.mrf.mxu1  ;;  %v254_v19 = vld [vmem:[%s10212_s13 + $0xc] sm:$0xf] }
 0x11a   : > { %13272 = vst [vmem:[#allocation43_spill] sm:$0xff] %v10541_v60  ;;  %v259_v60 = vld [vmem:[%s10212_s13 + $0x20] sm:$0xf]  ;;  %v2171_v49 = vshll.u32 %v254_v19, 16 }
 0x11b   : > { %v10545_v12 = vpop.f32.mrf.mxu0 }
 0x11c   : > { %1049 = vmatmul.bf16.gmra.mxu1 %v9349_v10  ;;  %1129 = vmatmul.bf16.gmra.mxu2 %v9365_v4  ;;  %v2154_v4 = vsel %vm10547_vm2, %v2149_v44, %v2153_v25  ;;  %v2164_v10 = vsel %vm10547_vm2, %v2159_v38, %v2163_v16  ;;  %v2215_v25 = vshll.u32 %v259_v60, 16  ;;  %v2219_v44 = vshrl.u32 %v259_v60, 16 }
 0x11d   : > { %1209 = vmatmul.bf16.gmra.mxu3 %v9381_v11  ;;  %v2175_v11 = vshrl.u32 %v254_v19, 16  ;;  %v3566_v38 = vunpack.c.l.b16 %v2154_v4  ;;  %v2173_v36 = vrot.slane %v2171_v49, 5  ;;  %v2168_v4 = vor.u32 %v2167_v46, %v2163_v16 }
 0x11e   : > { %969 = vmatmul.bf16.gmra.mxu0 %v9333_v54  ;;  %v2217_v19 = vrot.slane %v2215_v25, 5  ;;  %v2221_v63 = vrot.slane %v2219_v44, 4  ;;  %v2212_v49 = vor.u32 %v2211_v28, %v2207_v9  ;;  %v261_v25 = vld [vmem:[%s10212_s13 + $0x28] sm:$0xf] }
 0x11f   : > { %v10552_v20 = vpop.f32.mrf.mxu2  ;;  %v2177_v43 = vrot.slane %v2175_v11, 4  ;;  %v2230_v28 = vshrl.u32 %v261_v25, 16  ;;  %v2233_v9 = vshll.u32 %v261_v25, 16 }
 0x120   : > { %13276 = vst [vmem:[#allocation45_spill] sm:$0xff] %v10552_v20  ;;  %v10555_v24 = vpop.f32.mrf.mxu3  ;;  %v3570_v20 = vunpack.c.l.b16 %v2198_v42  ;;  %v2181_v42 = vshll.u32 %v255_v37, 16  ;;  %v2222_v11 = vor.u32 %v2221_v63, %v2217_v19 }
 0x121   : > { %13277 = vst [vmem:[#allocation46_spill] sm:$0xff] %v10555_v24  ;;  %v10561_v33 = vpop.f32.mrf.mxu1  ;;  %v3567_v24 = vunpack.c.l.b16 %v2164_v10  ;;  %v2178_v10 = vor.u32 %v2177_v43, %v2173_v36 }
 0x122   : > { %13278 = vst [vmem:[#allocation47_spill] sm:$0xff] %v10561_v33  ;;  %v3571_v33 = vunpack.c.l.b16 %v2208_v34  ;;  %v2225_v34 = vshll.u32 %v260_v48, 16  ;;  %v2223_v46 = vrot.slane %v2222_v11, 4 }
 0x123   : > { %v10565_v54 = vpop.f32.mrf.mxu0  ;;  %v3694_v40 = vpack.c.b16 %v3567_v24, %v3566_v38  ;;  %v2169_v24 = vrot.slane %v2168_v4, 4  ;;  %v2179_v2 = vrot.slane %v2178_v10, 4  ;;  %v262_v38 = vld [vmem:[%s10212_s13 + $0x2c] sm:$0xf] }
 0x124   : > { %v10578_v60 = vpack.c.b16 %v3571_v33, %v3570_v20  ;;  %v2183_v20 = vrot.slane %v2181_v42, 5  ;;  %v2213_v33 = vrot.slane %v2212_v49, 4  ;;  %v2227_v16 = vrot.slane %v2225_v34, 5 }
 0x125   : > { %v2174_v48 = vsel %vm10547_vm2, %v2169_v24, %v2173_v36  ;;  %v2239_v10 = vshll.u32 %v262_v38, 16  ;;  %v2243_v42 = vshrl.u32 %v262_v38, 16  ;;  %v2232_v24 = vrot.slane %v2230_v28, 4 }
 0x126   : > { %v2228_v4 = vsel %vm10547_vm2, %v2223_v46, %v2227_v16  ;;  %v3568_v49 = vunpack.c.l.b16 %v2174_v48 }
 0x127   : > { %v10570_v55 = vpop.f32.mrf.mxu2  ;;  %v3573_v34 = vunpack.c.l.b16 %v2228_v4 }
 0x128   : > { %13279 = vst [vmem:[#allocation48_spill] sm:$0xff] %v10570_v55  ;;  %v10573_v53 = vpop.f32.mrf.mxu3  ;;  %v9317_v55 = vld [vmem:[%s10212_s13 + $0x8] sm:$0xff] }
 0x129   : > { %13280 = vst [vmem:[#allocation49_spill] sm:$0xff] %v10573_v53  ;;  %v10576_v29 = vpop.f32.mrf.mxu1  ;;  %v263_v53 = vld [vmem:[%s10212_s13 + $0x30] sm:$0xf] }
 0x12a   : > { %13281 = vst [vmem:[#allocation50_spill] sm:$0xff] %v10576_v29 }
 0x12b   : > { %v10580_v45 = vpop.f32.mrf.mxu0 }
 0x12c   : > { %1283 = vmatmul.bf16.vlgmr.msrb.gmra.mxu1 %v9316_v5  ;;  %1689 = vmatmul.bf16.vlgmr.msrb.gmra.mxu2 %v10256_v27  ;;  %v2218_v5 = vsel %vm10547_vm2, %v2213_v33, %v2217_v19 }
 0x12d   : > { %3878 = vmatmul.bf16.vlgmr.msrb.gmra.mxu3 %v3694_v40  ;;  %v2184_v40 = vsel %vm10547_vm2, %v2179_v2, %v2183_v20  ;;  %v3572_v36 = vunpack.c.l.b16 %v2218_v5  ;;  %v2235_v2 = vrot.slane %v2233_v9, 5  ;;  %v2241_v20 = vrot.slane %v2239_v10, 5  ;;  %v264_v10 = vld [vmem:[%s10212_s13 + $0x34] sm:$0xf] }
 0x12e   : > { %4452 = vmatmul.bf16.vlgmr.msrb.gmra.mxu0 %v10578_v60  ;;  %v3569_v11 = vunpack.c.l.b16 %v2184_v40  ;;  %v2249_v40 = vshll.u32 %v263_v53, 16 }
 0x12f   : > { %v10585_v44 = vpop.f32.mrf.mxu2  ;;  %v10610_v46 = vpack.c.b16 %v3573_v34, %v3572_v36  ;;  %v2236_v16 = vor.u32 %v2235_v2, %v2232_v24  ;;  %v2253_v36 = vshrl.u32 %v263_v53, 16  ;;  %v2259_v34 = vshll.u32 %v264_v10, 16 }
 0x130   : > { %13282 = vst [vmem:[#allocation51_spill] sm:$0xff] %v10585_v44  ;;  %v10588_v43 = vpop.f32.mrf.mxu3  ;;  %v3695_v33 = vpack.c.b16 %v3569_v11, %v3568_v49  ;;  %v2251_v5 = vrot.slane %v2249_v40, 5  ;;  %v2263_v24 = vshrl.u32 %v264_v10, 16 }
 0x131   : > { %13283 = vst [vmem:[#allocation52_spill] sm:$0xff] %v10588_v43  ;;  %v10590_v63 = vpop.f32.mrf.mxu1  ;;  %v2245_v43 = vrot.slane %v2243_v42, 4  ;;  %v2237_v28 = vrot.slane %v2236_v16, 4  ;;  %v2255_v16 = vrot.slane %v2253_v36, 4 }
 0x132   : > { %13284 = vst [vmem:[#allocation53_spill] sm:$0xff] %v10590_v63  ;;  %v2265_v40 = vrot.slane %v2263_v24, 4  ;;  %v266_v24 = vld [vmem:[%s10212_s13 + $0x3c] sm:$0xf] }
 0x133   : > { %v10596_v37 = vpop.f32.mrf.mxu0  ;;  %v2246_v48 = vor.u32 %v2245_v43, %v2241_v20  ;;  %v2242_v43 = vsel %vm10547_vm2, %v2237_v28, %v2241_v20  ;;  %v2256_v53 = vor.u32 %v2255_v16, %v2251_v5 }
 0x134   : > { %v3574_v2 = vunpack.c.l.b16 %v2242_v43 }
 0x135   : > { %v2247_v9 = vrot.slane %v2246_v48, 4  ;;  %v2261_v48 = vrot.slane %v2259_v34, 5 }
 0x137   : > { %v10602_v25 = vpop.f32.mrf.mxu2  ;;  %v2252_v11 = vsel %vm10547_vm2, %v2247_v9, %v2251_v5  ;;  %v2266_v10 = vor.u32 %v2265_v40, %v2261_v48 }
 0x138   : > { %13285 = vst [vmem:[#allocation54_spill] sm:$0xff] %v10602_v25  ;;  %v10605_v44 = vpop.f32.mrf.mxu3 }
 0x139   : > { %13286 = vst [vmem:[#allocation55_spill] sm:$0xff] %v10605_v44  ;;  %v10608_v19 = vpop.f32.mrf.mxu1  ;;  %v2267_v36 = vrot.slane %v2266_v10, 4 }
 0x13a   : > { %13287 = vst [vmem:[#allocation56_spill] sm:$0xff] %v10608_v19 }
 0x13b   : > { %v10612_v38 = vpop.f32.mrf.mxu0 }
 0x13c   : > { %1288 = vmatmul.bf16.gmra.mxu1 %v9317_v55  ;;  %1694 = vmatmul.bf16.gmra.mxu2 %v10275_v35 }
 0x13d   : > { %3883 = vmatmul.bf16.gmra.mxu3 %v3695_v33  ;;  %v3575_v33 = vunpack.c.l.b16 %v2252_v11  ;;  %v2257_v11 = vrot.slane %v2256_v53, 4 }
 0x13e   : > { %4457 = vmatmul.bf16.gmra.mxu0 %v10610_v46 }
 0x13f   : > { %v10616_v4 = vpop.f32.mrf.mxu2  ;;  %v10636_v28 = vpack.c.b16 %v3575_v33, %v3574_v2  ;;  %v267_v2 = vld [vmem:[%s10212_s13 + $0x40] sm:$0xf] }
 0x140   : > { %13288 = vst [vmem:[#allocation57_spill] sm:$0xff] %v10616_v4  ;;  %v10619_v42 = vpop.f32.mrf.mxu3  ;;  %v2283_v53 = vshll.u32 %v267_v2, 16  ;;  %v2287_v10 = vshrl.u32 %v267_v2, 16 }
 0x141   : > { %13289 = vst [vmem:[#allocation58_spill] sm:$0xff] %v10619_v42  ;;  %v10621_v49 = vpop.f32.mrf.mxu1  ;;  %v265_v42 = vld [vmem:[%s10212_s13 + $0x38] sm:$0x1] }
 0x142   : > { %13290 = vst [vmem:[#allocation59_spill] sm:$0xff] %v10621_v49  ;;  %v2269_v43 = vshll.u32 %v265_v42, 16  ;;  %v2274_v42 = vshrl.u32 %v266_v24, 16 }
 0x143   : > { %v10625_v55 = vpop.f32.mrf.mxu0  ;;  %13294 = vst [vmem:[#allocation63_spill] sm:$0xff] %v10636_v28 }
 0x144   : > { %v2271_v34 = vrot.slane %v2269_v43, 5 }
 0x146   : > { %v2272_v40 = vsel %vm10547_vm2, %v2267_v36, %v2271_v34 }
 0x147   : > { %v10629_v44 = vpop.f32.mrf.mxu2 }
 0x148   : > { %13291 = vst [vmem:[#allocation60_spill] sm:$0xff] %v10629_v44  ;;  %v10632_v4 = vpop.f32.mrf.mxu3  ;;  %v2276_v44 = vrot.slane %v2274_v42, 4 }
 0x149   : > { %13292 = vst [vmem:[#allocation61_spill] sm:$0xff] %v10632_v4  ;;  %v10634_v20 = vpop.f32.mrf.mxu1 }
 0x14a   : > { %13293 = vst [vmem:[#allocation62_spill] sm:$0xff] %v10634_v20  ;;  %v2289_v20 = vrot.slane %v2287_v10, 4 }
 0x14b   : > { %v10638_v9 = vpop.f32.mrf.mxu0 }
 0x14c   : > { %1293 = vmatmul.bf16.gmra.mxu1 %v10224_v13  ;;  %1699 = vmatmul.bf16.gmra.mxu2 %v10282_v39  ;;  %v2277_v13 = vshll.u32 %v266_v24, 16 }
 0x14d   : > { %3888 = vmatmul.bf16.gmra.mxu3 %v10578_v60  ;;  %v2262_v60 = vsel %vm10547_vm2, %v2257_v11, %v2261_v48 }
 0x14e   : > { %4462 = vmatmul.bf16.gmra.mxu0 %v10636_v28  ;;  %v3576_v43 = vunpack.c.l.b16 %v2262_v60  ;;  %v2279_v25 = vrot.slane %v2277_v13, 5 }
 0x14f   : > { %v10645_v4 = vpop.f32.mrf.mxu2 }
 0x150   : > { %13295 = vst [vmem:[#allocation64_spill] sm:$0xff] %v10645_v4  ;;  %v10648_v33 = vpop.f32.mrf.mxu3  ;;  %v3577_v4 = vunpack.c.l.b16 %v2272_v40  ;;  %v2280_v11 = vor.u32 %v2279_v25, %v2276_v44 }
 0x151   : > { %13296 = vst [vmem:[#allocation65_spill] sm:$0xff] %v10648_v33  ;;  %v10650_v5 = vpop.f32.mrf.mxu1  ;;  %v2285_v33 = vrot.slane %v2283_v53, 5 }
 0x152   : > { %13297 = vst [vmem:[#allocation66_spill] sm:$0xff] %v10650_v5  ;;  %v268_v5 = vld [vmem:[%s10212_s13 + $0x44] sm:$0xf]  ;;  %v10665_v48 = vpack.c.b16 %v3577_v4, %v3576_v43  ;;  %v2281_v42 = vrot.slane %v2280_v11, 4  ;;  %v269_v4 = vld [vmem:[%s10212_s13 + $0x48] sm:$0xf] }
 0x153   : > { %v10652_v16 = vpop.f32.mrf.mxu0  ;;  %v2290_v34 = vor.u32 %v2289_v20, %v2285_v33  ;;  %v2293_v2 = vshll.u32 %v268_v5, 16  ;;  %v2297_v53 = vshrl.u32 %v268_v5, 16  ;;  %v2303_v10 = vshll.u32 %v269_v4, 16 }
 0x154   : > { %13301 = vst [vmem:[#allocation70_spill] sm:$0xff] %v10665_v48  ;;  %v2307_v43 = vshrl.u32 %v269_v4, 16 }
 0x155   : > { %v2291_v13 = vrot.slane %v2290_v34, 4  ;;  %v2295_v60 = vrot.slane %v2293_v2, 5  ;;  %v2299_v2 = vrot.slane %v2297_v53, 4 }
 0x157   : > { %v10658_v49 = vpop.f32.mrf.mxu2  ;;  %v2300_v5 = vor.u32 %v2299_v2, %v2295_v60 }
 0x158   : > { %13298 = vst [vmem:[#allocation67_spill] sm:$0xff] %v10658_v49  ;;  %v10661_v24 = vpop.f32.mrf.mxu3 }
 0x159   : > { %13299 = vst [vmem:[#allocation68_spill] sm:$0xff] %v10661_v24  ;;  %v10663_v19 = vpop.f32.mrf.mxu1  ;;  %v2305_v24 = vrot.slane %v2303_v10, 5 }
 0x15a   : > { %13300 = vst [vmem:[#allocation69_spill] sm:$0xff] %v10663_v19 }
 0x15b   : > { %v10667_v36 = vpop.f32.mrf.mxu0 }
 0x15c   : > { %1298 = vmatmul.bf16.gmra.mxu1 %v10249_v23  ;;  %1704 = vmatmul.bf16.gmra.mxu2 %v10301_v47  ;;  %v2286_v23 = vsel %vm10547_vm2, %v2281_v42, %v2285_v33 }
 0x15d   : > { %3893 = vmatmul.bf16.gmra.mxu3 %v10610_v46  ;;  %v2296_v46 = vsel %vm10547_vm2, %v2291_v13, %v2295_v60  ;;  %v3578_v11 = vunpack.c.l.b16 %v2286_v23 }
 0x15e   : > { %4467 = vmatmul.bf16.gmra.mxu0 %v10665_v48  ;;  %v3579_v34 = vunpack.c.l.b16 %v2296_v46  ;;  %v2301_v46 = vrot.slane %v2300_v5, 4 }
 0x15f   : > { %v10673_v40 = vpop.f32.mrf.mxu2 }
 0x160   : > { %13302 = vst [vmem:[#allocation71_spill] sm:$0xff] %v10673_v40  ;;  %v10676_v44 = vpop.f32.mrf.mxu3  ;;  %v2309_v40 = vrot.slane %v2307_v43, 4  ;;  %v10693_v42 = vpack.c.b16 %v3579_v34, %v3578_v11  ;;  %v271_v43 = vld [vmem:[%s10212_s13 + $0x50] sm:$0xf]  ;;  %v272_v11 = vld [vmem:[%s10212_s13 + $0x54] sm:$0xf] }
 0x161   : > { %13303 = vst [vmem:[#allocation72_spill] sm:$0xff] %v10676_v44  ;;  %v10678_v25 = vpop.f32.mrf.mxu1  ;;  %v270_v44 = vld [vmem:[%s10212_s13 + $0x4c] sm:$0x1]  ;;  %v2327_v5 = vshll.u32 %v272_v11, 16 }
 0x162   : > { %13304 = vst [vmem:[#allocation73_spill] sm:$0xff] %v10678_v25  ;;  %v2310_v4 = vor.u32 %v2309_v40, %v2305_v24  ;;  %v2313_v23 = vshll.u32 %v270_v44, 16  ;;  %v2318_v40 = vshrl.u32 %v271_v43, 16 }
 0x163   : > { %v10682_v20 = vpop.f32.mrf.mxu0  ;;  %13308 = vst [vmem:[#allocation77_spill] sm:$0xff] %v10693_v42 }
 0x164   : > { %v2311_v53 = vrot.slane %v2310_v4, 4  ;;  %v2315_v10 = vrot.slane %v2313_v23, 5  ;;  %v2331_v4 = vshrl.u32 %v272_v11, 16 }
 0x166   : > { %v2316_v2 = vsel %vm10547_vm2, %v2311_v53, %v2315_v10 }
 0x167   : > { %v10686_v49 = vpop.f32.mrf.mxu2 }
 0x168   : > { %13305 = vst [vmem:[#allocation74_spill] sm:$0xff] %v10686_v49  ;;  %v10689_v25 = vpop.f32.mrf.mxu3 }
 0x169   : > { %13306 = vst [vmem:[#allocation75_spill] sm:$0xff] %v10689_v25  ;;  %v10691_v33 = vpop.f32.mrf.mxu1 }
 0x16a   : > { %13307 = vst [vmem:[#allocation76_spill] sm:$0xff] %v10691_v33  ;;  %v2333_v33 = vrot.slane %v2331_v4, 4 }
 0x16b   : > { %v10695_v13 = vpop.f32.mrf.mxu0 }
 0x16c   : > { %1303 = vmatmul.bf16.gmra.mxu1 %v10256_v27  ;;  %1709 = vmatmul.bf16.gmra.mxu2 %v10308_v51  ;;  %v2321_v27 = vshll.u32 %v271_v43, 16  ;;  %v2306_v51 = vsel %vm10547_vm2, %v2301_v46, %v2305_v24  ;;  %v273_v43 = vld [vmem:[%s10212_s13 + $0x58] sm:$0xf] }
 0x16d   : > { %3898 = vmatmul.bf16.gmra.mxu3 %v10636_v28  ;;  %v3580_v23 = vunpack.c.l.b16 %v2306_v51  ;;  %v3581_v28 = vunpack.c.l.b16 %v2316_v2  ;;  %v2337_v11 = vshll.u32 %v273_v43, 16  ;;  %v274_v2 = vld [vmem:[%s10212_s13 + $0x5c] sm:$0xf] }
 0x16e   : > { %4472 = vmatmul.bf16.gmra.mxu0 %v10693_v42  ;;  %v2323_v49 = vrot.slane %v2321_v27, 5 }
 0x16f   : > { %v10702_v25 = vpop.f32.mrf.mxu2  ;;  %v10722_v24 = vpack.c.b16 %v3581_v28, %v3580_v23  ;;  %v2339_v51 = vrot.slane %v2337_v11, 5 }
 0x170   : > { %13309 = vst [vmem:[#allocation78_spill] sm:$0xff] %v10702_v25  ;;  %v10705_v34 = vpop.f32.mrf.mxu3  ;;  %v2320_v25 = vrot.slane %v2318_v40, 4 }
 0x171   : > { %13310 = vst [vmem:[#allocation79_spill] sm:$0xff] %v10705_v34  ;;  %v10707_v60 = vpop.f32.mrf.mxu1  ;;  %v2329_v34 = vrot.slane %v2327_v5, 5  ;;  %v2351_v5 = vshrl.u32 %v274_v2, 16 }
 0x172   : > { %13311 = vst [vmem:[#allocation80_spill] sm:$0xff] %v10707_v60  ;;  %v2324_v46 = vor.u32 %v2323_v49, %v2320_v25 }
 0x173   : > { %v10709_v44 = vpop.f32.mrf.mxu0  ;;  %13315 = vst [vmem:[#allocation84_spill] sm:$0xff] %v10722_v24  ;;  %v2334_v10 = vor.u32 %v2333_v33, %v2329_v34  ;;  %v2341_v33 = vshrl.u32 %v273_v43, 16 }
 0x174   : > { %v2325_v40 = vrot.slane %v2324_v46, 4 }
 0x175   : > { %v2335_v27 = vrot.slane %v2334_v10, 4  ;;  %v2343_v11 = vrot.slane %v2341_v33, 4 }
 0x177   : > { %v10715_v19 = vpop.f32.mrf.mxu2  ;;  %v2340_v23 = vsel %vm10547_vm2, %v2335_v27, %v2339_v51  ;;  %v2344_v43 = vor.u32 %v2343_v11, %v2339_v51  ;;  %v9438_v51 = vld [vmem:[%s13185_s1 + $0xb0] sm:$0xff] }
 0x178   : > { %13312 = vst [vmem:[#allocation81_spill] sm:$0xff] %v10715_v19  ;;  %v10718_v60 = vpop.f32.mrf.mxu3  ;;  %v3583_v10 = vunpack.c.l.b16 %v2340_v23  ;;  %6248 = vmatpush.bf16.msra.mxu2 %v9438_v51 }
 0x179   : > { %13313 = vst [vmem:[#allocation82_spill] sm:$0xff] %v10718_v60  ;;  %v10720_v63 = vpop.f32.mrf.mxu1 }
 0x17a   : > { %13314 = vst [vmem:[#allocation83_spill] sm:$0xff] %v10720_v63 }
 0x17b   : > { %v10724_v53 = vpop.f32.mrf.mxu0 }
 0x17c   : > { %1308 = vmatmul.bf16.gmra.mxu1 %v10275_v35  ;;  %1714 = vmatmul.bf16.gmra.mxu2 %v10327_v59  ;;  %v2330_v35 = vsel %vm10547_vm2, %v2325_v40, %v2329_v34  ;;  %v2347_v59 = vshll.u32 %v274_v2, 16 }
 0x17d   : > { %3903 = vmatmul.bf16.gmra.mxu3 %v10665_v48  ;;  %v3582_v46 = vunpack.c.l.b16 %v2330_v35  ;;  %v2353_v48 = vrot.slane %v2351_v5, 4  ;;  %v2345_v35 = vrot.slane %v2344_v43, 4 }
 0x17e   : > { %4477 = vmatmul.bf16.gmra.mxu0 %v10722_v24  ;;  %v2349_v60 = vrot.slane %v2347_v59, 5 }
 0x17f   : > { %v10731_v28 = vpop.f32.mrf.mxu2  ;;  %v10750_v34 = vpack.c.b16 %v3583_v10, %v3582_v46 }
 0x180   : > { %13316 = vst [vmem:[#allocation85_spill] sm:$0xff] %v10731_v28  ;;  %v10733_v49 = vpop.f32.mrf.mxu3  ;;  %v275_v28 = vld [vmem:[%s10212_s13 + $0x60] sm:$0x1]  ;;  %v2354_v40 = vor.u32 %v2353_v48, %v2349_v60  ;;  %v9446_v48 = vld [vmem:[%s13185_s1 + $0x170] sm:$0xff]  ;;  %v2350_v46 = vsel %vm10547_vm2, %v2345_v35, %v2349_v60 }
 0x181   : > { %13317 = vst [vmem:[#allocation86_spill] sm:$0xff] %v10733_v49  ;;  %v10735_v25 = vpop.f32.mrf.mxu1  ;;  %v2357_v2 = vshll.u32 %v275_v28, 16  ;;  %6792 = vmatpush.bf16.msra.mxu3 %v9446_v48  ;;  %v9430_v48 = vld [vmem:[%s13185_s1 + $0x1f0] sm:$0xff]  ;;  %v3584_v60 = vunpack.c.l.b16 %v2350_v46 }
 0x182   : > { %13318 = vst [vmem:[#allocation87_spill] sm:$0xff] %v10735_v25  ;;  %v2355_v33 = vrot.slane %v2354_v40, 4  ;;  %5019 = vmatpush.bf16.msra.mxu1 %v9430_v48 }
 0x183   : > { %v10739_v4 = vpop.f32.mrf.mxu0  ;;  %13322 = vst [vmem:[#allocation91_spill] sm:$0xff] %v10750_v34  ;;  %v2359_v59 = vrot.slane %v2357_v2, 5 }
 0x185   : > { %v2360_v10 = vsel %vm10547_vm2, %v2355_v33, %v2359_v59 }
 0x186   : > { %v3585_v35 = vunpack.c.l.b16 %v2360_v10 }
 0x187   : > { %v10744_v49 = vpop.f32.mrf.mxu2 }
 0x188   : > { %13319 = vst [vmem:[#allocation88_spill] sm:$0xff] %v10744_v49  ;;  %v10746_v19 = vpop.f32.mrf.mxu3 }
 0x189   : > { %13320 = vst [vmem:[#allocation89_spill] sm:$0xff] %v10746_v19  ;;  %v10748_v25 = vpop.f32.mrf.mxu1 }
 0x18a   : > { %13321 = vst [vmem:[#allocation90_spill] sm:$0xff] %v10748_v25 }
 0x18b   : > { %v10752_v27 = vpop.f32.mrf.mxu0 }
 0x18c   : > { %1313 = vmatmul.bf16.gmra.mxu1 %v10282_v39  ;;  %1719 = vmatmul.bf16.gmra.mxu2 %v10336_v0  ;;  %v276_v39 = vld [vmem:[%s10212_s13 + $0x64] sm:$0xf]  ;;  %v277_v0 = vld [vmem:[%s10212_s13 + $0x68] sm:$0xf] }
 0x18d   : > { %3908 = vmatmul.bf16.gmra.mxu3 %v10693_v42  ;;  %v2362_v43 = vshrl.u32 %v276_v39, 16  ;;  %v2365_v40 = vshll.u32 %v276_v39, 16  ;;  %v2371_v2 = vshll.u32 %v277_v0, 16  ;;  %v2375_v51 = vshrl.u32 %v277_v0, 16  ;;  %v278_v39 = vld [vmem:[%s10212_s13 + $0x6c] sm:$0xf] }
 0x18e   : > { %4482 = vmatmul.bf16.gmra.mxu0 %v10750_v34  ;;  %v2381_v46 = vshll.u32 %v278_v39, 16 }
 0x18f   : > { %v10764_v28 = vpop.f32.mrf.mxu2  ;;  %v2364_v33 = vrot.slane %v2362_v43, 4  ;;  %v2367_v59 = vrot.slane %v2365_v40, 5  ;;  %v2373_v19 = vrot.slane %v2371_v2, 5  ;;  %v2377_v42 = vrot.slane %v2375_v51, 4  ;;  %v279_v51 = vld [vmem:[%s10212_s13 + $0x70] sm:$0xf] }
 0x190   : > { %13323 = vst [vmem:[#allocation92_spill] sm:$0xff] %v10764_v28  ;;  %v10768_v5 = vpop.f32.mrf.mxu3  ;;  %v2383_v40 = vrot.slane %v2381_v46, 5 }
 0x191   : > { %13324 = vst [vmem:[#allocation93_spill] sm:$0xff] %v10768_v5  ;;  %v10770_v23 = vpop.f32.mrf.mxu1  ;;  %v9454_v5 = vld [vmem:[%s13185_s1 + $0x230] sm:$0xff]  ;;  %v2368_v48 = vor.u32 %v2367_v59, %v2364_v33  ;;  %v2391_v59 = vshll.u32 %v279_v51, 16 }
 0x192   : > { %13325 = vst [vmem:[#allocation94_spill] sm:$0xff] %v10770_v23  ;;  %7336 = vmatpush.bf16.msra.mxu0 %v9454_v5  ;;  %v10791_v23 = vpack.c.b16 %v3585_v35, %v3584_v60  ;;  %v2378_v5 = vor.u32 %v2377_v42, %v2373_v19  ;;  %v2385_v42 = vshrl.u32 %v278_v39, 16 }
 0x193   : > { %v10776_v11 = vpop.f32.mrf.mxu0  ;;  %v2369_v10 = vrot.slane %v2368_v48, 4  ;;  %v2395_v48 = vshrl.u32 %v279_v51, 16  ;;  %v9888_v51 = vld [vmem:[%s10212_s13 + $0x50] sm:$0xff] }
 0x194   : > { %v2379_v43 = vrot.slane %v2378_v5, 4 }
 0x197   : > { %v10784_v28 = vpop.f32.mrf.mxu2 }
 0x198   : > { %13326 = vst [vmem:[#allocation95_spill] sm:$0xff] %v10784_v28  ;;  %v10787_v0 = vpop.f32.mrf.mxu3  ;;  %v280_v28 = vld [vmem:[%s10212_s13 + $0x74] sm:$0x1] }
 0x199   : > { %13327 = vst [vmem:[#allocation96_spill] sm:$0xff] %v10787_v0  ;;  %v10789_v49 = vpop.f32.mrf.mxu1  ;;  %v2387_v0 = vrot.slane %v2385_v42, 4  ;;  %v2401_v63 = vshll.u32 %v280_v28, 16 }
 0x19a   : > { %13328 = vst [vmem:[#allocation97_spill] sm:$0xff] %v10789_v49 }
 0x19b   : > { %v10793_v25 = vpop.f32.mrf.mxu0 }
 0x19c   : > { %1318 = vmatmul.bf16.gmra.mxu1 %v10301_v47  ;;  %1724 = vmatmul.bf16.gmra.mxu2 %v10371_v17  ;;  %v2374_v47 = vsel %vm10547_vm2, %v2369_v10, %v2373_v19  ;;  %v2384_v17 = vsel %vm10547_vm2, %v2379_v43, %v2383_v40  ;;  %v2388_v19 = vor.u32 %v2387_v0, %v2383_v40 }
 0x19d   : > { %3913 = vmatmul.bf16.gmra.mxu3 %v10722_v24  ;;  %v3586_v5 = vunpack.c.l.b16 %v2374_v47  ;;  %v3587_v46 = vunpack.c.l.b16 %v2384_v17  ;;  %v2393_v24 = vrot.slane %v2391_v59, 5  ;;  %v2403_v59 = vrot.slane %v2401_v63, 5 }
 0x19e   : > { %4487 = vmatmul.bf16.gmra.mxu0 %v10791_v23  ;;  %v2389_v42 = vrot.slane %v2388_v19, 4 }
 0x19f   : > { %v10799_v2 = vpop.f32.mrf.mxu2  ;;  %v10817_v49 = vpack.c.b16 %v3587_v46, %v3586_v5  ;;  %v282_v46 = vld [vmem:[%s10212_s13 + $0x7c] sm:$0xf] }
 0x1a0   : > { %13329 = vst [vmem:[#allocation98_spill] sm:$0xff] %v10799_v2  ;;  %v10802_v60 = vpop.f32.mrf.mxu3  ;;  %v2397_v2 = vrot.slane %v2395_v48, 4  ;;  %v281_v48 = vld [vmem:[%s10212_s13 + $0x78] sm:$0xf]  ;;  %v2394_v28 = vsel %vm10547_vm2, %v2389_v42, %v2393_v24 }
 0x1a1   : > { %13330 = vst [vmem:[#allocation99_spill] sm:$0xff] %v10802_v60  ;;  %v10804_v35 = vpop.f32.mrf.mxu1 }
 0x1a2   : > { %13331 = vst [vmem:[#allocation100_spill] sm:$0xff] %v10804_v35  ;;  %v2398_v43 = vor.u32 %v2397_v2, %v2393_v24 }
 0x1a3   : > { %v10806_v33 = vpop.f32.mrf.mxu0 }
 0x1a4   : > { %v2399_v17 = vrot.slane %v2398_v43, 4  ;;  %v3588_v43 = vunpack.c.l.b16 %v2394_v28  ;;  %v9889_v28 = vld [vmem:[%s10212_s13 + $0x58] sm:$0xff] }
 0x1a6   : > { %v2404_v19 = vsel %vm10547_vm2, %v2399_v17, %v2403_v59 }
 0x1a7   : > { %v10812_v60 = vpop.f32.mrf.mxu2 }
 0x1a8   : > { %13332 = vst [vmem:[#allocation101_spill] sm:$0xff] %v10812_v60  ;;  %v10815_v39 = vpop.f32.mrf.mxu3  ;;  %v3589_v60 = vunpack.c.l.b16 %v2404_v19 }
 0x1a9   : > { %13333 = vst [vmem:[#allocation102_spill] sm:$0xff] %v10815_v39  ;;  %v1284_v35 = vpop.f32.mrf.mxu1 }
 0x1aa   : > { %v1285_v47 = vadd.f32 %v1284_v35, %v10338_v1  ;;  %v2415_v1 = vshll.u32 %v282_v46, 16  ;;  %v2419_v35 = vshrl.u32 %v282_v46, 16  ;;  %v10834_v7 = vpack.c.b16 %v3589_v60, %v3588_v43 }
 0x1ab   : > { %v4453_v10 = vpop.f32.mrf.mxu0 }
 0x1ac   : > { %1323 = vmatmul.bf16.gmra.mxu1 %v9888_v51  ;;  %1729 = vmatmul.bf16.gmra.mxu2 %v10394_v31  ;;  %v2406_v51 = vshrl.u32 %v281_v48, 16  ;;  %v2409_v31 = vshll.u32 %v281_v48, 16  ;;  %v2417_v24 = vrot.slane %v2415_v1, 5  ;;  %v2421_v42 = vrot.slane %v2419_v35, 4  ;;  %v283_v48 = vld [vmem:[%s10212_s13 + $0x80] sm:$0xf] }
 0x1ad   : > { %3918 = vmatmul.bf16.gmra.mxu3 %v10750_v34  ;;  %v2425_v46 = vshll.u32 %v283_v48, 16 }
 0x1ae   : > { %4492 = vmatmul.bf16.gmra.mxu0 %v10817_v49  ;;  %v2422_v59 = vor.u32 %v2421_v42, %v2417_v24 }
 0x1af   : > { %v1690_v5 = vpop.f32.mrf.mxu2 }
 0x1b0   : > { %v2010_v0 = vadd.f32 %v1690_v5, %v1285_v47  ;;  %v3879_v40 = vpop.f32.mrf.mxu3  ;;  %v2408_v47 = vrot.slane %v2406_v51, 4  ;;  %v2411_v5 = vrot.slane %v2409_v31, 5  ;;  %v2423_v60 = vrot.slane %v2422_v59, 4  ;;  %v284_v31 = vld [vmem:[%s10212_s13 + $0x84] sm:$0xf] }
 0x1b1   : > { %v1286_v2 = vpop.f32.mrf.mxu1  ;;  %v2435_v42 = vshll.u32 %v284_v31, 16 }
 0x1b2   : > { %v4199_v39 = vadd.f32 %v3879_v40, %v2010_v0  ;;  %v1287_v29 = vadd.f32 %v1286_v2, %v10356_v8  ;;  %v2412_v17 = vor.u32 %v2411_v5, %v2408_v47  ;;  %v2427_v2 = vrot.slane %v2425_v46, 5 }
 0x1b3   : > { %v4455_v34 = vpop.f32.mrf.mxu0  ;;  %v2437_v59 = vrot.slane %v2435_v42, 5 }
 0x1b4   : > { %v10830_v63 = vadd.f32 %v4453_v10, %v4199_v39  ;;  %v2428_v5 = vsel %vm10547_vm2, %v2423_v60, %v2427_v2 }
 0x1b7   : > { %v1692_v21 = vpop.f32.mrf.mxu2 }
 0x1b8   : > { %v2011_v0 = vadd.f32 %v1692_v21, %v1287_v29  ;;  %v3881_v40 = vpop.f32.mrf.mxu3  ;;  %v2413_v21 = vrot.slane %v2412_v17, 4 }
 0x1b9   : > { %v1289_v15 = vpop.f32.mrf.mxu1 }
 0x1ba   : > { %v4200_v39 = vadd.f32 %v3881_v40, %v2011_v0  ;;  %v1290_v29 = vadd.f32 %v1289_v15, %v10373_v18  ;;  %v2439_v0 = vshrl.u32 %v284_v31, 16  ;;  %v3591_v40 = vunpack.c.l.b16 %v2428_v5  ;;  %v286_v5 = vld [vmem:[%s10212_s13 + $0x8c] sm:$0xf] }
 0x1bb   : > { %v4458_v10 = vpop.f32.mrf.mxu0 }
 0x1bc   : > { %1328 = vmatmul.bf16.gmra.mxu1 %v9889_v28  ;;  %1734 = vmatmul.bf16.gmra.mxu2 %v10429_v50  ;;  %v10838_v8 = vadd.f32 %v4455_v34, %v4200_v39  ;;  %v2418_v50 = vsel %vm10547_vm2, %v2413_v21, %v2417_v24  ;;  %v2429_v34 = vshrl.u32 %v283_v48, 16  ;;  %v2441_v46 = vrot.slane %v2439_v0, 4  ;;  %v285_v24 = vld [vmem:[%s10212_s13 + $0x88] sm:$0x1]  ;;  %v287_v0 = vld [vmem:[%s10212_s13 + $0x90] sm:$0xf] }
 0x1bd   : > { %3923 = vmatmul.bf16.gmra.mxu3 %v10791_v23  ;;  %v3590_v18 = vunpack.c.l.b16 %v2418_v50  ;;  %v9890_v50 = vld [vmem:[%s10212_s13 + $0x64] sm:$0xff] }
 0x1be   : > { %4497 = vmatmul.bf16.gmra.mxu0 %v10834_v7  ;;  %v2431_v17 = vrot.slane %v2429_v34, 4 }
 0x1bf   : > { %v1695_v51 = vpop.f32.mrf.mxu2 }
 0x1c0   : > { %v2012_v19 = vadd.f32 %v1695_v51, %v1290_v29  ;;  %v3884_v1 = vpop.f32.mrf.mxu3  ;;  %v10852_v51 = vpack.c.b16 %v3591_v40, %v3590_v18  ;;  %v2432_v60 = vor.u32 %v2431_v17, %v2427_v2 }
 0x1c1   : > { %v1291_v35 = vpop.f32.mrf.mxu1 }
 0x1c2   : > { %v4201_v43 = vadd.f32 %v3884_v1, %v2012_v19  ;;  %v1292_v39 = vadd.f32 %v1291_v35, %v10382_v22  ;;  %v2442_v19 = vor.u32 %v2441_v46, %v2437_v59  ;;  %v2445_v1 = vshll.u32 %v285_v24, 16 }
 0x1c3   : > { %v4460_v47 = vpop.f32.mrf.mxu0  ;;  %v2433_v35 = vrot.slane %v2432_v60, 4 }
 0x1c4   : > { %v10848_v15 = vadd.f32 %v4458_v10, %v4201_v43  ;;  %v2443_v43 = vrot.slane %v2442_v19, 4  ;;  %v2447_v2 = vrot.slane %v2445_v1, 5 }
 0x1c6   : > { %v2448_v24 = vsel %vm10547_vm2, %v2443_v43, %v2447_v2 }
 0x1c7   : > { %v1697_v28 = vpop.f32.mrf.mxu2  ;;  %v3593_v60 = vunpack.c.l.b16 %v2448_v24 }
 0x1c8   : > { %v2013_v48 = vadd.f32 %v1697_v28, %v1292_v39  ;;  %v3886_v21 = vpop.f32.mrf.mxu3  ;;  %v2453_v39 = vshll.u32 %v286_v5, 16 }
 0x1c9   : > { %v1294_v29 = vpop.f32.mrf.mxu1 }
 0x1ca   : > { %v4202_v31 = vadd.f32 %v3886_v21, %v2013_v48  ;;  %v1295_v34 = vadd.f32 %v1294_v29, %v10396_v32  ;;  %v2459_v32 = vshll.u32 %v287_v0, 16  ;;  %v2463_v48 = vshrl.u32 %v287_v0, 16 }
 0x1cb   : > { %v4463_v10 = vpop.f32.mrf.mxu0  ;;  %v2455_v19 = vrot.slane %v2453_v39, 5  ;;  %v10875_v39 = vld [vmem:[%s10212_s13 + $0x94] sm:$0xff] }
 0x1cc   : > { %1333 = vmatmul.bf16.gmra.mxu1 %v9890_v50  ;;  %1739 = vmatmul.bf16.gmra.mxu2 %v10452_v3  ;;  %v10856_v22 = vadd.f32 %v4460_v47, %v4202_v31  ;;  %v2438_v3 = vsel %vm10547_vm2, %v2433_v35, %v2437_v59  ;;  %v2450_v47 = vshrl.u32 %v286_v5, 16  ;;  %v2461_v59 = vrot.slane %v2459_v32, 5 }
 0x1cd   : > { %3928 = vmatmul.bf16.gmra.mxu3 %v10817_v49  ;;  %v3592_v29 = vunpack.c.l.b16 %v2438_v3  ;;  %v2465_v50 = vrot.slane %v2463_v48, 4 }
 0x1ce   : > { %4502 = vmatmul.bf16.gmra.mxu0 %v10852_v51  ;;  %v2452_v31 = vrot.slane %v2450_v47, 4  ;;  %v9891_v47 = vld [vmem:[%s10212_s13 + $0x6c] sm:$0xff] }
 0x1cf   : > { %v1700_v42 = vpop.f32.mrf.mxu2  ;;  %v10871_v43 = vpack.c.b16 %v3593_v60, %v3592_v29  ;;  %v289_v29 = vld [vmem:[%s10212_s13 + $0x98] sm:$0xf] }
 0x1d0   : > { %v2014_v18 = vadd.f32 %v1700_v42, %v1295_v34  ;;  %v3889_v40 = vpop.f32.mrf.mxu3  ;;  %v288_v34 = vld [vmem:[%s10212_s13 + $0x94] sm:$0xf]  ;;  %v2456_v2 = vor.u32 %v2455_v19, %v2452_v31 }
 0x1d1   : > { %v1296_v17 = vpop.f32.mrf.mxu1  ;;  %v2469_v3 = vshll.u32 %v288_v34, 16 }
 0x1d2   : > { %v4203_v46 = vadd.f32 %v3889_v40, %v2014_v18  ;;  %v1297_v1 = vadd.f32 %v1296_v17, %v10414_v41  ;;  %v2466_v40 = vor.u32 %v2465_v50, %v2461_v59  ;;  %v2457_v17 = vrot.slane %v2456_v2, 4 }
 0x1d3   : > { %v4465_v28 = vpop.f32.mrf.mxu0  ;;  %v2471_v32 = vrot.slane %v2469_v3, 5  ;;  %v2483_v2 = vshrl.u32 %v289_v29, 16 }
 0x1d4   : > { %v10867_v21 = vadd.f32 %v4463_v10, %v4203_v46  ;;  %v2467_v24 = vrot.slane %v2466_v40, 4 }
 0x1d7   : > { %v1702_v35 = vpop.f32.mrf.mxu2 }
 0x1d8   : > { %v2015_v5 = vadd.f32 %v1702_v35, %v1297_v1  ;;  %v3891_v42 = vpop.f32.mrf.mxu3  ;;  %v2462_v1 = vsel %vm10547_vm2, %v2457_v17, %v2461_v59 }
 0x1d9   : > { %v1299_v18 = vpop.f32.mrf.mxu1 }
 0x1da   : > { %v4204_v10 = vadd.f32 %v3891_v42, %v2015_v5  ;;  %v1300_v46 = vadd.f32 %v1299_v18, %v10431_v52  ;;  %v2472_v5 = vsel %vm10547_vm2, %v2467_v24, %v2471_v32  ;;  %v2479_v42 = vshll.u32 %v289_v29, 16 }
 0x1db   : > { %v4468_v0 = vpop.f32.mrf.mxu0  ;;  %v3594_v18 = vunpack.c.l.b16 %v2462_v1 }
 0x1dc   : > { %1338 = vmatmul.bf16.gmra.mxu1 %v9891_v47  ;;  %1744 = vmatmul.bf16.gmra.mxu2 %v10875_v39  ;;  %v10878_v41 = vadd.f32 %v4465_v28, %v4204_v10  ;;  %v2473_v28 = vshrl.u32 %v288_v34, 16  ;;  %v3595_v10 = vunpack.c.l.b16 %v2472_v5  ;;  %v2481_v47 = vrot.slane %v2479_v42, 5  ;;  %v290_v34 = vld [vmem:[%s10212_s13 + $0x9c] sm:$0x1] }
 0x1dd   : > { %3933 = vmatmul.bf16.gmra.mxu3 %v10834_v7 }
 0x1de   : > { %13334 = vst [vmem:[#allocation103_spill] sm:$0xff] %v10878_v41  ;;  %4507 = vmatmul.bf16.gmra.mxu0 %v10871_v43  ;;  %v2475_v40 = vrot.slane %v2473_v28, 4  ;;  %v9893_v28 = vld [vmem:[%s10212_s13 + $0x78] sm:$0xff] }
 0x1df   : > { %v1705_v48 = vpop.f32.mrf.mxu2 }
 0x1e0   : > { %v2016_v60 = vadd.f32 %v1705_v48, %v1300_v46  ;;  %v3894_v31 = vpop.f32.mrf.mxu3  ;;  %v2485_v46 = vrot.slane %v2483_v2, 4  ;;  %v2476_v24 = vor.u32 %v2475_v40, %v2471_v32  ;;  %v292_v40 = vld [vmem:[%s10212_s13 + $0xa4] sm:$0xf] }
 0x1e1   : > { %v1301_v19 = vpop.f32.mrf.mxu1 }
 0x1e2   : > { %v4205_v50 = vadd.f32 %v3894_v31, %v2016_v60  ;;  %v1302_v3 = vadd.f32 %v1301_v19, %v10440_v56  ;;  %v10892_v31 = vpack.c.b16 %v3595_v10, %v3594_v18  ;;  %v2486_v1 = vor.u32 %v2485_v46, %v2481_v47  ;;  %v10896_v56 = vld [vmem:[%s10212_s13 + $0xa0] sm:$0xff] }
 0x1e3   : > { %v4470_v35 = vpop.f32.mrf.mxu0  ;;  %v2477_v5 = vrot.slane %v2476_v24, 4  ;;  %v291_v18 = vld [vmem:[%s10212_s13 + $0xa0] sm:$0xf] }
 0x1e4   : > { %v10888_v52 = vadd.f32 %v4468_v0, %v4205_v50  ;;  %v2489_v50 = vshll.u32 %v290_v34, 16  ;;  %v2487_v42 = vrot.slane %v2486_v1, 4 }
 0x1e5   : > { %v2482_v34 = vsel %vm10547_vm2, %v2477_v5, %v2481_v47 }
 0x1e6   : > { %13335 = vst [vmem:[#allocation104_spill] sm:$0xff] %v10888_v52  ;;  %v2491_v2 = vrot.slane %v2489_v50, 5  ;;  %v3596_v50 = vunpack.c.l.b16 %v2482_v34 }
 0x1e7   : > { %v1707_v59 = vpop.f32.mrf.mxu2 }
 0x1e8   : > { %v2017_v17 = vadd.f32 %v1707_v59, %v1302_v3  ;;  %v3896_v48 = vpop.f32.mrf.mxu3  ;;  %v2492_v24 = vsel %vm10547_vm2, %v2487_v42, %v2491_v2 }
 0x1e9   : > { %v1304_v60 = vpop.f32.mrf.mxu1 }
 0x1ea   : > { %v4206_v0 = vadd.f32 %v3896_v48, %v2017_v17  ;;  %v1305_v32 = vadd.f32 %v1304_v60, %v10454_v6  ;;  %v2497_v17 = vshll.u32 %v291_v18, 16  ;;  %v2503_v6 = vshll.u32 %v292_v40, 16 }
 0x1eb   : > { %v4473_v29 = vpop.f32.mrf.mxu0  ;;  %v2507_v60 = vshrl.u32 %v292_v40, 16 }
 0x1ec   : > { %1343 = vmatmul.bf16.gmra.mxu1 %v9893_v28  ;;  %1749 = vmatmul.bf16.gmra.mxu2 %v10896_v56  ;;  %v10899_v19 = vadd.f32 %v4470_v35, %v4206_v0  ;;  %v2494_v35 = vshrl.u32 %v291_v18, 16  ;;  %v3597_v28 = vunpack.c.l.b16 %v2492_v24  ;;  %v2505_v47 = vrot.slane %v2503_v6, 5 }
 0x1ed   : > { %3938 = vmatmul.bf16.gmra.mxu3 %v10852_v51  ;;  %v2509_v5 = vrot.slane %v2507_v60, 4  ;;  %v294_v60 = vld [vmem:[%s10212_s13 + $0xac] sm:$0xf] }
 0x1ee   : > { %13336 = vst [vmem:[#allocation105_spill] sm:$0xff] %v10899_v19  ;;  %4512 = vmatmul.bf16.gmra.mxu0 %v10892_v31  ;;  %v10914_v42 = vpack.c.b16 %v3597_v28, %v3596_v50 }
 0x1ef   : > { %v1710_v10 = vpop.f32.mrf.mxu2  ;;  %v2510_v34 = vor.u32 %v2509_v5, %v2505_v47 }
 0x1f0   : > { %v2018_v3 = vadd.f32 %v1710_v10, %v1305_v32  ;;  %v3899_v46 = vpop.f32.mrf.mxu3  ;;  %v2496_v32 = vrot.slane %v2494_v35, 4  ;;  %v2499_v10 = vrot.slane %v2497_v17, 5  ;;  %v10918_v17 = vld [vmem:[%s10212_s13 + $0xa8] sm:$0xff] }
 0x1f1   : > { %v1306_v59 = vpop.f32.mrf.mxu1 }
 0x1f2   : > { %v4207_v48 = vadd.f32 %v3899_v46, %v2018_v3  ;;  %v1307_v19 = vadd.f32 %v1306_v59, %v10472_v30  ;;  %v293_v3 = vld [vmem:[%s10212_s13 + $0xa8] sm:$0xf]  ;;  %v2500_v2 = vor.u32 %v2499_v10, %v2496_v32 }
 0x1f3   : > { %v4475_v0 = vpop.f32.mrf.mxu0  ;;  %v2513_v35 = vshll.u32 %v293_v3, 16 }
 0x1f4   : > { %v10910_v1 = vadd.f32 %v4473_v29, %v4207_v48  ;;  %v9895_v48 = vld [vmem:[%s10212_s13 + $0x80] sm:$0xff] }
 0x1f5   : > { %v2515_v24 = vrot.slane %v2513_v35, 5 }
 0x1f6   : > { %13337 = vst [vmem:[#allocation106_spill] sm:$0xff] %v10910_v1 }
 0x1f7   : > { %v1712_v18 = vpop.f32.mrf.mxu2 }
 0x1f8   : > { %v2019_v46 = vadd.f32 %v1712_v18, %v1307_v19  ;;  %v3901_v52 = vpop.f32.mrf.mxu3  ;;  %v2501_v19 = vrot.slane %v2500_v2, 4  ;;  %v2523_v2 = vshll.u32 %v294_v60, 16 }
 0x1f9   : > { %v1309_v41 = vpop.f32.mrf.mxu1 }
 0x1fa   : > { %v4208_v29 = vadd.f32 %v3901_v52, %v2019_v46  ;;  %v1310_v59 = vadd.f32 %v1309_v41, %v10487_v61  ;;  %v2511_v52 = vrot.slane %v2510_v34, 4  ;;  %v2506_v10 = vsel %vm10547_vm2, %v2501_v19, %v2505_v47 }
 0x1fb   : > { %v4478_v40 = vpop.f32.mrf.mxu0  ;;  %v3598_v41 = vunpack.c.l.b16 %v2506_v10 }
 0x1fc   : > { %1348 = vmatmul.bf16.gmra.mxu1 %v9895_v48  ;;  %1754 = vmatmul.bf16.gmra.mxu2 %v10918_v17  ;;  %v10921_v30 = vadd.f32 %v4475_v0, %v4208_v29  ;;  %v2517_v0 = vshrl.u32 %v293_v3, 16  ;;  %v2516_v46 = vsel %vm10547_vm2, %v2511_v52, %v2515_v24  ;;  %v2527_v29 = vshrl.u32 %v294_v60, 16  ;;  %v295_v3 = vld [vmem:[%s10212_s13 + $0xb0] sm:$0x1] }
 0x1fd   : > { %3943 = vmatmul.bf16.gmra.mxu3 %v10871_v43  ;;  %v3599_v34 = vunpack.c.l.b16 %v2516_v46  ;;  %v9897_v46 = vld [vmem:[%s10212_s13 + $0x8c] sm:$0xff] }
 0x1fe   : > { %13338 = vst [vmem:[#allocation107_spill] sm:$0xff] %v10921_v30  ;;  %4517 = vmatmul.bf16.gmra.mxu0 %v10914_v42  ;;  %v2519_v35 = vrot.slane %v2517_v0, 4 }
 0x1ff   : > { %v1715_v6 = vpop.f32.mrf.mxu2  ;;  %v10935_v30 = vpack.c.b16 %v3599_v34, %v3598_v41 }
 0x200   : > { %v2020_v50 = vadd.f32 %v1715_v6, %v1310_v59  ;;  %v3904_v28 = vpop.f32.mrf.mxu3  ;;  %v2525_v59 = vrot.slane %v2523_v2, 5  ;;  %v2529_v6 = vrot.slane %v2527_v29, 4  ;;  %v2520_v52 = vor.u32 %v2519_v35, %v2515_v24  ;;  %v9437_v24 = vld [vmem:[%s13185_s1 + $0xa8] sm:$0xff]  ;;  %v296_v35 = vld [vmem:[%s10212_s13 + $0xb4] sm:$0xf] }
 0x201   : > { %v1311_v32 = vpop.f32.mrf.mxu1  ;;  %v9445_v2 = vld [vmem:[%s13185_s1 + $0x168] sm:$0xff]  ;;  %6249 = vmatpush.bf16.msra.mxu2 %v9437_v24 }
 0x202   : > { %v4209_v5 = vadd.f32 %v3904_v28, %v2020_v50  ;;  %v1312_v48 = vadd.f32 %v1311_v32, %v10495_v26  ;;  %v2530_v10 = vor.u32 %v2529_v6, %v2525_v59  ;;  %v10939_v26 = vld [vmem:[%s10212_s13 + $0xb4] sm:$0xff]  ;;  %v2521_v0 = vrot.slane %v2520_v52, 4  ;;  %6793 = vmatpush.bf16.msra.mxu3 %v9445_v2  ;;  %v9453_v24 = vld [vmem:[%s13185_s1 + $0x228] sm:$0xff] }
 0x203   : > { %v4480_v18 = vpop.f32.mrf.mxu0  ;;  %v2541_v52 = vshll.u32 %v296_v35, 16  ;;  %7337 = vmatpush.bf16.msra.mxu0 %v9453_v24  ;;  %v299_v24 = vld [vmem:[%s10212_s13 + $0xc0] sm:$0xf] }
 0x204   : > { %v10931_v61 = vadd.f32 %v4478_v40, %v4209_v5  ;;  %v2533_v5 = vshll.u32 %v295_v3, 16  ;;  %v2531_v41 = vrot.slane %v2530_v10, 4 }
 0x206   : > { %13339 = vst [vmem:[#allocation108_spill] sm:$0xff] %v10931_v61  ;;  %v2535_v34 = vrot.slane %v2533_v5, 5  ;;  %v9429_v5 = vld [vmem:[%s13185_s1 + $0x1e8] sm:$0xff] }
 0x207   : > { %v1717_v47 = vpop.f32.mrf.mxu2  ;;  %5020 = vmatpush.bf16.msra.mxu1 %v9429_v5 }
 0x208   : > { %v2021_v19 = vadd.f32 %v1717_v47, %v1312_v48  ;;  %v3906_v50 = vpop.f32.mrf.mxu3  ;;  %v297_v48 = vld [vmem:[%s10212_s13 + $0xb8] sm:$0xf] }
 0x209   : > { %v1314_v28 = vpop.f32.mrf.mxu1  ;;  %v2551_v10 = vshrl.u32 %v297_v48, 16 }
 0x20a   : > { %v4210_v60 = vadd.f32 %v3906_v50, %v2021_v19  ;;  %v1315_v29 = vadd.f32 %v1314_v28, %v10507_v58  ;;  %v2526_v19 = vsel %vm10547_vm2, %v2521_v0, %v2525_v59  ;;  %v2538_v50 = vshrl.u32 %v296_v35, 16 }
 0x20b   : > { %v4483_v40 = vpop.f32.mrf.mxu0  ;;  %v2536_v58 = vsel %vm10547_vm2, %v2531_v41, %v2535_v34  ;;  %v2547_v28 = vshll.u32 %v297_v48, 16  ;;  %v3600_v0 = vunpack.c.l.b16 %v2526_v19  ;;  %v2543_v35 = vrot.slane %v2541_v52, 5 }
 0x20c   : > { %1353 = vmatmul.bf16.gmra.mxu1 %v9897_v46  ;;  %1759 = vmatmul.bf16.gmra.mxu2 %v10939_v26  ;;  %v10942_v32 = vadd.f32 %v4480_v18, %v4210_v60  ;;  %v3601_v2 = vunpack.c.l.b16 %v2536_v58 }
 0x20d   : > { %3948 = vmatmul.bf16.gmra.mxu3 %v10892_v31  ;;  %v2549_v34 = vrot.slane %v2547_v28, 5 }
 0x20e   : > { %13340 = vst [vmem:[#allocation109_spill] sm:$0xff] %v10942_v32  ;;  %4522 = vmatmul.bf16.gmra.mxu0 %v10935_v30  ;;  %v10969_v1 = vpack.c.b16 %v3601_v2, %v3600_v0 }
 0x20f   : > { %v1720_v18 = vpop.f32.mrf.mxu2 }
 0x210   : > { %v2022_v6 = vadd.f32 %v1720_v18, %v1315_v29  ;;  %v3909_v47 = vpop.f32.mrf.mxu3  ;;  %v2540_v29 = vrot.slane %v2538_v50, 4  ;;  %v2553_v18 = vrot.slane %v2551_v10, 4  ;;  %v10973_v50 = vld [vmem:[%s10212_s13 + $0xbc] sm:$0xff] }
 0x211   : > { %v1316_v3 = vpop.f32.mrf.mxu1 }
 0x212   : > { %v4211_v60 = vadd.f32 %v3909_v47, %v2022_v6  ;;  %v1317_v41 = vadd.f32 %v1316_v3, %v10528_v14  ;;  %v298_v6 = vld [vmem:[%s10212_s13 + $0xbc] sm:$0xf]  ;;  %v2544_v5 = vor.u32 %v2543_v35, %v2540_v29  ;;  %v2554_v19 = vor.u32 %v2553_v18, %v2549_v34 }
 0x213   : > { %v4485_v46 = vpop.f32.mrf.mxu0  ;;  %v2557_v58 = vshll.u32 %v298_v6, 16 }
 0x214   : > { %v10965_v59 = vadd.f32 %v4483_v40, %v4211_v60  ;;  %v2545_v3 = vrot.slane %v2544_v5, 4  ;;  %v2555_v28 = vrot.slane %v2554_v19, 4 }
 0x216   : > { %v2550_v29 = vsel %vm10547_vm2, %v2545_v3, %v2549_v34  ;;  %v300_v34 = vld [vmem:[%s10212_s13 + $0xc4] sm:$0x1] }
 0x217   : > { %v1722_v48 = vpop.f32.mrf.mxu2 }
 0x218   : > { %v2023_v47 = vadd.f32 %v1722_v48, %v1317_v41  ;;  %v3911_v32 = vpop.f32.mrf.mxu3  ;;  %v2567_v48 = vshll.u32 %v299_v24, 16 }
 0x219   : > { %v1319_v61 = vpop.f32.mrf.mxu1 }
 0x21a   : > { %v4212_v40 = vadd.f32 %v3911_v32, %v2023_v47  ;;  %v1320_v52 = vadd.f32 %v1319_v61, %v10545_v12  ;;  %v2559_v32 = vrot.slane %v2557_v58, 5  ;;  %v2571_v47 = vshrl.u32 %v299_v24, 16 }
 0x21b   : > { %v4488_v60 = vpop.f32.mrf.mxu0  ;;  %v3602_v61 = vunpack.c.l.b16 %v2550_v29  ;;  %v2569_v58 = vrot.slane %v2567_v48, 5 }
 0x21c   : > { %1358 = vmatmul.bf16.gmra.mxu1 %v10875_v39  ;;  %1764 = vmatmul.bf16.gmra.mxu2 %v10973_v50  ;;  %v10976_v14 = vadd.f32 %v4485_v46, %v4212_v40  ;;  %v2561_v46 = vshrl.u32 %v298_v6, 16  ;;  %v2560_v18 = vsel %vm10547_vm2, %v2555_v28, %v2559_v32 }
 0x21d   : > { %3953 = vmatmul.bf16.gmra.mxu3 %v10914_v42  ;;  %v3603_v5 = vunpack.c.l.b16 %v2560_v18 }
 0x21e   : > { %13341 = vst [vmem:[#allocation110_spill] sm:$0xff] %v10976_v14  ;;  %4527 = vmatmul.bf16.gmra.mxu0 %v10969_v1  ;;  %v2563_v40 = vrot.slane %v2561_v46, 4  ;;  %v10994_v46 = vld [vmem:[%s10212_s13 + $0xc8] sm:$0xff] }
 0x21f   : > { %v1725_v10 = vpop.f32.mrf.mxu2 }
 0x220   : > { %v2024_v0 = vadd.f32 %v1725_v10, %v1320_v52  ;;  %v3914_v2 = vpop.f32.mrf.mxu3  ;;  %v2573_v52 = vrot.slane %v2571_v47, 4  ;;  %v2564_v28 = vor.u32 %v2563_v40, %v2559_v32  ;;  %v301_v47 = vld [vmem:[%s10212_s13 + $0xc8] sm:$0xf] }
 0x221   : > { %v1321_v39 = vpop.f32.mrf.mxu1 }
 0x222   : > { %v4213_v35 = vadd.f32 %v3914_v2, %v2024_v0  ;;  %v1322_v19 = vadd.f32 %v1321_v39, %v10565_v54  ;;  %v10990_v2 = vpack.c.b16 %v3603_v5, %v3602_v61  ;;  %v2574_v29 = vor.u32 %v2573_v52, %v2569_v58  ;;  %v302_v5 = vld [vmem:[%s10212_s13 + $0xcc] sm:$0xf] }
 0x223   : > { %v4490_v41 = vpop.f32.mrf.mxu0  ;;  %v2565_v39 = vrot.slane %v2564_v28, 4 }
 0x224   : > { %v10986_v12 = vadd.f32 %v4488_v60, %v4213_v35  ;;  %v2577_v35 = vshll.u32 %v300_v34, 16  ;;  %v2575_v18 = vrot.slane %v2574_v29, 4 }
 0x225   : > { %v2570_v52 = vsel %vm10547_vm2, %v2565_v39, %v2569_v58 }
 0x226   : > { %13342 = vst [vmem:[#allocation111_spill] sm:$0xff] %v10986_v12  ;;  %v2579_v48 = vrot.slane %v2577_v35, 5 }
 0x227   : > { %v1727_v10 = vpop.f32.mrf.mxu2 }
 0x228   : > { %v2025_v6 = vadd.f32 %v1727_v10, %v1322_v19  ;;  %v3916_v3 = vpop.f32.mrf.mxu3  ;;  %v2585_v10 = vshll.u32 %v301_v47, 16 }
 0x229   : > { %v1324_v0 = vpop.f32.mrf.mxu1 }
 0x22a   : > { %v4214_v24 = vadd.f32 %v3916_v3, %v2025_v6  ;;  %v1325_v32 = vadd.f32 %v1324_v0, %v10580_v45  ;;  %v2580_v3 = vsel %vm10547_vm2, %v2575_v18, %v2579_v48  ;;  %v2591_v45 = vshll.u32 %v302_v5, 16 }
 0x22b   : > { %v4493_v60 = vpop.f32.mrf.mxu0  ;;  %v2595_v0 = vshrl.u32 %v302_v5, 16  ;;  %v3605_v29 = vunpack.c.l.b16 %v2580_v3 }
 0x22c   : > { %1363 = vmatmul.bf16.gmra.mxu1 %v10896_v56  ;;  %1769 = vmatmul.bf16.gmra.mxu2 %v10994_v46  ;;  %v10997_v54 = vadd.f32 %v4490_v41, %v4214_v24  ;;  %v2582_v41 = vshrl.u32 %v301_v47, 16  ;;  %v3604_v24 = vunpack.c.l.b16 %v2570_v52  ;;  %v2593_v58 = vrot.slane %v2591_v45, 5  ;;  %v303_v47 = vld [vmem:[%s10212_s13 + $0xd0] sm:$0xf]  ;;  %v304_v45 = vld [vmem:[%s10212_s13 + $0xd4] sm:$0xf] }
 0x22d   : > { %3958 = vmatmul.bf16.gmra.mxu3 %v10935_v30  ;;  %v2597_v39 = vrot.slane %v2595_v0, 4  ;;  %v2601_v52 = vshll.u32 %v303_v47, 16 }
 0x22e   : > { %13343 = vst [vmem:[#allocation112_spill] sm:$0xff] %v10997_v54  ;;  %4532 = vmatmul.bf16.gmra.mxu0 %v10990_v2  ;;  %v2584_v35 = vrot.slane %v2582_v41, 4  ;;  %v11012_v14 = vpack.c.b16 %v3605_v29, %v3604_v24  ;;  %v11016_v41 = vld [vmem:[%s10212_s13 + $0xd0] sm:$0xff] }
 0x22f   : > { %v1730_v61 = vpop.f32.mrf.mxu2  ;;  %v2598_v5 = vor.u32 %v2597_v39, %v2593_v58  ;;  %v2611_v39 = vshll.u32 %v304_v45, 16 }
 0x230   : > { %v2026_v40 = vadd.f32 %v1730_v61, %v1325_v32  ;;  %v3919_v56 = vpop.f32.mrf.mxu3  ;;  %v2587_v32 = vrot.slane %v2585_v10, 5 }
 0x231   : > { %v1326_v19 = vpop.f32.mrf.mxu1  ;;  %v2599_v10 = vrot.slane %v2598_v5, 4  ;;  %v2613_v5 = vrot.slane %v2611_v39, 5  ;;  %v306_v39 = vld [vmem:[%s10212_s13 + $0xdc] sm:$0xf] }
 0x232   : > { %v4215_v34 = vadd.f32 %v3919_v56, %v2026_v40  ;;  %v1327_v61 = vadd.f32 %v1326_v19, %v10596_v37  ;;  %v2588_v18 = vor.u32 %v2587_v32, %v2584_v35 }
 0x233   : > { %v4495_v6 = vpop.f32.mrf.mxu0 }
 0x234   : > { %v11008_v28 = vadd.f32 %v4493_v60, %v4215_v34  ;;  %v2603_v34 = vrot.slane %v2601_v52, 5 }
 0x237   : > { %v1732_v54 = vpop.f32.mrf.mxu2 }
 0x238   : > { %v2027_v40 = vadd.f32 %v1732_v54, %v1327_v61  ;;  %v3921_v56 = vpop.f32.mrf.mxu3  ;;  %v2589_v54 = vrot.slane %v2588_v18, 4  ;;  %v2604_v61 = vsel %vm10547_vm2, %v2599_v10, %v2603_v34 }
 0x239   : > { %v1329_v12 = vpop.f32.mrf.mxu1 }
 0x23a   : > { %v4216_v60 = vadd.f32 %v3921_v56, %v2027_v40  ;;  %v1330_v19 = vadd.f32 %v1329_v12, %v10612_v38  ;;  %v2594_v29 = vsel %vm10547_vm2, %v2589_v54, %v2593_v58  ;;  %v2615_v40 = vshrl.u32 %v304_v45, 16  ;;  %v305_v58 = vld [vmem:[%s10212_s13 + $0xd8] sm:$0x1] }
 0x23b   : > { %v4498_v48 = vpop.f32.mrf.mxu0  ;;  %v3606_v12 = vunpack.c.l.b16 %v2594_v29  ;;  %v3607_v56 = vunpack.c.l.b16 %v2604_v61  ;;  %v2621_v29 = vshll.u32 %v305_v58, 16 }
 0x23c   : > { %1368 = vmatmul.bf16.gmra.mxu1 %v10918_v17  ;;  %1774 = vmatmul.bf16.gmra.mxu2 %v11016_v41  ;;  %v11019_v37 = vadd.f32 %v4495_v6, %v4216_v60  ;;  %v2605_v6 = vshrl.u32 %v303_v47, 16  ;;  %v2617_v52 = vrot.slane %v2615_v40, 4 }
 0x23d   : > { %3963 = vmatmul.bf16.gmra.mxu3 %v10969_v1  ;;  %v2623_v61 = vrot.slane %v2621_v29, 5 }
 0x23e   : > { %4537 = vmatmul.bf16.gmra.mxu0 %v11012_v14  ;;  %v2607_v18 = vrot.slane %v2605_v6, 4  ;;  %v11037_v6 = vld [vmem:[%s10212_s13 + $0xdc] sm:$0xff] }
 0x23f   : > { %v1735_v3 = vpop.f32.mrf.mxu2 }
 0x240   : > { %v2028_v0 = vadd.f32 %v1735_v3, %v1330_v19  ;;  %v3924_v24 = vpop.f32.mrf.mxu3  ;;  %v2608_v10 = vor.u32 %v2607_v18, %v2603_v34 }
 0x241   : > { %v1331_v17 = vpop.f32.mrf.mxu1 }
 0x242   : > { %v4217_v35 = vadd.f32 %v3924_v24, %v2028_v0  ;;  %v1332_v60 = vadd.f32 %v1331_v17, %v10625_v55  ;;  %v11033_v0 = vpack.c.b16 %v3607_v56, %v3606_v12  ;;  %v2618_v24 = vor.u32 %v2617_v52, %v2613_v5  ;;  %v307_v12 = vld [vmem:[%s10212_s13 + $0xe0] sm:$0xf] }
 0x243   : > { %v4500_v32 = vpop.f32.mrf.mxu0  ;;  %v2609_v17 = vrot.slane %v2608_v10, 4  ;;  %v2629_v52 = vshll.u32 %v306_v39, 16 }
 0x244   : > { %v11029_v38 = vadd.f32 %v4498_v48, %v4217_v35  ;;  %v2619_v35 = vrot.slane %v2618_v24, 4 }
 0x245   : > { %v2631_v29 = vrot.slane %v2629_v52, 5 }
 0x246   : > { %13344 = vst [vmem:[#allocation113_spill] sm:$0xff] %v11029_v38 }
 0x247   : > { %v1737_v19 = vpop.f32.mrf.mxu2 }
 0x248   : > { %v2029_v47 = vadd.f32 %v1737_v19, %v1332_v60  ;;  %v3926_v54 = vpop.f32.mrf.mxu3  ;;  %v2614_v60 = vsel %vm10547_vm2, %v2609_v17, %v2613_v5 }
 0x249   : > { %v1334_v3 = vpop.f32.mrf.mxu1  ;;  %v3608_v10 = vunpack.c.l.b16 %v2614_v60 }
 0x24a   : > { %v4218_v45 = vadd.f32 %v3926_v54, %v2029_v47  ;;  %v1335_v34 = vadd.f32 %v1334_v3, %v10638_v9  ;;  %v2624_v47 = vsel %vm10547_vm2, %v2619_v35, %v2623_v61  ;;  %v2635_v9 = vshll.u32 %v307_v12, 16 }
 0x24b   : > { %v4503_v48 = vpop.f32.mrf.mxu0  ;;  %v2639_v54 = vshrl.u32 %v307_v12, 16 }
 0x24c   : > { %1373 = vmatmul.bf16.gmra.mxu1 %v10939_v26  ;;  %1779 = vmatmul.bf16.gmra.mxu2 %v11037_v6  ;;  %v11040_v55 = vadd.f32 %v4500_v32, %v4218_v45  ;;  %v2626_v32 = vshrl.u32 %v306_v39, 16  ;;  %v3609_v45 = vunpack.c.l.b16 %v2624_v47  ;;  %v2637_v5 = vrot.slane %v2635_v9, 5  ;;  %v308_v39 = vld [vmem:[%s10212_s13 + $0xe4] sm:$0xf] }
 0x24d   : > { %3968 = vmatmul.bf16.gmra.mxu3 %v10990_v2  ;;  %v2641_v17 = vrot.slane %v2639_v54, 4  ;;  %v2645_v60 = vshll.u32 %v308_v39, 16  ;;  %v309_v54 = vld [vmem:[%s10212_s13 + $0xe8] sm:$0xf] }
 0x24e   : > { %13345 = vst [vmem:[#allocation114_spill] sm:$0xff] %v11040_v55  ;;  %4542 = vmatmul.bf16.gmra.mxu0 %v11033_v0  ;;  %v2628_v24 = vrot.slane %v2626_v32, 4  ;;  %v11055_v38 = vpack.c.b16 %v3609_v45, %v3608_v10  ;;  %v11059_v32 = vld [vmem:[%s10212_s13 + $0xe4] sm:$0xff] }
 0x24f   : > { %v1740_v40 = vpop.f32.mrf.mxu2  ;;  %v2642_v12 = vor.u32 %v2641_v17, %v2637_v5  ;;  %v2647_v47 = vrot.slane %v2645_v60, 5 }
 0x250   : > { %v2030_v56 = vadd.f32 %v1740_v40, %v1335_v34  ;;  %v3929_v26 = vpop.f32.mrf.mxu3  ;;  %v2632_v35 = vor.u32 %v2631_v29, %v2628_v24 }
 0x251   : > { %v1336_v18 = vpop.f32.mrf.mxu1 }
 0x252   : > { %v4219_v19 = vadd.f32 %v3929_v26, %v2030_v56  ;;  %v1337_v34 = vadd.f32 %v1336_v18, %v10652_v16  ;;  %v2633_v18 = vrot.slane %v2632_v35, 4 }
 0x253   : > { %v4505_v58 = vpop.f32.mrf.mxu0 }
 0x254   : > { %v11051_v3 = vadd.f32 %v4503_v48, %v4219_v19  ;;  %v2643_v19 = vrot.slane %v2642_v12, 4  ;;  %v2638_v24 = vsel %vm10547_vm2, %v2633_v18, %v2637_v5  ;;  %v310_v5 = vld [vmem:[%s10212_s13 + $0xec] sm:$0x1] }
 0x256   : > { %v2648_v17 = vsel %vm10547_vm2, %v2643_v19, %v2647_v47 }
 0x257   : > { %v1742_v40 = vpop.f32.mrf.mxu2 }
 0x258   : > { %v2031_v56 = vadd.f32 %v1742_v40, %v1337_v34  ;;  %v3931_v26 = vpop.f32.mrf.mxu3  ;;  %v2655_v40 = vshll.u32 %v309_v54, 16 }
 0x259   : > { %v1339_v55 = vpop.f32.mrf.mxu1 }
 0x25a   : > { %v4220_v48 = vadd.f32 %v3931_v26, %v2031_v56  ;;  %v1340_v52 = vadd.f32 %v1339_v55, %v10667_v36  ;;  %v2659_v56 = vshrl.u32 %v309_v54, 16  ;;  %v3610_v55 = vunpack.c.l.b16 %v2638_v24 }
 0x25b   : > { %v4508_v61 = vpop.f32.mrf.mxu0  ;;  %v3611_v26 = vunpack.c.l.b16 %v2648_v17  ;;  %v2657_v12 = vrot.slane %v2655_v40, 5  ;;  %v2665_v24 = vshll.u32 %v310_v5, 16  ;;  %v311_v40 = vld [vmem:[%s10212_s13 + $0xf0] sm:$0xf] }
 0x25c   : > { %1378 = vmatmul.bf16.gmra.mxu1 %v10973_v50  ;;  %1784 = vmatmul.bf16.gmra.mxu2 %v11059_v32  ;;  %v11062_v16 = vadd.f32 %v4505_v58, %v4220_v48  ;;  %v2649_v58 = vshrl.u32 %v308_v39, 16  ;;  %v2661_v60 = vrot.slane %v2659_v56, 4 }
 0x25d   : > { %3973 = vmatmul.bf16.gmra.mxu3 %v11012_v14  ;;  %v2667_v17 = vrot.slane %v2665_v24, 5 }
 0x25e   : > { %4547 = vmatmul.bf16.gmra.mxu0 %v11055_v38  ;;  %v2651_v35 = vrot.slane %v2649_v58, 4  ;;  %v11080_v58 = vld [vmem:[%s10212_s13 + $0xf0] sm:$0xff] }
 0x25f   : > { %v1745_v9 = vpop.f32.mrf.mxu2 }
 0x260   : > { %v2032_v10 = vadd.f32 %v1745_v9, %v1340_v52  ;;  %v3934_v45 = vpop.f32.mrf.mxu3  ;;  %v2652_v19 = vor.u32 %v2651_v35, %v2647_v47 }
 0x261   : > { %v1341_v50 = vpop.f32.mrf.mxu1 }
 0x262   : > { %v4221_v29 = vadd.f32 %v3934_v45, %v2032_v10  ;;  %v1342_v48 = vadd.f32 %v1341_v50, %v10682_v20  ;;  %v11076_v10 = vpack.c.b16 %v3611_v26, %v3610_v55  ;;  %v2662_v45 = vor.u32 %v2661_v60, %v2657_v12  ;;  %v312_v55 = vld [vmem:[%s10212_s13 + $0xf4] sm:$0xf] }
 0x263   : > { %v4510_v34 = vpop.f32.mrf.mxu0  ;;  %v2653_v50 = vrot.slane %v2652_v19, 4  ;;  %v2673_v60 = vshll.u32 %v311_v40, 16 }
 0x264   : > { %v11072_v36 = vadd.f32 %v4508_v61, %v4221_v29  ;;  %v2663_v29 = vrot.slane %v2662_v45, 4 }
 0x265   : > { %v2675_v24 = vrot.slane %v2673_v60, 5 }
 0x266   : > { %13346 = vst [vmem:[#allocation115_spill] sm:$0xff] %v11072_v36 }
 0x267   : > { %v1747_v52 = vpop.f32.mrf.mxu2 }
 0x268   : > { %v2033_v39 = vadd.f32 %v1747_v52, %v1342_v48  ;;  %v3936_v18 = vpop.f32.mrf.mxu3  ;;  %v2658_v48 = vsel %vm10547_vm2, %v2653_v50, %v2657_v12 }
 0x269   : > { %v1344_v9 = vpop.f32.mrf.mxu1  ;;  %v3612_v19 = vunpack.c.l.b16 %v2658_v48 }
 0x26a   : > { %v4222_v54 = vadd.f32 %v3936_v18, %v2033_v39  ;;  %v1345_v47 = vadd.f32 %v1344_v9, %v10695_v13  ;;  %v2668_v39 = vsel %vm10547_vm2, %v2663_v29, %v2667_v17  ;;  %v2679_v13 = vshll.u32 %v312_v55, 16 }
 0x26b   : > { %v4513_v61 = vpop.f32.mrf.mxu0  ;;  %v2683_v18 = vshrl.u32 %v312_v55, 16 }
 0x26c   : > { %1383 = vmatmul.bf16.gmra.mxu1 %v10994_v46  ;;  %1789 = vmatmul.bf16.gmra.mxu2 %v11080_v58  ;;  %v11083_v20 = vadd.f32 %v4510_v34, %v4222_v54  ;;  %v2670_v34 = vshrl.u32 %v311_v40, 16  ;;  %v3613_v54 = vunpack.c.l.b16 %v2668_v39  ;;  %v2681_v12 = vrot.slane %v2679_v13, 5  ;;  %v313_v40 = vld [vmem:[%s10212_s13 + $0xf8] sm:$0xf] }
 0x26d   : > { %3978 = vmatmul.bf16.gmra.mxu3 %v11033_v0  ;;  %v2685_v50 = vrot.slane %v2683_v18, 4  ;;  %v2689_v48 = vshll.u32 %v313_v40, 16  ;;  %v314_v18 = vld [vmem:[%s10212_s13 + $0xfc] sm:$0xf] }
 0x26e   : > { %13347 = vst [vmem:[#allocation116_spill] sm:$0xff] %v11083_v20  ;;  %4552 = vmatmul.bf16.gmra.mxu0 %v11076_v10  ;;  %v2672_v45 = vrot.slane %v2670_v34, 4  ;;  %v11098_v36 = vpack.c.b16 %v3613_v54, %v3612_v19  ;;  %v11102_v34 = vld [vmem:[%s10212_s13 + $0xf8] sm:$0xff] }
 0x26f   : > { %v1750_v56 = vpop.f32.mrf.mxu2  ;;  %v2686_v55 = vor.u32 %v2685_v50, %v2681_v12  ;;  %v2691_v39 = vrot.slane %v2689_v48, 5 }
 0x270   : > { %v2034_v26 = vadd.f32 %v1750_v56, %v1345_v47  ;;  %v3939_v46 = vpop.f32.mrf.mxu3  ;;  %v2676_v29 = vor.u32 %v2675_v24, %v2672_v45 }
 0x271   : > { %v1346_v35 = vpop.f32.mrf.mxu1 }
 0x272   : > { %v4223_v52 = vadd.f32 %v3939_v46, %v2034_v26  ;;  %v1347_v47 = vadd.f32 %v1346_v35, %v10709_v44  ;;  %v2677_v35 = vrot.slane %v2676_v29, 4 }
 0x273   : > { %v4515_v5 = vpop.f32.mrf.mxu0 }
 0x274   : > { %v11094_v9 = vadd.f32 %v4513_v61, %v4223_v52  ;;  %v2687_v52 = vrot.slane %v2686_v55, 4  ;;  %v2682_v45 = vsel %vm10547_vm2, %v2677_v35, %v2681_v12  ;;  %v315_v12 = vld [vmem:[%s10212_s13 + $0x100] sm:$0x1] }
 0x276   : > { %v2692_v50 = vsel %vm10547_vm2, %v2687_v52, %v2691_v39 }
 0x277   : > { %v1752_v56 = vpop.f32.mrf.mxu2 }
 0x278   : > { %v2035_v26 = vadd.f32 %v1752_v56, %v1347_v47  ;;  %v3941_v46 = vpop.f32.mrf.mxu3  ;;  %v2699_v56 = vshll.u32 %v314_v18, 16 }
 0x279   : > { %v1349_v20 = vpop.f32.mrf.mxu1 }
 0x27a   : > { %v4224_v61 = vadd.f32 %v3941_v46, %v2035_v26  ;;  %v1350_v60 = vadd.f32 %v1349_v20, %v10724_v53  ;;  %v2703_v26 = vshrl.u32 %v314_v18, 16  ;;  %v3614_v20 = vunpack.c.l.b16 %v2682_v45 }
 0x27b   : > { %v4518_v17 = vpop.f32.mrf.mxu0  ;;  %v3615_v46 = vunpack.c.l.b16 %v2692_v50  ;;  %v2701_v55 = vrot.slane %v2699_v56, 5  ;;  %v2709_v45 = vshll.u32 %v315_v12, 16 }
 0x27c   : > { %1388 = vmatmul.bf16.gmra.mxu1 %v11016_v41  ;;  %1794 = vmatmul.bf16.gmra.mxu2 %v11102_v34  ;;  %v11105_v44 = vadd.f32 %v4515_v5, %v4224_v61  ;;  %v2693_v5 = vshrl.u32 %v313_v40, 16  ;;  %v2705_v48 = vrot.slane %v2703_v26, 4  ;;  %v316_v26 = vld [vmem:[%s10212_s13 + $0x104] sm:$0xf] }
 0x27d   : > { %3983 = vmatmul.bf16.gmra.mxu3 %v11055_v38  ;;  %v2711_v56 = vrot.slane %v2709_v45, 5  ;;  %v2717_v12 = vshll.u32 %v316_v26, 16 }
 0x27e   : > { %4557 = vmatmul.bf16.gmra.mxu0 %v11098_v36  ;;  %v2695_v29 = vrot.slane %v2693_v5, 4  ;;  %v2706_v18 = vor.u32 %v2705_v48, %v2701_v55  ;;  %v11123_v5 = vld [vmem:[%s10212_s13 + $0x104] sm:$0xff] }
 0x27f   : > { %v1755_v13 = vpop.f32.mrf.mxu2 }
 0x280   : > { %v2036_v19 = vadd.f32 %v1755_v13, %v1350_v60  ;;  %v3944_v54 = vpop.f32.mrf.mxu3  ;;  %v2696_v52 = vor.u32 %v2695_v29, %v2691_v39  ;;  %v9436_v39 = vld [vmem:[%s13185_s1 + $0xa0] sm:$0xff]  ;;  %v2707_v50 = vrot.slane %v2706_v18, 4 }
 0x281   : > { %v1351_v41 = vpop.f32.mrf.mxu1  ;;  %6250 = vmatpush.bf16.msra.mxu2 %v9436_v39  ;;  %v9452_v18 = vld [vmem:[%s13185_s1 + $0x220] sm:$0xff] }
 0x282   : > { %v4225_v24 = vadd.f32 %v3944_v54, %v2036_v19  ;;  %v1352_v61 = vadd.f32 %v1351_v41, %v10739_v4  ;;  %v11119_v19 = vpack.c.b16 %v3615_v46, %v3614_v20  ;;  %v2697_v41 = vrot.slane %v2696_v52, 4  ;;  %v317_v20 = vld [vmem:[%s10212_s13 + $0x108] sm:$0xf]  ;;  %7338 = vmatpush.bf16.msra.mxu0 %v9452_v18 }
 0x283   : > { %v4520_v47 = vpop.f32.mrf.mxu0  ;;  %v2727_v52 = vshrl.u32 %v317_v20, 16 }
 0x284   : > { %v11115_v53 = vadd.f32 %v4518_v17, %v4225_v24  ;;  %v9444_v24 = vld [vmem:[%s13185_s1 + $0x160] sm:$0xff]  ;;  %v2702_v48 = vsel %vm10547_vm2, %v2697_v41, %v2701_v55 }
 0x285   : > { %6794 = vmatpush.bf16.msra.mxu3 %v9444_v24  ;;  %v3616_v45 = vunpack.c.l.b16 %v2702_v48  ;;  %v2719_v24 = vrot.slane %v2717_v12, 5 }
 0x286   : > { %13348 = vst [vmem:[#allocation117_spill] sm:$0xff] %v11115_v53 }
 0x287   : > { %v1757_v60 = vpop.f32.mrf.mxu2 }
 0x288   : > { %v2037_v40 = vadd.f32 %v1757_v60, %v1352_v61  ;;  %v3946_v35 = vpop.f32.mrf.mxu3  ;;  %v2714_v60 = vshrl.u32 %v316_v26, 16 }
 0x289   : > { %v1354_v13 = vpop.f32.mrf.mxu1 }
 0x28a   : > { %v4226_v54 = vadd.f32 %v3946_v35, %v2037_v40  ;;  %v2716_v39 = vrot.slane %v2714_v60, 4  ;;  %v11157_v60 = vld [vmem:[%s10212_s13 + $0x10c] sm:$0xff] }
 0x28b   : > { %v4523_v17 = vpop.f32.mrf.mxu0 }
 0x28c   : > { %1393 = vmatmul.bf16.gmra.mxu1 %v11037_v6  ;;  %1799 = vmatmul.bf16.gmra.mxu2 %v11123_v5  ;;  %v11126_v4 = vadd.f32 %v4520_v47, %v4226_v54  ;;  %v1355_v6 = vadd.f32 %v1354_v13, %v10752_v27  ;;  %v2712_v27 = vsel %vm10547_vm2, %v2707_v50, %v2711_v56  ;;  %v2723_v13 = vshll.u32 %v317_v20, 16  ;;  %v9428_v54 = vld [vmem:[%s13185_s1 + $0x1e0] sm:$0xff] }
 0x28d   : > { %3988 = vmatmul.bf16.gmra.mxu3 %v11076_v10  ;;  %5021 = vmatpush.bf16.msra.mxu1 %v9428_v54  ;;  %v3617_v41 = vunpack.c.l.b16 %v2712_v27  ;;  %v2729_v56 = vrot.slane %v2727_v52, 4  ;;  %v2720_v54 = vor.u32 %v2719_v24, %v2716_v39 }
 0x28e   : > { %13349 = vst [vmem:[#allocation118_spill] sm:$0xff] %v11126_v4  ;;  %4562 = vmatmul.bf16.gmra.mxu0 %v11119_v19  ;;  %v2725_v50 = vrot.slane %v2723_v13, 5 }
 0x28f   : > { %v1760_v47 = vpop.f32.mrf.mxu2  ;;  %v11153_v4 = vpack.c.b16 %v3617_v41, %v3616_v45  ;;  %v319_v45 = vld [vmem:[%s10212_s13 + $0x110] sm:$0xf] }
 0x290   : > { %v2038_v46 = vadd.f32 %v1760_v47, %v1355_v6  ;;  %v3949_v29 = vpop.f32.mrf.mxu3  ;;  %v318_v47 = vld [vmem:[%s10212_s13 + $0x10c] sm:$0xf]  ;;  %v2730_v48 = vor.u32 %v2729_v56, %v2725_v50 }
 0x291   : > { %v1356_v61 = vpop.f32.mrf.mxu1  ;;  %v2733_v27 = vshll.u32 %v318_v47, 16 }
 0x292   : > { %v4227_v40 = vadd.f32 %v3949_v29, %v2038_v46  ;;  %v1357_v6 = vadd.f32 %v1356_v61, %v10776_v11  ;;  %v2721_v61 = vrot.slane %v2720_v54, 4  ;;  %v2731_v13 = vrot.slane %v2730_v48, 4 }
 0x293   : > { %v4525_v35 = vpop.f32.mrf.mxu0  ;;  %v2735_v52 = vrot.slane %v2733_v27, 5 }
 0x294   : > { %v11149_v55 = vadd.f32 %v4523_v17, %v4227_v40  ;;  %v2726_v24 = vsel %vm10547_vm2, %v2721_v61, %v2725_v50  ;;  %v320_v50 = vld [vmem:[%s10212_s13 + $0x114] sm:$0x1] }
 0x296   : > { %13350 = vst [vmem:[#allocation119_spill] sm:$0xff] %v11149_v55 }
 0x297   : > { %v1762_v26 = vpop.f32.mrf.mxu2 }
 0x298   : > { %v2039_v20 = vadd.f32 %v1762_v26, %v1357_v6  ;;  %v3951_v46 = vpop.f32.mrf.mxu3  ;;  %v2736_v26 = vsel %vm10547_vm2, %v2731_v13, %v2735_v52 }
 0x299   : > { %v1359_v29 = vpop.f32.mrf.mxu1  ;;  %v3619_v54 = vunpack.c.l.b16 %v2736_v26 }
 0x29a   : > { %v4228_v17 = vadd.f32 %v3951_v46, %v2039_v20  ;;  %v1360_v12 = vadd.f32 %v1359_v29, %v10793_v25  ;;  %v2743_v20 = vshll.u32 %v319_v45, 16  ;;  %v2747_v46 = vshrl.u32 %v319_v45, 16 }
 0x29b   : > { %v4528_v40 = vpop.f32.mrf.mxu0  ;;  %v3618_v29 = vunpack.c.l.b16 %v2726_v24 }
 0x29c   : > { %1398 = vmatmul.bf16.gmra.mxu1 %v11059_v32  ;;  %1804 = vmatmul.bf16.gmra.mxu2 %v11157_v60  ;;  %v11160_v11 = vadd.f32 %v4525_v35, %v4228_v17  ;;  %v2737_v35 = vshrl.u32 %v318_v47, 16  ;;  %v2745_v27 = vrot.slane %v2743_v20, 5 }
 0x29d   : > { %3993 = vmatmul.bf16.gmra.mxu3 %v11098_v36 }
 0x29e   : > { %13351 = vst [vmem:[#allocation120_spill] sm:$0xff] %v11160_v11  ;;  %4567 = vmatmul.bf16.gmra.mxu0 %v11153_v4  ;;  %v2739_v17 = vrot.slane %v2737_v35, 4  ;;  %v11178_v35 = vld [vmem:[%s10212_s13 + $0x118] sm:$0xff] }
 0x29f   : > { %v1765_v18 = vpop.f32.mrf.mxu2 }
 0x2a0   : > { %v2040_v41 = vadd.f32 %v1765_v18, %v1360_v12  ;;  %v3954_v39 = vpop.f32.mrf.mxu3  ;;  %v2749_v12 = vrot.slane %v2747_v46, 4  ;;  %v2740_v13 = vor.u32 %v2739_v17, %v2735_v52  ;;  %v321_v46 = vld [vmem:[%s10212_s13 + $0x118] sm:$0xf] }
 0x2a1   : > { %v1361_v32 = vpop.f32.mrf.mxu1 }
 0x2a2   : > { %v4229_v6 = vadd.f32 %v3954_v39, %v2040_v41  ;;  %v1362_v48 = vadd.f32 %v1361_v32, %v10806_v33  ;;  %v11174_v39 = vpack.c.b16 %v3619_v54, %v3618_v29  ;;  %v2750_v24 = vor.u32 %v2749_v12, %v2745_v27  ;;  %v322_v54 = vld [vmem:[%s10212_s13 + $0x11c] sm:$0xf] }
 0x2a3   : > { %v4530_v56 = vpop.f32.mrf.mxu0  ;;  %v2741_v32 = vrot.slane %v2740_v13, 4 }
 0x2a4   : > { %v11170_v25 = vadd.f32 %v4528_v40, %v4229_v6  ;;  %13353 = vst [vmem:[#allocation122_spill] sm:$0xff] %v11174_v39  ;;  %v2753_v6 = vshll.u32 %v320_v50, 16  ;;  %v2751_v26 = vrot.slane %v2750_v24, 4 }
 0x2a5   : > { %v2746_v12 = vsel %vm10547_vm2, %v2741_v32, %v2745_v27 }
 0x2a6   : > { %13352 = vst [vmem:[#allocation121_spill] sm:$0xff] %v11170_v25  ;;  %v2755_v20 = vrot.slane %v2753_v6, 5 }
 0x2a7   : > { %v1767_v18 = vpop.f32.mrf.mxu2 }
 0x2a8   : > { %v2041_v47 = vadd.f32 %v1767_v18, %v1362_v48  ;;  %v3956_v61 = vpop.f32.mrf.mxu3  ;;  %v2761_v18 = vshll.u32 %v321_v46, 16 }
 0x2a9   : > { %v1364_v41 = vpop.f32.mrf.mxu1 }
 0x2aa   : > { %v4230_v45 = vadd.f32 %v3956_v61, %v2041_v47  ;;  %v1365_v52 = vadd.f32 %v1364_v41, %v10332_v62  ;;  %v2756_v61 = vsel %vm10547_vm2, %v2751_v26, %v2755_v20  ;;  %v2767_v62 = vshll.u32 %v322_v54, 16 }
 0x2ab   : > { %v4533_v40 = vpop.f32.mrf.mxu0  ;;  %v2771_v41 = vshrl.u32 %v322_v54, 16  ;;  %v3621_v24 = vunpack.c.l.b16 %v2756_v61 }
 0x2ac   : > { %1403 = vmatmul.bf16.gmra.mxu1 %v11080_v58  ;;  %1809 = vmatmul.bf16.gmra.mxu2 %v11178_v35  ;;  %v11181_v33 = vadd.f32 %v4530_v56, %v4230_v45  ;;  %v2758_v56 = vshrl.u32 %v321_v46, 16  ;;  %v3620_v45 = vunpack.c.l.b16 %v2746_v12  ;;  %v2769_v27 = vrot.slane %v2767_v62, 5  ;;  %v323_v46 = vld [vmem:[%s10212_s13 + $0x120] sm:$0xf] }
 0x2ad   : > { %3998 = vmatmul.bf16.gmra.mxu3 %v11119_v19  ;;  %v2773_v32 = vrot.slane %v2771_v41, 4  ;;  %v2777_v12 = vshll.u32 %v323_v46, 16  ;;  %v324_v41 = vld [vmem:[%s10212_s13 + $0x124] sm:$0xf] }
 0x2ae   : > { %13354 = vst [vmem:[#allocation123_spill] sm:$0xff] %v11181_v33  ;;  %4572 = vmatmul.bf16.gmra.mxu0 %v11174_v39  ;;  %v2760_v6 = vrot.slane %v2758_v56, 4  ;;  %v11196_v55 = vpack.c.b16 %v3621_v24, %v3620_v45  ;;  %v11200_v56 = vld [vmem:[%s10212_s13 + $0x120] sm:$0xff] }
 0x2af   : > { %v1770_v29 = vpop.f32.mrf.mxu2  ;;  %v2774_v54 = vor.u32 %v2773_v32, %v2769_v27  ;;  %v2779_v61 = vrot.slane %v2777_v12, 5  ;;  %v13361_v12 = vld [vmem:[#allocation10_spill] sm:$0xff] }
 0x2b0   : > { %v2042_v17 = vadd.f32 %v1770_v29, %v1365_v52  ;;  %v3959_v58 = vpop.f32.mrf.mxu3  ;;  %v2763_v52 = vrot.slane %v2761_v18, 5  ;;  %v13356_v29 = vld [vmem:[#allocation4_spill] sm:$0xff] }
 0x2b1   : > { %v1366_v48 = vpop.f32.mrf.mxu1  ;;  %13357 = vst [vmem:[#allocation4_spill] sm:$0xff] %v11196_v55 }
 0x2b2   : > { %v4231_v50 = vadd.f32 %v3959_v58, %v2042_v17  ;;  %v1367_v33 = vadd.f32 %v1366_v48, %v13356_v29  ;;  %v2764_v26 = vor.u32 %v2763_v52, %v2760_v6 }
 0x2b3   : > { %v4535_v47 = vpop.f32.mrf.mxu0 }
 0x2b4   : > { %v11192_v13 = vadd.f32 %v4533_v40, %v4231_v50  ;;  %v2775_v50 = vrot.slane %v2774_v54, 4 }
 0x2b6   : > { %13355 = vst [vmem:[#allocation124_spill] sm:$0xff] %v11192_v13  ;;  %v2780_v32 = vsel %vm10547_vm2, %v2775_v50, %v2779_v61 }
 0x2b7   : > { %v1772_v25 = vpop.f32.mrf.mxu2 }
 0x2b8   : > { %v2043_v17 = vadd.f32 %v1772_v25, %v1367_v33  ;;  %v3961_v58 = vpop.f32.mrf.mxu3  ;;  %v2765_v25 = vrot.slane %v2764_v26, 4  ;;  %v13359_v33 = vld [vmem:[#allocation7_spill] sm:$0xff] }
 0x2b9   : > { %v1369_v11 = vpop.f32.mrf.mxu1 }
 0x2ba   : > { %v4232_v40 = vadd.f32 %v3961_v58, %v2043_v17  ;;  %v1370_v18 = vadd.f32 %v1369_v11, %v13359_v33  ;;  %v2770_v6 = vsel %vm10547_vm2, %v2765_v25, %v2769_v27  ;;  %v2787_v17 = vshll.u32 %v324_v41, 16  ;;  %v325_v27 = vld [vmem:[%s10212_s13 + $0x128] sm:$0x1] }
 0x2bb   : > { %v4538_v20 = vpop.f32.mrf.mxu0  ;;  %v2791_v58 = vshrl.u32 %v324_v41, 16  ;;  %v3622_v26 = vunpack.c.l.b16 %v2770_v6 }
 0x2bc   : > { %1408 = vmatmul.bf16.gmra.mxu1 %v11102_v34  ;;  %1814 = vmatmul.bf16.gmra.mxu2 %v11200_v56  ;;  %v11203_v48 = vadd.f32 %v4535_v47, %v4232_v40  ;;  %v2781_v47 = vshrl.u32 %v323_v46, 16  ;;  %v3623_v40 = vunpack.c.l.b16 %v2780_v32  ;;  %v13364_v32 = vld [vmem:[#allocation13_spill] sm:$0xff] }
 0x2bd   : > { %4003 = vmatmul.bf16.gmra.mxu3 %v11153_v4 }
 0x2be   : > { %13358 = vst [vmem:[#allocation125_spill] sm:$0xff] %v11203_v48  ;;  %4577 = vmatmul.bf16.gmra.mxu0 %v11196_v55  ;;  %v2783_v54 = vrot.slane %v2781_v47, 4  ;;  %v11221_v47 = vld [vmem:[%s10212_s13 + $0x12c] sm:$0xff] }
 0x2bf   : > { %v1775_v62 = vpop.f32.mrf.mxu2 }
 0x2c0   : > { %v2044_v45 = vadd.f32 %v1775_v62, %v1370_v18  ;;  %v3964_v24 = vpop.f32.mrf.mxu3  ;;  %v2789_v18 = vrot.slane %v2787_v17, 5  ;;  %v2793_v62 = vrot.slane %v2791_v58, 4  ;;  %v2784_v50 = vor.u32 %v2783_v54, %v2779_v61  ;;  %v327_v54 = vld [vmem:[%s10212_s13 + $0x130] sm:$0xf] }
 0x2c1   : > { %v1371_v34 = vpop.f32.mrf.mxu1 }
 0x2c2   : > { %v4233_v52 = vadd.f32 %v3964_v24, %v2044_v45  ;;  %v1372_v33 = vadd.f32 %v1371_v34, %v13361_v12  ;;  %v11217_v24 = vpack.c.b16 %v3623_v40, %v3622_v26  ;;  %v2794_v6 = vor.u32 %v2793_v62, %v2789_v18  ;;  %v326_v26 = vld [vmem:[%s10212_s13 + $0x12c] sm:$0xf] }
 0x2c3   : > { %v4540_v29 = vpop.f32.mrf.mxu0 }
 0x2c4   : > { %v11213_v11 = vadd.f32 %v4538_v20, %v4233_v52  ;;  %13362 = vst [vmem:[#allocation10_spill] sm:$0xff] %v11217_v24  ;;  %v2797_v52 = vshll.u32 %v325_v27, 16  ;;  %v2795_v17 = vrot.slane %v2794_v6, 4  ;;  %v2805_v27 = vshll.u32 %v326_v26, 16 }
 0x2c6   : > { %13360 = vst [vmem:[#allocation7_spill] sm:$0xff] %v11213_v11  ;;  %v2799_v58 = vrot.slane %v2797_v52, 5 }
 0x2c7   : > { %v1777_v48 = vpop.f32.mrf.mxu2 }
 0x2c8   : > { %v2045_v46 = vadd.f32 %v1777_v48, %v1372_v33  ;;  %v3966_v25 = vpop.f32.mrf.mxu3  ;;  %v2785_v48 = vrot.slane %v2784_v50, 4  ;;  %v2800_v50 = vsel %vm10547_vm2, %v2795_v17, %v2799_v58 }
 0x2c9   : > { %v1374_v45 = vpop.f32.mrf.mxu1 }
 0x2ca   : > { %v4234_v41 = vadd.f32 %v3966_v25, %v2045_v46  ;;  %v1375_v61 = vadd.f32 %v1374_v45, %v13364_v32  ;;  %v2790_v62 = vsel %vm10547_vm2, %v2785_v48, %v2789_v18  ;;  %v2811_v45 = vshll.u32 %v327_v54, 16 }
 0x2cb   : > { %v4543_v20 = vpop.f32.mrf.mxu0  ;;  %v3624_v52 = vunpack.c.l.b16 %v2790_v62  ;;  %v3625_v32 = vunpack.c.l.b16 %v2800_v50 }
 0x2cc   : > { %1413 = vmatmul.bf16.gmra.mxu1 %v11123_v5  ;;  %1819 = vmatmul.bf16.gmra.mxu2 %v11221_v47  ;;  %v11224_v34 = vadd.f32 %v4540_v29, %v4234_v41  ;;  %v2802_v29 = vshrl.u32 %v326_v26, 16  ;;  %v2815_v41 = vshrl.u32 %v327_v54, 16  ;;  %v2813_v18 = vrot.slane %v2811_v45, 5  ;;  %v328_v26 = vld [vmem:[%s10212_s13 + $0x134] sm:$0xf] }
 0x2cd   : > { %4008 = vmatmul.bf16.gmra.mxu3 %v11174_v39  ;;  %v11239_v53 = vpack.c.b16 %v3625_v32, %v3624_v52  ;;  %v2821_v62 = vshll.u32 %v328_v26, 16  ;;  %v329_v45 = vld [vmem:[%s10212_s13 + $0x138] sm:$0xf] }
 0x2ce   : > { %13363 = vst [vmem:[#allocation126_spill] sm:$0xff] %v11224_v34  ;;  %4582 = vmatmul.bf16.gmra.mxu0 %v11217_v24  ;;  %v13366_v34 = vld [vmem:[#allocation16_spill] sm:$0xff]  ;;  %v2817_v48 = vrot.slane %v2815_v41, 4 }
 0x2cf   : > { %v1780_v40 = vpop.f32.mrf.mxu2  ;;  %13367 = vst [vmem:[#allocation16_spill] sm:$0xff] %v11239_v53 }
 0x2d0   : > { %v2046_v12 = vadd.f32 %v1780_v40, %v1375_v61  ;;  %v3969_v5 = vpop.f32.mrf.mxu3  ;;  %v2804_v61 = vrot.slane %v2802_v29, 4  ;;  %v2807_v40 = vrot.slane %v2805_v27, 5  ;;  %v2818_v54 = vor.u32 %v2817_v48, %v2813_v18  ;;  %v11243_v29 = vld [vmem:[%s10212_s13 + $0x134] sm:$0xff] }
 0x2d1   : > { %v1376_v33 = vpop.f32.mrf.mxu1 }
 0x2d2   : > { %v4235_v46 = vadd.f32 %v3969_v5, %v2046_v12  ;;  %v1377_v11 = vadd.f32 %v1376_v33, %v13366_v34  ;;  %v2808_v17 = vor.u32 %v2807_v40, %v2804_v61  ;;  %v2819_v27 = vrot.slane %v2818_v54, 4 }
 0x2d3   : > { %v4545_v25 = vpop.f32.mrf.mxu0 }
 0x2d4   : > { %v11235_v6 = vadd.f32 %v4543_v20, %v4235_v46  ;;  %v2823_v46 = vrot.slane %v2821_v62, 5  ;;  %v13371_v62 = vld [vmem:[#allocation22_spill] sm:$0xff] }
 0x2d6   : > { %13365 = vst [vmem:[#allocation13_spill] sm:$0xff] %v11235_v6  ;;  %v2824_v48 = vsel %vm10547_vm2, %v2819_v27, %v2823_v46 }
 0x2d7   : > { %v1782_v13 = vpop.f32.mrf.mxu2 }
 0x2d8   : > { %v2047_v12 = vadd.f32 %v1782_v13, %v1377_v11  ;;  %v3971_v5 = vpop.f32.mrf.mxu3  ;;  %v2809_v13 = vrot.slane %v2808_v17, 4  ;;  %v13369_v11 = vld [vmem:[#allocation19_spill] sm:$0xff] }
 0x2d9   : > { %v1379_v39 = vpop.f32.mrf.mxu1 }
 0x2da   : > { %v4236_v20 = vadd.f32 %v3971_v5, %v2047_v12  ;;  %v1380_v33 = vadd.f32 %v1379_v39, %v13369_v11  ;;  %v2814_v32 = vsel %vm10547_vm2, %v2809_v13, %v2813_v18  ;;  %v2831_v12 = vshll.u32 %v329_v45, 16  ;;  %v330_v18 = vld [vmem:[%s10212_s13 + $0x13c] sm:$0x1] }
 0x2db   : > { %v4548_v58 = vpop.f32.mrf.mxu0  ;;  %v2835_v5 = vshrl.u32 %v329_v45, 16  ;;  %v3626_v17 = vunpack.c.l.b16 %v2814_v32 }
 0x2dc   : > { %1418 = vmatmul.bf16.gmra.mxu1 %v11157_v60  ;;  %1824 = vmatmul.bf16.gmra.mxu2 %v11243_v29  ;;  %v11246_v34 = vadd.f32 %v4545_v25, %v4236_v20  ;;  %v2825_v25 = vshrl.u32 %v328_v26, 16  ;;  %v3627_v20 = vunpack.c.l.b16 %v2824_v48  ;;  %v13374_v48 = vld [vmem:[#allocation25_spill] sm:$0xff] }
 0x2dd   : > { %4013 = vmatmul.bf16.gmra.mxu3 %v11196_v55 }
 0x2de   : > { %13368 = vst [vmem:[#allocation127_spill] sm:$0xff] %v11246_v34  ;;  %4587 = vmatmul.bf16.gmra.mxu0 %v11239_v53  ;;  %v2827_v54 = vrot.slane %v2825_v25, 4  ;;  %v11264_v25 = vld [vmem:[%s10212_s13 + $0x140] sm:$0xff] }
 0x2df   : > { %v1785_v50 = vpop.f32.mrf.mxu2 }
 0x2e0   : > { %v2048_v41 = vadd.f32 %v1785_v50, %v1380_v33  ;;  %v3974_v52 = vpop.f32.mrf.mxu3  ;;  %v2833_v33 = vrot.slane %v2831_v12, 5  ;;  %v2837_v50 = vrot.slane %v2835_v5, 4  ;;  %v2828_v27 = vor.u32 %v2827_v54, %v2823_v46  ;;  %v332_v54 = vld [vmem:[%s10212_s13 + $0x144] sm:$0xf] }
 0x2e1   : > { %v1381_v60 = vpop.f32.mrf.mxu1 }
 0x2e2   : > { %v4237_v61 = vadd.f32 %v3974_v52, %v2048_v41  ;;  %v1382_v11 = vadd.f32 %v1381_v60, %v13371_v62  ;;  %v11260_v52 = vpack.c.b16 %v3627_v20, %v3626_v17  ;;  %v2838_v32 = vor.u32 %v2837_v50, %v2833_v33  ;;  %v331_v17 = vld [vmem:[%s10212_s13 + $0x140] sm:$0xf] }
 0x2e3   : > { %v4550_v40 = vpop.f32.mrf.mxu0 }
 0x2e4   : > { %v11256_v39 = vadd.f32 %v4548_v58, %v4237_v61  ;;  %13372 = vst [vmem:[#allocation22_spill] sm:$0xff] %v11260_v52  ;;  %v2841_v61 = vshll.u32 %v330_v18, 16  ;;  %v2839_v12 = vrot.slane %v2838_v32, 4  ;;  %v2849_v18 = vshll.u32 %v331_v17, 16 }
 0x2e6   : > { %13370 = vst [vmem:[#allocation19_spill] sm:$0xff] %v11256_v39  ;;  %v2843_v5 = vrot.slane %v2841_v61, 5 }
 0x2e7   : > { %v1787_v34 = vpop.f32.mrf.mxu2 }
 0x2e8   : > { %v2049_v26 = vadd.f32 %v1787_v34, %v1382_v11  ;;  %v3976_v13 = vpop.f32.mrf.mxu3  ;;  %v2829_v34 = vrot.slane %v2828_v27, 4  ;;  %v2844_v27 = vsel %vm10547_vm2, %v2839_v12, %v2843_v5 }
 0x2e9   : > { %v1384_v41 = vpop.f32.mrf.mxu1 }
 0x2ea   : > { %v4238_v45 = vadd.f32 %v3976_v13, %v2049_v26  ;;  %v1385_v46 = vadd.f32 %v1384_v41, %v13374_v48  ;;  %v2834_v50 = vsel %vm10547_vm2, %v2829_v34, %v2833_v33  ;;  %v2855_v41 = vshll.u32 %v332_v54, 16 }
 0x2eb   : > { %v4553_v58 = vpop.f32.mrf.mxu0  ;;  %v3628_v61 = vunpack.c.l.b16 %v2834_v50  ;;  %v3629_v48 = vunpack.c.l.b16 %v2844_v27 }
 0x2ec   : > { %1423 = vmatmul.bf16.gmra.mxu1 %v11178_v35  ;;  %1829 = vmatmul.bf16.gmra.mxu2 %v11264_v25  ;;  %v11267_v60 = vadd.f32 %v4550_v40, %v4238_v45  ;;  %v2846_v40 = vshrl.u32 %v331_v17, 16  ;;  %v2859_v45 = vshrl.u32 %v332_v54, 16  ;;  %v2857_v33 = vrot.slane %v2855_v41, 5  ;;  %v333_v17 = vld [vmem:[%s10212_s13 + $0x148] sm:$0xf] }
 0x2ed   : > { %4018 = vmatmul.bf16.gmra.mxu3 %v11217_v24  ;;  %v11282_v55 = vpack.c.b16 %v3629_v48, %v3628_v61  ;;  %v2865_v50 = vshll.u32 %v333_v17, 16  ;;  %v334_v41 = vld [vmem:[%s10212_s13 + $0x14c] sm:$0xf] }
 0x2ee   : > { %13373 = vst [vmem:[#allocation128_spill] sm:$0xff] %v11267_v60  ;;  %4592 = vmatmul.bf16.gmra.mxu0 %v11260_v52  ;;  %v13376_v60 = vld [vmem:[#allocation28_spill] sm:$0xff]  ;;  %v2861_v34 = vrot.slane %v2859_v45, 4 }
 0x2ef   : > { %v1790_v20 = vpop.f32.mrf.mxu2  ;;  %13377 = vst [vmem:[#allocation28_spill] sm:$0xff] %v11282_v55 }
 0x2f0   : > { %v2050_v62 = vadd.f32 %v1790_v20, %v1385_v46  ;;  %v3979_v35 = vpop.f32.mrf.mxu3  ;;  %v2848_v46 = vrot.slane %v2846_v40, 4  ;;  %v2851_v20 = vrot.slane %v2849_v18, 5  ;;  %v2862_v54 = vor.u32 %v2861_v34, %v2857_v33  ;;  %v11286_v40 = vld [vmem:[%s10212_s13 + $0x148] sm:$0xff] }
 0x2f1   : > { %v1386_v11 = vpop.f32.mrf.mxu1 }
 0x2f2   : > { %v4239_v26 = vadd.f32 %v3979_v35, %v2050_v62  ;;  %v1387_v39 = vadd.f32 %v1386_v11, %v13376_v60  ;;  %v2852_v12 = vor.u32 %v2851_v20, %v2848_v46  ;;  %v2863_v18 = vrot.slane %v2862_v54, 4 }
 0x2f3   : > { %v4555_v13 = vpop.f32.mrf.mxu0 }
 0x2f4   : > { %v11278_v32 = vadd.f32 %v4553_v58, %v4239_v26  ;;  %v2867_v26 = vrot.slane %v2865_v50, 5  ;;  %v13381_v50 = vld [vmem:[#allocation34_spill] sm:$0xff] }
 0x2f6   : > { %13375 = vst [vmem:[#allocation25_spill] sm:$0xff] %v11278_v32  ;;  %v2868_v34 = vsel %vm10547_vm2, %v2863_v18, %v2867_v26 }
 0x2f7   : > { %v1792_v6 = vpop.f32.mrf.mxu2 }
 0x2f8   : > { %v2051_v62 = vadd.f32 %v1792_v6, %v1387_v39  ;;  %v3981_v35 = vpop.f32.mrf.mxu3  ;;  %v2853_v6 = vrot.slane %v2852_v12, 4  ;;  %v13379_v39 = vld [vmem:[#allocation31_spill] sm:$0xff] }
 0x2f9   : > { %v1389_v24 = vpop.f32.mrf.mxu1 }
 0x2fa   : > { %v4240_v58 = vadd.f32 %v3981_v35, %v2051_v62  ;;  %v1390_v11 = vadd.f32 %v1389_v24, %v13379_v39  ;;  %v2858_v48 = vsel %vm10547_vm2, %v2853_v6, %v2857_v33  ;;  %v2875_v62 = vshll.u32 %v334_v41, 16  ;;  %v335_v33 = vld [vmem:[%s10212_s13 + $0x150] sm:$0x1] }
 0x2fb   : > { %v4558_v5 = vpop.f32.mrf.mxu0  ;;  %v2879_v35 = vshrl.u32 %v334_v41, 16  ;;  %v3630_v12 = vunpack.c.l.b16 %v2858_v48  ;;  %v2885_v48 = vshll.u32 %v335_v33, 16 }
 0x2fc   : > { %1428 = vmatmul.bf16.gmra.mxu1 %v11200_v56  ;;  %1834 = vmatmul.bf16.gmra.mxu2 %v11286_v40  ;;  %v11289_v60 = vadd.f32 %v4555_v13, %v4240_v58  ;;  %v2869_v13 = vshrl.u32 %v333_v17, 16  ;;  %v3631_v58 = vunpack.c.l.b16 %v2868_v34 }
 0x2fd   : > { %4023 = vmatmul.bf16.gmra.mxu3 %v11239_v53 }
 0x2fe   : > { %13378 = vst [vmem:[#allocation129_spill] sm:$0xff] %v11289_v60  ;;  %4597 = vmatmul.bf16.gmra.mxu0 %v11282_v55  ;;  %v2871_v54 = vrot.slane %v2869_v13, 4  ;;  %v11307_v13 = vld [vmem:[%s10212_s13 + $0x154] sm:$0xff] }
 0x2ff   : > { %v1795_v27 = vpop.f32.mrf.mxu2 }
 0x300   : > { %v2052_v45 = vadd.f32 %v1795_v27, %v1390_v11  ;;  %v3984_v61 = vpop.f32.mrf.mxu3  ;;  %v2877_v11 = vrot.slane %v2875_v62, 5  ;;  %v2881_v27 = vrot.slane %v2879_v35, 4  ;;  %v2872_v18 = vor.u32 %v2871_v54, %v2867_v26  ;;  %v9435_v26 = vld [vmem:[%s13185_s1 + $0x98] sm:$0xff] }
 0x301   : > { %v1391_v56 = vpop.f32.mrf.mxu1  ;;  %v2887_v35 = vrot.slane %v2885_v48, 5  ;;  %6251 = vmatpush.bf16.msra.mxu2 %v9435_v26  ;;  %v9427_v48 = vld [vmem:[%s13185_s1 + $0x1d8] sm:$0xff] }
 0x302   : > { %v4241_v46 = vadd.f32 %v3984_v61, %v2052_v45  ;;  %v1392_v39 = vadd.f32 %v1391_v56, %v13381_v50  ;;  %v11303_v61 = vpack.c.b16 %v3631_v58, %v3630_v12  ;;  %v2882_v41 = vor.u32 %v2881_v27, %v2877_v11  ;;  %v336_v12 = vld [vmem:[%s10212_s13 + $0x154] sm:$0xf]  ;;  %v9451_v26 = vld [vmem:[%s13185_s1 + $0x218] sm:$0xff]  ;;  %5022 = vmatpush.bf16.msra.mxu1 %v9427_v48 }
 0x303   : > { %v4560_v20 = vpop.f32.mrf.mxu0  ;;  %v2890_v27 = vshrl.u32 %v336_v12, 16  ;;  %v2893_v33 = vshll.u32 %v336_v12, 16  ;;  %7339 = vmatpush.bf16.msra.mxu0 %v9451_v26 }
 0x304   : > { %v11299_v24 = vadd.f32 %v4558_v5, %v4241_v46  ;;  %13382 = vst [vmem:[#allocation34_spill] sm:$0xff] %v11303_v61  ;;  %v9443_v46 = vld [vmem:[%s13185_s1 + $0x158] sm:$0xff]  ;;  %v2883_v62 = vrot.slane %v2882_v41, 4 }
 0x305   : > { %6795 = vmatpush.bf16.msra.mxu3 %v9443_v46 }
 0x306   : > { %13380 = vst [vmem:[#allocation31_spill] sm:$0xff] %v11299_v24 }
 0x307   : > { %v1797_v60 = vpop.f32.mrf.mxu2 }
 0x308   : > { %v2053_v17 = vadd.f32 %v1797_v60, %v1392_v39  ;;  %v3986_v6 = vpop.f32.mrf.mxu3  ;;  %v2873_v60 = vrot.slane %v2872_v18, 4 }
 0x309   : > { %v1394_v45 = vpop.f32.mrf.mxu1 }
 0x30a   : > { %v4242_v32 = vadd.f32 %v3986_v6, %v2053_v17  ;;  %v2878_v39 = vsel %vm10547_vm2, %v2873_v60, %v2877_v11 }
 0x30b   : > { %v4563_v5 = vpop.f32.mrf.mxu0  ;;  %v3632_v60 = vunpack.c.l.b16 %v2878_v39 }
 0x30c   : > { %1433 = vmatmul.bf16.gmra.mxu1 %v11221_v47  ;;  %1839 = vmatmul.bf16.gmra.mxu2 %v11307_v13  ;;  %v11310_v56 = vadd.f32 %v4560_v20, %v4242_v32  ;;  %v13384_v47 = vld [vmem:[#allocation37_spill] sm:$0xff] }
 0x30d   : > { %4028 = vmatmul.bf16.gmra.mxu3 %v11260_v52  ;;  %v1395_v34 = vadd.f32 %v1394_v45, %v13384_v47  ;;  %v337_v20 = vld [vmem:[%s10212_s13 + $0x158] sm:$0xf]  ;;  %v2888_v45 = vsel %vm10547_vm2, %v2883_v62, %v2887_v35  ;;  %v2892_v47 = vrot.slane %v2890_v27, 4  ;;  %v13386_v62 = vld [vmem:[#allocation40_spill] sm:$0xff]  ;;  %v11341_v27 = vld [vmem:[%s10212_s13 + $0x15c] sm:$0xff] }
 0x30e   : > { %13383 = vst [vmem:[#allocation130_spill] sm:$0xff] %v11310_v56  ;;  %4602 = vmatmul.bf16.gmra.mxu0 %v11303_v61  ;;  %v2899_v18 = vshll.u32 %v337_v20, 16  ;;  %v2903_v41 = vshrl.u32 %v337_v20, 16  ;;  %v3633_v46 = vunpack.c.l.b16 %v2888_v45 }
 0x30f   : > { %v1800_v32 = vpop.f32.mrf.mxu2 }
 0x310   : > { %v2054_v58 = vadd.f32 %v1800_v32, %v1395_v34  ;;  %v3989_v54 = vpop.f32.mrf.mxu3  ;;  %v2895_v34 = vrot.slane %v2893_v33, 5  ;;  %v2901_v12 = vrot.slane %v2899_v18, 5  ;;  %v2905_v32 = vrot.slane %v2903_v41, 4  ;;  %v13389_v18 = vld [vmem:[#allocation43_spill] sm:$0xff] }
 0x311   : > { %v1396_v50 = vpop.f32.mrf.mxu1  ;;  %v11337_v52 = vpack.c.b16 %v3633_v46, %v3632_v60  ;;  %v339_v46 = vld [vmem:[%s10212_s13 + $0x160] sm:$0xf] }
 0x312   : > { %v4243_v17 = vadd.f32 %v3989_v54, %v2054_v58  ;;  %v1397_v35 = vadd.f32 %v1396_v50, %v13386_v62  ;;  %v338_v58 = vld [vmem:[%s10212_s13 + $0x15c] sm:$0xf]  ;;  %v2896_v48 = vor.u32 %v2895_v34, %v2892_v47  ;;  %v2906_v39 = vor.u32 %v2905_v32, %v2901_v12 }
 0x313   : > { %v4565_v6 = vpop.f32.mrf.mxu0  ;;  %13387 = vst [vmem:[#allocation40_spill] sm:$0xff] %v11337_v52  ;;  %v2909_v45 = vshll.u32 %v338_v58, 16 }
 0x314   : > { %v11333_v11 = vadd.f32 %v4563_v5, %v4243_v17  ;;  %v2897_v33 = vrot.slane %v2896_v48, 4  ;;  %v2907_v26 = vrot.slane %v2906_v39, 4  ;;  %v2923_v48 = vshrl.u32 %v339_v46, 16 }
 0x316   : > { %13385 = vst [vmem:[#allocation37_spill] sm:$0xff] %v11333_v11  ;;  %v2902_v62 = vsel %vm10547_vm2, %v2897_v33, %v2901_v12  ;;  %v340_v12 = vld [vmem:[%s10212_s13 + $0x164] sm:$0x1] }
 0x317   : > { %v1802_v20 = vpop.f32.mrf.mxu2 }
 0x318   : > { %v2055_v54 = vadd.f32 %v1802_v20, %v1397_v35  ;;  %v3991_v56 = vpop.f32.mrf.mxu3 }
 0x319   : > { %v1399_v24 = vpop.f32.mrf.mxu1 }
 0x31a   : > { %v4244_v5 = vadd.f32 %v3991_v56, %v2055_v54  ;;  %v1400_v41 = vadd.f32 %v1399_v24, %v13389_v18  ;;  %v2911_v56 = vrot.slane %v2909_v45, 5  ;;  %v2919_v54 = vshll.u32 %v339_v46, 16  ;;  %v13391_v18 = vld [vmem:[#allocation47_spill] sm:$0xff] }
 0x31b   : > { %v4568_v17 = vpop.f32.mrf.mxu0 }
 0x31c   : > { %1438 = vmatmul.bf16.gmra.mxu1 %v11243_v29  ;;  %1844 = vmatmul.bf16.gmra.mxu2 %v11341_v27  ;;  %v11344_v50 = vadd.f32 %v4565_v6, %v4244_v5  ;;  %v2913_v6 = vshrl.u32 %v338_v58, 16  ;;  %v2912_v20 = vsel %vm10547_vm2, %v2907_v26, %v2911_v56  ;;  %v3634_v5 = vunpack.c.l.b16 %v2902_v62 }
 0x31d   : > { %4033 = vmatmul.bf16.gmra.mxu3 %v11282_v55  ;;  %v3635_v39 = vunpack.c.l.b16 %v2912_v20  ;;  %v13394_v20 = vld [vmem:[#allocation50_spill] sm:$0xff] }
 0x31e   : > { %13388 = vst [vmem:[#allocation131_spill] sm:$0xff] %v11344_v50  ;;  %4607 = vmatmul.bf16.gmra.mxu0 %v11337_v52  ;;  %v2915_v45 = vrot.slane %v2913_v6, 4  ;;  %v2925_v50 = vrot.slane %v2923_v48, 4  ;;  %v11362_v6 = vld [vmem:[%s10212_s13 + $0x168] sm:$0xff] }
 0x31f   : > { %v1805_v60 = vpop.f32.mrf.mxu2 }
 0x320   : > { %v2056_v47 = vadd.f32 %v1805_v60, %v1400_v41  ;;  %v3994_v34 = vpop.f32.mrf.mxu3  ;;  %v2921_v60 = vrot.slane %v2919_v54, 5  ;;  %v2916_v26 = vor.u32 %v2915_v45, %v2911_v56 }
 0x321   : > { %v1401_v29 = vpop.f32.mrf.mxu1 }
 0x322   : > { %v4245_v35 = vadd.f32 %v3994_v34, %v2056_v47  ;;  %v1402_v41 = vadd.f32 %v1401_v29, %v13391_v18  ;;  %v11358_v34 = vpack.c.b16 %v3635_v39, %v3634_v5  ;;  %v2926_v62 = vor.u32 %v2925_v50, %v2921_v60  ;;  %v341_v5 = vld [vmem:[%s10212_s13 + $0x168] sm:$0xf]  ;;  %v342_v39 = vld [vmem:[%s10212_s13 + $0x16c] sm:$0xf] }
 0x323   : > { %v4570_v32 = vpop.f32.mrf.mxu0 }
 0x324   : > { %v11354_v24 = vadd.f32 %v4568_v17, %v4245_v35  ;;  %13392 = vst [vmem:[#allocation47_spill] sm:$0xff] %v11358_v34  ;;  %v2929_v35 = vshll.u32 %v340_v12, 16  ;;  %v2927_v54 = vrot.slane %v2926_v62, 4  ;;  %v2937_v12 = vshll.u32 %v341_v5, 16 }
 0x326   : > { %13390 = vst [vmem:[#allocation43_spill] sm:$0xff] %v11354_v24  ;;  %v2931_v48 = vrot.slane %v2929_v35, 5 }
 0x327   : > { %v1807_v11 = vpop.f32.mrf.mxu2 }
 0x328   : > { %v2057_v58 = vadd.f32 %v1807_v11, %v1402_v41  ;;  %v3996_v33 = vpop.f32.mrf.mxu3  ;;  %v2917_v11 = vrot.slane %v2916_v26, 4  ;;  %v2932_v26 = vsel %vm10547_vm2, %v2927_v54, %v2931_v48 }
 0x329   : > { %v1404_v47 = vpop.f32.mrf.mxu1 }
 0x32a   : > { %v4246_v46 = vadd.f32 %v3996_v33, %v2057_v58  ;;  %v1405_v56 = vadd.f32 %v1404_v47, %v13394_v20  ;;  %v2922_v41 = vsel %vm10547_vm2, %v2917_v11, %v2921_v60  ;;  %v2943_v47 = vshll.u32 %v342_v39, 16 }
 0x32b   : > { %v4573_v17 = vpop.f32.mrf.mxu0  ;;  %v3636_v35 = vunpack.c.l.b16 %v2922_v41  ;;  %v3637_v20 = vunpack.c.l.b16 %v2932_v26 }
 0x32c   : > { %1443 = vmatmul.bf16.gmra.mxu1 %v11264_v25  ;;  %1849 = vmatmul.bf16.gmra.mxu2 %v11362_v6  ;;  %v11365_v29 = vadd.f32 %v4570_v32, %v4246_v46  ;;  %v2934_v32 = vshrl.u32 %v341_v5, 16  ;;  %v2947_v46 = vshrl.u32 %v342_v39, 16  ;;  %v2945_v60 = vrot.slane %v2943_v47, 5  ;;  %v343_v5 = vld [vmem:[%s10212_s13 + $0x170] sm:$0xf] }
 0x32d   : > { %4038 = vmatmul.bf16.gmra.mxu3 %v11303_v61  ;;  %v11380_v53 = vpack.c.b16 %v3637_v20, %v3636_v35  ;;  %v2953_v41 = vshll.u32 %v343_v5, 16  ;;  %v344_v47 = vld [vmem:[%s10212_s13 + $0x174] sm:$0xf] }
 0x32e   : > { %13393 = vst [vmem:[#allocation132_spill] sm:$0xff] %v11365_v29  ;;  %4612 = vmatmul.bf16.gmra.mxu0 %v11358_v34  ;;  %v13396_v29 = vld [vmem:[#allocation53_spill] sm:$0xff]  ;;  %v2949_v11 = vrot.slane %v2947_v46, 4 }
 0x32f   : > { %v1810_v50 = vpop.f32.mrf.mxu2  ;;  %13397 = vst [vmem:[#allocation53_spill] sm:$0xff] %v11380_v53 }
 0x330   : > { %v2058_v45 = vadd.f32 %v1810_v50, %v1405_v56  ;;  %v3999_v25 = vpop.f32.mrf.mxu3  ;;  %v2936_v56 = vrot.slane %v2934_v32, 4  ;;  %v2939_v50 = vrot.slane %v2937_v12, 5  ;;  %v2950_v39 = vor.u32 %v2949_v11, %v2945_v60  ;;  %v11384_v32 = vld [vmem:[%s10212_s13 + $0x170] sm:$0xff] }
 0x331   : > { %v1406_v18 = vpop.f32.mrf.mxu1 }
 0x332   : > { %v4247_v58 = vadd.f32 %v3999_v25, %v2058_v45  ;;  %v1407_v24 = vadd.f32 %v1406_v18, %v13396_v29  ;;  %v2940_v54 = vor.u32 %v2939_v50, %v2936_v56  ;;  %v2951_v12 = vrot.slane %v2950_v39, 4 }
 0x333   : > { %v4575_v33 = vpop.f32.mrf.mxu0 }
 0x334   : > { %v11376_v62 = vadd.f32 %v4573_v17, %v4247_v58  ;;  %v2955_v58 = vrot.slane %v2953_v41, 5  ;;  %v13401_v41 = vld [vmem:[#allocation59_spill] sm:$0xff] }
 0x336   : > { %13395 = vst [vmem:[#allocation50_spill] sm:$0xff] %v11376_v62  ;;  %v2956_v11 = vsel %vm10547_vm2, %v2951_v12, %v2955_v58 }
 0x337   : > { %v1812_v61 = vpop.f32.mrf.mxu2 }
 0x338   : > { %v2059_v45 = vadd.f32 %v1812_v61, %v1407_v24  ;;  %v4001_v25 = vpop.f32.mrf.mxu3  ;;  %v2941_v61 = vrot.slane %v2940_v54, 4  ;;  %v13399_v24 = vld [vmem:[#allocation56_spill] sm:$0xff] }
 0x339   : > { %v1409_v55 = vpop.f32.mrf.mxu1 }
 0x33a   : > { %v4248_v17 = vadd.f32 %v4001_v25, %v2059_v45  ;;  %v1410_v18 = vadd.f32 %v1409_v55, %v13399_v24  ;;  %v2946_v20 = vsel %vm10547_vm2, %v2941_v61, %v2945_v60  ;;  %v2963_v45 = vshll.u32 %v344_v47, 16  ;;  %v345_v60 = vld [vmem:[%s10212_s13 + $0x178] sm:$0x1] }
 0x33b   : > { %v4578_v48 = vpop.f32.mrf.mxu0  ;;  %v2967_v25 = vshrl.u32 %v344_v47, 16  ;;  %v3638_v54 = vunpack.c.l.b16 %v2946_v20 }
 0x33c   : > { %1448 = vmatmul.bf16.gmra.mxu1 %v11286_v40  ;;  %1854 = vmatmul.bf16.gmra.mxu2 %v11384_v32  ;;  %v11387_v29 = vadd.f32 %v4575_v33, %v4248_v17  ;;  %v2957_v33 = vshrl.u32 %v343_v5, 16  ;;  %v3639_v17 = vunpack.c.l.b16 %v2956_v11  ;;  %v13404_v11 = vld [vmem:[#allocation62_spill] sm:$0xff] }
 0x33d   : > { %4043 = vmatmul.bf16.gmra.mxu3 %v11337_v52 }
 0x33e   : > { %13398 = vst [vmem:[#allocation133_spill] sm:$0xff] %v11387_v29  ;;  %4617 = vmatmul.bf16.gmra.mxu0 %v11380_v53  ;;  %v2959_v39 = vrot.slane %v2957_v33, 4  ;;  %v11405_v33 = vld [vmem:[%s10212_s13 + $0x17c] sm:$0xff] }
 0x33f   : > { %v1815_v26 = vpop.f32.mrf.mxu2 }
 0x340   : > { %v2060_v46 = vadd.f32 %v1815_v26, %v1410_v18  ;;  %v4004_v35 = vpop.f32.mrf.mxu3  ;;  %v2965_v18 = vrot.slane %v2963_v45, 5  ;;  %v2969_v26 = vrot.slane %v2967_v25, 4  ;;  %v2960_v12 = vor.u32 %v2959_v39, %v2955_v58  ;;  %v347_v39 = vld [vmem:[%s10212_s13 + $0x180] sm:$0xf] }
 0x341   : > { %v1411_v40 = vpop.f32.mrf.mxu1 }
 0x342   : > { %v4249_v56 = vadd.f32 %v4004_v35, %v2060_v46  ;;  %v1412_v24 = vadd.f32 %v1411_v40, %v13401_v41  ;;  %v11401_v35 = vpack.c.b16 %v3639_v17, %v3638_v54  ;;  %v2970_v20 = vor.u32 %v2969_v26, %v2965_v18  ;;  %v346_v54 = vld [vmem:[%s10212_s13 + $0x17c] sm:$0xf] }
 0x343   : > { %v4580_v50 = vpop.f32.mrf.mxu0 }
 0x344   : > { %v11397_v55 = vadd.f32 %v4578_v48, %v4249_v56  ;;  %13402 = vst [vmem:[#allocation59_spill] sm:$0xff] %v11401_v35  ;;  %v2973_v56 = vshll.u32 %v345_v60, 16  ;;  %v2971_v45 = vrot.slane %v2970_v20, 4  ;;  %v2981_v60 = vshll.u32 %v346_v54, 16 }
 0x346   : > { %13400 = vst [vmem:[#allocation56_spill] sm:$0xff] %v11397_v55  ;;  %v2975_v25 = vrot.slane %v2973_v56, 5 }
 0x347   : > { %v1817_v29 = vpop.f32.mrf.mxu2 }
 0x348   : > { %v2061_v5 = vadd.f32 %v1817_v29, %v1412_v24  ;;  %v4006_v61 = vpop.f32.mrf.mxu3  ;;  %v2961_v29 = vrot.slane %v2960_v12, 4  ;;  %v2976_v12 = vsel %vm10547_vm2, %v2971_v45, %v2975_v25 }
 0x349   : > { %v1414_v46 = vpop.f32.mrf.mxu1 }
 0x34a   : > { %v4250_v47 = vadd.f32 %v4006_v61, %v2061_v5  ;;  %v1415_v58 = vadd.f32 %v1414_v46, %v13404_v11  ;;  %v2966_v26 = vsel %vm10547_vm2, %v2961_v29, %v2965_v18  ;;  %v2987_v46 = vshll.u32 %v347_v39, 16 }
 0x34b   : > { %v4583_v48 = vpop.f32.mrf.mxu0  ;;  %v3640_v56 = vunpack.c.l.b16 %v2966_v26  ;;  %v3641_v11 = vunpack.c.l.b16 %v2976_v12 }
 0x34c   : > { %1453 = vmatmul.bf16.gmra.mxu1 %v11307_v13  ;;  %1859 = vmatmul.bf16.gmra.mxu2 %v11405_v33  ;;  %v11408_v40 = vadd.f32 %v4580_v50, %v4250_v47  ;;  %v2978_v50 = vshrl.u32 %v346_v54, 16  ;;  %v2991_v47 = vshrl.u32 %v347_v39, 16  ;;  %v2989_v18 = vrot.slane %v2987_v46, 5  ;;  %v348_v54 = vld [vmem:[%s10212_s13 + $0x184] sm:$0xf] }
 0x34d   : > { %4048 = vmatmul.bf16.gmra.mxu3 %v11358_v34  ;;  %v11423_v52 = vpack.c.b16 %v3641_v11, %v3640_v56  ;;  %v2997_v26 = vshll.u32 %v348_v54, 16  ;;  %v349_v46 = vld [vmem:[%s10212_s13 + $0x188] sm:$0xf] }
 0x34e   : > { %13403 = vst [vmem:[#allocation134_spill] sm:$0xff] %v11408_v40  ;;  %4622 = vmatmul.bf16.gmra.mxu0 %v11401_v35  ;;  %v13406_v40 = vld [vmem:[#allocation66_spill] sm:$0xff]  ;;  %v2993_v29 = vrot.slane %v2991_v47, 4 }
 0x34f   : > { %v1820_v17 = vpop.f32.mrf.mxu2  ;;  %13407 = vst [vmem:[#allocation66_spill] sm:$0xff] %v11423_v52 }
 0x350   : > { %v2062_v41 = vadd.f32 %v1820_v17, %v1415_v58  ;;  %v4009_v13 = vpop.f32.mrf.mxu3  ;;  %v2980_v58 = vrot.slane %v2978_v50, 4  ;;  %v2983_v17 = vrot.slane %v2981_v60, 5  ;;  %v2994_v39 = vor.u32 %v2993_v29, %v2989_v18  ;;  %v11427_v50 = vld [vmem:[%s10212_s13 + $0x184] sm:$0xff] }
 0x351   : > { %v1416_v24 = vpop.f32.mrf.mxu1 }
 0x352   : > { %v4251_v5 = vadd.f32 %v4009_v13, %v2062_v41  ;;  %v1417_v55 = vadd.f32 %v1416_v24, %v13406_v40  ;;  %v2984_v45 = vor.u32 %v2983_v17, %v2980_v58  ;;  %v2995_v60 = vrot.slane %v2994_v39, 4 }
 0x353   : > { %v4585_v61 = vpop.f32.mrf.mxu0 }
 0x354   : > { %v11419_v20 = vadd.f32 %v4583_v48, %v4251_v5  ;;  %v2999_v5 = vrot.slane %v2997_v26, 5  ;;  %v13411_v26 = vld [vmem:[#allocation73_spill] sm:$0xff] }
 0x356   : > { %13405 = vst [vmem:[#allocation62_spill] sm:$0xff] %v11419_v20  ;;  %v3000_v29 = vsel %vm10547_vm2, %v2995_v60, %v2999_v5 }
 0x357   : > { %v1822_v62 = vpop.f32.mrf.mxu2 }
 0x358   : > { %v2063_v41 = vadd.f32 %v1822_v62, %v1417_v55  ;;  %v4011_v13 = vpop.f32.mrf.mxu3  ;;  %v2985_v62 = vrot.slane %v2984_v45, 4  ;;  %v13409_v55 = vld [vmem:[#allocation69_spill] sm:$0xff] }
 0x359   : > { %v1419_v34 = vpop.f32.mrf.mxu1 }
 0x35a   : > { %v4252_v48 = vadd.f32 %v4011_v13, %v2063_v41  ;;  %v1420_v24 = vadd.f32 %v1419_v34, %v13409_v55  ;;  %v2990_v11 = vsel %vm10547_vm2, %v2985_v62, %v2989_v18  ;;  %v3007_v41 = vshll.u32 %v349_v46, 16  ;;  %v350_v18 = vld [vmem:[%s10212_s13 + $0x18c] sm:$0x1] }
 0x35b   : > { %v4588_v25 = vpop.f32.mrf.mxu0  ;;  %v3011_v13 = vshrl.u32 %v349_v46, 16  ;;  %v3642_v45 = vunpack.c.l.b16 %v2990_v11 }
 0x35c   : > { %1458 = vmatmul.bf16.gmra.mxu1 %v11341_v27  ;;  %1864 = vmatmul.bf16.gmra.mxu2 %v11427_v50  ;;  %v11430_v40 = vadd.f32 %v4585_v61, %v4252_v48  ;;  %v3001_v61 = vshrl.u32 %v348_v54, 16  ;;  %v3643_v48 = vunpack.c.l.b16 %v3000_v29  ;;  %v13414_v29 = vld [vmem:[#allocation76_spill] sm:$0xff] }
 0x35d   : > { %4053 = vmatmul.bf16.gmra.mxu3 %v11380_v53 }
 0x35e   : > { %13408 = vst [vmem:[#allocation135_spill] sm:$0xff] %v11430_v40  ;;  %4627 = vmatmul.bf16.gmra.mxu0 %v11423_v52  ;;  %v3003_v39 = vrot.slane %v3001_v61, 4  ;;  %v11448_v61 = vld [vmem:[%s10212_s13 + $0x190] sm:$0xff] }
 0x35f   : > { %v1825_v12 = vpop.f32.mrf.mxu2 }
 0x360   : > { %v2064_v47 = vadd.f32 %v1825_v12, %v1420_v24  ;;  %v4014_v56 = vpop.f32.mrf.mxu3  ;;  %v3009_v24 = vrot.slane %v3007_v41, 5  ;;  %v3013_v12 = vrot.slane %v3011_v13, 4  ;;  %v3004_v60 = vor.u32 %v3003_v39, %v2999_v5  ;;  %v352_v39 = vld [vmem:[%s10212_s13 + $0x194] sm:$0xf] }
 0x361   : > { %v1421_v27 = vpop.f32.mrf.mxu1 }
 0x362   : > { %v4253_v58 = vadd.f32 %v4014_v56, %v2064_v47  ;;  %v1422_v55 = vadd.f32 %v1421_v27, %v13411_v26  ;;  %v11444_v56 = vpack.c.b16 %v3643_v48, %v3642_v45  ;;  %v3014_v11 = vor.u32 %v3013_v12, %v3009_v24  ;;  %v351_v45 = vld [vmem:[%s10212_s13 + $0x190] sm:$0xf] }
 0x363   : > { %v4590_v17 = vpop.f32.mrf.mxu0 }
 0x364   : > { %v11440_v34 = vadd.f32 %v4588_v25, %v4253_v58  ;;  %13412 = vst [vmem:[#allocation73_spill] sm:$0xff] %v11444_v56  ;;  %v3017_v58 = vshll.u32 %v350_v18, 16  ;;  %v3015_v41 = vrot.slane %v3014_v11, 4  ;;  %v3025_v18 = vshll.u32 %v351_v45, 16 }
 0x366   : > { %13410 = vst [vmem:[#allocation69_spill] sm:$0xff] %v11440_v34  ;;  %v3019_v13 = vrot.slane %v3017_v58, 5 }
 0x367   : > { %v1827_v40 = vpop.f32.mrf.mxu2 }
 0x368   : > { %v2065_v54 = vadd.f32 %v1827_v40, %v1422_v55  ;;  %v4016_v62 = vpop.f32.mrf.mxu3  ;;  %v3005_v40 = vrot.slane %v3004_v60, 4  ;;  %v3020_v60 = vsel %vm10547_vm2, %v3015_v41, %v3019_v13 }
 0x369   : > { %v1424_v47 = vpop.f32.mrf.mxu1 }
 0x36a   : > { %v4254_v46 = vadd.f32 %v4016_v62, %v2065_v54  ;;  %v1425_v5 = vadd.f32 %v1424_v47, %v13414_v29  ;;  %v3010_v12 = vsel %vm10547_vm2, %v3005_v40, %v3009_v24  ;;  %v3031_v47 = vshll.u32 %v352_v39, 16 }
 0x36b   : > { %v4593_v25 = vpop.f32.mrf.mxu0  ;;  %v3644_v58 = vunpack.c.l.b16 %v3010_v12  ;;  %v3645_v29 = vunpack.c.l.b16 %v3020_v60 }
 0x36c   : > { %1463 = vmatmul.bf16.gmra.mxu1 %v11362_v6  ;;  %1869 = vmatmul.bf16.gmra.mxu2 %v11448_v61  ;;  %v11451_v27 = vadd.f32 %v4590_v17, %v4254_v46  ;;  %v3022_v17 = vshrl.u32 %v351_v45, 16  ;;  %v3035_v46 = vshrl.u32 %v352_v39, 16  ;;  %v3033_v24 = vrot.slane %v3031_v47, 5  ;;  %v353_v45 = vld [vmem:[%s10212_s13 + $0x198] sm:$0xf] }
 0x36d   : > { %4058 = vmatmul.bf16.gmra.mxu3 %v11401_v35  ;;  %v11466_v53 = vpack.c.b16 %v3645_v29, %v3644_v58  ;;  %v3041_v12 = vshll.u32 %v353_v45, 16  ;;  %v354_v47 = vld [vmem:[%s10212_s13 + $0x19c] sm:$0xf] }
 0x36e   : > { %13413 = vst [vmem:[#allocation136_spill] sm:$0xff] %v11451_v27  ;;  %4632 = vmatmul.bf16.gmra.mxu0 %v11444_v56  ;;  %v13416_v27 = vld [vmem:[#allocation80_spill] sm:$0xff]  ;;  %v3037_v40 = vrot.slane %v3035_v46, 4 }
 0x36f   : > { %v1830_v48 = vpop.f32.mrf.mxu2  ;;  %13417 = vst [vmem:[#allocation80_spill] sm:$0xff] %v11466_v53 }
 0x370   : > { %v2066_v26 = vadd.f32 %v1830_v48, %v1425_v5  ;;  %v4019_v6 = vpop.f32.mrf.mxu3  ;;  %v3024_v5 = vrot.slane %v3022_v17, 4  ;;  %v3027_v48 = vrot.slane %v3025_v18, 5  ;;  %v3038_v39 = vor.u32 %v3037_v40, %v3033_v24  ;;  %v11470_v17 = vld [vmem:[%s10212_s13 + $0x198] sm:$0xff] }
 0x371   : > { %v1426_v55 = vpop.f32.mrf.mxu1 }
 0x372   : > { %v4255_v54 = vadd.f32 %v4019_v6, %v2066_v26  ;;  %v1427_v34 = vadd.f32 %v1426_v55, %v13416_v27  ;;  %v3028_v41 = vor.u32 %v3027_v48, %v3024_v5  ;;  %v3039_v18 = vrot.slane %v3038_v39, 4 }
 0x373   : > { %v4595_v62 = vpop.f32.mrf.mxu0 }
 0x374   : > { %v11462_v11 = vadd.f32 %v4593_v25, %v4255_v54  ;;  %v3043_v54 = vrot.slane %v3041_v12, 5  ;;  %v13421_v12 = vld [vmem:[#allocation87_spill] sm:$0xff] }
 0x376   : > { %13415 = vst [vmem:[#allocation76_spill] sm:$0xff] %v11462_v11  ;;  %v3044_v40 = vsel %vm10547_vm2, %v3039_v18, %v3043_v54 }
 0x377   : > { %v1832_v20 = vpop.f32.mrf.mxu2 }
 0x378   : > { %v2067_v26 = vadd.f32 %v1832_v20, %v1427_v34  ;;  %v4021_v6 = vpop.f32.mrf.mxu3  ;;  %v3029_v20 = vrot.slane %v3028_v41, 4  ;;  %v13419_v34 = vld [vmem:[#allocation83_spill] sm:$0xff] }
 0x379   : > { %v1429_v35 = vpop.f32.mrf.mxu1 }
 0x37a   : > { %v4256_v25 = vadd.f32 %v4021_v6, %v2067_v26  ;;  %v1430_v55 = vadd.f32 %v1429_v35, %v13419_v34  ;;  %v3034_v29 = vsel %vm10547_vm2, %v3029_v20, %v3033_v24  ;;  %v3051_v26 = vshll.u32 %v354_v47, 16  ;;  %v355_v24 = vld [vmem:[%s10212_s13 + $0x1a0] sm:$0x1] }
 0x37b   : > { %v4598_v13 = vpop.f32.mrf.mxu0  ;;  %v3055_v6 = vshrl.u32 %v354_v47, 16  ;;  %v3646_v41 = vunpack.c.l.b16 %v3034_v29  ;;  %v3061_v29 = vshll.u32 %v355_v24, 16 }
 0x37c   : > { %1468 = vmatmul.bf16.gmra.mxu1 %v11384_v32  ;;  %1874 = vmatmul.bf16.gmra.mxu2 %v11470_v17  ;;  %v11473_v27 = vadd.f32 %v4595_v62, %v4256_v25  ;;  %v3045_v62 = vshrl.u32 %v353_v45, 16  ;;  %v3647_v25 = vunpack.c.l.b16 %v3044_v40 }
 0x37d   : > { %4063 = vmatmul.bf16.gmra.mxu3 %v11423_v52 }
 0x37e   : > { %13418 = vst [vmem:[#allocation137_spill] sm:$0xff] %v11473_v27  ;;  %4637 = vmatmul.bf16.gmra.mxu0 %v11466_v53  ;;  %v3047_v39 = vrot.slane %v3045_v62, 4  ;;  %v11491_v62 = vld [vmem:[%s10212_s13 + $0x1a4] sm:$0xff] }
 0x37f   : > { %v1835_v60 = vpop.f32.mrf.mxu2 }
 0x380   : > { %v2068_v46 = vadd.f32 %v1835_v60, %v1430_v55  ;;  %v4024_v58 = vpop.f32.mrf.mxu3  ;;  %v3053_v55 = vrot.slane %v3051_v26, 5  ;;  %v3057_v60 = vrot.slane %v3055_v6, 4  ;;  %v3048_v18 = vor.u32 %v3047_v39, %v3043_v54  ;;  %v9434_v54 = vld [vmem:[%s13185_s1 + $0x90] sm:$0xff] }
 0x381   : > { %v1431_v32 = vpop.f32.mrf.mxu1  ;;  %v3063_v6 = vrot.slane %v3061_v29, 5  ;;  %6252 = vmatpush.bf16.msra.mxu2 %v9434_v54  ;;  %v9426_v29 = vld [vmem:[%s13185_s1 + $0x1d0] sm:$0xff] }
 0x382   : > { %v4257_v5 = vadd.f32 %v4024_v58, %v2068_v46  ;;  %v1432_v34 = vadd.f32 %v1431_v32, %v13421_v12  ;;  %v11487_v58 = vpack.c.b16 %v3647_v25, %v3646_v41  ;;  %v3058_v47 = vor.u32 %v3057_v60, %v3053_v55  ;;  %v356_v41 = vld [vmem:[%s10212_s13 + $0x1a4] sm:$0xf]  ;;  %v9450_v54 = vld [vmem:[%s13185_s1 + $0x210] sm:$0xff]  ;;  %5023 = vmatpush.bf16.msra.mxu1 %v9426_v29 }
 0x383   : > { %v4600_v48 = vpop.f32.mrf.mxu0  ;;  %v3066_v60 = vshrl.u32 %v356_v41, 16  ;;  %v3069_v24 = vshll.u32 %v356_v41, 16  ;;  %7340 = vmatpush.bf16.msra.mxu0 %v9450_v54 }
 0x384   : > { %v11483_v35 = vadd.f32 %v4598_v13, %v4257_v5  ;;  %13422 = vst [vmem:[#allocation87_spill] sm:$0xff] %v11487_v58  ;;  %v9442_v5 = vld [vmem:[%s13185_s1 + $0x150] sm:$0xff]  ;;  %v3059_v26 = vrot.slane %v3058_v47, 4 }
 0x385   : > { %6796 = vmatpush.bf16.msra.mxu3 %v9442_v5 }
 0x386   : > { %13420 = vst [vmem:[#allocation83_spill] sm:$0xff] %v11483_v35 }
 0x387   : > { %v1837_v27 = vpop.f32.mrf.mxu2 }
 0x388   : > { %v2069_v45 = vadd.f32 %v1837_v27, %v1432_v34  ;;  %v4026_v20 = vpop.f32.mrf.mxu3  ;;  %v3049_v27 = vrot.slane %v3048_v18, 4 }
 0x389   : > { %v1434_v46 = vpop.f32.mrf.mxu1 }
 0x38a   : > { %v4258_v11 = vadd.f32 %v4026_v20, %v2069_v45  ;;  %v3054_v34 = vsel %vm10547_vm2, %v3049_v27, %v3053_v55 }
 0x38b   : > { %v4603_v13 = vpop.f32.mrf.mxu0  ;;  %v3648_v27 = vunpack.c.l.b16 %v3054_v34 }
 0x38c   : > { %1473 = vmatmul.bf16.gmra.mxu1 %v11405_v33  ;;  %1879 = vmatmul.bf16.gmra.mxu2 %v11491_v62  ;;  %v11494_v32 = vadd.f32 %v4600_v48, %v4258_v11  ;;  %v13424_v33 = vld [vmem:[#allocation90_spill] sm:$0xff]  ;;  %v357_v48 = vld [vmem:[%s10212_s13 + $0x1a8] sm:$0xf] }
 0x38d   : > { %4068 = vmatmul.bf16.gmra.mxu3 %v11444_v56  ;;  %v1435_v40 = vadd.f32 %v1434_v46, %v13424_v33  ;;  %v3064_v46 = vsel %vm10547_vm2, %v3059_v26, %v3063_v6  ;;  %v3075_v18 = vshll.u32 %v357_v48, 16  ;;  %v3079_v47 = vshrl.u32 %v357_v48, 16  ;;  %v13426_v26 = vld [vmem:[#allocation94_spill] sm:$0xff] }
 0x38e   : > { %13423 = vst [vmem:[#allocation138_spill] sm:$0xff] %v11494_v32  ;;  %4642 = vmatmul.bf16.gmra.mxu0 %v11487_v58  ;;  %v3649_v5 = vunpack.c.l.b16 %v3064_v46  ;;  %v3068_v33 = vrot.slane %v3066_v60, 4  ;;  %v11525_v60 = vld [vmem:[%s10212_s13 + $0x1ac] sm:$0xff] }
 0x38f   : > { %v1840_v11 = vpop.f32.mrf.mxu2  ;;  %v3077_v41 = vrot.slane %v3075_v18, 5  ;;  %v13429_v18 = vld [vmem:[#allocation97_spill] sm:$0xff] }
 0x390   : > { %v2070_v25 = vadd.f32 %v1840_v11, %v1435_v40  ;;  %v4029_v39 = vpop.f32.mrf.mxu3  ;;  %v3071_v40 = vrot.slane %v3069_v24, 5  ;;  %v3081_v11 = vrot.slane %v3079_v47, 4  ;;  %v11521_v56 = vpack.c.b16 %v3649_v5, %v3648_v27  ;;  %v359_v5 = vld [vmem:[%s10212_s13 + $0x1b0] sm:$0xf] }
 0x391   : > { %v1436_v12 = vpop.f32.mrf.mxu1 }
 0x392   : > { %v4259_v45 = vadd.f32 %v4029_v39, %v2070_v25  ;;  %v1437_v6 = vadd.f32 %v1436_v12, %v13426_v26  ;;  %v358_v25 = vld [vmem:[%s10212_s13 + $0x1ac] sm:$0xf]  ;;  %13427 = vst [vmem:[#allocation94_spill] sm:$0xff] %v11521_v56  ;;  %v3072_v29 = vor.u32 %v3071_v40, %v3068_v33  ;;  %v3082_v34 = vor.u32 %v3081_v11, %v3077_v41 }
 0x393   : > { %v4605_v20 = vpop.f32.mrf.mxu0  ;;  %v3085_v46 = vshll.u32 %v358_v25, 16 }
 0x394   : > { %v11517_v55 = vadd.f32 %v4603_v13, %v4259_v45  ;;  %v3073_v24 = vrot.slane %v3072_v29, 4  ;;  %v3083_v54 = vrot.slane %v3082_v34, 4  ;;  %v3099_v29 = vshrl.u32 %v359_v5, 16 }
 0x396   : > { %13425 = vst [vmem:[#allocation90_spill] sm:$0xff] %v11517_v55  ;;  %v3078_v26 = vsel %vm10547_vm2, %v3073_v24, %v3077_v41  ;;  %v360_v41 = vld [vmem:[%s10212_s13 + $0x1b4] sm:$0x1] }
 0x397   : > { %v1842_v48 = vpop.f32.mrf.mxu2 }
 0x398   : > { %v2071_v39 = vadd.f32 %v1842_v48, %v1437_v6  ;;  %v4031_v32 = vpop.f32.mrf.mxu3 }
 0x399   : > { %v1439_v35 = vpop.f32.mrf.mxu1 }
 0x39a   : > { %v4260_v13 = vadd.f32 %v4031_v32, %v2071_v39  ;;  %v1440_v47 = vadd.f32 %v1439_v35, %v13429_v18  ;;  %v3087_v32 = vrot.slane %v3085_v46, 5  ;;  %v3095_v39 = vshll.u32 %v359_v5, 16  ;;  %v13431_v18 = vld [vmem:[#allocation100_spill] sm:$0xff] }
 0x39b   : > { %v4608_v45 = vpop.f32.mrf.mxu0 }
 0x39c   : > { %1478 = vmatmul.bf16.gmra.mxu1 %v11427_v50  ;;  %1884 = vmatmul.bf16.gmra.mxu2 %v11525_v60  ;;  %v11528_v12 = vadd.f32 %v4605_v20, %v4260_v13  ;;  %v3089_v20 = vshrl.u32 %v358_v25, 16  ;;  %v3088_v48 = vsel %vm10547_vm2, %v3083_v54, %v3087_v32  ;;  %v3650_v13 = vunpack.c.l.b16 %v3078_v26 }
 0x39d   : > { %4073 = vmatmul.bf16.gmra.mxu3 %v11466_v53  ;;  %v3651_v34 = vunpack.c.l.b16 %v3088_v48  ;;  %v13434_v48 = vld [vmem:[#allocation2_spill] sm:$0xff] }
 0x39e   : > { %13428 = vst [vmem:[#allocation139_spill] sm:$0xff] %v11528_v12  ;;  %4647 = vmatmul.bf16.gmra.mxu0 %v11521_v56  ;;  %v3091_v46 = vrot.slane %v3089_v20, 4  ;;  %v3101_v12 = vrot.slane %v3099_v29, 4  ;;  %v11546_v20 = vld [vmem:[%s10212_s13 + $0x1b8] sm:$0xff] }
 0x39f   : > { %v1845_v27 = vpop.f32.mrf.mxu2 }
 0x3a0   : > { %v2072_v33 = vadd.f32 %v1845_v27, %v1440_v47  ;;  %v4034_v40 = vpop.f32.mrf.mxu3  ;;  %v3097_v27 = vrot.slane %v3095_v39, 5  ;;  %v3092_v54 = vor.u32 %v3091_v46, %v3087_v32 }
 0x3a1   : > { %v1441_v50 = vpop.f32.mrf.mxu1 }
 0x3a2   : > { %v4261_v6 = vadd.f32 %v4034_v40, %v2072_v33  ;;  %v1442_v47 = vadd.f32 %v1441_v50, %v13431_v18  ;;  %v11542_v40 = vpack.c.b16 %v3651_v34, %v3650_v13  ;;  %v3102_v26 = vor.u32 %v3101_v12, %v3097_v27  ;;  %v361_v13 = vld [vmem:[%s10212_s13 + $0x1b8] sm:$0xf]  ;;  %v362_v34 = vld [vmem:[%s10212_s13 + $0x1bc] sm:$0xf] }
 0x3a3   : > { %v4610_v11 = vpop.f32.mrf.mxu0 }
 0x3a4   : > { %v11538_v35 = vadd.f32 %v4608_v45, %v4261_v6  ;;  %13432 = vst [vmem:[#allocation100_spill] sm:$0xff] %v11542_v40  ;;  %v3105_v6 = vshll.u32 %v360_v41, 16  ;;  %v3103_v39 = vrot.slane %v3102_v26, 4  ;;  %v3113_v41 = vshll.u32 %v361_v13, 16 }
 0x3a6   : > { %13430 = vst [vmem:[#allocation97_spill] sm:$0xff] %v11538_v35  ;;  %v3107_v29 = vrot.slane %v3105_v6, 5 }
 0x3a7   : > { %v1847_v55 = vpop.f32.mrf.mxu2 }
 0x3a8   : > { %v2073_v25 = vadd.f32 %v1847_v55, %v1442_v47  ;;  %v4036_v24 = vpop.f32.mrf.mxu3  ;;  %v3093_v55 = vrot.slane %v3092_v54, 4  ;;  %v3108_v54 = vsel %vm10547_vm2, %v3103_v39, %v3107_v29 }
 0x3a9   : > { %v1444_v33 = vpop.f32.mrf.mxu1 }
 0x3aa   : > { %v4262_v5 = vadd.f32 %v4036_v24, %v2073_v25  ;;  %v1445_v32 = vadd.f32 %v1444_v33, %v13434_v48  ;;  %v3098_v47 = vsel %vm10547_vm2, %v3093_v55, %v3097_v27  ;;  %v3119_v33 = vshll.u32 %v362_v34, 16 }
 0x3ab   : > { %v4613_v45 = vpop.f32.mrf.mxu0  ;;  %v3652_v6 = vunpack.c.l.b16 %v3098_v47  ;;  %v3653_v48 = vunpack.c.l.b16 %v3108_v54 }
 0x3ac   : > { %1483 = vmatmul.bf16.gmra.mxu1 %v11448_v61  ;;  %1889 = vmatmul.bf16.gmra.mxu2 %v11546_v20  ;;  %v11549_v50 = vadd.f32 %v4610_v11, %v4262_v5  ;;  %v3110_v11 = vshrl.u32 %v361_v13, 16  ;;  %v3123_v5 = vshrl.u32 %v362_v34, 16  ;;  %v3121_v27 = vrot.slane %v3119_v33, 5  ;;  %v363_v13 = vld [vmem:[%s10212_s13 + $0x1c0] sm:$0xf] }
 0x3ad   : > { %4078 = vmatmul.bf16.gmra.mxu3 %v11487_v58  ;;  %v11564_v52 = vpack.c.b16 %v3653_v48, %v3652_v6  ;;  %v3129_v47 = vshll.u32 %v363_v13, 16  ;;  %v364_v33 = vld [vmem:[%s10212_s13 + $0x1c4] sm:$0xf] }
 0x3ae   : > { %13433 = vst [vmem:[#allocation140_spill] sm:$0xff] %v11549_v50  ;;  %4652 = vmatmul.bf16.gmra.mxu0 %v11542_v40  ;;  %v13436_v50 = vld [vmem:[#allocation5_spill] sm:$0xff]  ;;  %v3125_v55 = vrot.slane %v3123_v5, 4 }
 0x3af   : > { %v1850_v12 = vpop.f32.mrf.mxu2  ;;  %13437 = vst [vmem:[#allocation5_spill] sm:$0xff] %v11564_v52 }
 0x3b0   : > { %v2074_v46 = vadd.f32 %v1850_v12, %v1445_v32  ;;  %v4039_v61 = vpop.f32.mrf.mxu3  ;;  %v3112_v32 = vrot.slane %v3110_v11, 4  ;;  %v3115_v12 = vrot.slane %v3113_v41, 5  ;;  %v3126_v34 = vor.u32 %v3125_v55, %v3121_v27  ;;  %v11568_v11 = vld [vmem:[%s10212_s13 + $0x1c0] sm:$0xff] }
 0x3b1   : > { %v1446_v18 = vpop.f32.mrf.mxu1 }
 0x3b2   : > { %v4263_v25 = vadd.f32 %v4039_v61, %v2074_v46  ;;  %v1447_v35 = vadd.f32 %v1446_v18, %v13436_v50  ;;  %v3116_v39 = vor.u32 %v3115_v12, %v3112_v32  ;;  %v3127_v41 = vrot.slane %v3126_v34, 4 }
 0x3b3   : > { %v4615_v24 = vpop.f32.mrf.mxu0 }
 0x3b4   : > { %v11560_v26 = vadd.f32 %v4613_v45, %v4263_v25  ;;  %v3131_v25 = vrot.slane %v3129_v47, 5  ;;  %v13441_v47 = vld [vmem:[#allocation11_spill] sm:$0xff] }
 0x3b6   : > { %13435 = vst [vmem:[#allocation2_spill] sm:$0xff] %v11560_v26  ;;  %v3132_v55 = vsel %vm10547_vm2, %v3127_v41, %v3131_v25 }
 0x3b7   : > { %v1852_v58 = vpop.f32.mrf.mxu2 }
 0x3b8   : > { %v2075_v46 = vadd.f32 %v1852_v58, %v1447_v35  ;;  %v4041_v61 = vpop.f32.mrf.mxu3  ;;  %v3117_v58 = vrot.slane %v3116_v39, 4  ;;  %v13439_v35 = vld [vmem:[#allocation8_spill] sm:$0xff] }
 0x3b9   : > { %v1449_v53 = vpop.f32.mrf.mxu1 }
 0x3ba   : > { %v4264_v45 = vadd.f32 %v4041_v61, %v2075_v46  ;;  %v1450_v18 = vadd.f32 %v1449_v53, %v13439_v35  ;;  %v3122_v48 = vsel %vm10547_vm2, %v3117_v58, %v3121_v27  ;;  %v3139_v46 = vshll.u32 %v364_v33, 16  ;;  %v365_v27 = vld [vmem:[%s10212_s13 + $0x1c8] sm:$0x1] }
 0x3bb   : > { %v4618_v29 = vpop.f32.mrf.mxu0  ;;  %v3143_v61 = vshrl.u32 %v364_v33, 16  ;;  %v3654_v39 = vunpack.c.l.b16 %v3122_v48 }
 0x3bc   : > { %1488 = vmatmul.bf16.gmra.mxu1 %v11470_v17  ;;  %1894 = vmatmul.bf16.gmra.mxu2 %v11568_v11  ;;  %v11571_v50 = vadd.f32 %v4615_v24, %v4264_v45  ;;  %v3133_v24 = vshrl.u32 %v363_v13, 16  ;;  %v3655_v45 = vunpack.c.l.b16 %v3132_v55  ;;  %v13444_v55 = vld [vmem:[#allocation14_spill] sm:$0xff] }
 0x3bd   : > { %4083 = vmatmul.bf16.gmra.mxu3 %v11521_v56 }
 0x3be   : > { %13438 = vst [vmem:[#allocation141_spill] sm:$0xff] %v11571_v50  ;;  %4657 = vmatmul.bf16.gmra.mxu0 %v11564_v52  ;;  %v3135_v34 = vrot.slane %v3133_v24, 4  ;;  %v11589_v24 = vld [vmem:[%s10212_s13 + $0x1cc] sm:$0xff] }
 0x3bf   : > { %v1855_v54 = vpop.f32.mrf.mxu2 }
 0x3c0   : > { %v2076_v5 = vadd.f32 %v1855_v54, %v1450_v18  ;;  %v4044_v6 = vpop.f32.mrf.mxu3  ;;  %v3141_v18 = vrot.slane %v3139_v46, 5  ;;  %v3145_v54 = vrot.slane %v3143_v61, 4  ;;  %v3136_v41 = vor.u32 %v3135_v34, %v3131_v25  ;;  %v367_v34 = vld [vmem:[%s10212_s13 + $0x1d0] sm:$0xf] }
 0x3c1   : > { %v1451_v17 = vpop.f32.mrf.mxu1 }
 0x3c2   : > { %v4265_v32 = vadd.f32 %v4044_v6, %v2076_v5  ;;  %v1452_v35 = vadd.f32 %v1451_v17, %v13441_v47  ;;  %v11585_v6 = vpack.c.b16 %v3655_v45, %v3654_v39  ;;  %v3146_v48 = vor.u32 %v3145_v54, %v3141_v18  ;;  %v366_v39 = vld [vmem:[%s10212_s13 + $0x1cc] sm:$0xf] }
 0x3c3   : > { %v4620_v12 = vpop.f32.mrf.mxu0 }
 0x3c4   : > { %v11581_v53 = vadd.f32 %v4618_v29, %v4265_v32  ;;  %13442 = vst [vmem:[#allocation11_spill] sm:$0xff] %v11585_v6  ;;  %v3149_v32 = vshll.u32 %v365_v27, 16  ;;  %v3147_v46 = vrot.slane %v3146_v48, 4  ;;  %v3157_v27 = vshll.u32 %v366_v39, 16 }
 0x3c6   : > { %13440 = vst [vmem:[#allocation8_spill] sm:$0xff] %v11581_v53  ;;  %v3151_v61 = vrot.slane %v3149_v32, 5 }
 0x3c7   : > { %v1857_v50 = vpop.f32.mrf.mxu2 }
 0x3c8   : > { %v2077_v13 = vadd.f32 %v1857_v50, %v1452_v35  ;;  %v4046_v58 = vpop.f32.mrf.mxu3  ;;  %v3137_v50 = vrot.slane %v3136_v41, 4  ;;  %v3152_v41 = vsel %vm10547_vm2, %v3147_v46, %v3151_v61 }
 0x3c9   : > { %v1454_v5 = vpop.f32.mrf.mxu1 }
 0x3ca   : > { %v4266_v33 = vadd.f32 %v4046_v58, %v2077_v13  ;;  %v1455_v25 = vadd.f32 %v1454_v5, %v13444_v55  ;;  %v3142_v54 = vsel %vm10547_vm2, %v3137_v50, %v3141_v18  ;;  %v3163_v5 = vshll.u32 %v367_v34, 16 }
 0x3cb   : > { %v4623_v29 = vpop.f32.mrf.mxu0  ;;  %v3656_v32 = vunpack.c.l.b16 %v3142_v54  ;;  %v3657_v55 = vunpack.c.l.b16 %v3152_v41 }
 0x3cc   : > { %1493 = vmatmul.bf16.gmra.mxu1 %v11491_v62  ;;  %1899 = vmatmul.bf16.gmra.mxu2 %v11589_v24  ;;  %v11592_v17 = vadd.f32 %v4620_v12, %v4266_v33  ;;  %v3154_v12 = vshrl.u32 %v366_v39, 16  ;;  %v3167_v33 = vshrl.u32 %v367_v34, 16  ;;  %v3165_v18 = vrot.slane %v3163_v5, 5  ;;  %v368_v39 = vld [vmem:[%s10212_s13 + $0x1d4] sm:$0xf] }
 0x3cd   : > { %4088 = vmatmul.bf16.gmra.mxu3 %v11542_v40  ;;  %v11607_v56 = vpack.c.b16 %v3657_v55, %v3656_v32  ;;  %v3173_v54 = vshll.u32 %v368_v39, 16  ;;  %v369_v5 = vld [vmem:[%s10212_s13 + $0x1d8] sm:$0xf] }
 0x3ce   : > { %13443 = vst [vmem:[#allocation142_spill] sm:$0xff] %v11592_v17  ;;  %4662 = vmatmul.bf16.gmra.mxu0 %v11585_v6  ;;  %v13446_v17 = vld [vmem:[#allocation17_spill] sm:$0xff]  ;;  %v3169_v50 = vrot.slane %v3167_v33, 4 }
 0x3cf   : > { %v1860_v45 = vpop.f32.mrf.mxu2  ;;  %13447 = vst [vmem:[#allocation17_spill] sm:$0xff] %v11607_v56 }
 0x3d0   : > { %v2078_v47 = vadd.f32 %v1860_v45, %v1455_v25  ;;  %v4049_v62 = vpop.f32.mrf.mxu3  ;;  %v3156_v25 = vrot.slane %v3154_v12, 4  ;;  %v3159_v45 = vrot.slane %v3157_v27, 5  ;;  %v3170_v34 = vor.u32 %v3169_v50, %v3165_v18  ;;  %v11611_v12 = vld [vmem:[%s10212_s13 + $0x1d4] sm:$0xff] }
 0x3d1   : > { %v1456_v35 = vpop.f32.mrf.mxu1 }
 0x3d2   : > { %v4267_v13 = vadd.f32 %v4049_v62, %v2078_v47  ;;  %v1457_v53 = vadd.f32 %v1456_v35, %v13446_v17  ;;  %v3160_v46 = vor.u32 %v3159_v45, %v3156_v25  ;;  %v3171_v27 = vrot.slane %v3170_v34, 4 }
 0x3d3   : > { %v4625_v58 = vpop.f32.mrf.mxu0 }
 0x3d4   : > { %v11603_v48 = vadd.f32 %v4623_v29, %v4267_v13  ;;  %v3175_v13 = vrot.slane %v3173_v54, 5  ;;  %v13451_v54 = vld [vmem:[#allocation23_spill] sm:$0xff] }
 0x3d6   : > { %13445 = vst [vmem:[#allocation14_spill] sm:$0xff] %v11603_v48  ;;  %v3176_v50 = vsel %vm10547_vm2, %v3171_v27, %v3175_v13 }
 0x3d7   : > { %v1862_v26 = vpop.f32.mrf.mxu2 }
 0x3d8   : > { %v2079_v47 = vadd.f32 %v1862_v26, %v1457_v53  ;;  %v4051_v62 = vpop.f32.mrf.mxu3  ;;  %v3161_v26 = vrot.slane %v3160_v46, 4  ;;  %v13449_v53 = vld [vmem:[#allocation20_spill] sm:$0xff] }
 0x3d9   : > { %v1459_v40 = vpop.f32.mrf.mxu1 }
 0x3da   : > { %v4268_v29 = vadd.f32 %v4051_v62, %v2079_v47  ;;  %v1460_v35 = vadd.f32 %v1459_v40, %v13449_v53  ;;  %v3166_v55 = vsel %vm10547_vm2, %v3161_v26, %v3165_v18  ;;  %v3183_v47 = vshll.u32 %v369_v5, 16  ;;  %v370_v18 = vld [vmem:[%s10212_s13 + $0x1dc] sm:$0x1] }
 0x3db   : > { %v4628_v61 = vpop.f32.mrf.mxu0  ;;  %v3187_v62 = vshrl.u32 %v369_v5, 16  ;;  %v3658_v46 = vunpack.c.l.b16 %v3166_v55 }
 0x3dc   : > { %1498 = vmatmul.bf16.gmra.mxu1 %v11525_v60  ;;  %1904 = vmatmul.bf16.gmra.mxu2 %v11611_v12  ;;  %v11614_v17 = vadd.f32 %v4625_v58, %v4268_v29  ;;  %v3177_v58 = vshrl.u32 %v368_v39, 16  ;;  %v3659_v29 = vunpack.c.l.b16 %v3176_v50  ;;  %v13454_v50 = vld [vmem:[#allocation26_spill] sm:$0xff] }
 0x3dd   : > { %4093 = vmatmul.bf16.gmra.mxu3 %v11564_v52 }
 0x3de   : > { %13448 = vst [vmem:[#allocation143_spill] sm:$0xff] %v11614_v17  ;;  %4667 = vmatmul.bf16.gmra.mxu0 %v11607_v56  ;;  %v3179_v34 = vrot.slane %v3177_v58, 4  ;;  %v11632_v58 = vld [vmem:[%s10212_s13 + $0x1e0] sm:$0xff] }
 0x3df   : > { %v1865_v41 = vpop.f32.mrf.mxu2 }
 0x3e0   : > { %v2080_v33 = vadd.f32 %v1865_v41, %v1460_v35  ;;  %v4054_v32 = vpop.f32.mrf.mxu3  ;;  %v3185_v35 = vrot.slane %v3183_v47, 5  ;;  %v3189_v41 = vrot.slane %v3187_v62, 4  ;;  %v3180_v27 = vor.u32 %v3179_v34, %v3175_v13  ;;  %v372_v34 = vld [vmem:[%s10212_s13 + $0x1e4] sm:$0xf] }
 0x3e1   : > { %v1461_v60 = vpop.f32.mrf.mxu1 }
 0x3e2   : > { %v4269_v25 = vadd.f32 %v4054_v32, %v2080_v33  ;;  %v1462_v53 = vadd.f32 %v1461_v60, %v13451_v54  ;;  %v11628_v32 = vpack.c.b16 %v3659_v29, %v3658_v46  ;;  %v3190_v55 = vor.u32 %v3189_v41, %v3185_v35  ;;  %v371_v46 = vld [vmem:[%s10212_s13 + $0x1e0] sm:$0xf] }
 0x3e3   : > { %v4630_v45 = vpop.f32.mrf.mxu0 }
 0x3e4   : > { %v11624_v40 = vadd.f32 %v4628_v61, %v4269_v25  ;;  %13452 = vst [vmem:[#allocation23_spill] sm:$0xff] %v11628_v32  ;;  %v3193_v25 = vshll.u32 %v370_v18, 16  ;;  %v3191_v47 = vrot.slane %v3190_v55, 4  ;;  %v3201_v18 = vshll.u32 %v371_v46, 16 }
 0x3e6   : > { %13450 = vst [vmem:[#allocation20_spill] sm:$0xff] %v11624_v40  ;;  %v3195_v62 = vrot.slane %v3193_v25, 5 }
 0x3e7   : > { %v1867_v17 = vpop.f32.mrf.mxu2 }
 0x3e8   : > { %v2081_v39 = vadd.f32 %v1867_v17, %v1462_v53  ;;  %v4056_v26 = vpop.f32.mrf.mxu3  ;;  %v3181_v17 = vrot.slane %v3180_v27, 4  ;;  %v3196_v27 = vsel %vm10547_vm2, %v3191_v47, %v3195_v62 }
 0x3e9   : > { %v1464_v33 = vpop.f32.mrf.mxu1 }
 0x3ea   : > { %v4270_v5 = vadd.f32 %v4056_v26, %v2081_v39  ;;  %v1465_v13 = vadd.f32 %v1464_v33, %v13454_v50  ;;  %v3186_v41 = vsel %vm10547_vm2, %v3181_v17, %v3185_v35  ;;  %v3207_v33 = vshll.u32 %v372_v34, 16 }
 0x3eb   : > { %v4633_v61 = vpop.f32.mrf.mxu0  ;;  %v3660_v25 = vunpack.c.l.b16 %v3186_v41  ;;  %v3661_v50 = vunpack.c.l.b16 %v3196_v27 }
 0x3ec   : > { %1503 = vmatmul.bf16.gmra.mxu1 %v11546_v20  ;;  %1909 = vmatmul.bf16.gmra.mxu2 %v11632_v58  ;;  %v11635_v60 = vadd.f32 %v4630_v45, %v4270_v5  ;;  %v3198_v45 = vshrl.u32 %v371_v46, 16  ;;  %v3211_v5 = vshrl.u32 %v372_v34, 16  ;;  %v3209_v35 = vrot.slane %v3207_v33, 5  ;;  %v373_v46 = vld [vmem:[%s10212_s13 + $0x1e8] sm:$0xf] }
 0x3ed   : > { %4098 = vmatmul.bf16.gmra.mxu3 %v11585_v6  ;;  %v11650_v52 = vpack.c.b16 %v3661_v50, %v3660_v25  ;;  %v3217_v41 = vshll.u32 %v373_v46, 16  ;;  %v374_v33 = vld [vmem:[%s10212_s13 + $0x1ec] sm:$0xf] }
 0x3ee   : > { %13453 = vst [vmem:[#allocation144_spill] sm:$0xff] %v11635_v60  ;;  %4672 = vmatmul.bf16.gmra.mxu0 %v11628_v32  ;;  %v13456_v60 = vld [vmem:[#allocation29_spill] sm:$0xff]  ;;  %v3213_v17 = vrot.slane %v3211_v5, 4 }
 0x3ef   : > { %v1870_v29 = vpop.f32.mrf.mxu2  ;;  %13457 = vst [vmem:[#allocation29_spill] sm:$0xff] %v11650_v52 }
 0x3f0   : > { %v2082_v54 = vadd.f32 %v1870_v29, %v1465_v13  ;;  %v4059_v20 = vpop.f32.mrf.mxu3  ;;  %v3200_v13 = vrot.slane %v3198_v45, 4  ;;  %v3203_v29 = vrot.slane %v3201_v18, 5  ;;  %v3214_v34 = vor.u32 %v3213_v17, %v3209_v35  ;;  %v11654_v45 = vld [vmem:[%s10212_s13 + $0x1e8] sm:$0xff] }
 0x3f1   : > { %v1466_v53 = vpop.f32.mrf.mxu1 }
 0x3f2   : > { %v4271_v39 = vadd.f32 %v4059_v20, %v2082_v54  ;;  %v1467_v40 = vadd.f32 %v1466_v53, %v13456_v60  ;;  %v3204_v47 = vor.u32 %v3203_v29, %v3200_v13  ;;  %v3215_v18 = vrot.slane %v3214_v34, 4 }
 0x3f3   : > { %v4635_v26 = vpop.f32.mrf.mxu0 }
 0x3f4   : > { %v11646_v55 = vadd.f32 %v4633_v61, %v4271_v39  ;;  %v3219_v39 = vrot.slane %v3217_v41, 5  ;;  %v13461_v41 = vld [vmem:[#allocation35_spill] sm:$0xff] }
 0x3f6   : > { %13455 = vst [vmem:[#allocation26_spill] sm:$0xff] %v11646_v55  ;;  %v3220_v17 = vsel %vm10547_vm2, %v3215_v18, %v3219_v39 }
 0x3f7   : > { %v1872_v48 = vpop.f32.mrf.mxu2 }
 0x3f8   : > { %v2083_v54 = vadd.f32 %v1872_v48, %v1467_v40  ;;  %v4061_v20 = vpop.f32.mrf.mxu3  ;;  %v3205_v48 = vrot.slane %v3204_v47, 4  ;;  %v13459_v40 = vld [vmem:[#allocation32_spill] sm:$0xff] }
 0x3f9   : > { %v1469_v6 = vpop.f32.mrf.mxu1 }
 0x3fa   : > { %v4272_v61 = vadd.f32 %v4061_v20, %v2083_v54  ;;  %v1470_v53 = vadd.f32 %v1469_v6, %v13459_v40  ;;  %v3210_v50 = vsel %vm10547_vm2, %v3205_v48, %v3209_v35  ;;  %v3227_v54 = vshll.u32 %v374_v33, 16  ;;  %v375_v35 = vld [vmem:[%s10212_s13 + $0x1f0] sm:$0x1] }
 0x3fb   : > { %v4638_v62 = vpop.f32.mrf.mxu0  ;;  %v3231_v20 = vshrl.u32 %v374_v33, 16  ;;  %v3662_v47 = vunpack.c.l.b16 %v3210_v50  ;;  %v3237_v50 = vshll.u32 %v375_v35, 16 }
 0x3fc   : > { %1508 = vmatmul.bf16.gmra.mxu1 %v11568_v11  ;;  %1914 = vmatmul.bf16.gmra.mxu2 %v11654_v45  ;;  %v11657_v60 = vadd.f32 %v4635_v26, %v4272_v61  ;;  %v3221_v26 = vshrl.u32 %v373_v46, 16  ;;  %v3663_v61 = vunpack.c.l.b16 %v3220_v17 }
 0x3fd   : > { %4103 = vmatmul.bf16.gmra.mxu3 %v11607_v56 }
 0x3fe   : > { %13458 = vst [vmem:[#allocation145_spill] sm:$0xff] %v11657_v60  ;;  %4677 = vmatmul.bf16.gmra.mxu0 %v11650_v52  ;;  %v3223_v34 = vrot.slane %v3221_v26, 4  ;;  %v11675_v26 = vld [vmem:[%s10212_s13 + $0x1f4] sm:$0xff] }
 0x3ff   : > { %v1875_v27 = vpop.f32.mrf.mxu2 }
 0x400   : > { %v2084_v5 = vadd.f32 %v1875_v27, %v1470_v53  ;;  %v4064_v25 = vpop.f32.mrf.mxu3  ;;  %v3229_v53 = vrot.slane %v3227_v54, 5  ;;  %v3233_v27 = vrot.slane %v3231_v20, 4  ;;  %v3224_v18 = vor.u32 %v3223_v34, %v3219_v39  ;;  %v9433_v39 = vld [vmem:[%s13185_s1 + $0x88] sm:$0xff] }
 0x401   : > { %v1471_v11 = vpop.f32.mrf.mxu1  ;;  %v3239_v20 = vrot.slane %v3237_v50, 5  ;;  %6253 = vmatpush.bf16.msra.mxu2 %v9433_v39  ;;  %v9425_v50 = vld [vmem:[%s13185_s1 + $0x1c8] sm:$0xff] }
 0x402   : > { %v4273_v13 = vadd.f32 %v4064_v25, %v2084_v5  ;;  %v1472_v40 = vadd.f32 %v1471_v11, %v13461_v41  ;;  %v11671_v25 = vpack.c.b16 %v3663_v61, %v3662_v47  ;;  %v3234_v33 = vor.u32 %v3233_v27, %v3229_v53  ;;  %v376_v47 = vld [vmem:[%s10212_s13 + $0x1f4] sm:$0xf]  ;;  %v9449_v39 = vld [vmem:[%s13185_s1 + $0x208] sm:$0xff]  ;;  %5024 = vmatpush.bf16.msra.mxu1 %v9425_v50 }
 0x403   : > { %v4640_v29 = vpop.f32.mrf.mxu0  ;;  %v3242_v27 = vshrl.u32 %v376_v47, 16  ;;  %v3245_v35 = vshll.u32 %v376_v47, 16  ;;  %7341 = vmatpush.bf16.msra.mxu0 %v9449_v39 }
 0x404   : > { %v11667_v6 = vadd.f32 %v4638_v62, %v4273_v13  ;;  %13462 = vst [vmem:[#allocation35_spill] sm:$0xff] %v11671_v25  ;;  %v9441_v13 = vld [vmem:[%s13185_s1 + $0x148] sm:$0xff]  ;;  %v3235_v54 = vrot.slane %v3234_v33, 4 }
 0x405   : > { %6797 = vmatpush.bf16.msra.mxu3 %v9441_v13 }
 0x406   : > { %13460 = vst [vmem:[#allocation32_spill] sm:$0xff] %v11667_v6 }
 0x407   : > { %v1877_v60 = vpop.f32.mrf.mxu2 }
 0x408   : > { %v2085_v46 = vadd.f32 %v1877_v60, %v1472_v40  ;;  %v4066_v48 = vpop.f32.mrf.mxu3  ;;  %v3225_v60 = vrot.slane %v3224_v18, 4 }
 0x409   : > { %v1474_v5 = vpop.f32.mrf.mxu1 }
 0x40a   : > { %v4274_v55 = vadd.f32 %v4066_v48, %v2085_v46  ;;  %v3230_v40 = vsel %vm10547_vm2, %v3225_v60, %v3229_v53 }
 0x40b   : > { %v4643_v62 = vpop.f32.mrf.mxu0  ;;  %v3664_v60 = vunpack.c.l.b16 %v3230_v40 }
 0x40c   : > { %1513 = vmatmul.bf16.gmra.mxu1 %v11589_v24  ;;  %1919 = vmatmul.bf16.gmra.mxu2 %v11675_v26  ;;  %v11678_v11 = vadd.f32 %v4640_v29, %v4274_v55  ;;  %v13464_v24 = vld [vmem:[#allocation38_spill] sm:$0xff]  ;;  %v377_v29 = vld [vmem:[%s10212_s13 + $0x1f8] sm:$0xf] }
 0x40d   : > { %4108 = vmatmul.bf16.gmra.mxu3 %v11628_v32  ;;  %v1475_v17 = vadd.f32 %v1474_v5, %v13464_v24  ;;  %v3240_v5 = vsel %vm10547_vm2, %v3235_v54, %v3239_v20  ;;  %v3251_v18 = vshll.u32 %v377_v29, 16  ;;  %v3255_v33 = vshrl.u32 %v377_v29, 16  ;;  %v13466_v54 = vld [vmem:[#allocation41_spill] sm:$0xff] }
 0x40e   : > { %13463 = vst [vmem:[#allocation146_spill] sm:$0xff] %v11678_v11  ;;  %4682 = vmatmul.bf16.gmra.mxu0 %v11671_v25  ;;  %v3665_v13 = vunpack.c.l.b16 %v3240_v5  ;;  %v3244_v24 = vrot.slane %v3242_v27, 4  ;;  %v11709_v27 = vld [vmem:[%s10212_s13 + $0x1fc] sm:$0xff] }
 0x40f   : > { %v1880_v55 = vpop.f32.mrf.mxu2  ;;  %v3253_v47 = vrot.slane %v3251_v18, 5  ;;  %v13469_v18 = vld [vmem:[#allocation45_spill] sm:$0xff] }
 0x410   : > { %v2086_v61 = vadd.f32 %v1880_v55, %v1475_v17  ;;  %v4069_v34 = vpop.f32.mrf.mxu3  ;;  %v3247_v17 = vrot.slane %v3245_v35, 5  ;;  %v3257_v55 = vrot.slane %v3255_v33, 4  ;;  %v11705_v32 = vpack.c.b16 %v3665_v13, %v3664_v60  ;;  %v379_v13 = vld [vmem:[%s10212_s13 + $0x200] sm:$0xf] }
 0x411   : > { %v1476_v41 = vpop.f32.mrf.mxu1 }
 0x412   : > { %v4275_v46 = vadd.f32 %v4069_v34, %v2086_v61  ;;  %v1477_v20 = vadd.f32 %v1476_v41, %v13466_v54  ;;  %v378_v61 = vld [vmem:[%s10212_s13 + $0x1fc] sm:$0xf]  ;;  %13467 = vst [vmem:[#allocation41_spill] sm:$0xff] %v11705_v32  ;;  %v3248_v50 = vor.u32 %v3247_v17, %v3244_v24  ;;  %v3258_v40 = vor.u32 %v3257_v55, %v3253_v47 }
 0x413   : > { %v4645_v48 = vpop.f32.mrf.mxu0  ;;  %v3261_v5 = vshll.u32 %v378_v61, 16 }
 0x414   : > { %v11701_v53 = vadd.f32 %v4643_v62, %v4275_v46  ;;  %v3249_v35 = vrot.slane %v3248_v50, 4  ;;  %v3259_v39 = vrot.slane %v3258_v40, 4  ;;  %v3275_v50 = vshrl.u32 %v379_v13, 16 }
 0x416   : > { %13465 = vst [vmem:[#allocation38_spill] sm:$0xff] %v11701_v53  ;;  %v3254_v54 = vsel %vm10547_vm2, %v3249_v35, %v3253_v47  ;;  %v380_v47 = vld [vmem:[%s10212_s13 + $0x204] sm:$0x1] }
 0x417   : > { %v1882_v29 = vpop.f32.mrf.mxu2 }
 0x418   : > { %v2087_v34 = vadd.f32 %v1882_v29, %v1477_v20  ;;  %v4071_v11 = vpop.f32.mrf.mxu3 }
 0x419   : > { %v1479_v6 = vpop.f32.mrf.mxu1 }
 0x41a   : > { %v4276_v62 = vadd.f32 %v4071_v11, %v2087_v34  ;;  %v1480_v33 = vadd.f32 %v1479_v6, %v13469_v18  ;;  %v3263_v11 = vrot.slane %v3261_v5, 5  ;;  %v3271_v34 = vshll.u32 %v379_v13, 16  ;;  %v13471_v18 = vld [vmem:[#allocation48_spill] sm:$0xff] }
 0x41b   : > { %v4648_v46 = vpop.f32.mrf.mxu0 }
 0x41c   : > { %1518 = vmatmul.bf16.gmra.mxu1 %v11611_v12  ;;  %1924 = vmatmul.bf16.gmra.mxu2 %v11709_v27  ;;  %v11712_v41 = vadd.f32 %v4645_v48, %v4276_v62  ;;  %v3265_v48 = vshrl.u32 %v378_v61, 16  ;;  %v3264_v29 = vsel %vm10547_vm2, %v3259_v39, %v3263_v11  ;;  %v3666_v62 = vunpack.c.l.b16 %v3254_v54 }
 0x41d   : > { %4113 = vmatmul.bf16.gmra.mxu3 %v11650_v52  ;;  %v3667_v40 = vunpack.c.l.b16 %v3264_v29  ;;  %v13474_v29 = vld [vmem:[#allocation51_spill] sm:$0xff] }
 0x41e   : > { %13468 = vst [vmem:[#allocation147_spill] sm:$0xff] %v11712_v41  ;;  %4687 = vmatmul.bf16.gmra.mxu0 %v11705_v32  ;;  %v3267_v5 = vrot.slane %v3265_v48, 4  ;;  %v3277_v41 = vrot.slane %v3275_v50, 4  ;;  %v11730_v48 = vld [vmem:[%s10212_s13 + $0x208] sm:$0xff] }
 0x41f   : > { %v1885_v60 = vpop.f32.mrf.mxu2 }
 0x420   : > { %v2088_v24 = vadd.f32 %v1885_v60, %v1480_v33  ;;  %v4074_v17 = vpop.f32.mrf.mxu3  ;;  %v3273_v60 = vrot.slane %v3271_v34, 5  ;;  %v3268_v39 = vor.u32 %v3267_v5, %v3263_v11 }
 0x421   : > { %v1481_v12 = vpop.f32.mrf.mxu1 }
 0x422   : > { %v4277_v20 = vadd.f32 %v4074_v17, %v2088_v24  ;;  %v1482_v33 = vadd.f32 %v1481_v12, %v13471_v18  ;;  %v11726_v17 = vpack.c.b16 %v3667_v40, %v3666_v62  ;;  %v3278_v54 = vor.u32 %v3277_v41, %v3273_v60  ;;  %v381_v62 = vld [vmem:[%s10212_s13 + $0x208] sm:$0xf]  ;;  %v382_v40 = vld [vmem:[%s10212_s13 + $0x20c] sm:$0xf] }
 0x423   : > { %v4650_v55 = vpop.f32.mrf.mxu0 }
 0x424   : > { %v11722_v6 = vadd.f32 %v4648_v46, %v4277_v20  ;;  %13472 = vst [vmem:[#allocation48_spill] sm:$0xff] %v11726_v17  ;;  %v3281_v20 = vshll.u32 %v380_v47, 16  ;;  %v3279_v34 = vrot.slane %v3278_v54, 4  ;;  %v3289_v47 = vshll.u32 %v381_v62, 16 }
 0x426   : > { %13470 = vst [vmem:[#allocation45_spill] sm:$0xff] %v11722_v6  ;;  %v3283_v50 = vrot.slane %v3281_v20, 5 }
 0x427   : > { %v1887_v53 = vpop.f32.mrf.mxu2 }
 0x428   : > { %v2089_v61 = vadd.f32 %v1887_v53, %v1482_v33  ;;  %v4076_v35 = vpop.f32.mrf.mxu3  ;;  %v3269_v53 = vrot.slane %v3268_v39, 4  ;;  %v3284_v39 = vsel %vm10547_vm2, %v3279_v34, %v3283_v50 }
 0x429   : > { %v1484_v24 = vpop.f32.mrf.mxu1 }
 0x42a   : > { %v4278_v13 = vadd.f32 %v4076_v35, %v2089_v61  ;;  %v1485_v11 = vadd.f32 %v1484_v24, %v13474_v29  ;;  %v3274_v33 = vsel %vm10547_vm2, %v3269_v53, %v3273_v60  ;;  %v3295_v24 = vshll.u32 %v382_v40, 16 }
 0x42b   : > { %v4653_v46 = vpop.f32.mrf.mxu0  ;;  %v3668_v20 = vunpack.c.l.b16 %v3274_v33  ;;  %v3669_v29 = vunpack.c.l.b16 %v3284_v39 }
 0x42c   : > { %1523 = vmatmul.bf16.gmra.mxu1 %v11632_v58  ;;  %1929 = vmatmul.bf16.gmra.mxu2 %v11730_v48  ;;  %v11733_v12 = vadd.f32 %v4650_v55, %v4278_v13  ;;  %v3286_v55 = vshrl.u32 %v381_v62, 16  ;;  %v3299_v13 = vshrl.u32 %v382_v40, 16  ;;  %v3297_v60 = vrot.slane %v3295_v24, 5  ;;  %v383_v62 = vld [vmem:[%s10212_s13 + $0x210] sm:$0xf] }
 0x42d   : > { %4118 = vmatmul.bf16.gmra.mxu3 %v11671_v25  ;;  %v11748_v56 = vpack.c.b16 %v3669_v29, %v3668_v20  ;;  %v3305_v33 = vshll.u32 %v383_v62, 16  ;;  %v384_v24 = vld [vmem:[%s10212_s13 + $0x214] sm:$0xf] }
 0x42e   : > { %13473 = vst [vmem:[#allocation148_spill] sm:$0xff] %v11733_v12  ;;  %4692 = vmatmul.bf16.gmra.mxu0 %v11726_v17  ;;  %v13476_v12 = vld [vmem:[#allocation54_spill] sm:$0xff]  ;;  %v3301_v53 = vrot.slane %v3299_v13, 4 }
 0x42f   : > { %v1890_v41 = vpop.f32.mrf.mxu2  ;;  %13477 = vst [vmem:[#allocation54_spill] sm:$0xff] %v11748_v56 }
 0x430   : > { %v2090_v5 = vadd.f32 %v1890_v41, %v1485_v11  ;;  %v4079_v58 = vpop.f32.mrf.mxu3  ;;  %v3288_v11 = vrot.slane %v3286_v55, 4  ;;  %v3291_v41 = vrot.slane %v3289_v47, 5  ;;  %v3302_v40 = vor.u32 %v3301_v53, %v3297_v60  ;;  %v11752_v55 = vld [vmem:[%s10212_s13 + $0x210] sm:$0xff] }
 0x431   : > { %v1486_v18 = vpop.f32.mrf.mxu1 }
 0x432   : > { %v4279_v61 = vadd.f32 %v4079_v58, %v2090_v5  ;;  %v1487_v6 = vadd.f32 %v1486_v18, %v13476_v12  ;;  %v3292_v34 = vor.u32 %v3291_v41, %v3288_v11  ;;  %v3303_v47 = vrot.slane %v3302_v40, 4 }
 0x433   : > { %v4655_v35 = vpop.f32.mrf.mxu0 }
 0x434   : > { %v11744_v54 = vadd.f32 %v4653_v46, %v4279_v61  ;;  %v3307_v61 = vrot.slane %v3305_v33, 5  ;;  %v13481_v33 = vld [vmem:[#allocation60_spill] sm:$0xff] }
 0x436   : > { %13475 = vst [vmem:[#allocation51_spill] sm:$0xff] %v11744_v54  ;;  %v3308_v53 = vsel %vm10547_vm2, %v3303_v47, %v3307_v61 }
 0x437   : > { %v1892_v25 = vpop.f32.mrf.mxu2 }
 0x438   : > { %v2091_v5 = vadd.f32 %v1892_v25, %v1487_v6  ;;  %v4081_v58 = vpop.f32.mrf.mxu3  ;;  %v3293_v25 = vrot.slane %v3292_v34, 4  ;;  %v13479_v6 = vld [vmem:[#allocation57_spill] sm:$0xff] }
 0x439   : > { %v1489_v52 = vpop.f32.mrf.mxu1 }
 0x43a   : > { %v4280_v46 = vadd.f32 %v4081_v58, %v2091_v5  ;;  %v1490_v18 = vadd.f32 %v1489_v52, %v13479_v6  ;;  %v3298_v29 = vsel %vm10547_vm2, %v3293_v25, %v3297_v60  ;;  %v3315_v5 = vshll.u32 %v384_v24, 16  ;;  %v385_v60 = vld [vmem:[%s10212_s13 + $0x218] sm:$0x1] }
 0x43b   : > { %v4658_v50 = vpop.f32.mrf.mxu0  ;;  %v3319_v58 = vshrl.u32 %v384_v24, 16  ;;  %v3670_v34 = vunpack.c.l.b16 %v3298_v29 }
 0x43c   : > { %1528 = vmatmul.bf16.gmra.mxu1 %v11654_v45  ;;  %1934 = vmatmul.bf16.gmra.mxu2 %v11752_v55  ;;  %v11755_v12 = vadd.f32 %v4655_v35, %v4280_v46  ;;  %v3309_v35 = vshrl.u32 %v383_v62, 16  ;;  %v3671_v46 = vunpack.c.l.b16 %v3308_v53  ;;  %v13484_v53 = vld [vmem:[#allocation64_spill] sm:$0xff] }
 0x43d   : > { %4123 = vmatmul.bf16.gmra.mxu3 %v11705_v32 }
 0x43e   : > { %13478 = vst [vmem:[#allocation149_spill] sm:$0xff] %v11755_v12  ;;  %4697 = vmatmul.bf16.gmra.mxu0 %v11748_v56  ;;  %v3311_v40 = vrot.slane %v3309_v35, 4  ;;  %v11773_v35 = vld [vmem:[%s10212_s13 + $0x21c] sm:$0xff] }
 0x43f   : > { %v1895_v39 = vpop.f32.mrf.mxu2 }
 0x440   : > { %v2092_v13 = vadd.f32 %v1895_v39, %v1490_v18  ;;  %v4084_v20 = vpop.f32.mrf.mxu3  ;;  %v3317_v18 = vrot.slane %v3315_v5, 5  ;;  %v3321_v39 = vrot.slane %v3319_v58, 4  ;;  %v3312_v47 = vor.u32 %v3311_v40, %v3307_v61  ;;  %v387_v40 = vld [vmem:[%s10212_s13 + $0x220] sm:$0xf] }
 0x441   : > { %v1491_v45 = vpop.f32.mrf.mxu1 }
 0x442   : > { %v4281_v11 = vadd.f32 %v4084_v20, %v2092_v13  ;;  %v1492_v6 = vadd.f32 %v1491_v45, %v13481_v33  ;;  %v11769_v20 = vpack.c.b16 %v3671_v46, %v3670_v34  ;;  %v3322_v29 = vor.u32 %v3321_v39, %v3317_v18  ;;  %v386_v34 = vld [vmem:[%s10212_s13 + $0x21c] sm:$0xf] }
 0x443   : > { %v4660_v41 = vpop.f32.mrf.mxu0 }
 0x444   : > { %v11765_v52 = vadd.f32 %v4658_v50, %v4281_v11  ;;  %13482 = vst [vmem:[#allocation60_spill] sm:$0xff] %v11769_v20  ;;  %v3325_v11 = vshll.u32 %v385_v60, 16  ;;  %v3323_v5 = vrot.slane %v3322_v29, 4  ;;  %v3333_v60 = vshll.u32 %v386_v34, 16 }
 0x446   : > { %13480 = vst [vmem:[#allocation57_spill] sm:$0xff] %v11765_v52  ;;  %v3327_v58 = vrot.slane %v3325_v11, 5 }
 0x447   : > { %v1897_v12 = vpop.f32.mrf.mxu2 }
 0x448   : > { %v2093_v62 = vadd.f32 %v1897_v12, %v1492_v6  ;;  %v4086_v25 = vpop.f32.mrf.mxu3  ;;  %v3313_v12 = vrot.slane %v3312_v47, 4  ;;  %v3328_v47 = vsel %vm10547_vm2, %v3323_v5, %v3327_v58 }
 0x449   : > { %v1494_v13 = vpop.f32.mrf.mxu1 }
 0x44a   : > { %v4282_v24 = vadd.f32 %v4086_v25, %v2093_v62  ;;  %v1495_v61 = vadd.f32 %v1494_v13, %v13484_v53  ;;  %v3318_v39 = vsel %vm10547_vm2, %v3313_v12, %v3317_v18  ;;  %v3339_v13 = vshll.u32 %v387_v40, 16 }
 0x44b   : > { %v4663_v50 = vpop.f32.mrf.mxu0  ;;  %v3672_v11 = vunpack.c.l.b16 %v3318_v39  ;;  %v3673_v53 = vunpack.c.l.b16 %v3328_v47 }
 0x44c   : > { %1533 = vmatmul.bf16.gmra.mxu1 %v11675_v26  ;;  %1939 = vmatmul.bf16.gmra.mxu2 %v11773_v35  ;;  %v11776_v45 = vadd.f32 %v4660_v41, %v4282_v24  ;;  %v3330_v41 = vshrl.u32 %v386_v34, 16  ;;  %v3343_v24 = vshrl.u32 %v387_v40, 16  ;;  %v3341_v18 = vrot.slane %v3339_v13, 5  ;;  %v388_v34 = vld [vmem:[%s10212_s13 + $0x224] sm:$0xf] }
 0x44d   : > { %4128 = vmatmul.bf16.gmra.mxu3 %v11726_v17  ;;  %v11791_v32 = vpack.c.b16 %v3673_v53, %v3672_v11  ;;  %v3349_v39 = vshll.u32 %v388_v34, 16  ;;  %v389_v13 = vld [vmem:[%s10212_s13 + $0x228] sm:$0xf] }
 0x44e   : > { %13483 = vst [vmem:[#allocation150_spill] sm:$0xff] %v11776_v45  ;;  %4702 = vmatmul.bf16.gmra.mxu0 %v11769_v20  ;;  %v13486_v45 = vld [vmem:[#allocation67_spill] sm:$0xff]  ;;  %v3345_v12 = vrot.slane %v3343_v24, 4 }
 0x44f   : > { %v1900_v46 = vpop.f32.mrf.mxu2  ;;  %13487 = vst [vmem:[#allocation67_spill] sm:$0xff] %v11791_v32 }
 0x450   : > { %v2094_v33 = vadd.f32 %v1900_v46, %v1495_v61  ;;  %v4089_v26 = vpop.f32.mrf.mxu3  ;;  %v3332_v61 = vrot.slane %v3330_v41, 4  ;;  %v3335_v46 = vrot.slane %v3333_v60, 5  ;;  %v3346_v40 = vor.u32 %v3345_v12, %v3341_v18  ;;  %v11795_v41 = vld [vmem:[%s10212_s13 + $0x224] sm:$0xff] }
 0x451   : > { %v1496_v6 = vpop.f32.mrf.mxu1 }
 0x452   : > { %v4283_v62 = vadd.f32 %v4089_v26, %v2094_v33  ;;  %v1497_v52 = vadd.f32 %v1496_v6, %v13486_v45  ;;  %v3336_v5 = vor.u32 %v3335_v46, %v3332_v61  ;;  %v3347_v60 = vrot.slane %v3346_v40, 4 }
 0x453   : > { %v4665_v25 = vpop.f32.mrf.mxu0 }
 0x454   : > { %v11787_v29 = vadd.f32 %v4663_v50, %v4283_v62  ;;  %v3351_v62 = vrot.slane %v3349_v39, 5  ;;  %v13491_v39 = vld [vmem:[#allocation74_spill] sm:$0xff] }
 0x456   : > { %13485 = vst [vmem:[#allocation64_spill] sm:$0xff] %v11787_v29  ;;  %v3352_v12 = vsel %vm10547_vm2, %v3347_v60, %v3351_v62 }
 0x457   : > { %v1902_v54 = vpop.f32.mrf.mxu2 }
 0x458   : > { %v2095_v33 = vadd.f32 %v1902_v54, %v1497_v52  ;;  %v4091_v26 = vpop.f32.mrf.mxu3  ;;  %v3337_v54 = vrot.slane %v3336_v5, 4  ;;  %v13489_v52 = vld [vmem:[#allocation71_spill] sm:$0xff] }
 0x459   : > { %v1499_v17 = vpop.f32.mrf.mxu1 }
 0x45a   : > { %v4284_v50 = vadd.f32 %v4091_v26, %v2095_v33  ;;  %v1500_v6 = vadd.f32 %v1499_v17, %v13489_v52  ;;  %v3342_v53 = vsel %vm10547_vm2, %v3337_v54, %v3341_v18  ;;  %v3359_v33 = vshll.u32 %v389_v13, 16  ;;  %v390_v18 = vld [vmem:[%s10212_s13 + $0x22c] sm:$0x1] }
 0x45b   : > { %v4668_v58 = vpop.f32.mrf.mxu0  ;;  %v3363_v26 = vshrl.u32 %v389_v13, 16  ;;  %v3674_v5 = vunpack.c.l.b16 %v3342_v53 }
 0x45c   : > { %1538 = vmatmul.bf16.gmra.mxu1 %v11709_v27  ;;  %1944 = vmatmul.bf16.gmra.mxu2 %v11795_v41  ;;  %v11798_v45 = vadd.f32 %v4665_v25, %v4284_v50  ;;  %v3353_v25 = vshrl.u32 %v388_v34, 16  ;;  %v3675_v50 = vunpack.c.l.b16 %v3352_v12  ;;  %v13494_v12 = vld [vmem:[#allocation78_spill] sm:$0xff] }
 0x45d   : > { %4133 = vmatmul.bf16.gmra.mxu3 %v11748_v56 }
 0x45e   : > { %13488 = vst [vmem:[#allocation151_spill] sm:$0xff] %v11798_v45  ;;  %4707 = vmatmul.bf16.gmra.mxu0 %v11791_v32  ;;  %v3355_v40 = vrot.slane %v3353_v25, 4  ;;  %v11816_v25 = vld [vmem:[%s10212_s13 + $0x230] sm:$0xff] }
 0x45f   : > { %v1905_v47 = vpop.f32.mrf.mxu2 }
 0x460   : > { %v2096_v24 = vadd.f32 %v1905_v47, %v1500_v6  ;;  %v4094_v11 = vpop.f32.mrf.mxu3  ;;  %v3361_v6 = vrot.slane %v3359_v33, 5  ;;  %v3365_v47 = vrot.slane %v3363_v26, 4  ;;  %v3356_v60 = vor.u32 %v3355_v40, %v3351_v62  ;;  %v392_v40 = vld [vmem:[%s10212_s13 + $0x234] sm:$0xf] }
 0x461   : > { %v1501_v27 = vpop.f32.mrf.mxu1 }
 0x462   : > { %v4285_v61 = vadd.f32 %v4094_v11, %v2096_v24  ;;  %v1502_v52 = vadd.f32 %v1501_v27, %v13491_v39  ;;  %v11812_v11 = vpack.c.b16 %v3675_v50, %v3674_v5  ;;  %v3366_v53 = vor.u32 %v3365_v47, %v3361_v6  ;;  %v391_v5 = vld [vmem:[%s10212_s13 + $0x230] sm:$0xf] }
 0x463   : > { %v4670_v46 = vpop.f32.mrf.mxu0 }
 0x464   : > { %v11808_v17 = vadd.f32 %v4668_v58, %v4285_v61  ;;  %13492 = vst [vmem:[#allocation74_spill] sm:$0xff] %v11812_v11  ;;  %v3369_v61 = vshll.u32 %v390_v18, 16  ;;  %v3367_v33 = vrot.slane %v3366_v53, 4  ;;  %v3377_v18 = vshll.u32 %v391_v5, 16 }
 0x466   : > { %13490 = vst [vmem:[#allocation71_spill] sm:$0xff] %v11808_v17  ;;  %v3371_v26 = vrot.slane %v3369_v61, 5 }
 0x467   : > { %v1907_v45 = vpop.f32.mrf.mxu2 }
 0x468   : > { %v2097_v34 = vadd.f32 %v1907_v45, %v1502_v52  ;;  %v4096_v54 = vpop.f32.mrf.mxu3  ;;  %v3357_v45 = vrot.slane %v3356_v60, 4  ;;  %v3372_v60 = vsel %vm10547_vm2, %v3367_v33, %v3371_v26 }
 0x469   : > { %v1504_v24 = vpop.f32.mrf.mxu1 }
 0x46a   : > { %v4286_v13 = vadd.f32 %v4096_v54, %v2097_v34  ;;  %v1505_v62 = vadd.f32 %v1504_v24, %v13494_v12  ;;  %v3362_v47 = vsel %vm10547_vm2, %v3357_v45, %v3361_v6  ;;  %v3383_v24 = vshll.u32 %v392_v40, 16 }
 0x46b   : > { %v4673_v58 = vpop.f32.mrf.mxu0  ;;  %v3676_v61 = vunpack.c.l.b16 %v3362_v47  ;;  %v3677_v12 = vunpack.c.l.b16 %v3372_v60 }
 0x46c   : > { %1543 = vmatmul.bf16.gmra.mxu1 %v11730_v48  ;;  %1949 = vmatmul.bf16.gmra.mxu2 %v11816_v25  ;;  %v11819_v27 = vadd.f32 %v4670_v46, %v4286_v13  ;;  %v3374_v46 = vshrl.u32 %v391_v5, 16  ;;  %v3387_v13 = vshrl.u32 %v392_v40, 16  ;;  %v3385_v6 = vrot.slane %v3383_v24, 5  ;;  %v393_v5 = vld [vmem:[%s10212_s13 + $0x238] sm:$0xf] }
 0x46d   : > { %4138 = vmatmul.bf16.gmra.mxu3 %v11769_v20  ;;  %v11834_v56 = vpack.c.b16 %v3677_v12, %v3676_v61  ;;  %v3393_v47 = vshll.u32 %v393_v5, 16  ;;  %v394_v24 = vld [vmem:[%s10212_s13 + $0x23c] sm:$0xf] }
 0x46e   : > { %13493 = vst [vmem:[#allocation152_spill] sm:$0xff] %v11819_v27  ;;  %4712 = vmatmul.bf16.gmra.mxu0 %v11812_v11  ;;  %v13496_v27 = vld [vmem:[#allocation81_spill] sm:$0xff]  ;;  %v3389_v45 = vrot.slane %v3387_v13, 4 }
 0x46f   : > { %v1910_v50 = vpop.f32.mrf.mxu2  ;;  %13497 = vst [vmem:[#allocation81_spill] sm:$0xff] %v11834_v56 }
 0x470   : > { %v2098_v39 = vadd.f32 %v1910_v50, %v1505_v62  ;;  %v4099_v48 = vpop.f32.mrf.mxu3  ;;  %v3376_v62 = vrot.slane %v3374_v46, 4  ;;  %v3379_v50 = vrot.slane %v3377_v18, 5  ;;  %v3390_v40 = vor.u32 %v3389_v45, %v3385_v6  ;;  %v11838_v46 = vld [vmem:[%s10212_s13 + $0x238] sm:$0xff] }
 0x471   : > { %v1506_v52 = vpop.f32.mrf.mxu1 }
 0x472   : > { %v4287_v34 = vadd.f32 %v4099_v48, %v2098_v39  ;;  %v1507_v17 = vadd.f32 %v1506_v52, %v13496_v27  ;;  %v3380_v33 = vor.u32 %v3379_v50, %v3376_v62  ;;  %v3391_v18 = vrot.slane %v3390_v40, 4 }
 0x473   : > { %v4675_v54 = vpop.f32.mrf.mxu0 }
 0x474   : > { %v11830_v53 = vadd.f32 %v4673_v58, %v4287_v34  ;;  %v3395_v34 = vrot.slane %v3393_v47, 5  ;;  %v13501_v47 = vld [vmem:[#allocation88_spill] sm:$0xff] }
 0x476   : > { %13495 = vst [vmem:[#allocation78_spill] sm:$0xff] %v11830_v53  ;;  %v3396_v45 = vsel %vm10547_vm2, %v3391_v18, %v3395_v34 }
 0x477   : > { %v1912_v29 = vpop.f32.mrf.mxu2 }
 0x478   : > { %v2099_v39 = vadd.f32 %v1912_v29, %v1507_v17  ;;  %v4101_v48 = vpop.f32.mrf.mxu3  ;;  %v3381_v29 = vrot.slane %v3380_v33, 4  ;;  %v13499_v17 = vld [vmem:[#allocation85_spill] sm:$0xff] }
 0x479   : > { %v1509_v20 = vpop.f32.mrf.mxu1 }
 0x47a   : > { %v4288_v58 = vadd.f32 %v4101_v48, %v2099_v39  ;;  %v1510_v52 = vadd.f32 %v1509_v20, %v13499_v17  ;;  %v3386_v12 = vsel %vm10547_vm2, %v3381_v29, %v3385_v6  ;;  %v3403_v39 = vshll.u32 %v394_v24, 16  ;;  %v395_v6 = vld [vmem:[%s10212_s13 + $0x240] sm:$0x1] }
 0x47b   : > { %v4678_v26 = vpop.f32.mrf.mxu0  ;;  %v3407_v48 = vshrl.u32 %v394_v24, 16  ;;  %v3678_v33 = vunpack.c.l.b16 %v3386_v12  ;;  %v3413_v12 = vshll.u32 %v395_v6, 16 }
 0x47c   : > { %1548 = vmatmul.bf16.gmra.mxu1 %v11752_v55  ;;  %1954 = vmatmul.bf16.gmra.mxu2 %v11838_v46  ;;  %v11841_v27 = vadd.f32 %v4675_v54, %v4288_v58  ;;  %v3397_v54 = vshrl.u32 %v393_v5, 16  ;;  %v3679_v58 = vunpack.c.l.b16 %v3396_v45 }
 0x47d   : > { %4143 = vmatmul.bf16.gmra.mxu3 %v11791_v32 }
 0x47e   : > { %13498 = vst [vmem:[#allocation153_spill] sm:$0xff] %v11841_v27  ;;  %4717 = vmatmul.bf16.gmra.mxu0 %v11834_v56  ;;  %v3399_v40 = vrot.slane %v3397_v54, 4  ;;  %v11859_v54 = vld [vmem:[%s10212_s13 + $0x244] sm:$0xff] }
 0x47f   : > { %v1915_v60 = vpop.f32.mrf.mxu2 }
 0x480   : > { %v2100_v13 = vadd.f32 %v1915_v60, %v1510_v52  ;;  %v4104_v61 = vpop.f32.mrf.mxu3  ;;  %v3405_v52 = vrot.slane %v3403_v39, 5  ;;  %v3409_v60 = vrot.slane %v3407_v48, 4  ;;  %v3400_v18 = vor.u32 %v3399_v40, %v3395_v34  ;;  %v9432_v34 = vld [vmem:[%s13185_s1 + $0x80] sm:$0xff] }
 0x481   : > { %v1511_v55 = vpop.f32.mrf.mxu1  ;;  %v3415_v48 = vrot.slane %v3413_v12, 5  ;;  %6254 = vmatpush.bf16.msra.mxu2 %v9432_v34  ;;  %v9424_v12 = vld [vmem:[%s13185_s1 + $0x1c0] sm:$0xff] }
 0x482   : > { %v4289_v62 = vadd.f32 %v4104_v61, %v2100_v13  ;;  %v1512_v17 = vadd.f32 %v1511_v55, %v13501_v47  ;;  %v11855_v61 = vpack.c.b16 %v3679_v58, %v3678_v33  ;;  %v3410_v24 = vor.u32 %v3409_v60, %v3405_v52  ;;  %v396_v33 = vld [vmem:[%s10212_s13 + $0x244] sm:$0xf]  ;;  %5025 = vmatpush.bf16.msra.mxu1 %v9424_v12 }
 0x483   : > { %v4680_v50 = vpop.f32.mrf.mxu0  ;;  %v3418_v60 = vshrl.u32 %v396_v33, 16  ;;  %v3421_v6 = vshll.u32 %v396_v33, 16  ;;  %v9448_v34 = vld [vmem:[%s13185_s1 + $0x200] sm:$0xff] }
 0x484   : > { %v11851_v20 = vadd.f32 %v4678_v26, %v4289_v62  ;;  %13502 = vst [vmem:[#allocation88_spill] sm:$0xff] %v11855_v61  ;;  %v9440_v62 = vld [vmem:[%s13185_s1 + $0x140] sm:$0xff]  ;;  %v3411_v39 = vrot.slane %v3410_v24, 4  ;;  %7342 = vmatpush.bf16.msra.mxu0 %v9448_v34 }
 0x485   : > { %6798 = vmatpush.bf16.msra.mxu3 %v9440_v62 }
 0x486   : > { %13500 = vst [vmem:[#allocation85_spill] sm:$0xff] %v11851_v20 }
 0x487   : > { %v1917_v27 = vpop.f32.mrf.mxu2 }
 0x488   : > { %v2101_v5 = vadd.f32 %v1917_v27, %v1512_v17  ;;  %v4106_v29 = vpop.f32.mrf.mxu3  ;;  %v3401_v27 = vrot.slane %v3400_v18, 4 }
 0x489   : > { %v1514_v13 = vpop.f32.mrf.mxu1 }
 0x48a   : > { %v4290_v53 = vadd.f32 %v4106_v29, %v2101_v5  ;;  %v3406_v17 = vsel %vm10547_vm2, %v3401_v27, %v3405_v52 }
 0x48b   : > { %v4683_v26 = vpop.f32.mrf.mxu0  ;;  %v3680_v27 = vunpack.c.l.b16 %v3406_v17 }
 0x48c   : > { %1553 = vmatmul.bf16.gmra.mxu1 %v11773_v35  ;;  %1959 = vmatmul.bf16.gmra.mxu2 %v11859_v54  ;;  %v11862_v55 = vadd.f32 %v4680_v50, %v4290_v53  ;;  %v13504_v35 = vld [vmem:[#allocation92_spill] sm:$0xff]  ;;  %v397_v50 = vld [vmem:[%s10212_s13 + $0x248] sm:$0xf] }
 0x48d   : > { %4148 = vmatmul.bf16.gmra.mxu3 %v11812_v11  ;;  %v1515_v45 = vadd.f32 %v1514_v13, %v13504_v35  ;;  %v3416_v13 = vsel %vm10547_vm2, %v3411_v39, %v3415_v48  ;;  %v3427_v18 = vshll.u32 %v397_v50, 16  ;;  %v3431_v24 = vshrl.u32 %v397_v50, 16  ;;  %v13506_v39 = vld [vmem:[#allocation95_spill] sm:$0xff] }
 0x48e   : > { %13503 = vst [vmem:[#allocation154_spill] sm:$0xff] %v11862_v55  ;;  %4722 = vmatmul.bf16.gmra.mxu0 %v11855_v61  ;;  %v3681_v62 = vunpack.c.l.b16 %v3416_v13  ;;  %v3420_v35 = vrot.slane %v3418_v60, 4  ;;  %v11893_v60 = vld [vmem:[%s10212_s13 + $0x24c] sm:$0xff] }
 0x48f   : > { %v1920_v53 = vpop.f32.mrf.mxu2  ;;  %v3429_v33 = vrot.slane %v3427_v18, 5  ;;  %v13509_v18 = vld [vmem:[#allocation98_spill] sm:$0xff] }
 0x490   : > { %v2102_v58 = vadd.f32 %v1920_v53, %v1515_v45  ;;  %v4109_v40 = vpop.f32.mrf.mxu3  ;;  %v3423_v45 = vrot.slane %v3421_v6, 5  ;;  %v3433_v53 = vrot.slane %v3431_v24, 4  ;;  %v11889_v11 = vpack.c.b16 %v3681_v62, %v3680_v27  ;;  %v399_v62 = vld [vmem:[%s10212_s13 + $0x250] sm:$0xf] }
 0x491   : > { %v1516_v47 = vpop.f32.mrf.mxu1 }
 0x492   : > { %v4291_v5 = vadd.f32 %v4109_v40, %v2102_v58  ;;  %v1517_v48 = vadd.f32 %v1516_v47, %v13506_v39  ;;  %v398_v58 = vld [vmem:[%s10212_s13 + $0x24c] sm:$0xf]  ;;  %13507 = vst [vmem:[#allocation95_spill] sm:$0xff] %v11889_v11  ;;  %v3424_v12 = vor.u32 %v3423_v45, %v3420_v35  ;;  %v3434_v17 = vor.u32 %v3433_v53, %v3429_v33 }
 0x493   : > { %v4685_v29 = vpop.f32.mrf.mxu0  ;;  %v3437_v13 = vshll.u32 %v398_v58, 16 }
 0x494   : > { %v11885_v52 = vadd.f32 %v4683_v26, %v4291_v5  ;;  %v3425_v6 = vrot.slane %v3424_v12, 4  ;;  %v3435_v34 = vrot.slane %v3434_v17, 4  ;;  %v3451_v12 = vshrl.u32 %v399_v62, 16 }
 0x496   : > { %13505 = vst [vmem:[#allocation92_spill] sm:$0xff] %v11885_v52  ;;  %v3430_v39 = vsel %vm10547_vm2, %v3425_v6, %v3429_v33  ;;  %v400_v33 = vld [vmem:[%s10212_s13 + $0x254] sm:$0x1] }
 0x497   : > { %v1922_v50 = vpop.f32.mrf.mxu2 }
 0x498   : > { %v2103_v40 = vadd.f32 %v1922_v50, %v1517_v48  ;;  %v4111_v55 = vpop.f32.mrf.mxu3 }
 0x499   : > { %v1519_v20 = vpop.f32.mrf.mxu1 }
 0x49a   : > { %v4292_v26 = vadd.f32 %v4111_v55, %v2103_v40  ;;  %v1520_v24 = vadd.f32 %v1519_v20, %v13509_v18  ;;  %v3439_v55 = vrot.slane %v3437_v13, 5  ;;  %v3447_v40 = vshll.u32 %v399_v62, 16  ;;  %v13511_v18 = vld [vmem:[#allocation101_spill] sm:$0xff] }
 0x49b   : > { %v4688_v5 = vpop.f32.mrf.mxu0 }
 0x49c   : > { %1558 = vmatmul.bf16.gmra.mxu1 %v11795_v41  ;;  %1964 = vmatmul.bf16.gmra.mxu2 %v11893_v60  ;;  %v11896_v47 = vadd.f32 %v4685_v29, %v4292_v26  ;;  %v3441_v29 = vshrl.u32 %v398_v58, 16  ;;  %v3440_v50 = vsel %vm10547_vm2, %v3435_v34, %v3439_v55  ;;  %v3682_v26 = vunpack.c.l.b16 %v3430_v39 }
 0x49d   : > { %4153 = vmatmul.bf16.gmra.mxu3 %v11834_v56  ;;  %v3683_v17 = vunpack.c.l.b16 %v3440_v50  ;;  %v13514_v50 = vld [vmem:[#allocation3_spill] sm:$0xff] }
 0x49e   : > { %13508 = vst [vmem:[#allocation155_spill] sm:$0xff] %v11896_v47  ;;  %4727 = vmatmul.bf16.gmra.mxu0 %v11889_v11  ;;  %v3443_v13 = vrot.slane %v3441_v29, 4  ;;  %v3453_v47 = vrot.slane %v3451_v12, 4  ;;  %v11914_v29 = vld [vmem:[%s10212_s13 + $0x258] sm:$0xff] }
 0x49f   : > { %v1925_v27 = vpop.f32.mrf.mxu2 }
 0x4a0   : > { %v2104_v35 = vadd.f32 %v1925_v27, %v1520_v24  ;;  %v4114_v45 = vpop.f32.mrf.mxu3  ;;  %v3449_v27 = vrot.slane %v3447_v40, 5  ;;  %v3444_v34 = vor.u32 %v3443_v13, %v3439_v55 }
 0x4a1   : > { %v1521_v41 = vpop.f32.mrf.mxu1 }
 0x4a2   : > { %v4293_v48 = vadd.f32 %v4114_v45, %v2104_v35  ;;  %v1522_v24 = vadd.f32 %v1521_v41, %v13511_v18  ;;  %v11910_v45 = vpack.c.b16 %v3683_v17, %v3682_v26  ;;  %v3454_v39 = vor.u32 %v3453_v47, %v3449_v27  ;;  %v401_v26 = vld [vmem:[%s10212_s13 + $0x258] sm:$0xf]  ;;  %v402_v17 = vld [vmem:[%s10212_s13 + $0x25c] sm:$0xf] }
 0x4a3   : > { %v4690_v53 = vpop.f32.mrf.mxu0 }
 0x4a4   : > { %v11906_v20 = vadd.f32 %v4688_v5, %v4293_v48  ;;  %13512 = vst [vmem:[#allocation101_spill] sm:$0xff] %v11910_v45  ;;  %v3457_v48 = vshll.u32 %v400_v33, 16  ;;  %v3455_v40 = vrot.slane %v3454_v39, 4  ;;  %v3465_v33 = vshll.u32 %v401_v26, 16 }
 0x4a6   : > { %13510 = vst [vmem:[#allocation98_spill] sm:$0xff] %v11906_v20  ;;  %v3459_v12 = vrot.slane %v3457_v48, 5 }
 0x4a7   : > { %v1927_v52 = vpop.f32.mrf.mxu2 }
 0x4a8   : > { %v2105_v58 = vadd.f32 %v1927_v52, %v1522_v24  ;;  %v4116_v6 = vpop.f32.mrf.mxu3  ;;  %v3445_v52 = vrot.slane %v3444_v34, 4  ;;  %v3460_v34 = vsel %vm10547_vm2, %v3455_v40, %v3459_v12 }
 0x4a9   : > { %v1524_v35 = vpop.f32.mrf.mxu1 }
 0x4aa   : > { %v4294_v62 = vadd.f32 %v4116_v6, %v2105_v58  ;;  %v1525_v55 = vadd.f32 %v1524_v35, %v13514_v50  ;;  %v3450_v24 = vsel %vm10547_vm2, %v3445_v52, %v3449_v27  ;;  %v3471_v35 = vshll.u32 %v402_v17, 16 }
 0x4ab   : > { %v4693_v5 = vpop.f32.mrf.mxu0  ;;  %v3684_v48 = vunpack.c.l.b16 %v3450_v24  ;;  %v3685_v50 = vunpack.c.l.b16 %v3460_v34 }
 0x4ac   : > { %1563 = vmatmul.bf16.gmra.mxu1 %v11816_v25  ;;  %1969 = vmatmul.bf16.gmra.mxu2 %v11914_v29  ;;  %v11917_v41 = vadd.f32 %v4690_v53, %v4294_v62  ;;  %v3462_v53 = vshrl.u32 %v401_v26, 16  ;;  %v3475_v62 = vshrl.u32 %v402_v17, 16  ;;  %v3473_v27 = vrot.slane %v3471_v35, 5  ;;  %v403_v26 = vld [vmem:[%s10212_s13 + $0x260] sm:$0xf] }
 0x4ad   : > { %4158 = vmatmul.bf16.gmra.mxu3 %v11855_v61  ;;  %v11932_v32 = vpack.c.b16 %v3685_v50, %v3684_v48  ;;  %v3481_v24 = vshll.u32 %v403_v26, 16  ;;  %v404_v35 = vld [vmem:[%s10212_s13 + $0x264] sm:$0xf] }
 0x4ae   : > { %13513 = vst [vmem:[#allocation156_spill] sm:$0xff] %v11917_v41  ;;  %4732 = vmatmul.bf16.gmra.mxu0 %v11910_v45  ;;  %v13516_v41 = vld [vmem:[#allocation6_spill] sm:$0xff]  ;;  %v3477_v52 = vrot.slane %v3475_v62, 4 }
 0x4af   : > { %v1930_v47 = vpop.f32.mrf.mxu2 }
 0x4b0   : > { %v2106_v13 = vadd.f32 %v1930_v47, %v1525_v55  ;;  %v4119_v25 = vpop.f32.mrf.mxu3  ;;  %v3464_v55 = vrot.slane %v3462_v53, 4  ;;  %v3467_v47 = vrot.slane %v3465_v33, 5  ;;  %v3478_v17 = vor.u32 %v3477_v52, %v3473_v27  ;;  %v11936_v53 = vld [vmem:[%s10212_s13 + $0x260] sm:$0xff] }
 0x4b1   : > { %v1526_v18 = vpop.f32.mrf.mxu1 }
 0x4b2   : > { %v4295_v58 = vadd.f32 %v4119_v25, %v2106_v13  ;;  %v1527_v20 = vadd.f32 %v1526_v18, %v13516_v41  ;;  %v3468_v40 = vor.u32 %v3467_v47, %v3464_v55  ;;  %v3479_v33 = vrot.slane %v3478_v17, 4 }
 0x4b3   : > { %v4695_v6 = vpop.f32.mrf.mxu0 }
 0x4b4   : > { %v11928_v39 = vadd.f32 %v4693_v5, %v4295_v58  ;;  %v3483_v58 = vrot.slane %v3481_v24, 5  ;;  %v13520_v24 = vld [vmem:[#allocation12_spill] sm:$0xff] }
 0x4b6   : > { %13515 = vst [vmem:[#allocation3_spill] sm:$0xff] %v11928_v39  ;;  %v3484_v52 = vsel %vm10547_vm2, %v3479_v33, %v3483_v58 }
 0x4b7   : > { %v1932_v61 = vpop.f32.mrf.mxu2 }
 0x4b8   : > { %v2107_v13 = vadd.f32 %v1932_v61, %v1527_v20  ;;  %v4121_v25 = vpop.f32.mrf.mxu3  ;;  %v3469_v61 = vrot.slane %v3468_v40, 4  ;;  %v13518_v20 = vld [vmem:[#allocation9_spill] sm:$0xff] }
 0x4b9   : > { %v1529_v56 = vpop.f32.mrf.mxu1 }
 0x4ba   : > { %v4296_v5 = vadd.f32 %v4121_v25, %v2107_v13  ;;  %v1530_v18 = vadd.f32 %v1529_v56, %v13518_v20  ;;  %v3474_v50 = vsel %vm10547_vm2, %v3469_v61, %v3473_v27  ;;  %v3491_v13 = vshll.u32 %v404_v35, 16  ;;  %v405_v27 = vld [vmem:[%s10212_s13 + $0x268] sm:$0x1] }
 0x4bb   : > { %v4698_v12 = vpop.f32.mrf.mxu0  ;;  %v3495_v25 = vshrl.u32 %v404_v35, 16  ;;  %v3686_v40 = vunpack.c.l.b16 %v3474_v50 }
 0x4bc   : > { %1568 = vmatmul.bf16.gmra.mxu1 %v11838_v46  ;;  %1974 = vmatmul.bf16.gmra.mxu2 %v11936_v53  ;;  %v11939_v41 = vadd.f32 %v4695_v6, %v4296_v5  ;;  %v3485_v6 = vshrl.u32 %v403_v26, 16  ;;  %v3687_v5 = vunpack.c.l.b16 %v3484_v52  ;;  %v13523_v52 = vld [vmem:[#allocation15_spill] sm:$0xff] }
 0x4bd   : > { %4163 = vmatmul.bf16.gmra.mxu3 %v11889_v11 }
 0x4be   : > { %13517 = vst [vmem:[#allocation6_spill] sm:$0xff] %v11939_v41  ;;  %4737 = vmatmul.bf16.gmra.mxu0 %v11932_v32  ;;  %v3487_v17 = vrot.slane %v3485_v6, 4  ;;  %v11957_v6 = vld [vmem:[%s10212_s13 + $0x26c] sm:$0xff] }
 0x4bf   : > { %v1935_v34 = vpop.f32.mrf.mxu2 }
 0x4c0   : > { %v2108_v62 = vadd.f32 %v1935_v34, %v1530_v18  ;;  %v4124_v48 = vpop.f32.mrf.mxu3  ;;  %v3493_v18 = vrot.slane %v3491_v13, 5  ;;  %v3497_v34 = vrot.slane %v3495_v25, 4  ;;  %v3488_v33 = vor.u32 %v3487_v17, %v3483_v58  ;;  %v407_v17 = vld [vmem:[%s10212_s13 + $0x270] sm:$0xf] }
 0x4c1   : > { %v1531_v46 = vpop.f32.mrf.mxu1 }
 0x4c2   : > { %v4297_v55 = vadd.f32 %v4124_v48, %v2108_v62  ;;  %v1532_v20 = vadd.f32 %v1531_v46, %v13520_v24  ;;  %v11953_v48 = vpack.c.b16 %v3687_v5, %v3686_v40  ;;  %v3498_v50 = vor.u32 %v3497_v34, %v3493_v18  ;;  %v406_v40 = vld [vmem:[%s10212_s13 + $0x26c] sm:$0xf] }
 0x4c3   : > { %v4700_v47 = vpop.f32.mrf.mxu0 }
 0x4c4   : > { %v11949_v56 = vadd.f32 %v4698_v12, %v4297_v55  ;;  %13521 = vst [vmem:[#allocation12_spill] sm:$0xff] %v11953_v48  ;;  %v3501_v55 = vshll.u32 %v405_v27, 16  ;;  %v3499_v13 = vrot.slane %v3498_v50, 4  ;;  %v3509_v27 = vshll.u32 %v406_v40, 16 }
 0x4c6   : > { %13519 = vst [vmem:[#allocation9_spill] sm:$0xff] %v11949_v56  ;;  %v3503_v25 = vrot.slane %v3501_v55, 5 }
 0x4c7   : > { %v1937_v41 = vpop.f32.mrf.mxu2 }
 0x4c8   : > { %v2109_v26 = vadd.f32 %v1937_v41, %v1532_v20  ;;  %v4126_v61 = vpop.f32.mrf.mxu3  ;;  %v3489_v41 = vrot.slane %v3488_v33, 4  ;;  %v3504_v33 = vsel %vm10547_vm2, %v3499_v13, %v3503_v25 }
 0x4c9   : > { %v1534_v62 = vpop.f32.mrf.mxu1 }
 0x4ca   : > { %v4298_v35 = vadd.f32 %v4126_v61, %v2109_v26  ;;  %v1535_v58 = vadd.f32 %v1534_v62, %v13523_v52  ;;  %v3494_v34 = vsel %vm10547_vm2, %v3489_v41, %v3493_v18  ;;  %v3515_v62 = vshll.u32 %v407_v17, 16 }
 0x4cb   : > { %v4703_v12 = vpop.f32.mrf.mxu0  ;;  %v3688_v55 = vunpack.c.l.b16 %v3494_v34  ;;  %v3689_v52 = vunpack.c.l.b16 %v3504_v33 }
 0x4cc   : > { %1573 = vmatmul.bf16.gmra.mxu1 %v11859_v54  ;;  %1979 = vmatmul.bf16.gmra.mxu2 %v11957_v6  ;;  %v11960_v46 = vadd.f32 %v4700_v47, %v4298_v35  ;;  %v3506_v47 = vshrl.u32 %v406_v40, 16  ;;  %v3519_v35 = vshrl.u32 %v407_v17, 16  ;;  %v3517_v18 = vrot.slane %v3515_v62, 5  ;;  %v408_v40 = vld [vmem:[%s10212_s13 + $0x274] sm:$0xf] }
 0x4cd   : > { %4168 = vmatmul.bf16.gmra.mxu3 %v11910_v45  ;;  %v11975_v11 = vpack.c.b16 %v3689_v52, %v3688_v55  ;;  %v3525_v34 = vshll.u32 %v408_v40, 16  ;;  %v409_v62 = vld [vmem:[%s10212_s13 + $0x278] sm:$0xf] }
 0x4ce   : > { %13522 = vst [vmem:[#allocation157_spill] sm:$0xff] %v11960_v46  ;;  %4742 = vmatmul.bf16.gmra.mxu0 %v11953_v48  ;;  %v13525_v46 = vld [vmem:[#allocation18_spill] sm:$0xff]  ;;  %v3521_v41 = vrot.slane %v3519_v35, 4 }
 0x4cf   : > { %v1940_v5 = vpop.f32.mrf.mxu2 }
 0x4d0   : > { %v2110_v24 = vadd.f32 %v1940_v5, %v1535_v58  ;;  %v4129_v54 = vpop.f32.mrf.mxu3  ;;  %v3508_v58 = vrot.slane %v3506_v47, 4  ;;  %v3511_v5 = vrot.slane %v3509_v27, 5  ;;  %v3522_v17 = vor.u32 %v3521_v41, %v3517_v18  ;;  %v11979_v47 = vld [vmem:[%s10212_s13 + $0x274] sm:$0xff] }
 0x4d1   : > { %v1536_v20 = vpop.f32.mrf.mxu1 }
 0x4d2   : > { %v4299_v26 = vadd.f32 %v4129_v54, %v2110_v24  ;;  %v1537_v56 = vadd.f32 %v1536_v20, %v13525_v46  ;;  %v3512_v13 = vor.u32 %v3511_v5, %v3508_v58  ;;  %v3523_v27 = vrot.slane %v3522_v17, 4 }
 0x4d3   : > { %v4705_v61 = vpop.f32.mrf.mxu0 }
 0x4d4   : > { %v11971_v50 = vadd.f32 %v4703_v12, %v4299_v26  ;;  %v3527_v26 = vrot.slane %v3525_v34, 5  ;;  %v13529_v34 = vld [vmem:[#allocation24_spill] sm:$0xff] }
 0x4d6   : > { %13524 = vst [vmem:[#allocation15_spill] sm:$0xff] %v11971_v50  ;;  %v3528_v41 = vsel %vm10547_vm2, %v3523_v27, %v3527_v26 }
 0x4d7   : > { %v1942_v39 = vpop.f32.mrf.mxu2 }
 0x4d8   : > { %v2111_v24 = vadd.f32 %v1942_v39, %v1537_v56  ;;  %v4131_v54 = vpop.f32.mrf.mxu3  ;;  %v3513_v39 = vrot.slane %v3512_v13, 4  ;;  %v13527_v56 = vld [vmem:[#allocation21_spill] sm:$0xff] }
 0x4d9   : > { %v1539_v45 = vpop.f32.mrf.mxu1 }
 0x4da   : > { %v4300_v12 = vadd.f32 %v4131_v54, %v2111_v24  ;;  %v1540_v20 = vadd.f32 %v1539_v45, %v13527_v56  ;;  %v3518_v52 = vsel %vm10547_vm2, %v3513_v39, %v3517_v18  ;;  %v3535_v24 = vshll.u32 %v409_v62, 16  ;;  %v410_v18 = vld [vmem:[%s10212_s13 + $0x27c] sm:$0x1] }
 0x4db   : > { %v4708_v25 = vpop.f32.mrf.mxu0  ;;  %v3539_v54 = vshrl.u32 %v409_v62, 16  ;;  %v3690_v13 = vunpack.c.l.b16 %v3518_v52 }
 0x4dc   : > { %1578 = vmatmul.bf16.gmra.mxu1 %v11893_v60  ;;  %1984 = vmatmul.bf16.gmra.mxu2 %v11979_v47  ;;  %v11982_v46 = vadd.f32 %v4705_v61, %v4300_v12  ;;  %v3529_v61 = vshrl.u32 %v408_v40, 16  ;;  %v3691_v12 = vunpack.c.l.b16 %v3528_v41  ;;  %v13531_v41 = vld [vmem:[#allocation27_spill] sm:$0xff] }
 0x4dd   : > { %4173 = vmatmul.bf16.gmra.mxu3 %v11932_v32 }
 0x4de   : > { %13526 = vst [vmem:[#allocation18_spill] sm:$0xff] %v11982_v46  ;;  %4747 = vmatmul.bf16.gmra.mxu0 %v11975_v11  ;;  %v3531_v17 = vrot.slane %v3529_v61, 4  ;;  %v9944_v61 = vld [vmem:[%s10212_s13 + $0x280] sm:$0xff] }
 0x4df   : > { %v1945_v33 = vpop.f32.mrf.mxu2 }
 0x4e0   : > { %v2112_v35 = vadd.f32 %v1945_v33, %v1540_v20  ;;  %v4134_v55 = vpop.f32.mrf.mxu3  ;;  %v3537_v20 = vrot.slane %v3535_v24, 5  ;;  %v3541_v33 = vrot.slane %v3539_v54, 4  ;;  %v3532_v27 = vor.u32 %v3531_v17, %v3527_v26  ;;  %v412_v17 = vld [vmem:[%s10212_s13 + $0x284] sm:$0xf] }
 0x4e1   : > { %v1541_v60 = vpop.f32.mrf.mxu1 }
 0x4e2   : > { %v4301_v58 = vadd.f32 %v4134_v55, %v2112_v35  ;;  %v1542_v56 = vadd.f32 %v1541_v60, %v13529_v34  ;;  %v11996_v55 = vpack.c.b16 %v3691_v12, %v3690_v13  ;;  %v3542_v52 = vor.u32 %v3541_v33, %v3537_v20  ;;  %v411_v13 = vld [vmem:[%s10212_s13 + $0x280] sm:$0xf] }
 0x4e3   : > { %v4710_v5 = vpop.f32.mrf.mxu0 }
 0x4e4   : > { %v11992_v45 = vadd.f32 %v4708_v25, %v4301_v58  ;;  %v3545_v58 = vshll.u32 %v410_v18, 16  ;;  %v3543_v54 = vrot.slane %v3542_v52, 4  ;;  %v4331_v18 = vshll.u32 %v411_v13, 16 }
 0x4e6   : > { %13528 = vst [vmem:[#allocation21_spill] sm:$0xff] %v11992_v45  ;;  %v3547_v26 = vrot.slane %v3545_v58, 5 }
 0x4e7   : > { %v1947_v46 = vpop.f32.mrf.mxu2 }
 0x4e8   : > { %v2113_v40 = vadd.f32 %v1947_v46, %v1542_v56  ;;  %v4136_v39 = vpop.f32.mrf.mxu3  ;;  %v3533_v46 = vrot.slane %v3532_v27, 4  ;;  %v3548_v27 = vsel %vm10547_vm2, %v3543_v54, %v3547_v26 }
 0x4e9   : > { %v1544_v35 = vpop.f32.mrf.mxu1 }
 0x4ea   : > { %v4302_v62 = vadd.f32 %v4136_v39, %v2113_v40  ;;  %v1545_v24 = vadd.f32 %v1544_v35, %v13531_v41  ;;  %v4337_v35 = vshll.u32 %v412_v17, 16 }
 0x4eb   : > { %v4713_v25 = vpop.f32.mrf.mxu0 }
 0x4ec   : > { %1583 = vmatmul.bf16.gmra.mxu1 %v11914_v29  ;;  %1989 = vmatmul.bf16.gmra.mxu2 %v9944_v61  ;;  %v12000_v60 = vadd.f32 %v4710_v5, %v4302_v62  ;;  %v3538_v29 = vsel %vm10547_vm2, %v3533_v46, %v3537_v20  ;;  %v4328_v5 = vshrl.u32 %v411_v13, 16  ;;  %v4341_v62 = vshrl.u32 %v412_v17, 16  ;;  %v413_v13 = vld [vmem:[%s10212_s13 + $0x288] sm:$0xf] }
 0x4ed   : > { %4178 = vmatmul.bf16.gmra.mxu3 %v11953_v48  ;;  %v3692_v58 = vunpack.c.l.b16 %v3538_v29  ;;  %v3693_v61 = vunpack.c.l.b16 %v3548_v27  ;;  %v4339_v20 = vrot.slane %v4337_v35, 5  ;;  %v4347_v29 = vshll.u32 %v413_v13, 16 }
 0x4ee   : > { %13530 = vst [vmem:[#allocation24_spill] sm:$0xff] %v12000_v60  ;;  %4752 = vmatmul.bf16.gmra.mxu0 %v11996_v55  ;;  %v4330_v41 = vrot.slane %v4328_v5, 4  ;;  %v4343_v46 = vrot.slane %v4341_v62, 4  ;;  %v9945_v5 = vld [vmem:[%s10212_s13 + $0x288] sm:$0xff] }
 0x4ef   : > { %v1950_v12 = vpop.f32.mrf.mxu2  ;;  %v12015_v48 = vpack.c.b16 %v3693_v61, %v3692_v58  ;;  %v4349_v27 = vrot.slane %v4347_v29, 5  ;;  %v414_v62 = vld [vmem:[%s10212_s13 + $0x28c] sm:$0xf] }
 0x4f0   : > { %v2114_v34 = vadd.f32 %v1950_v12, %v1545_v24  ;;  %v4139_v56 = vpop.f32.mrf.mxu3  ;;  %v4333_v24 = vrot.slane %v4331_v18, 5  ;;  %v13533_v12 = vld [vmem:[#allocation30_spill] sm:$0xff]  ;;  %v4344_v17 = vor.u32 %v4343_v46, %v4339_v20 }
 0x4f1   : > { %v1546_v33 = vpop.f32.mrf.mxu1 }
 0x4f2   : > { %v4303_v40 = vadd.f32 %v4139_v56, %v2114_v34  ;;  %v1547_v60 = vadd.f32 %v1546_v33, %v13533_v12  ;;  %v4334_v54 = vor.u32 %v4333_v24, %v4330_v41  ;;  %v4351_v41 = vshrl.u32 %v413_v13, 16  ;;  %v13537_v13 = vld [vmem:[#allocation36_spill] sm:$0xff] }
 0x4f3   : > { %v4715_v39 = vpop.f32.mrf.mxu0 }
 0x4f4   : > { %v12011_v52 = vadd.f32 %v4713_v25, %v4303_v40  ;;  %v4345_v40 = vrot.slane %v4344_v17, 4 }
 0x4f6   : > { %13532 = vst [vmem:[#allocation27_spill] sm:$0xff] %v12011_v52  ;;  %v4350_v46 = vsel %vm10547_vm2, %v4345_v40, %v4349_v27 }
 0x4f7   : > { %v1952_v45 = vpop.f32.mrf.mxu2  ;;  %v4389_v29 = vunpack.c.l.b16 %v4350_v46 }
 0x4f8   : > { %v2115_v34 = vadd.f32 %v1952_v45, %v1547_v60  ;;  %v4141_v56 = vpop.f32.mrf.mxu3  ;;  %v4335_v45 = vrot.slane %v4334_v54, 4  ;;  %v13535_v60 = vld [vmem:[#allocation33_spill] sm:$0xff] }
 0x4f9   : > { %v1549_v50 = vpop.f32.mrf.mxu1 }
 0x4fa   : > { %v4304_v25 = vadd.f32 %v4141_v56, %v2115_v34  ;;  %v1550_v18 = vadd.f32 %v1549_v50, %v13535_v60  ;;  %v4357_v34 = vshll.u32 %v414_v62, 16  ;;  %v4361_v50 = vshrl.u32 %v414_v62, 16  ;;  %v9946_v56 = vld [vmem:[%s10212_s13 + $0x2c] sm:$0xf]  ;;  %v9947_v60 = vld [vmem:[%s10212_s13 + $0x28] sm:$0xf] }
 0x4fb   : > { %v4718_v26 = vpop.f32.mrf.mxu0  ;;  %v5538_v54 = vrot.slane %v9946_v56, 5 }
 0x4fc   : > { %1588 = vmatmul.bf16.gmra.mxu1 %v11936_v53  ;;  %1994 = vmatmul.bf16.gmra.mxu2 %v9945_v5  ;;  %v12019_v33 = vadd.f32 %v4715_v39, %v4304_v25  ;;  %v4340_v39 = vsel %vm10547_vm2, %v4335_v45, %v4339_v20  ;;  %v4353_v5 = vrot.slane %v4351_v41, 4  ;;  %v9138_v20 = vrot.slane %v9947_v60, 9 }
 0x4fd   : > { %4183 = vmatmul.bf16.gmra.mxu3 %v11975_v11  ;;  %v4388_v17 = vunpack.c.l.b16 %v4340_v39 }
 0x4fe   : > { %13534 = vst [vmem:[#allocation30_spill] sm:$0xff] %v12019_v33  ;;  %4757 = vmatmul.bf16.gmra.mxu0 %v12015_v48  ;;  %v415_v33 = vld [vmem:[%s10212_s13 + $0x290] sm:$0x1]  ;;  %v4354_v56 = vor.u32 %v4353_v5, %v4349_v27  ;;  %v5539_v40 = vsel %vm12042_vm5, %v9138_v20, %v5538_v54  ;;  %v13542_v5 = vld [vmem:[#allocation39_spill] sm:$0xff] }
 0x4ff   : > { %v1955_v35 = vpop.f32.mrf.mxu2  ;;  %v12040_v41 = vpack.c.b16 %v4389_v29, %v4388_v17  ;;  %v5951_v27 = vunpack.c.l.b16 %v5539_v40 }
 0x500   : > { %v2116_v58 = vadd.f32 %v1955_v35, %v1550_v18  ;;  %v4144_v61 = vpop.f32.mrf.mxu3  ;;  %v4359_v18 = vrot.slane %v4357_v34, 5  ;;  %v4363_v35 = vrot.slane %v4361_v50, 4  ;;  %v4367_v50 = vshll.u32 %v415_v33, 16 }
 0x501   : > { %v1551_v53 = vpop.f32.mrf.mxu1  ;;  %v4355_v33 = vrot.slane %v4354_v56, 4 }
 0x502   : > { %v4305_v24 = vadd.f32 %v4144_v61, %v2116_v58  ;;  %v1552_v45 = vadd.f32 %v1551_v53, %v13537_v13  ;;  %v5540_v58 = vrot.slane %v5538_v54, 4  ;;  %v12035_v61 = vld [vmem:[%s10212_s13 + $0x30] sm:$0xf]  ;;  %v4364_v34 = vor.u32 %v4363_v35, %v4359_v18 }
 0x503   : > { %v4720_v12 = vpop.f32.mrf.mxu0  ;;  %v4369_v20 = vrot.slane %v4367_v50, 5 }
 0x504   : > { %v12030_v25 = vadd.f32 %v4718_v26, %v4305_v24  ;;  %v9382_v24 = vld [vmem:[%s10212_s13 + $0x294] sm:$0xff]  ;;  %v4365_v54 = vrot.slane %v4364_v34, 4  ;;  %v13544_v34 = vld [vmem:[#allocation42_spill] sm:$0xff] }
 0x506   : > { %13536 = vst [vmem:[#allocation33_spill] sm:$0xff] %v12030_v25  ;;  %v13540_v25 = vrot.slane %v12035_v61, 5 }
 0x507   : > { %v1957_v62 = vpop.f32.mrf.mxu2 }
 0x508   : > { %v2117_v26 = vadd.f32 %v1957_v62, %v1552_v45  ;;  %v4146_v39 = vpop.f32.mrf.mxu3  ;;  %v5542_v45 = vsel %vm12042_vm5, %v5540_v58, %v13540_v25 }
 0x509   : > { %v1554_v46 = vpop.f32.mrf.mxu1  ;;  %v5952_v17 = vunpack.c.l.b16 %v5542_v45 }
 0x50a   : > { %v4306_v60 = vadd.f32 %v4146_v39, %v2117_v26  ;;  %v1555_v35 = vadd.f32 %v1554_v46, %v13542_v5  ;;  %v4360_v39 = vsel %vm10547_vm2, %v4355_v33, %v4359_v18  ;;  %v9383_v5 = vld [vmem:[%s10212_s13 + $0x29c] sm:$0xff]  ;;  %v9949_v18 = vld [vmem:[%s10212_s13 + $0x4] sm:$0xf] }
 0x50b   : > { %v4723_v53 = vpop.f32.mrf.mxu0  ;;  %v12058_v62 = vpack.c.b16 %v5952_v17, %v5951_v27  ;;  %v4390_v56 = vunpack.c.l.b16 %v4360_v39  ;;  %v5512_v33 = vrot.slane %v9949_v18, 5 }
 0x50c   : > { %1593 = vmatmul.bf16.gmra.mxu1 %v11957_v6  ;;  %1999 = vmatmul.bf16.gmra.mxu2 %v9382_v24  ;;  %v12053_v29 = vadd.f32 %v4720_v12, %v4306_v60  ;;  %v4370_v24 = vsel %vm10547_vm2, %v4365_v54, %v4369_v20 }
 0x50d   : > { %4188 = vmatmul.bf16.gmra.mxu3 %v11996_v55  ;;  %v4391_v60 = vunpack.c.l.b16 %v4370_v24  ;;  %v5514_v39 = vrot.slane %v5512_v33, 4  ;;  %v9952_v24 = vld [vmem:[%s10212_s13 + $0x8] sm:$0xf] }
 0x50e   : > { %13541 = vst [vmem:[#allocation36_spill] sm:$0xff] %v12053_v29  ;;  %4762 = vmatmul.bf16.gmra.mxu0 %v12040_v41 }
 0x50f   : > { %v1960_v25 = vpop.f32.mrf.mxu2 }
 0x510   : > { %v2118_v58 = vadd.f32 %v1960_v25, %v1555_v35  ;;  %v4149_v6 = vpop.f32.mrf.mxu3  ;;  %v12068_v25 = vpack.c.b16 %v4391_v60, %v4390_v56  ;;  %v5515_v56 = vrot.slane %v9952_v24, 5  ;;  %v13547_v60 = vld [vmem:[#allocation46_spill] sm:$0xff] }
 0x511   : > { %v1556_v40 = vpop.f32.mrf.mxu1 }
 0x512   : > { %v4307_v26 = vadd.f32 %v4149_v6, %v2118_v58  ;;  %v1557_v50 = vadd.f32 %v1556_v40, %v13544_v34  ;;  %13545 = vst [vmem:[#allocation42_spill] sm:$0xff] %v12068_v25  ;;  %v9951_v40 = vld [vmem:[%s10212_s13] sm:$0xf] }
 0x513   : > { %v4725_v12 = vpop.f32.mrf.mxu0 }
 0x514   : > { %v12064_v46 = vadd.f32 %v4723_v53, %v4307_v26  ;;  %v9950_v53 = vld [vmem:[%s10212_s13 + $0x18] sm:$0xf]  ;;  %v9136_v26 = vrot.slane %v9951_v40, 9  ;;  %v5516_v40 = vsel %vm12042_vm5, %v5514_v39, %v5515_v56 }
 0x515   : > { %v5525_v20 = vrot.slane %v9950_v53, 5 }
 0x516   : > { %13543 = vst [vmem:[#allocation39_spill] sm:$0xff] %v12064_v46  ;;  %v5513_v53 = vsel %vm12042_vm5, %v9136_v26, %v5512_v33  ;;  %v13549_v26 = vld [vmem:[#allocation49_spill] sm:$0xff] }
 0x517   : > { %v1962_v45 = vpop.f32.mrf.mxu2 }
 0x518   : > { %v2119_v27 = vadd.f32 %v1962_v45, %v1557_v50  ;;  %v4151_v17 = vpop.f32.mrf.mxu3  ;;  %v9953_v50 = vld [vmem:[%s10212_s13 + $0x14] sm:$0xf] }
 0x519   : > { %v1559_v35 = vpop.f32.mrf.mxu1  ;;  %v9137_v45 = vrot.slane %v9953_v50, 9  ;;  %v5943_v50 = vunpack.c.l.b16 %v5513_v53 }
 0x51a   : > { %v4308_v58 = vadd.f32 %v4151_v17, %v2119_v27  ;;  %v1560_v34 = vadd.f32 %v1559_v35, %v13547_v60  ;;  %v5527_v27 = vrot.slane %v5525_v20, 4  ;;  %v9954_v17 = vld [vmem:[%s10212_s13 + $0x1c] sm:$0xf] }
 0x51b   : > { %v4728_v54 = vpop.f32.mrf.mxu0  ;;  %v5528_v18 = vrot.slane %v9954_v17, 5  ;;  %v5526_v35 = vsel %vm12042_vm5, %v9137_v45, %v5525_v20 }
 0x51c   : > { %1598 = vmatmul.bf16.gmra.mxu1 %v11979_v47  ;;  %2004 = vmatmul.bf16.gmra.mxu2 %v9383_v5  ;;  %v12073_v6 = vadd.f32 %v4725_v12, %v4308_v58 }
 0x51d   : > { %4193 = vmatmul.bf16.gmra.mxu3 %v12015_v48  ;;  %v5529_v60 = vsel %vm12042_vm5, %v5527_v27, %v5528_v18  ;;  %v9956_v27 = vld [vmem:[%s10212_s13 + $0x20] sm:$0xf] }
 0x51e   : > { %13546 = vst [vmem:[#allocation158_spill] sm:$0xff] %v12073_v6  ;;  %4767 = vmatmul.bf16.gmra.mxu0 %v12068_v25  ;;  %v5948_v33 = vunpack.c.l.b16 %v5529_v60  ;;  %v5518_v25 = vrot.slane %v9955_v57, 5  ;;  %v5531_v53 = vrot.slane %v9956_v27, 5  ;;  %v13550_v60 = vld [vmem:[#allocation63_spill] sm:$0xff]  ;;  %v9958_v57 = vld [vmem:[%s10212_s13 + $0x10] sm:$0x1] }
 0x51f   : > { %v1965_v47 = vpop.f32.mrf.mxu2  ;;  %v13553_v27 = vrot.slane %v12035_v61, 5 }
 0x520   : > { %v2120_v5 = vadd.f32 %v1965_v47, %v1560_v34  ;;  %v4154_v12 = vpop.f32.mrf.mxu3  ;;  %v5944_v34 = vunpack.c.l.b16 %v5516_v40  ;;  %v5947_v47 = vunpack.c.l.b16 %v5526_v35  ;;  %v9957_v40 = vld [vmem:[%s10212_s13 + $0x34] sm:$0xf] }
 0x521   : > { %v1561_v58 = vpop.f32.mrf.mxu1  ;;  %v5544_v35 = vrot.slane %v9957_v40, 5  ;;  %v5543_v40 = vrot.slane %v13553_v27, 4 }
 0x522   : > { %v4309_v6 = vadd.f32 %v4154_v12, %v2120_v5  ;;  %v1562_v46 = vadd.f32 %v1561_v58, %v13549_v26  ;;  %v6071_v12 = vpack.c.b16 %v5944_v34, %v5943_v50  ;;  %v12094_v45 = vpack.c.b16 %v5948_v33, %v5947_v47  ;;  %v9959_v33 = vld [vmem:[%s10212_s13 + $0x24] sm:$0x1] }
 0x523   : > { %v4730_v24 = vpop.f32.mrf.mxu0  ;;  %v5521_v50 = vrot.slane %v9958_v57, 5  ;;  %v5530_v34 = vrot.slane %v5528_v18, 4  ;;  %v5533_v47 = vrot.slane %v5531_v53, 4  ;;  %v5534_v26 = vrot.slane %v9959_v33, 5 }
 0x524   : > { %v12090_v17 = vadd.f32 %v4728_v54, %v4309_v6 }
 0x525   : > { %v5532_v57 = vsel %vm12042_vm5, %v5530_v34, %v5531_v53  ;;  %v5535_v61 = vsel %vm12042_vm5, %v5533_v47, %v5534_v26 }
 0x526   : > { %13548 = vst [vmem:[#allocation46_spill] sm:$0xff] %v12090_v17 }
 0x527   : > { %v1967_v29 = vpop.f32.mrf.mxu2 }
 0x528   : > { %v2121_v39 = vadd.f32 %v1967_v29, %v1562_v46  ;;  %v4156_v5 = vpop.f32.mrf.mxu3  ;;  %v5517_v29 = vrot.slane %v5515_v56, 4  ;;  %v5520_v46 = vrot.slane %v5518_v25, 4  ;;  %v9960_v56 = vld [vmem:[%s10212_s13 + $0x38] sm:$0x1] }
 0x529   : > { %v1564_v20 = vpop.f32.mrf.mxu1 }
 0x52a   : > { %v4310_v54 = vadd.f32 %v4156_v5, %v2121_v39  ;;  %v13552_v39 = vld [vmem:[#allocation52_spill] sm:$0xff]  ;;  %v5519_v52 = vsel %vm12042_vm5, %v5517_v29, %v5518_v25  ;;  %v5522_v18 = vsel %vm12042_vm5, %v5520_v46, %v5521_v50  ;;  %v5949_v29 = vunpack.c.l.b16 %v5532_v57  ;;  %v13555_v57 = vld [vmem:[#allocation70_spill] sm:$0xff] }
 0x52b   : > { %v4733_v6 = vpop.f32.mrf.mxu0  ;;  %v1565_v5 = vadd.f32 %v1564_v20, %v13552_v39  ;;  %v5545_v39 = vsel %vm12042_vm5, %v5543_v40, %v5544_v35  ;;  %v5945_v27 = vunpack.c.l.b16 %v5519_v52  ;;  %v5950_v46 = vunpack.c.l.b16 %v5535_v61 }
 0x52c   : > { %5026 = vmatmul.bf16.vlgmr.msra.gmra.mxu1 %v13550_v60  ;;  %6255 = vmatmul.bf16.vlgmr.msra.gmra.mxu2 %v6071_v12  ;;  %v12099_v58 = vadd.f32 %v4730_v24, %v4310_v54  ;;  %v5546_v12 = vrot.slane %v5544_v35, 4  ;;  %v5547_v60 = vrot.slane %v9960_v56, 5  ;;  %v5946_v56 = vunpack.c.l.b16 %v5522_v18 }
 0x52d   : > { %6799 = vmatmul.bf16.vlgmr.msra.gmra.mxu3 %v12094_v45  ;;  %v5953_v50 = vunpack.c.l.b16 %v5545_v39  ;;  %v12124_v40 = vpack.c.b16 %v5950_v46, %v5949_v29  ;;  %v9962_v39 = vld [vmem:[%s10212_s13 + $0x3c] sm:$0xf] }
 0x52e   : > { %13551 = vst [vmem:[#allocation49_spill] sm:$0xff] %v12099_v58  ;;  %7343 = vmatmul.bf16.vlgmr.msra.gmra.mxu0 %v12058_v62  ;;  %v6072_v26 = vpack.c.b16 %v5946_v56, %v5945_v27  ;;  %v9963_v56 = vld [vmem:[%s10212_s13 + $0x44] sm:$0xf] }
 0x52f   : > { %v1970_v24 = vpop.f32.mrf.mxu2  ;;  %v5554_v29 = vrot.slane %v9963_v56, 5 }
 0x530   : > { %v2122_v54 = vadd.f32 %v1970_v24, %v1565_v5  ;;  %v4159_v58 = vpop.f32.mrf.mxu3  ;;  %v5548_v5 = vsel %vm12042_vm5, %v5546_v12, %v5547_v60  ;;  %v9961_v60 = vld [vmem:[%s10212_s13 + $0x40] sm:$0xf] }
 0x531   : > { %v1566_v17 = vpop.f32.mrf.mxu1  ;;  %v5954_v53 = vunpack.c.l.b16 %v5548_v5  ;;  %v5551_v18 = vrot.slane %v9961_v60, 5  ;;  %v9139_v5 = vrot.slane %v9962_v39, 9 }
 0x532   : > { %v4311_v20 = vadd.f32 %v4159_v58, %v2122_v54  ;;  %v13554_v58 = vld [vmem:[#allocation55_spill] sm:$0xff] }
 0x533   : > { %v4735_v33 = vpop.f32.mrf.mxu0  ;;  %v1567_v34 = vadd.f32 %v1566_v17, %v13554_v58  ;;  %v12126_v52 = vpack.c.b16 %v5954_v53, %v5953_v50  ;;  %v13556_v17 = vld [vmem:[#allocation58_spill] sm:$0xff]  ;;  %v5553_v27 = vrot.slane %v5551_v18, 4 }
 0x534   : > { %v12121_v25 = vadd.f32 %v4733_v6, %v4311_v20 }
 0x537   : > { %v1972_v24 = vpop.f32.mrf.mxu2 }
 0x538   : > { %v2123_v54 = vadd.f32 %v1972_v24, %v1567_v34  ;;  %v4161_v47 = vpop.f32.mrf.mxu3 }
 0x539   : > { %v1569_v35 = vpop.f32.mrf.mxu1 }
 0x53a   : > { %v4312_v12 = vadd.f32 %v4161_v47, %v2123_v54  ;;  %v1570_v61 = vadd.f32 %v1569_v35, %v13556_v17  ;;  %v5555_v54 = vsel %vm12042_vm5, %v5553_v27, %v5554_v29  ;;  %v13561_v27 = vld [vmem:[#allocation65_spill] sm:$0xff] }
 0x53b   : > { %v4738_v6 = vpop.f32.mrf.mxu0  ;;  %v5956_v35 = vunpack.c.l.b16 %v5555_v54  ;;  %v9965_v54 = vld [vmem:[%s10212_s13 + $0x4c] sm:$0x1] }
 0x53c   : > { %5031 = vmatmul.bf16.gmra.mxu1 %v13555_v57  ;;  %6260 = vmatmul.bf16.gmra.mxu2 %v6072_v26  ;;  %v12130_v20 = vadd.f32 %v4735_v33, %v4312_v12  ;;  %v5552_v33 = vsel %vm12042_vm5, %v9139_v5, %v5551_v18  ;;  %v13558_v12 = vld [vmem:[#allocation61_spill] sm:$0xff] }
 0x53d   : > { %6804 = vmatmul.bf16.gmra.mxu3 %v12124_v40  ;;  %v5955_v26 = vunpack.c.l.b16 %v5552_v33  ;;  %v13559_v5 = vld [vmem:[#allocation77_spill] sm:$0xff] }
 0x53e   : > { %7348 = vmatmul.bf16.gmra.mxu0 %v12126_v52 }
 0x53f   : > { %v1975_v46 = vpop.f32.mrf.mxu2  ;;  %v12144_v56 = vpack.c.b16 %v5956_v35, %v5955_v26  ;;  %v5560_v26 = vrot.slane %v9965_v54, 5 }
 0x540   : > { %v2124_v50 = vadd.f32 %v1975_v46, %v1570_v61  ;;  %v4164_v53 = vpop.f32.mrf.mxu3 }
 0x541   : > { %v1571_v58 = vpop.f32.mrf.mxu1 }
 0x542   : > { %v4313_v34 = vadd.f32 %v4164_v53, %v2124_v50  ;;  %v1572_v60 = vadd.f32 %v1571_v58, %v13558_v12  ;;  %v9964_v53 = vld [vmem:[%s10212_s13 + $0x48] sm:$0xf] }
 0x543   : > { %v4740_v24 = vpop.f32.mrf.mxu0  ;;  %v5557_v18 = vrot.slane %v9964_v53, 5  ;;  %v13563_v53 = vld [vmem:[#allocation68_spill] sm:$0xff] }
 0x544   : > { %v12141_v47 = vadd.f32 %v4738_v6, %v4313_v34  ;;  %v5556_v34 = vrot.slane %v5554_v29, 4 }
 0x545   : > { %v5559_v33 = vrot.slane %v5557_v18, 4 }
 0x546   : > { %13557 = vst [vmem:[#allocation63_spill] sm:$0xff] %v12141_v47  ;;  %v13564_v47 = vld [vmem:[#allocation84_spill] sm:$0xff] }
 0x547   : > { %v1977_v57 = vpop.f32.mrf.mxu2 }
 0x548   : > { %v2125_v17 = vadd.f32 %v1977_v57, %v1572_v60  ;;  %v4166_v61 = vpop.f32.mrf.mxu3 }
 0x549   : > { %v1574_v39 = vpop.f32.mrf.mxu1 }
 0x54a   : > { %v4314_v46 = vadd.f32 %v4166_v61, %v2125_v17  ;;  %v1575_v58 = vadd.f32 %v1574_v39, %v13561_v27 }
 0x54b   : > { %v4743_v50 = vpop.f32.mrf.mxu0 }
 0x54c   : > { %5036 = vmatmul.bf16.gmra.mxu1 %v13559_v5  ;;  %6265 = vmatmul.bf16.gmra.mxu2 %v12094_v45  ;;  %v12149_v6 = vadd.f32 %v4740_v24, %v4314_v46  ;;  %v5558_v45 = vsel %vm12042_vm5, %v5556_v34, %v5557_v18  ;;  %v5561_v24 = vsel %vm12042_vm5, %v5559_v33, %v5560_v26  ;;  %v9966_v18 = vld [vmem:[%s10212_s13 + $0x54] sm:$0xf] }
 0x54d   : > { %6809 = vmatmul.bf16.gmra.mxu3 %v12058_v62  ;;  %v5957_v39 = vunpack.c.l.b16 %v5558_v45  ;;  %v5958_v29 = vunpack.c.l.b16 %v5561_v24  ;;  %v5564_v34 = vrot.slane %v9966_v18, 5  ;;  %v13566_v33 = vld [vmem:[#allocation72_spill] sm:$0xff]  ;;  %v9968_v24 = vld [vmem:[%s10212_s13 + $0x58] sm:$0xf]  ;;  %v13567_v18 = vld [vmem:[#allocation75_spill] sm:$0xff] }
 0x54e   : > { %13560 = vst [vmem:[#allocation52_spill] sm:$0xff] %v12149_v6  ;;  %7353 = vmatmul.bf16.gmra.mxu0 %v12144_v56 }
 0x54f   : > { %v1980_v35 = vpop.f32.mrf.mxu2  ;;  %v5566_v45 = vrot.slane %v5564_v34, 4 }
 0x550   : > { %v2126_v12 = vadd.f32 %v1980_v35, %v1575_v58  ;;  %v4169_v60 = vpop.f32.mrf.mxu3 }
 0x551   : > { %v1576_v57 = vpop.f32.mrf.mxu1 }
 0x552   : > { %v4315_v17 = vadd.f32 %v4169_v60, %v2126_v12  ;;  %v1577_v5 = vadd.f32 %v1576_v57, %v13563_v53  ;;  %v12162_v12 = vpack.c.b16 %v5958_v29, %v5957_v39  ;;  %v9967_v57 = vld [vmem:[%s10212_s13 + $0x50] sm:$0xf]  ;;  %v5567_v39 = vrot.slane %v9968_v24, 5 }
 0x553   : > { %v4745_v61 = vpop.f32.mrf.mxu0 }
 0x554   : > { %v12159_v46 = vadd.f32 %v4743_v50, %v4315_v17  ;;  %v9140_v17 = vrot.slane %v9967_v57, 9 }
 0x556   : > { %13562 = vst [vmem:[#allocation55_spill] sm:$0xff] %v12159_v46  ;;  %v9969_v46 = vld [vmem:[%s10212_s13 + $0x5c] sm:$0xf] }
 0x557   : > { %v1982_v27 = vpop.f32.mrf.mxu2 }
 0x558   : > { %v2127_v58 = vadd.f32 %v1982_v27, %v1577_v5  ;;  %v4171_v54 = vpop.f32.mrf.mxu3 }
 0x559   : > { %v1579_v35 = vpop.f32.mrf.mxu1 }
 0x55a   : > { %v4316_v60 = vadd.f32 %v4171_v54, %v2127_v58  ;;  %v1580_v26 = vadd.f32 %v1579_v35, %v13566_v33  ;;  %v5568_v58 = vsel %vm12042_vm5, %v5566_v45, %v5567_v39  ;;  %v13570_v45 = vld [vmem:[#allocation79_spill] sm:$0xff] }
 0x55b   : > { %v4748_v6 = vpop.f32.mrf.mxu0 }
 0x55c   : > { %5041 = vmatmul.bf16.gmra.mxu1 %v13564_v47  ;;  %6270 = vmatmul.bf16.gmra.mxu2 %v12124_v40  ;;  %v12167_v50 = vadd.f32 %v4745_v61, %v4316_v60  ;;  %v5565_v61 = vsel %vm12042_vm5, %v9140_v17, %v5564_v34  ;;  %v5960_v60 = vunpack.c.l.b16 %v5568_v58  ;;  %v5570_v34 = vrot.slane %v9969_v46, 5  ;;  %v13568_v17 = vld [vmem:[#allocation91_spill] sm:$0xff]  ;;  %v9970_v58 = vld [vmem:[%s10212_s13 + $0x60] sm:$0x1] }
 0x55d   : > { %6814 = vmatmul.bf16.gmra.mxu3 %v12126_v52  ;;  %v5959_v35 = vunpack.c.l.b16 %v5565_v61 }
 0x55e   : > { %13565 = vst [vmem:[#allocation70_spill] sm:$0xff] %v12167_v50  ;;  %7358 = vmatmul.bf16.gmra.mxu0 %v12162_v12  ;;  %v5572_v61 = vrot.slane %v5570_v34, 4 }
 0x55f   : > { %v1985_v29 = vpop.f32.mrf.mxu2  ;;  %v12181_v50 = vpack.c.b16 %v5960_v60, %v5959_v35  ;;  %v5573_v35 = vrot.slane %v9970_v58, 5 }
 0x560   : > { %v2128_v53 = vadd.f32 %v1985_v29, %v1580_v26  ;;  %v4174_v5 = vpop.f32.mrf.mxu3 }
 0x561   : > { %v1581_v27 = vpop.f32.mrf.mxu1 }
 0x562   : > { %v4317_v47 = vadd.f32 %v4174_v5, %v2128_v53  ;;  %v1582_v33 = vadd.f32 %v1581_v27, %v13567_v18 }
 0x563   : > { %v4750_v40 = vpop.f32.mrf.mxu0 }
 0x564   : > { %v12178_v54 = vadd.f32 %v4748_v6, %v4317_v47  ;;  %v5569_v47 = vrot.slane %v5567_v39, 4 }
 0x567   : > { %v1987_v57 = vpop.f32.mrf.mxu2 }
 0x568   : > { %v2129_v24 = vadd.f32 %v1987_v57, %v1582_v33  ;;  %v4176_v26 = vpop.f32.mrf.mxu3 }
 0x569   : > { %v1584_v29 = vpop.f32.mrf.mxu1 }
 0x56a   : > { %v4318_v53 = vadd.f32 %v4176_v26, %v2129_v24  ;;  %v1585_v27 = vadd.f32 %v1584_v29, %v13570_v45 }
 0x56b   : > { %v4753_v5 = vpop.f32.mrf.mxu0 }
 0x56c   : > { %5046 = vmatmul.bf16.gmra.mxu1 %v13568_v17  ;;  %6275 = vmatmul.bf16.gmra.mxu2 %v12058_v62  ;;  %v12186_v6 = vadd.f32 %v4750_v40, %v4318_v53  ;;  %v5571_v62 = vsel %vm12042_vm5, %v5569_v47, %v5570_v34  ;;  %v5574_v40 = vsel %vm12042_vm5, %v5572_v61, %v5573_v35  ;;  %v13572_v53 = vld [vmem:[#allocation82_spill] sm:$0xff]  ;;  %v9971_v34 = vld [vmem:[%s10212_s13 + $0x68] sm:$0xf] }
 0x56d   : > { %6819 = vmatmul.bf16.gmra.mxu3 %v12144_v56  ;;  %v5961_v29 = vunpack.c.l.b16 %v5571_v62  ;;  %v5962_v39 = vunpack.c.l.b16 %v5574_v40  ;;  %v5577_v47 = vrot.slane %v9971_v34, 5  ;;  %v13574_v61 = vld [vmem:[#allocation86_spill] sm:$0xff]  ;;  %v9973_v40 = vld [vmem:[%s10212_s13 + $0x6c] sm:$0xf]  ;;  %v13575_v34 = vld [vmem:[#allocation89_spill] sm:$0xff] }
 0x56e   : > { %13569 = vst [vmem:[#allocation58_spill] sm:$0xff] %v12186_v6  ;;  %7363 = vmatmul.bf16.gmra.mxu0 %v12181_v50 }
 0x56f   : > { %v1990_v60 = vpop.f32.mrf.mxu2  ;;  %v5579_v62 = vrot.slane %v5577_v47, 4 }
 0x570   : > { %v2130_v18 = vadd.f32 %v1990_v60, %v1585_v27  ;;  %v4179_v33 = vpop.f32.mrf.mxu3 }
 0x571   : > { %v1586_v46 = vpop.f32.mrf.mxu1 }
 0x572   : > { %v4319_v57 = vadd.f32 %v4179_v33, %v2130_v18  ;;  %v1587_v17 = vadd.f32 %v1586_v46, %v13572_v53  ;;  %v12199_v18 = vpack.c.b16 %v5962_v39, %v5961_v29  ;;  %v9972_v46 = vld [vmem:[%s10212_s13 + $0x64] sm:$0xf]  ;;  %v5580_v29 = vrot.slane %v9973_v40, 5 }
 0x573   : > { %v4755_v24 = vpop.f32.mrf.mxu0 }
 0x574   : > { %v12196_v26 = vadd.f32 %v4753_v5, %v4319_v57  ;;  %v9141_v57 = vrot.slane %v9972_v46, 9 }
 0x576   : > { %13571 = vst [vmem:[#allocation61_spill] sm:$0xff] %v12196_v26  ;;  %v9974_v26 = vld [vmem:[%s10212_s13 + $0x70] sm:$0xf] }
 0x577   : > { %v1992_v45 = vpop.f32.mrf.mxu2 }
 0x578   : > { %v2131_v27 = vadd.f32 %v1992_v45, %v1587_v17  ;;  %v4181_v58 = vpop.f32.mrf.mxu3 }
 0x579   : > { %v1589_v60 = vpop.f32.mrf.mxu1 }
 0x57a   : > { %v4320_v33 = vadd.f32 %v4181_v58, %v2131_v27  ;;  %v1590_v35 = vadd.f32 %v1589_v60, %v13574_v61  ;;  %v5581_v27 = vsel %vm12042_vm5, %v5579_v62, %v5580_v29 }
 0x57b   : > { %v4758_v6 = vpop.f32.mrf.mxu0 }
 0x57c   : > { %5051 = vmatmul.bf16.gmra.mxu1 %v10791_v23  ;;  %6280 = vmatmul.bf16.gmra.mxu2 %v12126_v52  ;;  %v12204_v5 = vadd.f32 %v4755_v24, %v4320_v33  ;;  %v5578_v24 = vsel %vm12042_vm5, %v9141_v57, %v5577_v47  ;;  %v5964_v33 = vunpack.c.l.b16 %v5581_v27  ;;  %v5583_v47 = vrot.slane %v9974_v26, 5  ;;  %v13576_v57 = vld [vmem:[#allocation93_spill] sm:$0xff] }
 0x57d   : > { %6824 = vmatmul.bf16.gmra.mxu3 %v12162_v12  ;;  %v5963_v60 = vunpack.c.l.b16 %v5578_v24  ;;  %v9975_v24 = vld [vmem:[%s10212_s13 + $0x74] sm:$0x1] }
 0x57e   : > { %13573 = vst [vmem:[#allocation77_spill] sm:$0xff] %v12204_v5  ;;  %7368 = vmatmul.bf16.gmra.mxu0 %v12199_v18  ;;  %v5586_v27 = vrot.slane %v9975_v24, 5 }
 0x57f   : > { %v1995_v39 = vpop.f32.mrf.mxu2  ;;  %v12218_v5 = vpack.c.b16 %v5964_v33, %v5963_v60 }
 0x580   : > { %v2132_v53 = vadd.f32 %v1995_v39, %v1590_v35  ;;  %v4184_v17 = vpop.f32.mrf.mxu3 }
 0x581   : > { %v1591_v45 = vpop.f32.mrf.mxu1 }
 0x582   : > { %v4321_v23 = vadd.f32 %v4184_v17, %v2132_v53  ;;  %v1592_v61 = vadd.f32 %v1591_v45, %v13575_v34  ;;  %v5582_v45 = vrot.slane %v5580_v29, 4 }
 0x583   : > { %v4760_v52 = vpop.f32.mrf.mxu0 }
 0x584   : > { %v12215_v58 = vadd.f32 %v4758_v6, %v4321_v23  ;;  %v5585_v23 = vrot.slane %v5583_v47, 4 }
 0x587   : > { %v1997_v46 = vpop.f32.mrf.mxu2 }
 0x588   : > { %v2133_v40 = vadd.f32 %v1997_v46, %v1592_v61  ;;  %v4186_v35 = vpop.f32.mrf.mxu3 }
 0x589   : > { %v1594_v39 = vpop.f32.mrf.mxu1 }
 0x58a   : > { %v4322_v53 = vadd.f32 %v4186_v35, %v2133_v40  ;;  %v1595_v62 = vadd.f32 %v1594_v39, %v13576_v57  ;;  %v13577_v35 = vld [vmem:[#allocation96_spill] sm:$0xff] }
 0x58b   : > { %v4763_v17 = vpop.f32.mrf.mxu0 }
 0x58c   : > { %5056 = vmatmul.bf16.gmra.mxu1 %v10817_v49  ;;  %6285 = vmatmul.bf16.gmra.mxu2 %v12144_v56  ;;  %v12223_v6 = vadd.f32 %v4760_v52, %v4322_v53  ;;  %v5584_v56 = vsel %vm12042_vm5, %v5582_v45, %v5583_v47  ;;  %v5587_v52 = vsel %vm12042_vm5, %v5585_v23, %v5586_v27  ;;  %v9976_v47 = vld [vmem:[%s10212_s13 + $0x7c] sm:$0xf]  ;;  %v13579_v23 = vld [vmem:[#allocation99_spill] sm:$0xff] }
 0x58d   : > { %6829 = vmatmul.bf16.gmra.mxu3 %v12181_v50  ;;  %v5965_v40 = vunpack.c.l.b16 %v5584_v56  ;;  %v5966_v29 = vunpack.c.l.b16 %v5587_v52  ;;  %v5590_v45 = vrot.slane %v9976_v47, 5  ;;  %v9978_v52 = vld [vmem:[%s10212_s13 + $0x80] sm:$0xf] }
 0x58e   : > { %7373 = vmatmul.bf16.gmra.mxu0 %v12218_v5  ;;  %v13580_v47 = vld [vmem:[#allocation102_spill] sm:$0xff] }
 0x58f   : > { %v2000_v60 = vpop.f32.mrf.mxu2  ;;  %v5592_v56 = vrot.slane %v5590_v45, 4 }
 0x590   : > { %v2134_v33 = vadd.f32 %v2000_v60, %v1595_v62  ;;  %v4189_v34 = vpop.f32.mrf.mxu3  ;;  %v12236_v60 = vpack.c.b16 %v5966_v29, %v5965_v40  ;;  %v5593_v40 = vrot.slane %v9978_v52, 5 }
 0x591   : > { %v1596_v26 = vpop.f32.mrf.mxu1 }
 0x592   : > { %v4323_v49 = vadd.f32 %v4189_v34, %v2134_v33  ;;  %v1597_v39 = vadd.f32 %v1596_v26, %v13577_v35  ;;  %v9977_v26 = vld [vmem:[%s10212_s13 + $0x78] sm:$0xf] }
 0x593   : > { %v4765_v61 = vpop.f32.mrf.mxu0 }
 0x594   : > { %v12233_v46 = vadd.f32 %v4763_v17, %v4323_v49  ;;  %v9142_v49 = vrot.slane %v9977_v26, 9 }
 0x597   : > { %v2002_v53 = vpop.f32.mrf.mxu2 }
 0x598   : > { %v2135_v57 = vadd.f32 %v2002_v53, %v1597_v39  ;;  %v4191_v62 = vpop.f32.mrf.mxu3 }
 0x599   : > { %v1599_v24 = vpop.f32.mrf.mxu1 }
 0x59a   : > { %v4324_v33 = vadd.f32 %v4191_v62, %v2135_v57  ;;  %v1600_v27 = vadd.f32 %v1599_v24, %v13579_v23  ;;  %v5594_v57 = vsel %vm12042_vm5, %v5592_v56, %v5593_v40  ;;  %v5595_v56 = vrot.slane %v5593_v40, 4 }
 0x59b   : > { %v4768_v34 = vpop.f32.mrf.mxu0 }
 0x59c   : > { %5061 = vmatmul.bf16.gmra.mxu1 %v10834_v7  ;;  %6290 = vmatmul.bf16.gmra.mxu2 %v12162_v12  ;;  %v12241_v17 = vadd.f32 %v4765_v61, %v4324_v33  ;;  %v5591_v61 = vsel %vm12042_vm5, %v9142_v49, %v5590_v45  ;;  %v5968_v33 = vunpack.c.l.b16 %v5594_v57  ;;  %v9979_v45 = vld [vmem:[%s10212_s13 + $0x84] sm:$0xf] }
 0x59d   : > { %6834 = vmatmul.bf16.gmra.mxu3 %v12199_v18  ;;  %v5967_v24 = vunpack.c.l.b16 %v5591_v61  ;;  %v5596_v49 = vrot.slane %v9979_v45, 5 }
 0x59e   : > { %13578 = vst [vmem:[#allocation65_spill] sm:$0xff] %v12241_v17  ;;  %7378 = vmatmul.bf16.gmra.mxu0 %v12236_v60 }
 0x59f   : > { %v2005_v29 = vpop.f32.mrf.mxu2  ;;  %v12255_v17 = vpack.c.b16 %v5968_v33, %v5967_v24 }
 0x5a0   : > { %v2136_v35 = vadd.f32 %v2005_v29, %v1600_v27  ;;  %v4194_v39 = vpop.f32.mrf.mxu3 }
 0x5a1   : > { %v1601_v53 = vpop.f32.mrf.mxu1 }
 0x5a2   : > { %v4325_v7 = vadd.f32 %v4194_v39, %v2136_v35  ;;  %v1602_v23 = vadd.f32 %v1601_v53, %v13580_v47  ;;  %v5598_v53 = vrot.slane %v5596_v49, 4 }
 0x5a3   : > { %v4770_v12 = vpop.f32.mrf.mxu0 }
 0x5a4   : > { %v12252_v62 = vadd.f32 %v4768_v34, %v4325_v7  ;;  %v9980_v7 = vld [vmem:[%s10212_s13 + $0x88] sm:$0x1] }
 0x5a5   : > { %v5599_v61 = vrot.slane %v9980_v7, 5 }
 0x5a7   : > { %v2007_v26 = vpop.f32.mrf.mxu2 }
 0x5a8   : > { %v2137_v27 = vadd.f32 %v2007_v26, %v1602_v23  ;;  %v4196_v52 = vpop.f32.mrf.mxu3 }
 0x5a9   : > { %v5027_v29 = vpop.f32.mrf.mxu1 }
 0x5aa   : > { %v4326_v35 = vadd.f32 %v4196_v52, %v2137_v27  ;;  %v5347_v57 = vadd.f32 %v5027_v29, %v10830_v63 }
 0x5ab   : > { %v7344_v39 = vpop.f32.mrf.mxu0 }
 0x5ac   : > { %5066 = vmatmul.bf16.gmra.mxu1 %v10852_v51  ;;  %6295 = vmatmul.bf16.gmra.mxu2 %v12181_v50  ;;  %v12260_v34 = vadd.f32 %v4770_v12, %v4326_v35  ;;  %v5597_v50 = vsel %vm12042_vm5, %v5595_v56, %v5596_v49  ;;  %v5600_v12 = vsel %vm12042_vm5, %v5598_v53, %v5599_v61 }
 0x5ad   : > { %6839 = vmatmul.bf16.gmra.mxu3 %v12218_v5  ;;  %v5969_v26 = vunpack.c.l.b16 %v5597_v50  ;;  %v5970_v27 = vunpack.c.l.b16 %v5600_v12 }
 0x5ae   : > { %7383 = vmatmul.bf16.gmra.mxu0 %v12255_v17 }
 0x5af   : > { %v6256_v24 = vpop.f32.mrf.mxu2 }
 0x5b0   : > { %v6800_v33 = vpop.f32.mrf.mxu3  ;;  %v6576_v47 = vadd.f32 %v6256_v24, %v5347_v57  ;;  %v12272_v57 = vpack.c.b16 %v5970_v27, %v5969_v26  ;;  %v9981_v24 = vld [vmem:[%s10212_s13 + $0x90] sm:$0xf] }
 0x5b1   : > { %v5029_v23 = vpop.f32.mrf.mxu1  ;;  %v5603_v49 = vrot.slane %v9981_v24, 5 }
 0x5b2   : > { %v7120_v40 = vadd.f32 %v6800_v33, %v6576_v47  ;;  %v5348_v52 = vadd.f32 %v5029_v23, %v10838_v8  ;;  %v9983_v23 = vld [vmem:[%s10212_s13 + $0x94] sm:$0xf] }
 0x5b3   : > { %v7346_v51 = vpop.f32.mrf.mxu0  ;;  %v5605_v47 = vrot.slane %v5603_v49, 4 }
 0x5b4   : > { %v7664_v45 = vadd.f32 %v7344_v39, %v7120_v40  ;;  %v9982_v39 = vld [vmem:[%s10212_s13 + $0x8c] sm:$0xf] }
 0x5b5   : > { %v9143_v33 = vrot.slane %v9982_v39, 9 }
 0x5b6   : > { %v8181_v8 = vmul.f32 %v7664_v45, %v7664_v45 }
 0x5b7   : > { %v6258_v63 = vpop.f32.mrf.mxu2  ;;  %v5604_v24 = vsel %vm12042_vm5, %v9143_v33, %v5603_v49 }
 0x5b8   : > { %v6577_v29 = vadd.f32 %v6258_v63, %v5348_v52  ;;  %v6802_v35 = vpop.f32.mrf.mxu3 }
 0x5b9   : > { %v5032_v7 = vpop.f32.mrf.mxu1 }
 0x5ba   : > { %v7121_v56 = vadd.f32 %v6802_v35, %v6577_v29 }
 0x5bb   : > { %v7349_v53 = vpop.f32.mrf.mxu0 }
 0x5bc   : > { %v7665_v61 = vadd.f32 %v7346_v51, %v7121_v56  ;;  %5071 = vmatmul.bf16.gmra.mxu1 %v10871_v43  ;;  %6300 = vmatmul.bf16.gmra.mxu2 %v12199_v18  ;;  %v5606_v51 = vrot.slane %v9983_v23, 5  ;;  %v5349_v18 = vadd.f32 %v5032_v7, %v10848_v15 }
 0x5bd   : > { %6844 = vmatmul.bf16.gmra.mxu3 %v12236_v60 }
 0x5be   : > { %7388 = vmatmul.bf16.gmra.mxu0 %v12272_v57  ;;  %v9459_v50 = vpack.c.bf16 %v7665_v61, %v7664_v45  ;;  %v8048_v43 = vadd.f32 %v7665_v61, %v7664_v45  ;;  %v8182_v12 = vmul.f32 %v7665_v61, %v7665_v61  ;;  %v5607_v56 = vsel %vm12042_vm5, %v5605_v47, %v5606_v51 }
 0x5bf   : > { %v6261_v40 = vpop.f32.mrf.mxu2  ;;  %v5971_v45 = vunpack.c.l.b16 %v5604_v24  ;;  %v5972_v61 = vunpack.c.l.b16 %v5607_v56 }
 0x5c0   : > { %9460 = vst [vmem:[%s12280_s29] sm:$0xff] %v9459_v50   ;;  %v8309_v26 = vadd.f32 %v8182_v12, %v8181_v8  ;;  %v6578_v27 = vadd.f32 %v6261_v40, %v5349_v18  ;;  %v6805_v52 = vpop.f32.mrf.mxu3 }
 0x5c1   : > { %v5034_v63 = vpop.f32.mrf.mxu1 }
 0x5c2   : > { %v7122_v29 = vadd.f32 %v6805_v52, %v6578_v27  ;;  %v5350_v7 = vadd.f32 %v5034_v63, %v10856_v22  ;;  %v12293_v27 = vpack.c.b16 %v5972_v61, %v5971_v45  ;;  %v9984_v52 = vld [vmem:[%s10212_s13 + $0x98] sm:$0xf]  ;;  %v5608_v22 = vrot.slane %v5606_v51, 4 }
 0x5c3   : > { %v7351_v35 = vpop.f32.mrf.mxu0  ;;  %v5609_v49 = vrot.slane %v9984_v52, 5 }
 0x5c4   : > { %v7666_v39 = vadd.f32 %v7349_v53, %v7122_v29 }
 0x5c5   : > { %v5610_v51 = vsel %vm12042_vm5, %v5608_v22, %v5609_v49 }
 0x5c6   : > { %v8049_v23 = vadd.f32 %v8048_v43, %v7666_v39  ;;  %v8183_v15 = vmul.f32 %v7666_v39, %v7666_v39  ;;  %v5611_v43 = vrot.slane %v5609_v49, 4  ;;  %v9986_v49 = vld [vmem:[%s10212_s13 + $0xa4] sm:$0xf] }
 0x5c7   : > { %v6263_v8 = vpop.f32.mrf.mxu2  ;;  %v5616_v22 = vrot.slane %v9986_v49, 5 }
 0x5c8   : > { %v8310_v50 = vadd.f32 %v8309_v26, %v8183_v15  ;;  %v6579_v12 = vadd.f32 %v6263_v8, %v5350_v7  ;;  %v6807_v18 = vpop.f32.mrf.mxu3  ;;  %v9985_v26 = vld [vmem:[%s10212_s13 + $0x9c] sm:$0x1] }
 0x5c9   : > { %v5037_v40 = vpop.f32.mrf.mxu1  ;;  %v5612_v63 = vrot.slane %v9985_v26, 5 }
 0x5ca   : > { %v7123_v33 = vadd.f32 %v6807_v18, %v6579_v12  ;;  %v5351_v45 = vadd.f32 %v5037_v40, %v10867_v21  ;;  %v13581_v40 = vld [vmem:[#allocation103_spill] sm:$0xff] }
 0x5cb   : > { %v7354_v47 = vpop.f32.mrf.mxu0  ;;  %v5613_v12 = vsel %vm12042_vm5, %v5611_v43, %v5612_v63  ;;  %v9987_v63 = vld [vmem:[%s10212_s13 + $0xa0] sm:$0xf] }
 0x5cc   : > { %v7667_v53 = vadd.f32 %v7351_v35, %v7123_v33  ;;  %5076 = vmatmul.bf16.gmra.mxu1 %v10892_v31  ;;  %6305 = vmatmul.bf16.gmra.mxu2 %v12218_v5  ;;  %v5974_v18 = vunpack.c.l.b16 %v5613_v12  ;;  %v13582_v12 = vld [vmem:[#allocation104_spill] sm:$0xff] }
 0x5cd   : > { %6849 = vmatmul.bf16.gmra.mxu3 %v12255_v17 }
 0x5ce   : > { %7393 = vmatmul.bf16.gmra.mxu0 %v12293_v27  ;;  %v9464_v29 = vpack.c.bf16 %v7667_v53, %v7666_v39  ;;  %v8050_v24 = vadd.f32 %v8049_v23, %v7667_v53  ;;  %v8184_v56 = vmul.f32 %v7667_v53, %v7667_v53  ;;  %v5973_v23 = vunpack.c.l.b16 %v5610_v51 }
 0x5cf   : > { %v6266_v61 = vpop.f32.mrf.mxu2 }
 0x5d0   : > { %9776 = vst [vmem:[%s12280_s29 + $0x8] sm:$0xff] %v9464_v29   ;;  %v8311_v35 = vadd.f32 %v8310_v50, %v8184_v56  ;;  %v6580_v15 = vadd.f32 %v6266_v61, %v5351_v45  ;;  %v6810_v31 = vpop.f32.mrf.mxu3  ;;  %v12308_v45 = vpack.c.b16 %v5974_v18, %v5973_v23 }
 0x5d1   : > { %v5039_v7 = vpop.f32.mrf.mxu1 }
 0x5d2   : > { %v7124_v5 = vadd.f32 %v6810_v31, %v6580_v15  ;;  %v5352_v33 = vadd.f32 %v5039_v7, %v13581_v40  ;;  %v9988_v15 = vld [vmem:[%s10212_s13 + $0xa8] sm:$0xf] }
 0x5d3   : > { %v7356_v8 = vpop.f32.mrf.mxu0  ;;  %v5619_v31 = vrot.slane %v9988_v15, 5 }
 0x5d4   : > { %v7668_v39 = vadd.f32 %v7354_v47, %v7124_v5 }
 0x5d6   : > { %v8051_v52 = vadd.f32 %v8050_v24, %v7668_v39  ;;  %v8185_v21 = vmul.f32 %v7668_v39, %v7668_v39  ;;  %v9144_v24 = vrot.slane %v9987_v63, 9 }
 0x5d7   : > { %v6268_v50 = vpop.f32.mrf.mxu2 }
 0x5d8   : > { %v8312_v53 = vadd.f32 %v8311_v35, %v8185_v21  ;;  %v6581_v26 = vadd.f32 %v6268_v50, %v5352_v33  ;;  %v6812_v29 = vpop.f32.mrf.mxu3  ;;  %v5618_v35 = vrot.slane %v5616_v22, 4  ;;  %v5617_v50 = vsel %vm12042_vm5, %v9144_v24, %v5616_v22 }
 0x5d9   : > { %v5042_v56 = vpop.f32.mrf.mxu1 }
 0x5da   : > { %v7125_v61 = vadd.f32 %v6812_v29, %v6581_v26  ;;  %v5353_v23 = vadd.f32 %v5042_v56, %v13582_v12  ;;  %v5620_v26 = vsel %vm12042_vm5, %v5618_v35, %v5619_v31 }
 0x5db   : > { %v7359_v43 = vpop.f32.mrf.mxu0  ;;  %v5976_v29 = vunpack.c.l.b16 %v5620_v26 }
 0x5dc   : > { %v7669_v47 = vadd.f32 %v7356_v8, %v7125_v61  ;;  %5081 = vmatmul.bf16.gmra.mxu1 %v10914_v42  ;;  %6310 = vmatmul.bf16.gmra.mxu2 %v12236_v60  ;;  %v13583_v61 = vld [vmem:[#allocation105_spill] sm:$0xff] }
 0x5dd   : > { %6854 = vmatmul.bf16.gmra.mxu3 %v12272_v57 }
 0x5de   : > { %7398 = vmatmul.bf16.gmra.mxu0 %v12308_v45  ;;  %v9469_v7 = vpack.c.bf16 %v7669_v47, %v7668_v39  ;;  %v8052_v5 = vadd.f32 %v8051_v52, %v7669_v47  ;;  %v8186_v51 = vmul.f32 %v7669_v47, %v7669_v47  ;;  %v5975_v52 = vunpack.c.l.b16 %v5617_v50  ;;  %v13584_v50 = vld [vmem:[#allocation106_spill] sm:$0xff] }
 0x5df   : > { %v6271_v18 = vpop.f32.mrf.mxu2 }
 0x5e0   : > { %9777 = vst [vmem:[%s12280_s29 + $0x10] sm:$0xff] %v9469_v7   ;;  %v8313_v8 = vadd.f32 %v8312_v53, %v8186_v51  ;;  %v6582_v42 = vadd.f32 %v6271_v18, %v5353_v23  ;;  %v6815_v21 = vpop.f32.mrf.mxu3  ;;  %v12324_v12 = vpack.c.b16 %v5976_v29, %v5975_v52  ;;  %v9989_v23 = vld [vmem:[%s10212_s13 + $0xac] sm:$0xf] }
 0x5e1   : > { %v5044_v60 = vpop.f32.mrf.mxu1  ;;  %v5622_v22 = vrot.slane %v9989_v23, 5 }
 0x5e2   : > { %v7126_v40 = vadd.f32 %v6815_v21, %v6582_v42  ;;  %v5354_v47 = vadd.f32 %v5044_v60, %v13583_v61 }
 0x5e3   : > { %v7361_v33 = vpop.f32.mrf.mxu0  ;;  %v5624_v18 = vrot.slane %v5622_v22, 4 }
 0x5e4   : > { %v7670_v39 = vadd.f32 %v7359_v43, %v7126_v40 }
 0x5e6   : > { %v8053_v49 = vadd.f32 %v8052_v5, %v7670_v39  ;;  %v8187_v56 = vmul.f32 %v7670_v39, %v7670_v39  ;;  %v5621_v5 = vrot.slane %v5619_v31, 4 }
 0x5e7   : > { %v6273_v53 = vpop.f32.mrf.mxu2 }
 0x5e8   : > { %v8314_v63 = vadd.f32 %v8313_v8, %v8187_v56  ;;  %v6583_v15 = vadd.f32 %v6273_v53, %v5354_v47  ;;  %v6817_v7 = vpop.f32.mrf.mxu3  ;;  %v9990_v8 = vld [vmem:[%s10212_s13 + $0xb0] sm:$0x1]  ;;  %v5623_v31 = vsel %vm12042_vm5, %v5621_v5, %v5622_v22  ;;  %v9991_v22 = vld [vmem:[%s10212_s13 + $0xb8] sm:$0xf] }
 0x5e9   : > { %v5047_v51 = vpop.f32.mrf.mxu1  ;;  %v5625_v42 = vrot.slane %v9990_v8, 5  ;;  %v5629_v5 = vrot.slane %v9991_v22, 5 }
 0x5ea   : > { %v7127_v24 = vadd.f32 %v6817_v7, %v6583_v15  ;;  %v5355_v26 = vadd.f32 %v5047_v51, %v13584_v50  ;;  %v13585_v51 = vld [vmem:[#allocation107_spill] sm:$0xff] }
 0x5eb   : > { %v7364_v35 = vpop.f32.mrf.mxu0  ;;  %v5626_v47 = vsel %vm12042_vm5, %v5624_v18, %v5625_v42  ;;  %v9992_v42 = vld [vmem:[%s10212_s13 + $0xb4] sm:$0xf] }
 0x5ec   : > { %v7671_v43 = vadd.f32 %v7361_v33, %v7127_v24  ;;  %5086 = vmatmul.bf16.gmra.mxu1 %v10935_v30  ;;  %6315 = vmatmul.bf16.gmra.mxu2 %v12255_v17  ;;  %v5978_v53 = vunpack.c.l.b16 %v5626_v47 }
 0x5ed   : > { %6859 = vmatmul.bf16.gmra.mxu3 %v12293_v27 }
 0x5ee   : > { %7403 = vmatmul.bf16.gmra.mxu0 %v12324_v12  ;;  %v9474_v21 = vpack.c.bf16 %v7671_v43, %v7670_v39  ;;  %v8054_v60 = vadd.f32 %v8053_v49, %v7671_v43  ;;  %v8188_v40 = vmul.f32 %v7671_v43, %v7671_v43  ;;  %v5977_v49 = vunpack.c.l.b16 %v5623_v31 }
 0x5ef   : > { %v6276_v52 = vpop.f32.mrf.mxu2 }
 0x5f0   : > { %9778 = vst [vmem:[%s12280_s29 + $0x18] sm:$0xff] %v9474_v21   ;;  %v8315_v33 = vadd.f32 %v8314_v63, %v8188_v40  ;;  %v6584_v29 = vadd.f32 %v6276_v52, %v5355_v26  ;;  %v6820_v30 = vpop.f32.mrf.mxu3  ;;  %v12339_v40 = vpack.c.b16 %v5978_v53, %v5977_v49  ;;  %v5631_v26 = vrot.slane %v5629_v5, 4  ;;  %v9993_v52 = vld [vmem:[%s10212_s13 + $0xbc] sm:$0xf] }
 0x5f1   : > { %v5049_v56 = vpop.f32.mrf.mxu1 }
 0x5f2   : > { %v7128_v17 = vadd.f32 %v6820_v30, %v6584_v29  ;;  %v5356_v23 = vadd.f32 %v5049_v56, %v13585_v51 }
 0x5f3   : > { %v7366_v61 = vpop.f32.mrf.mxu0 }
 0x5f4   : > { %v7672_v39 = vadd.f32 %v7364_v35, %v7128_v17  ;;  %v13586_v17 = vld [vmem:[#allocation108_spill] sm:$0xff] }
 0x5f6   : > { %v8055_v15 = vadd.f32 %v8054_v60, %v7672_v39  ;;  %v8189_v7 = vmul.f32 %v7672_v39, %v7672_v39  ;;  %v9145_v60 = vrot.slane %v9992_v42, 9 }
 0x5f7   : > { %v6278_v63 = vpop.f32.mrf.mxu2 }
 0x5f8   : > { %v8316_v24 = vadd.f32 %v8315_v33, %v8189_v7  ;;  %v6585_v43 = vadd.f32 %v6278_v63, %v5356_v23  ;;  %v6822_v8 = vpop.f32.mrf.mxu3  ;;  %v5632_v33 = vrot.slane %v9993_v52, 5  ;;  %v5630_v51 = vsel %vm12042_vm5, %v9145_v60, %v5629_v5 }
 0x5f9   : > { %v5052_v21 = vpop.f32.mrf.mxu1 }
 0x5fa   : > { %v7129_v50 = vadd.f32 %v6822_v8, %v6585_v43  ;;  %v5357_v31 = vadd.f32 %v5052_v21, %v13586_v17  ;;  %v5633_v23 = vsel %vm12042_vm5, %v5631_v26, %v5632_v33  ;;  %v13587_v21 = vld [vmem:[#allocation109_spill] sm:$0xff] }
 0x5fb   : > { %v7369_v18 = vpop.f32.mrf.mxu0  ;;  %v5980_v63 = vunpack.c.l.b16 %v5633_v23 }
 0x5fc   : > { %v7673_v35 = vadd.f32 %v7366_v61, %v7129_v50  ;;  %5091 = vmatmul.bf16.gmra.mxu1 %v10969_v1  ;;  %6320 = vmatmul.bf16.gmra.mxu2 %v12272_v57 }
 0x5fd   : > { %6864 = vmatmul.bf16.gmra.mxu3 %v12308_v45 }
 0x5fe   : > { %7408 = vmatmul.bf16.gmra.mxu0 %v12339_v40  ;;  %v9479_v29 = vpack.c.bf16 %v7673_v35, %v7672_v39  ;;  %v8056_v30 = vadd.f32 %v8055_v15, %v7673_v35  ;;  %v8190_v56 = vmul.f32 %v7673_v35, %v7673_v35  ;;  %v5979_v15 = vunpack.c.l.b16 %v5630_v51 }
 0x5ff   : > { %v6281_v47 = vpop.f32.mrf.mxu2 }
 0x600   : > { %9779 = vst [vmem:[%s12280_s29 + $0x20] sm:$0xff] %v9479_v29   ;;  %v8317_v61 = vadd.f32 %v8316_v24, %v8190_v56  ;;  %v6586_v1 = vadd.f32 %v6281_v47, %v5357_v31  ;;  %v6825_v49 = vpop.f32.mrf.mxu3  ;;  %v12355_v29 = vpack.c.b16 %v5980_v63, %v5979_v15  ;;  %v9994_v56 = vld [vmem:[%s10212_s13 + $0xc0] sm:$0xf]  ;;  %v9995_v31 = vld [vmem:[%s10212_s13 + $0xc4] sm:$0x1] }
 0x601   : > { %v5054_v57 = vpop.f32.mrf.mxu1  ;;  %v5635_v5 = vrot.slane %v9994_v56, 5  ;;  %v5638_v47 = vrot.slane %v9995_v31, 5  ;;  %v9997_v31 = vld [vmem:[%s10212_s13 + $0xc8] sm:$0xf] }
 0x602   : > { %v7130_v53 = vadd.f32 %v6825_v49, %v6586_v1  ;;  %v5358_v22 = vadd.f32 %v5054_v57, %v13587_v21 }
 0x603   : > { %v7371_v7 = vpop.f32.mrf.mxu0  ;;  %v5637_v17 = vrot.slane %v5635_v5, 4 }
 0x604   : > { %v7674_v39 = vadd.f32 %v7369_v18, %v7130_v53 }
 0x605   : > { %v5639_v63 = vsel %vm12042_vm5, %v5637_v17, %v5638_v47  ;;  %v9146_v47 = vrot.slane %v9997_v31, 9  ;;  %v9999_v31 = vld [vmem:[%s10212_s13 + $0xd4] sm:$0xf] }
 0x606   : > { %v8057_v43 = vadd.f32 %v8056_v30, %v7674_v39  ;;  %v8191_v8 = vmul.f32 %v7674_v39, %v7674_v39  ;;  %v5634_v30 = vrot.slane %v5632_v33, 4 }
 0x607   : > { %v6283_v24 = vpop.f32.mrf.mxu2 }
 0x608   : > { %v8318_v50 = vadd.f32 %v8317_v61, %v8191_v8  ;;  %v6587_v35 = vadd.f32 %v6283_v24, %v5358_v22  ;;  %v6827_v42 = vpop.f32.mrf.mxu3  ;;  %v5636_v33 = vsel %vm12042_vm5, %v5634_v30, %v5635_v5  ;;  %v5982_v8 = vunpack.c.l.b16 %v5639_v63  ;;  %v13588_v22 = vld [vmem:[#allocation110_spill] sm:$0xff]  ;;  %v9996_v5 = vld [vmem:[%s10212_s13 + $0xcc] sm:$0xf] }
 0x609   : > { %v5057_v52 = vpop.f32.mrf.mxu1 }
 0x60a   : > { %v7131_v60 = vadd.f32 %v6827_v42, %v6587_v35  ;;  %v5359_v57 = vadd.f32 %v5057_v52, %v10965_v59 }
 0x60b   : > { %v7374_v26 = vpop.f32.mrf.mxu0 }
 0x60c   : > { %v7675_v18 = vadd.f32 %v7371_v7, %v7131_v60  ;;  %5096 = vmatmul.bf16.gmra.mxu1 %v10990_v2  ;;  %6325 = vmatmul.bf16.gmra.mxu2 %v12293_v27 }
 0x60d   : > { %6869 = vmatmul.bf16.gmra.mxu3 %v12324_v12 }
 0x60e   : > { %7413 = vmatmul.bf16.gmra.mxu0 %v12355_v29  ;;  %v9484_v61 = vpack.c.bf16 %v7675_v18, %v7674_v39  ;;  %v8058_v1 = vadd.f32 %v8057_v43, %v7675_v18  ;;  %v8192_v49 = vmul.f32 %v7675_v18, %v7675_v18  ;;  %v5981_v43 = vunpack.c.l.b16 %v5636_v33 }
 0x60f   : > { %v6286_v53 = vpop.f32.mrf.mxu2  ;;  %v5642_v18 = vrot.slane %v9996_v5, 5 }
 0x610   : > { %9780 = vst [vmem:[%s12280_s29 + $0x28] sm:$0xff] %v9484_v61   ;;  %v8319_v7 = vadd.f32 %v8318_v50, %v8192_v49  ;;  %v6588_v51 = vadd.f32 %v6286_v53, %v5359_v57  ;;  %v6830_v2 = vpop.f32.mrf.mxu3  ;;  %v12370_v60 = vpack.c.b16 %v5982_v8, %v5981_v43 }
 0x611   : > { %v5059_v23 = vpop.f32.mrf.mxu1  ;;  %v5644_v61 = vrot.slane %v5642_v18, 4  ;;  %v5643_v43 = vsel %vm12042_vm5, %v9146_v47, %v5642_v18  ;;  %v5648_v18 = vrot.slane %v9999_v31, 5 }
 0x612   : > { %v7132_v27 = vadd.f32 %v6830_v2, %v6588_v51  ;;  %v5360_v24 = vadd.f32 %v5059_v23, %v13588_v22  ;;  %v13589_v51 = vld [vmem:[#allocation111_spill] sm:$0xff] }
 0x613   : > { %v7376_v15 = vpop.f32.mrf.mxu0 }
 0x614   : > { %v7676_v39 = vadd.f32 %v7374_v26, %v7132_v27 }
 0x616   : > { %v8059_v21 = vadd.f32 %v8058_v1, %v7676_v39  ;;  %v8193_v59 = vmul.f32 %v7676_v39, %v7676_v39  ;;  %v9998_v1 = vld [vmem:[%s10212_s13 + $0xd0] sm:$0xf] }
 0x617   : > { %v6288_v50 = vpop.f32.mrf.mxu2  ;;  %v5645_v49 = vrot.slane %v9998_v1, 5 }
 0x618   : > { %v8320_v35 = vadd.f32 %v8319_v7, %v8193_v59  ;;  %v6589_v42 = vadd.f32 %v6288_v50, %v5360_v24  ;;  %v6832_v52 = vpop.f32.mrf.mxu3  ;;  %v13590_v50 = vld [vmem:[#allocation112_spill] sm:$0xff] }
 0x619   : > { %v5062_v56 = vpop.f32.mrf.mxu1  ;;  %v5646_v8 = vsel %vm12042_vm5, %v5644_v61, %v5645_v49  ;;  %v5647_v1 = vrot.slane %v5645_v49, 4 }
 0x61a   : > { %v7133_v30 = vadd.f32 %v6832_v52, %v6589_v42  ;;  %v5361_v2 = vadd.f32 %v5062_v56, %v13589_v51  ;;  %v5984_v59 = vunpack.c.l.b16 %v5646_v8 }
 0x61b   : > { %v7379_v17 = vpop.f32.mrf.mxu0  ;;  %v5649_v49 = vsel %vm12042_vm5, %v5647_v1, %v5648_v18  ;;  %v10003_v1 = vld [vmem:[%s10212_s13 + $0xe4] sm:$0xf] }
 0x61c   : > { %v7677_v26 = vadd.f32 %v7376_v15, %v7133_v30  ;;  %5101 = vmatmul.bf16.gmra.mxu1 %v11012_v14  ;;  %6330 = vmatmul.bf16.gmra.mxu2 %v12308_v45 }
 0x61d   : > { %6874 = vmatmul.bf16.gmra.mxu3 %v12339_v40 }
 0x61e   : > { %7418 = vmatmul.bf16.gmra.mxu0 %v12370_v60  ;;  %v9489_v57 = vpack.c.bf16 %v7677_v26, %v7676_v39  ;;  %v8060_v53 = vadd.f32 %v8059_v21, %v7677_v26  ;;  %v8194_v7 = vmul.f32 %v7677_v26, %v7677_v26  ;;  %v5983_v21 = vunpack.c.l.b16 %v5643_v43 }
 0x61f   : > { %v6291_v23 = vpop.f32.mrf.mxu2 }
 0x620   : > { %9781 = vst [vmem:[%s12280_s29 + $0x30] sm:$0xff] %v9489_v57   ;;  %v8321_v27 = vadd.f32 %v8320_v35, %v8194_v7  ;;  %v6590_v14 = vadd.f32 %v6291_v23, %v5361_v2  ;;  %v6835_v15 = vpop.f32.mrf.mxu3  ;;  %v12386_v26 = vpack.c.b16 %v5984_v59, %v5983_v21  ;;  %v5650_v57 = vrot.slane %v5648_v18, 4 }
 0x621   : > { %v5064_v45 = vpop.f32.mrf.mxu1 }
 0x622   : > { %v7134_v33 = vadd.f32 %v6835_v15, %v6590_v14  ;;  %v5362_v42 = vadd.f32 %v5064_v45, %v13590_v50 }
 0x623   : > { %v7381_v63 = vpop.f32.mrf.mxu0 }
 0x624   : > { %v7678_v39 = vadd.f32 %v7379_v17, %v7134_v33 }
 0x626   : > { %v8061_v22 = vadd.f32 %v8060_v53, %v7678_v39  ;;  %v8195_v24 = vmul.f32 %v7678_v39, %v7678_v39  ;;  %v10000_v53 = vld [vmem:[%s10212_s13 + $0xd8] sm:$0x1] }
 0x627   : > { %v6293_v35 = vpop.f32.mrf.mxu2  ;;  %v5651_v7 = vrot.slane %v10000_v53, 5 }
 0x628   : > { %v8322_v52 = vadd.f32 %v8321_v27, %v8195_v24  ;;  %v6591_v56 = vadd.f32 %v6293_v35, %v5362_v42  ;;  %v6837_v5 = vpop.f32.mrf.mxu3 }
 0x629   : > { %v5067_v30 = vpop.f32.mrf.mxu1  ;;  %v5652_v43 = vsel %vm12042_vm5, %v5650_v57, %v5651_v7  ;;  %v5658_v57 = vrot.slane %v10003_v1, 5 }
 0x62a   : > { %v7135_v47 = vadd.f32 %v6837_v5, %v6591_v56  ;;  %v5363_v27 = vadd.f32 %v5067_v30, %v11008_v28  ;;  %v5986_v21 = vunpack.c.l.b16 %v5652_v43  ;;  %v10001_v5 = vld [vmem:[%s10212_s13 + $0xe0] sm:$0xf] }
 0x62b   : > { %v7384_v61 = vpop.f32.mrf.mxu0  ;;  %v5655_v30 = vrot.slane %v10001_v5, 5 }
 0x62c   : > { %v7679_v17 = vadd.f32 %v7381_v63, %v7135_v47  ;;  %5106 = vmatmul.bf16.gmra.mxu1 %v11033_v0  ;;  %6335 = vmatmul.bf16.gmra.mxu2 %v12324_v12 }
 0x62d   : > { %6879 = vmatmul.bf16.gmra.mxu3 %v12355_v29 }
 0x62e   : > { %7423 = vmatmul.bf16.gmra.mxu0 %v12386_v26  ;;  %v9494_v51 = vpack.c.bf16 %v7679_v17, %v7678_v39  ;;  %v8062_v2 = vadd.f32 %v8061_v22, %v7679_v17  ;;  %v8196_v23 = vmul.f32 %v7679_v17, %v7679_v17  ;;  %v5985_v39 = vunpack.c.l.b16 %v5649_v49 }
 0x62f   : > { %v6296_v14 = vpop.f32.mrf.mxu2  ;;  %v5657_v17 = vrot.slane %v5655_v30, 4 }
 0x630   : > { %9782 = vst [vmem:[%s12280_s29 + $0x38] sm:$0xff] %v9494_v51   ;;  %v8323_v15 = vadd.f32 %v8322_v52, %v8196_v23  ;;  %v6592_v45 = vadd.f32 %v6296_v14, %v5363_v27  ;;  %v6840_v0 = vpop.f32.mrf.mxu3  ;;  %v12401_v56 = vpack.c.b16 %v5986_v21, %v5985_v39  ;;  %v13592_v21 = vld [vmem:[#allocation114_spill] sm:$0xff] }
 0x631   : > { %v5069_v33 = vpop.f32.mrf.mxu1 }
 0x632   : > { %v7136_v12 = vadd.f32 %v6840_v0, %v6592_v45  ;;  %v5364_v22 = vadd.f32 %v5069_v33, %v11019_v37  ;;  %v10002_v37 = vld [vmem:[%s10212_s13 + $0xdc] sm:$0xf] }
 0x633   : > { %v7386_v63 = vpop.f32.mrf.mxu0 }
 0x634   : > { %v7680_v8 = vadd.f32 %v7384_v61, %v7136_v12  ;;  %v9147_v61 = vrot.slane %v10002_v37, 9  ;;  %v5659_v12 = vsel %vm12042_vm5, %v5657_v17, %v5658_v57 }
 0x635   : > { %v5988_v43 = vunpack.c.l.b16 %v5659_v12 }
 0x636   : > { %v8063_v59 = vadd.f32 %v8062_v2, %v7680_v8  ;;  %v8197_v28 = vmul.f32 %v7680_v8, %v7680_v8  ;;  %v13591_v2 = vld [vmem:[#allocation113_spill] sm:$0xff]  ;;  %v5656_v33 = vsel %vm12042_vm5, %v9147_v61, %v5655_v30  ;;  %v10005_v61 = vld [vmem:[%s10212_s13 + $0xec] sm:$0x1] }
 0x637   : > { %v6298_v24 = vpop.f32.mrf.mxu2  ;;  %v5987_v49 = vunpack.c.l.b16 %v5656_v33  ;;  %v5664_v17 = vrot.slane %v10005_v61, 5 }
 0x638   : > { %v8324_v50 = vadd.f32 %v8323_v15, %v8197_v28  ;;  %v6593_v42 = vadd.f32 %v6298_v24, %v5364_v22  ;;  %v6842_v35 = vpop.f32.mrf.mxu3 }
 0x639   : > { %v5072_v52 = vpop.f32.mrf.mxu1 }
 0x63a   : > { %v7137_v31 = vadd.f32 %v6842_v35, %v6593_v42  ;;  %v5365_v23 = vadd.f32 %v5072_v52, %v13591_v2  ;;  %v12417_v35 = vpack.c.b16 %v5988_v43, %v5987_v49  ;;  %v10004_v52 = vld [vmem:[%s10212_s13 + $0xe8] sm:$0xf] }
 0x63b   : > { %v7389_v18 = vpop.f32.mrf.mxu0  ;;  %v5661_v5 = vrot.slane %v10004_v52, 5 }
 0x63c   : > { %v7681_v47 = vadd.f32 %v7386_v63, %v7137_v31  ;;  %5111 = vmatmul.bf16.gmra.mxu1 %v11055_v38  ;;  %6340 = vmatmul.bf16.gmra.mxu2 %v12339_v40 }
 0x63d   : > { %6884 = vmatmul.bf16.gmra.mxu3 %v12370_v60  ;;  %v5663_v37 = vrot.slane %v5661_v5, 4 }
 0x63e   : > { %7428 = vmatmul.bf16.gmra.mxu0 %v12401_v56  ;;  %v9499_v53 = vpack.c.bf16 %v7681_v47, %v7680_v8  ;;  %v8064_v7 = vadd.f32 %v8063_v59, %v7681_v47  ;;  %v8198_v51 = vmul.f32 %v7681_v47, %v7681_v47  ;;  %v5660_v47 = vrot.slane %v5658_v57, 4 }
 0x63f   : > { %v6301_v27 = vpop.f32.mrf.mxu2 }
 0x640   : > { %9783 = vst [vmem:[%s12280_s29 + $0x40] sm:$0xff] %v9499_v53   ;;  %v8325_v14 = vadd.f32 %v8324_v50, %v8198_v51  ;;  %v6594_v38 = vadd.f32 %v6301_v27, %v5365_v23  ;;  %v6845_v15 = vpop.f32.mrf.mxu3  ;;  %v5662_v57 = vsel %vm12042_vm5, %v5660_v47, %v5661_v5  ;;  %v10008_v5 = vld [vmem:[%s10212_s13 + $0xf8] sm:$0xf] }
 0x641   : > { %v5074_v40 = vpop.f32.mrf.mxu1 }
 0x642   : > { %v7138_v45 = vadd.f32 %v6845_v15, %v6594_v38  ;;  %v5366_v59 = vadd.f32 %v5074_v40, %v13592_v21  ;;  %v5665_v15 = vsel %vm12042_vm5, %v5663_v37, %v5664_v17  ;;  %v13593_v37 = vld [vmem:[#allocation115_spill] sm:$0xff] }
 0x643   : > { %v7391_v0 = vpop.f32.mrf.mxu0 }
 0x644   : > { %v7682_v63 = vadd.f32 %v7389_v18, %v7138_v45  ;;  %v5989_v45 = vunpack.c.l.b16 %v5662_v57  ;;  %v13594_v57 = vld [vmem:[#allocation116_spill] sm:$0xff] }
 0x646   : > { %v8065_v8 = vadd.f32 %v8064_v7, %v7682_v63  ;;  %v8199_v39 = vmul.f32 %v7682_v63, %v7682_v63 }
 0x647   : > { %v6303_v28 = vpop.f32.mrf.mxu2 }
 0x648   : > { %v8326_v22 = vadd.f32 %v8325_v14, %v8199_v39  ;;  %v6595_v24 = vadd.f32 %v6303_v28, %v5366_v59  ;;  %v6847_v50 = vpop.f32.mrf.mxu3  ;;  %v10006_v59 = vld [vmem:[%s10212_s13 + $0xf4] sm:$0xf] }
 0x649   : > { %v5077_v42 = vpop.f32.mrf.mxu1  ;;  %v5668_v28 = vrot.slane %v10006_v59, 5 }
 0x64a   : > { %v7139_v30 = vadd.f32 %v6847_v50, %v6595_v24  ;;  %v5367_v51 = vadd.f32 %v5077_v42, %v11051_v3 }
 0x64b   : > { %v7394_v31 = vpop.f32.mrf.mxu0  ;;  %v5670_v52 = vrot.slane %v5668_v28, 4 }
 0x64c   : > { %v7683_v18 = vadd.f32 %v7391_v0, %v7139_v30  ;;  %5116 = vmatmul.bf16.gmra.mxu1 %v11076_v10  ;;  %6345 = vmatmul.bf16.gmra.mxu2 %v12355_v29  ;;  %v5990_v0 = vunpack.c.l.b16 %v5665_v15  ;;  %v5671_v30 = vrot.slane %v10008_v5, 5 }
 0x64d   : > { %6889 = vmatmul.bf16.gmra.mxu3 %v12386_v26 }
 0x64e   : > { %7433 = vmatmul.bf16.gmra.mxu0 %v12417_v35  ;;  %v9504_v1 = vpack.c.bf16 %v7683_v18, %v7682_v63  ;;  %v8066_v53 = vadd.f32 %v8065_v8, %v7683_v18  ;;  %v8200_v7 = vmul.f32 %v7683_v18, %v7683_v18  ;;  %v12432_v21 = vpack.c.b16 %v5990_v0, %v5989_v45 }
 0x64f   : > { %v6306_v2 = vpop.f32.mrf.mxu2  ;;  %v5673_v59 = vrot.slane %v5671_v30, 4 }
 0x650   : > { %9784 = vst [vmem:[%s12280_s29 + $0x48] sm:$0xff] %v9504_v1   ;;  %v8327_v23 = vadd.f32 %v8326_v22, %v8200_v7  ;;  %v6596_v27 = vadd.f32 %v6306_v2, %v5367_v51  ;;  %v6850_v10 = vpop.f32.mrf.mxu3 }
 0x651   : > { %v5079_v14 = vpop.f32.mrf.mxu1 }
 0x652   : > { %v7140_v29 = vadd.f32 %v6850_v10, %v6596_v27  ;;  %v5368_v12 = vadd.f32 %v5079_v14, %v11062_v16  ;;  %v10007_v16 = vld [vmem:[%s10212_s13 + $0xf0] sm:$0xf] }
 0x653   : > { %v7396_v38 = vpop.f32.mrf.mxu0  ;;  %v9148_v42 = vrot.slane %v10007_v16, 9 }
 0x654   : > { %v7684_v40 = vadd.f32 %v7394_v31, %v7140_v29 }
 0x655   : > { %v5669_v2 = vsel %vm12042_vm5, %v9148_v42, %v5668_v28 }
 0x656   : > { %v8067_v33 = vadd.f32 %v8066_v53, %v7684_v40  ;;  %v8201_v3 = vmul.f32 %v7684_v40, %v7684_v40  ;;  %v5991_v10 = vunpack.c.l.b16 %v5669_v2 }
 0x657   : > { %v6308_v63 = vpop.f32.mrf.mxu2 }
 0x658   : > { %v8328_v49 = vadd.f32 %v8327_v23, %v8201_v3  ;;  %v6597_v43 = vadd.f32 %v6308_v63, %v5368_v12  ;;  %v6852_v8 = vpop.f32.mrf.mxu3  ;;  %v5672_v23 = vsel %vm12042_vm5, %v5670_v52, %v5671_v30  ;;  %v10009_v63 = vld [vmem:[%s10212_s13 + $0xfc] sm:$0xf] }
 0x659   : > { %v5082_v39 = vpop.f32.mrf.mxu1  ;;  %v5992_v14 = vunpack.c.l.b16 %v5672_v23 }
 0x65a   : > { %v7141_v22 = vadd.f32 %v6852_v8, %v6597_v43  ;;  %v5369_v61 = vadd.f32 %v5082_v39, %v13593_v37 }
 0x65b   : > { %v7399_v24 = vpop.f32.mrf.mxu0  ;;  %v12448_v12 = vpack.c.b16 %v5992_v14, %v5991_v10  ;;  %v10011_v14 = vld [vmem:[%s10212_s13 + $0x108] sm:$0xf] }
 0x65c   : > { %v7685_v50 = vadd.f32 %v7396_v38, %v7141_v22  ;;  %5121 = vmatmul.bf16.gmra.mxu1 %v11098_v36  ;;  %6350 = vmatmul.bf16.gmra.mxu2 %v12370_v60  ;;  %v10010_v22 = vld [vmem:[%s10212_s13 + $0x100] sm:$0x1] }
 0x65d   : > { %6894 = vmatmul.bf16.gmra.mxu3 %v12401_v56 }
 0x65e   : > { %7438 = vmatmul.bf16.gmra.mxu0 %v12432_v21  ;;  %v9509_v31 = vpack.c.bf16 %v7685_v50, %v7684_v40  ;;  %v8068_v18 = vadd.f32 %v8067_v33, %v7685_v50  ;;  %v8202_v47 = vmul.f32 %v7685_v50, %v7685_v50 }
 0x65f   : > { %v6311_v17 = vpop.f32.mrf.mxu2 }
 0x660   : > { %9785 = vst [vmem:[%s12280_s29 + $0x50] sm:$0xff] %v9509_v31   ;;  %v8329_v1 = vadd.f32 %v8328_v49, %v8202_v47  ;;  %v6598_v36 = vadd.f32 %v6311_v17, %v5369_v61  ;;  %v6855_v53 = vpop.f32.mrf.mxu3  ;;  %v5674_v49 = vrot.slane %v10009_v63, 5 }
 0x661   : > { %v5084_v60 = vpop.f32.mrf.mxu1 }
 0x662   : > { %v7142_v7 = vadd.f32 %v6855_v53, %v6598_v36  ;;  %v5370_v15 = vadd.f32 %v5084_v60, %v13594_v57  ;;  %v5676_v28 = vrot.slane %v5674_v49, 4  ;;  %v5675_v30 = vsel %vm12042_vm5, %v5673_v59, %v5674_v49 }
 0x663   : > { %v7401_v51 = vpop.f32.mrf.mxu0 }
 0x664   : > { %v7686_v27 = vadd.f32 %v7399_v24, %v7142_v7  ;;  %v5677_v24 = vrot.slane %v10010_v22, 5 }
 0x666   : > { %v8069_v29 = vadd.f32 %v8068_v18, %v7686_v27  ;;  %v8203_v38 = vmul.f32 %v7686_v27, %v7686_v27  ;;  %v5678_v61 = vsel %vm12042_vm5, %v5676_v28, %v5677_v24 }
 0x667   : > { %v6313_v40 = vpop.f32.mrf.mxu2  ;;  %v5994_v36 = vunpack.c.l.b16 %v5678_v61 }
 0x668   : > { %v8330_v45 = vadd.f32 %v8329_v1, %v8203_v38  ;;  %v6599_v0 = vadd.f32 %v6313_v40, %v5370_v15  ;;  %v6857_v33 = vpop.f32.mrf.mxu3  ;;  %v5993_v1 = vunpack.c.l.b16 %v5675_v30 }
 0x669   : > { %v5087_v3 = vpop.f32.mrf.mxu1 }
 0x66a   : > { %v7143_v43 = vadd.f32 %v6857_v33, %v6599_v0  ;;  %v5371_v52 = vadd.f32 %v5087_v3, %v11094_v9  ;;  %v12463_v10 = vpack.c.b16 %v5994_v36, %v5993_v1  ;;  %v10013_v0 = vld [vmem:[%s10212_s13 + $0x10c] sm:$0xf]  ;;  %v10014_v36 = vld [vmem:[%s10212_s13 + $0x110] sm:$0xf] }
 0x66b   : > { %v7404_v8 = vpop.f32.mrf.mxu0  ;;  %v5684_v33 = vrot.slane %v10013_v0, 5 }
 0x66c   : > { %v7687_v39 = vadd.f32 %v7401_v51, %v7143_v43  ;;  %5126 = vmatmul.bf16.gmra.mxu1 %v11119_v19  ;;  %6355 = vmatmul.bf16.gmra.mxu2 %v12386_v26  ;;  %v13595_v43 = vld [vmem:[#allocation117_spill] sm:$0xff] }
 0x66d   : > { %6899 = vmatmul.bf16.gmra.mxu3 %v12417_v35 }
 0x66e   : > { %7443 = vmatmul.bf16.gmra.mxu0 %v12448_v12  ;;  %v9514_v50 = vpack.c.bf16 %v7687_v39, %v7686_v27  ;;  %v8070_v16 = vadd.f32 %v8069_v29, %v7687_v39  ;;  %v8204_v42 = vmul.f32 %v7687_v39, %v7687_v39  ;;  %v5681_v29 = vrot.slane %v10011_v14, 5 }
 0x66f   : > { %v6316_v5 = vpop.f32.mrf.mxu2 }
 0x670   : > { %9786 = vst [vmem:[%s12280_s29 + $0x58] sm:$0xff] %v9514_v50   ;;  %v8331_v31 = vadd.f32 %v8330_v45, %v8204_v42  ;;  %v6600_v18 = vadd.f32 %v6316_v5, %v5371_v52  ;;  %v6860_v19 = vpop.f32.mrf.mxu3  ;;  %v5683_v45 = vrot.slane %v5681_v29, 4 }
 0x671   : > { %v5089_v47 = vpop.f32.mrf.mxu1 }
 0x672   : > { %v7144_v26 = vadd.f32 %v6860_v19, %v6600_v18  ;;  %v5372_v60 = vadd.f32 %v5089_v47, %v11105_v44  ;;  %v10012_v44 = vld [vmem:[%s10212_s13 + $0x104] sm:$0xf] }
 0x673   : > { %v7406_v37 = vpop.f32.mrf.mxu0  ;;  %v9149_v40 = vrot.slane %v10012_v44, 9  ;;  %v13596_v19 = vld [vmem:[#allocation118_spill] sm:$0xff] }
 0x674   : > { %v7688_v17 = vadd.f32 %v7404_v8, %v7144_v26 }
 0x675   : > { %v5682_v50 = vsel %vm12042_vm5, %v9149_v40, %v5681_v29 }
 0x676   : > { %v8071_v53 = vadd.f32 %v8070_v16, %v7688_v17  ;;  %v8205_v9 = vmul.f32 %v7688_v17, %v7688_v17  ;;  %v5685_v16 = vsel %vm12042_vm5, %v5683_v45, %v5684_v33  ;;  %v5995_v52 = vunpack.c.l.b16 %v5682_v50 }
 0x677   : > { %v6318_v7 = vpop.f32.mrf.mxu2  ;;  %v5996_v5 = vunpack.c.l.b16 %v5685_v16 }
 0x678   : > { %v8332_v51 = vadd.f32 %v8331_v31, %v8205_v9  ;;  %v6601_v2 = vadd.f32 %v6318_v7, %v5372_v60  ;;  %v6862_v23 = vpop.f32.mrf.mxu3 }
 0x679   : > { %v5092_v27 = vpop.f32.mrf.mxu1  ;;  %v12479_v1 = vpack.c.b16 %v5996_v5, %v5995_v52 }
 0x67a   : > { %v7145_v38 = vadd.f32 %v6862_v23, %v6601_v2  ;;  %v5373_v8 = vadd.f32 %v5092_v27, %v13595_v43  ;;  %v5686_v2 = vrot.slane %v5684_v33, 4  ;;  %v10015_v27 = vld [vmem:[%s10212_s13 + $0x114] sm:$0x1] }
 0x67b   : > { %v7409_v57 = vpop.f32.mrf.mxu0  ;;  %v5690_v14 = vrot.slane %v10015_v27, 5 }
 0x67c   : > { %v7689_v15 = vadd.f32 %v7406_v37, %v7145_v38  ;;  %5131 = vmatmul.bf16.gmra.mxu1 %v11153_v4  ;;  %6360 = vmatmul.bf16.gmra.mxu2 %v12401_v56 }
 0x67d   : > { %6904 = vmatmul.bf16.gmra.mxu3 %v12432_v21 }
 0x67e   : > { %7448 = vmatmul.bf16.gmra.mxu0 %v12463_v10  ;;  %v9519_v3 = vpack.c.bf16 %v7689_v15, %v7688_v17  ;;  %v8072_v63 = vadd.f32 %v8071_v53, %v7689_v15  ;;  %v8206_v49 = vmul.f32 %v7689_v15, %v7689_v15  ;;  %v5687_v53 = vrot.slane %v10014_v36, 5  ;;  %v13598_v15 = vld [vmem:[#allocation119_spill] sm:$0xff]  ;;  %v10018_v36 = vld [vmem:[%s10212_s13 + $0x120] sm:$0xf] }
 0x67f   : > { %v6321_v39 = vpop.f32.mrf.mxu2 }
 0x680   : > { %9787 = vst [vmem:[%s12280_s29 + $0x60] sm:$0xff] %v9519_v3   ;;  %v8333_v59 = vadd.f32 %v8332_v51, %v8206_v49  ;;  %v6602_v4 = vadd.f32 %v6321_v39, %v5373_v8  ;;  %v6865_v28 = vpop.f32.mrf.mxu3  ;;  %v13597_v51 = vld [vmem:[#allocation122_spill] sm:$0xff]  ;;  %v5689_v23 = vrot.slane %v5687_v53, 4  ;;  %v5688_v33 = vsel %vm12042_vm5, %v5686_v2, %v5687_v53 }
 0x681   : > { %v5094_v56 = vpop.f32.mrf.mxu1  ;;  %v5997_v39 = vunpack.c.l.b16 %v5688_v33  ;;  %v5697_v53 = vrot.slane %v10018_v36, 5 }
 0x682   : > { %v7146_v22 = vadd.f32 %v6865_v28, %v6602_v4  ;;  %v5374_v47 = vadd.f32 %v5094_v56, %v13596_v19  ;;  %v5691_v43 = vsel %vm12042_vm5, %v5689_v23, %v5690_v14  ;;  %v13599_v56 = vld [vmem:[#allocation120_spill] sm:$0xff] }
 0x683   : > { %v7411_v24 = vpop.f32.mrf.mxu0 }
 0x684   : > { %v7690_v42 = vadd.f32 %v7409_v57, %v7146_v22 }
 0x686   : > { %v8073_v31 = vadd.f32 %v8072_v63, %v7690_v42  ;;  %v8207_v18 = vmul.f32 %v7690_v42, %v7690_v42 }
 0x687   : > { %v6323_v26 = vpop.f32.mrf.mxu2 }
 0x688   : > { %v8334_v37 = vadd.f32 %v8333_v59, %v8207_v18  ;;  %v6603_v30 = vadd.f32 %v6323_v26, %v5374_v47  ;;  %v6867_v61 = vpop.f32.mrf.mxu3  ;;  %v5998_v59 = vunpack.c.l.b16 %v5691_v43 }
 0x689   : > { %v5097_v17 = vpop.f32.mrf.mxu1 }
 0x68a   : > { %v7147_v9 = vadd.f32 %v6867_v61, %v6603_v30  ;;  %v5375_v44 = vadd.f32 %v5097_v17, %v13598_v15  ;;  %v12494_v5 = vpack.c.b16 %v5998_v59, %v5997_v39  ;;  %v10017_v30 = vld [vmem:[%s10212_s13 + $0x118] sm:$0xf] }
 0x68b   : > { %v7414_v60 = vpop.f32.mrf.mxu0  ;;  %v9150_v61 = vrot.slane %v10017_v30, 9 }
 0x68c   : > { %v7691_v7 = vadd.f32 %v7411_v24, %v7147_v9  ;;  %5136 = vmatmul.bf16.gmra.mxu1 %v13597_v51  ;;  %6365 = vmatmul.bf16.gmra.mxu2 %v12417_v35  ;;  %v13601_v51 = vld [vmem:[#allocation121_spill] sm:$0xff] }
 0x68d   : > { %6909 = vmatmul.bf16.gmra.mxu3 %v12448_v12 }
 0x68e   : > { %7453 = vmatmul.bf16.gmra.mxu0 %v12479_v1  ;;  %v9524_v29 = vpack.c.bf16 %v7691_v7, %v7690_v42  ;;  %v8074_v38 = vadd.f32 %v8073_v31, %v7691_v7  ;;  %v8208_v57 = vmul.f32 %v7691_v7, %v7691_v7  ;;  %v10016_v31 = vld [vmem:[%s10212_s13 + $0x11c] sm:$0xf] }
 0x68f   : > { %v6326_v40 = vpop.f32.mrf.mxu2  ;;  %v5694_v18 = vrot.slane %v10016_v31, 5  ;;  %v10020_v31 = vld [vmem:[%s10212_s13 + $0x128] sm:$0x1] }
 0x690   : > { %9788 = vst [vmem:[%s12280_s29 + $0x68] sm:$0xff] %v9524_v29   ;;  %v8335_v45 = vadd.f32 %v8334_v37, %v8208_v57  ;;  %v6604_v0 = vadd.f32 %v6326_v40, %v5375_v44  ;;  %v6870_v3 = vpop.f32.mrf.mxu3  ;;  %v13600_v37 = vld [vmem:[#allocation4_spill] sm:$0xff] }
 0x691   : > { %v5099_v63 = vpop.f32.mrf.mxu1  ;;  %v5696_v17 = vrot.slane %v5694_v18, 4  ;;  %v5695_v15 = vsel %vm12042_vm5, %v9150_v61, %v5694_v18  ;;  %v5703_v18 = vrot.slane %v10020_v31, 5 }
 0x692   : > { %v7148_v35 = vadd.f32 %v6870_v3, %v6604_v0  ;;  %v5376_v22 = vadd.f32 %v5099_v63, %v13599_v56 }
 0x693   : > { %v7416_v49 = vpop.f32.mrf.mxu0  ;;  %v5698_v44 = vsel %vm12042_vm5, %v5696_v17, %v5697_v53 }
 0x694   : > { %v7692_v8 = vadd.f32 %v7414_v60, %v7148_v35  ;;  %v6000_v0 = vunpack.c.l.b16 %v5698_v44  ;;  %v13602_v35 = vld [vmem:[#allocation123_spill] sm:$0xff] }
 0x696   : > { %v8075_v4 = vadd.f32 %v8074_v38, %v7692_v8  ;;  %v8209_v28 = vmul.f32 %v7692_v8, %v7692_v8 }
 0x697   : > { %v6328_v24 = vpop.f32.mrf.mxu2 }
 0x698   : > { %v8336_v50 = vadd.f32 %v8335_v45, %v8209_v28  ;;  %v6605_v16 = vadd.f32 %v6328_v24, %v5376_v22  ;;  %v6872_v42 = vpop.f32.mrf.mxu3  ;;  %v5999_v45 = vunpack.c.l.b16 %v5695_v15  ;;  %v10019_v28 = vld [vmem:[%s10212_s13 + $0x124] sm:$0xf] }
 0x699   : > { %v5102_v52 = vpop.f32.mrf.mxu1  ;;  %v5700_v56 = vrot.slane %v10019_v28, 5  ;;  %v10023_v28 = vld [vmem:[%s10212_s13 + $0x134] sm:$0xf] }
 0x69a   : > { %v7149_v19 = vadd.f32 %v6872_v42, %v6605_v16  ;;  %v5377_v2 = vadd.f32 %v5102_v52, %v13601_v51  ;;  %v13603_v16 = vld [vmem:[#allocation10_spill] sm:$0xff]  ;;  %v5699_v42 = vrot.slane %v5697_v53, 4 }
 0x69b   : > { %v7419_v47 = vpop.f32.mrf.mxu0  ;;  %v5702_v52 = vrot.slane %v5700_v56, 4 }
 0x69c   : > { %v7693_v26 = vadd.f32 %v7416_v49, %v7149_v19  ;;  %5141 = vmatmul.bf16.gmra.mxu1 %v13600_v37  ;;  %6370 = vmatmul.bf16.gmra.mxu2 %v12432_v21  ;;  %v13604_v37 = vld [vmem:[#allocation124_spill] sm:$0xff]  ;;  %v5701_v53 = vsel %vm12042_vm5, %v5699_v42, %v5700_v56  ;;  %v5710_v56 = vrot.slane %v10023_v28, 5 }
 0x69d   : > { %6914 = vmatmul.bf16.gmra.mxu3 %v12463_v10  ;;  %v5704_v51 = vsel %vm12042_vm5, %v5702_v52, %v5703_v18 }
 0x69e   : > { %7458 = vmatmul.bf16.gmra.mxu0 %v12494_v5  ;;  %v9529_v9 = vpack.c.bf16 %v7693_v26, %v7692_v8  ;;  %v8076_v60 = vadd.f32 %v8075_v4, %v7693_v26  ;;  %v8210_v7 = vmul.f32 %v7693_v26, %v7693_v26  ;;  %v12510_v4 = vpack.c.b16 %v6000_v0, %v5999_v45 }
 0x69f   : > { %v6331_v23 = vpop.f32.mrf.mxu2 }
 0x6a0   : > { %9789 = vst [vmem:[%s12280_s29 + $0x70] sm:$0xff] %v9529_v9   ;;  %v8337_v27 = vadd.f32 %v8336_v50, %v8210_v7  ;;  %v6606_v14 = vadd.f32 %v6331_v23, %v5377_v2  ;;  %v6875_v29 = vpop.f32.mrf.mxu3  ;;  %v6001_v23 = vunpack.c.l.b16 %v5701_v53 }
 0x6a1   : > { %v5104_v21 = vpop.f32.mrf.mxu1 }
 0x6a2   : > { %v7150_v38 = vadd.f32 %v6875_v29, %v6606_v14  ;;  %v5378_v49 = vadd.f32 %v5104_v21, %v13602_v35  ;;  %v13605_v21 = vld [vmem:[#allocation125_spill] sm:$0xff] }
 0x6a3   : > { %v7421_v57 = vpop.f32.mrf.mxu0 }
 0x6a4   : > { %v7694_v40 = vadd.f32 %v7419_v47, %v7150_v38 }
 0x6a6   : > { %v8077_v3 = vadd.f32 %v8076_v60, %v7694_v40  ;;  %v8211_v63 = vmul.f32 %v7694_v40, %v7694_v40 }
 0x6a7   : > { %v6333_v33 = vpop.f32.mrf.mxu2 }
 0x6a8   : > { %v8338_v43 = vadd.f32 %v8337_v27, %v8211_v63  ;;  %v6607_v8 = vadd.f32 %v6333_v33, %v5378_v49  ;;  %v6877_v39 = vpop.f32.mrf.mxu3  ;;  %v6002_v27 = vunpack.c.l.b16 %v5704_v51 }
 0x6a9   : > { %v5107_v59 = vpop.f32.mrf.mxu1 }
 0x6aa   : > { %v7151_v22 = vadd.f32 %v6877_v39, %v6607_v8  ;;  %v5379_v30 = vadd.f32 %v5107_v59, %v13604_v37  ;;  %v12525_v0 = vpack.c.b16 %v6002_v27, %v6001_v23  ;;  %v10022_v8 = vld [vmem:[%s10212_s13 + $0x12c] sm:$0xf] }
 0x6ab   : > { %v7424_v24 = vpop.f32.mrf.mxu0  ;;  %v9151_v39 = vrot.slane %v10022_v8, 9 }
 0x6ac   : > { %v7695_v50 = vadd.f32 %v7421_v57, %v7151_v22  ;;  %5146 = vmatmul.bf16.gmra.mxu1 %v13603_v16  ;;  %6375 = vmatmul.bf16.gmra.mxu2 %v12448_v12  ;;  %v13607_v16 = vld [vmem:[#allocation7_spill] sm:$0xff] }
 0x6ad   : > { %6919 = vmatmul.bf16.gmra.mxu3 %v12479_v1 }
 0x6ae   : > { %7463 = vmatmul.bf16.gmra.mxu0 %v12510_v4  ;;  %v9534_v19 = vpack.c.bf16 %v7695_v50, %v7694_v40  ;;  %v8078_v47 = vadd.f32 %v8077_v3, %v7695_v50  ;;  %v8212_v26 = vmul.f32 %v7695_v50, %v7695_v50  ;;  %v10021_v3 = vld [vmem:[%s10212_s13 + $0x130] sm:$0xf] }
 0x6af   : > { %v6336_v61 = vpop.f32.mrf.mxu2  ;;  %v5707_v63 = vrot.slane %v10021_v3, 5  ;;  %v10025_v3 = vld [vmem:[%s10212_s13 + $0x13c] sm:$0x1] }
 0x6b0   : > { %9790 = vst [vmem:[%s12280_s29 + $0x78] sm:$0xff] %v9534_v19   ;;  %v8339_v17 = vadd.f32 %v8338_v43, %v8212_v26  ;;  %v6608_v36 = vadd.f32 %v6336_v61, %v5379_v30  ;;  %v6880_v9 = vpop.f32.mrf.mxu3  ;;  %v13606_v43 = vld [vmem:[#allocation16_spill] sm:$0xff] }
 0x6b1   : > { %v5109_v60 = vpop.f32.mrf.mxu1  ;;  %v5709_v59 = vrot.slane %v5707_v63, 4  ;;  %v5708_v37 = vsel %vm12042_vm5, %v9151_v39, %v5707_v63  ;;  %v5716_v63 = vrot.slane %v10025_v3, 5 }
 0x6b2   : > { %v7152_v12 = vadd.f32 %v6880_v9, %v6608_v36  ;;  %v5380_v38 = vadd.f32 %v5109_v60, %v13605_v21 }
 0x6b3   : > { %v7426_v7 = vpop.f32.mrf.mxu0  ;;  %v5711_v30 = vsel %vm12042_vm5, %v5709_v59, %v5710_v56 }
 0x6b4   : > { %v7696_v2 = vadd.f32 %v7424_v24, %v7152_v12  ;;  %v6004_v36 = vunpack.c.l.b16 %v5711_v30  ;;  %v13608_v12 = vld [vmem:[#allocation126_spill] sm:$0xff] }
 0x6b6   : > { %v8079_v14 = vadd.f32 %v8078_v47, %v7696_v2  ;;  %v8213_v29 = vmul.f32 %v7696_v2, %v7696_v2 }
 0x6b7   : > { %v6338_v57 = vpop.f32.mrf.mxu2 }
 0x6b8   : > { %v8340_v15 = vadd.f32 %v8339_v17, %v8213_v29  ;;  %v6609_v44 = vadd.f32 %v6338_v57, %v5380_v38  ;;  %v6882_v40 = vpop.f32.mrf.mxu3  ;;  %v6003_v17 = vunpack.c.l.b16 %v5708_v37  ;;  %v10024_v29 = vld [vmem:[%s10212_s13 + $0x138] sm:$0xf] }
 0x6b9   : > { %v5112_v45 = vpop.f32.mrf.mxu1  ;;  %v5713_v21 = vrot.slane %v10024_v29, 5  ;;  %v10028_v29 = vld [vmem:[%s10212_s13 + $0x148] sm:$0xf] }
 0x6ba   : > { %v7153_v35 = vadd.f32 %v6882_v40, %v6609_v44  ;;  %v5381_v42 = vadd.f32 %v5112_v45, %v13607_v16  ;;  %v13609_v44 = vld [vmem:[#allocation22_spill] sm:$0xff]  ;;  %v5712_v40 = vrot.slane %v5710_v56, 4 }
 0x6bb   : > { %v7429_v49 = vpop.f32.mrf.mxu0  ;;  %v5715_v45 = vrot.slane %v5713_v21, 4 }
 0x6bc   : > { %v7697_v33 = vadd.f32 %v7426_v7, %v7153_v35  ;;  %5151 = vmatmul.bf16.gmra.mxu1 %v13606_v43  ;;  %6380 = vmatmul.bf16.gmra.mxu2 %v12463_v10  ;;  %v13610_v43 = vld [vmem:[#allocation13_spill] sm:$0xff]  ;;  %v5714_v56 = vsel %vm12042_vm5, %v5712_v40, %v5713_v21  ;;  %v5723_v21 = vrot.slane %v10028_v29, 5 }
 0x6bd   : > { %6924 = vmatmul.bf16.gmra.mxu3 %v12494_v5  ;;  %v5717_v16 = vsel %vm12042_vm5, %v5715_v45, %v5716_v63 }
 0x6be   : > { %7468 = vmatmul.bf16.gmra.mxu0 %v12525_v0  ;;  %v9539_v22 = vpack.c.bf16 %v7697_v33, %v7696_v2  ;;  %v8080_v24 = vadd.f32 %v8079_v14, %v7697_v33  ;;  %v8214_v50 = vmul.f32 %v7697_v33, %v7697_v33  ;;  %v12541_v14 = vpack.c.b16 %v6004_v36, %v6003_v17 }
 0x6bf   : > { %v6341_v52 = vpop.f32.mrf.mxu2 }
 0x6c0   : > { %9791 = vst [vmem:[%s12280_s29 + $0x80] sm:$0xff] %v9539_v22   ;;  %v8341_v31 = vadd.f32 %v8340_v15, %v8214_v50  ;;  %v6610_v18 = vadd.f32 %v6341_v52, %v5381_v42  ;;  %v6885_v19 = vpop.f32.mrf.mxu3  ;;  %v6005_v52 = vunpack.c.l.b16 %v5714_v56 }
 0x6c1   : > { %v5114_v10 = vpop.f32.mrf.mxu1 }
 0x6c2   : > { %v7154_v47 = vadd.f32 %v6885_v19, %v6610_v18  ;;  %v5382_v7 = vadd.f32 %v5114_v10, %v13608_v12  ;;  %v13611_v10 = vld [vmem:[#allocation127_spill] sm:$0xff] }
 0x6c3   : > { %v7431_v26 = vpop.f32.mrf.mxu0 }
 0x6c4   : > { %v7698_v61 = vadd.f32 %v7429_v49, %v7154_v47 }
 0x6c6   : > { %v8081_v9 = vadd.f32 %v8080_v24, %v7698_v61  ;;  %v8215_v60 = vmul.f32 %v7698_v61, %v7698_v61 }
 0x6c7   : > { %v6343_v53 = vpop.f32.mrf.mxu2 }
 0x6c8   : > { %v8342_v51 = vadd.f32 %v8341_v31, %v8215_v60  ;;  %v6611_v2 = vadd.f32 %v6343_v53, %v5382_v7  ;;  %v6887_v23 = vpop.f32.mrf.mxu3  ;;  %v6006_v31 = vunpack.c.l.b16 %v5717_v16 }
 0x6c9   : > { %v5117_v27 = vpop.f32.mrf.mxu1 }
 0x6ca   : > { %v7155_v38 = vadd.f32 %v6887_v23, %v6611_v2  ;;  %v5383_v8 = vadd.f32 %v5117_v27, %v13610_v43  ;;  %v12556_v36 = vpack.c.b16 %v6006_v31, %v6005_v52  ;;  %v10027_v2 = vld [vmem:[%s10212_s13 + $0x140] sm:$0xf] }
 0x6cb   : > { %v7434_v57 = vpop.f32.mrf.mxu0  ;;  %v9152_v23 = vrot.slane %v10027_v2, 9 }
 0x6cc   : > { %v7699_v15 = vadd.f32 %v7431_v26, %v7155_v38  ;;  %5156 = vmatmul.bf16.gmra.mxu1 %v13609_v44  ;;  %6385 = vmatmul.bf16.gmra.mxu2 %v12479_v1  ;;  %v13613_v44 = vld [vmem:[#allocation19_spill] sm:$0xff] }
 0x6cd   : > { %6929 = vmatmul.bf16.gmra.mxu3 %v12510_v4 }
 0x6ce   : > { %7473 = vmatmul.bf16.gmra.mxu0 %v12541_v14  ;;  %v9544_v35 = vpack.c.bf16 %v7699_v15, %v7698_v61  ;;  %v8082_v49 = vadd.f32 %v8081_v9, %v7699_v15  ;;  %v8216_v33 = vmul.f32 %v7699_v15, %v7699_v15  ;;  %v10026_v9 = vld [vmem:[%s10212_s13 + $0x144] sm:$0xf] }
 0x6cf   : > { %v6346_v39 = vpop.f32.mrf.mxu2  ;;  %v5720_v60 = vrot.slane %v10026_v9, 5  ;;  %v10030_v9 = vld [vmem:[%s10212_s13 + $0x150] sm:$0x1] }
 0x6d0   : > { %9792 = vst [vmem:[%s12280_s29 + $0x88] sm:$0xff] %v9544_v35   ;;  %v8343_v59 = vadd.f32 %v8342_v51, %v8216_v33  ;;  %v6612_v28 = vadd.f32 %v6346_v39, %v5383_v8  ;;  %v6890_v22 = vpop.f32.mrf.mxu3  ;;  %v13612_v51 = vld [vmem:[#allocation28_spill] sm:$0xff] }
 0x6d1   : > { %v5119_v24 = vpop.f32.mrf.mxu1  ;;  %v5722_v27 = vrot.slane %v5720_v60, 4  ;;  %v5721_v43 = vsel %vm12042_vm5, %v9152_v23, %v5720_v60  ;;  %v5729_v60 = vrot.slane %v10030_v9, 5 }
 0x6d2   : > { %v7156_v1 = vadd.f32 %v6890_v22, %v6612_v28  ;;  %v5384_v47 = vadd.f32 %v5119_v24, %v13611_v10 }
 0x6d3   : > { %v7436_v50 = vpop.f32.mrf.mxu0  ;;  %v5724_v8 = vsel %vm12042_vm5, %v5722_v27, %v5723_v21 }
 0x6d4   : > { %v7700_v42 = vadd.f32 %v7434_v57, %v7156_v1  ;;  %v6008_v28 = vunpack.c.l.b16 %v5724_v8  ;;  %v13614_v1 = vld [vmem:[#allocation128_spill] sm:$0xff] }
 0x6d6   : > { %v8083_v18 = vadd.f32 %v8082_v49, %v7700_v42  ;;  %v8217_v19 = vmul.f32 %v7700_v42, %v7700_v42 }
 0x6d7   : > { %v6348_v26 = vpop.f32.mrf.mxu2 }
 0x6d8   : > { %v8344_v37 = vadd.f32 %v8343_v59, %v8217_v19  ;;  %v6613_v30 = vadd.f32 %v6348_v26, %v5384_v47  ;;  %v6892_v61 = vpop.f32.mrf.mxu3  ;;  %v6007_v59 = vunpack.c.l.b16 %v5721_v43  ;;  %v10029_v19 = vld [vmem:[%s10212_s13 + $0x14c] sm:$0xf] }
 0x6d9   : > { %v5122_v17 = vpop.f32.mrf.mxu1  ;;  %v5726_v10 = vrot.slane %v10029_v19, 5  ;;  %v10033_v19 = vld [vmem:[%s10212_s13 + $0x15c] sm:$0xf] }
 0x6da   : > { %v7157_v12 = vadd.f32 %v6892_v61, %v6613_v30  ;;  %v5385_v40 = vadd.f32 %v5122_v17, %v13613_v44  ;;  %v13615_v30 = vld [vmem:[#allocation34_spill] sm:$0xff]  ;;  %v5725_v61 = vrot.slane %v5723_v21, 4 }
 0x6db   : > { %v7439_v7 = vpop.f32.mrf.mxu0  ;;  %v5728_v17 = vrot.slane %v5726_v10, 4 }
 0x6dc   : > { %v7701_v53 = vadd.f32 %v7436_v50, %v7157_v12  ;;  %5161 = vmatmul.bf16.gmra.mxu1 %v13612_v51  ;;  %6390 = vmatmul.bf16.gmra.mxu2 %v12494_v5  ;;  %v13616_v51 = vld [vmem:[#allocation25_spill] sm:$0xff]  ;;  %v5727_v21 = vsel %vm12042_vm5, %v5725_v61, %v5726_v10  ;;  %v5736_v10 = vrot.slane %v10033_v19, 5 }
 0x6dd   : > { %6934 = vmatmul.bf16.gmra.mxu3 %v12525_v0  ;;  %v5730_v44 = vsel %vm12042_vm5, %v5728_v17, %v5729_v60 }
 0x6de   : > { %7478 = vmatmul.bf16.gmra.mxu0 %v12556_v36  ;;  %v9549_v38 = vpack.c.bf16 %v7701_v53, %v7700_v42  ;;  %v8084_v57 = vadd.f32 %v8083_v18, %v7701_v53  ;;  %v8218_v15 = vmul.f32 %v7701_v53, %v7701_v53  ;;  %v12572_v18 = vpack.c.b16 %v6008_v28, %v6007_v59 }
 0x6df   : > { %v6351_v45 = vpop.f32.mrf.mxu2 }
 0x6e0   : > { %9793 = vst [vmem:[%s12280_s29 + $0x90] sm:$0xff] %v9549_v38   ;;  %v8345_v3 = vadd.f32 %v8344_v37, %v8218_v15  ;;  %v6614_v63 = vadd.f32 %v6351_v45, %v5385_v40  ;;  %v6895_v35 = vpop.f32.mrf.mxu3  ;;  %v6009_v45 = vunpack.c.l.b16 %v5727_v21 }
 0x6e1   : > { %v5124_v5 = vpop.f32.mrf.mxu1 }
 0x6e2   : > { %v7158_v49 = vadd.f32 %v6895_v35, %v6614_v63  ;;  %v5386_v50 = vadd.f32 %v5124_v5, %v13614_v1  ;;  %v13617_v5 = vld [vmem:[#allocation129_spill] sm:$0xff] }
 0x6e3   : > { %v7441_v33 = vpop.f32.mrf.mxu0 }
 0x6e4   : > { %v7702_v39 = vadd.f32 %v7439_v7, %v7158_v49 }
 0x6e6   : > { %v8085_v22 = vadd.f32 %v8084_v57, %v7702_v39  ;;  %v8219_v24 = vmul.f32 %v7702_v39, %v7702_v39 }
 0x6e7   : > { %v6353_v56 = vpop.f32.mrf.mxu2 }
 0x6e8   : > { %v8346_v16 = vadd.f32 %v8345_v3, %v8219_v24  ;;  %v6615_v42 = vadd.f32 %v6353_v56, %v5386_v50  ;;  %v6897_v52 = vpop.f32.mrf.mxu3  ;;  %v6010_v3 = vunpack.c.l.b16 %v5730_v44 }
 0x6e9   : > { %v5127_v31 = vpop.f32.mrf.mxu1 }
 0x6ea   : > { %v7159_v47 = vadd.f32 %v6897_v52, %v6615_v42  ;;  %v5387_v2 = vadd.f32 %v5127_v31, %v13616_v51  ;;  %v12587_v28 = vpack.c.b16 %v6010_v3, %v6009_v45  ;;  %v10032_v42 = vld [vmem:[%s10212_s13 + $0x154] sm:$0xf] }
 0x6eb   : > { %v7444_v26 = vpop.f32.mrf.mxu0  ;;  %v9153_v52 = vrot.slane %v10032_v42, 9 }
 0x6ec   : > { %v7703_v37 = vadd.f32 %v7441_v33, %v7159_v47  ;;  %5166 = vmatmul.bf16.gmra.mxu1 %v13615_v30  ;;  %6395 = vmatmul.bf16.gmra.mxu2 %v12510_v4  ;;  %v13619_v30 = vld [vmem:[#allocation31_spill] sm:$0xff] }
 0x6ed   : > { %6939 = vmatmul.bf16.gmra.mxu3 %v12541_v14 }
 0x6ee   : > { %7483 = vmatmul.bf16.gmra.mxu0 %v12572_v18  ;;  %v9554_v12 = vpack.c.bf16 %v7703_v37, %v7702_v39  ;;  %v8086_v7 = vadd.f32 %v8085_v22, %v7703_v37  ;;  %v8220_v53 = vmul.f32 %v7703_v37, %v7703_v37  ;;  %v10031_v22 = vld [vmem:[%s10212_s13 + $0x158] sm:$0xf] }
 0x6ef   : > { %v6356_v23 = vpop.f32.mrf.mxu2  ;;  %v5733_v24 = vrot.slane %v10031_v22, 5  ;;  %v10035_v22 = vld [vmem:[%s10212_s13 + $0x164] sm:$0x1] }
 0x6f0   : > { %9794 = vst [vmem:[%s12280_s29 + $0x98] sm:$0xff] %v9554_v12   ;;  %v8347_v27 = vadd.f32 %v8346_v16, %v8220_v53  ;;  %v6616_v29 = vadd.f32 %v6356_v23, %v5387_v2  ;;  %v6900_v38 = vpop.f32.mrf.mxu3  ;;  %v13618_v16 = vld [vmem:[#allocation40_spill] sm:$0xff] }
 0x6f1   : > { %v5129_v57 = vpop.f32.mrf.mxu1  ;;  %v5735_v31 = vrot.slane %v5733_v24, 4  ;;  %v5734_v51 = vsel %vm12042_vm5, %v9153_v52, %v5733_v24  ;;  %v5742_v24 = vrot.slane %v10035_v22, 5 }
 0x6f2   : > { %v7160_v4 = vadd.f32 %v6900_v38, %v6616_v29  ;;  %v5388_v49 = vadd.f32 %v5129_v57, %v13617_v5 }
 0x6f3   : > { %v7446_v15 = vpop.f32.mrf.mxu0  ;;  %v5737_v2 = vsel %vm12042_vm5, %v5735_v31, %v5736_v10 }
 0x6f4   : > { %v7704_v40 = vadd.f32 %v7444_v26, %v7160_v4  ;;  %v6012_v29 = vunpack.c.l.b16 %v5737_v2  ;;  %v13620_v4 = vld [vmem:[#allocation130_spill] sm:$0xff] }
 0x6f6   : > { %v8087_v63 = vadd.f32 %v8086_v7, %v7704_v40  ;;  %v8221_v35 = vmul.f32 %v7704_v40, %v7704_v40 }
 0x6f7   : > { %v6358_v33 = vpop.f32.mrf.mxu2 }
 0x6f8   : > { %v8348_v43 = vadd.f32 %v8347_v27, %v8221_v35  ;;  %v6617_v8 = vadd.f32 %v6358_v33, %v5388_v49  ;;  %v6902_v39 = vpop.f32.mrf.mxu3  ;;  %v6011_v27 = vunpack.c.l.b16 %v5734_v51  ;;  %v10034_v35 = vld [vmem:[%s10212_s13 + $0x160] sm:$0xf] }
 0x6f9   : > { %v5132_v59 = vpop.f32.mrf.mxu1  ;;  %v5739_v5 = vrot.slane %v10034_v35, 5  ;;  %v10038_v35 = vld [vmem:[%s10212_s13 + $0x170] sm:$0xf] }
 0x6fa   : > { %v7161_v1 = vadd.f32 %v6902_v39, %v6617_v8  ;;  %v5389_v61 = vadd.f32 %v5132_v59, %v13619_v30  ;;  %v13621_v8 = vld [vmem:[#allocation47_spill] sm:$0xff]  ;;  %v5738_v39 = vrot.slane %v5736_v10, 4 }
 0x6fb   : > { %v7449_v50 = vpop.f32.mrf.mxu0  ;;  %v5741_v59 = vrot.slane %v5739_v5, 4 }
 0x6fc   : > { %v7705_v56 = vadd.f32 %v7446_v15, %v7161_v1  ;;  %5171 = vmatmul.bf16.gmra.mxu1 %v13618_v16  ;;  %6400 = vmatmul.bf16.gmra.mxu2 %v12525_v0  ;;  %v13622_v16 = vld [vmem:[#allocation37_spill] sm:$0xff]  ;;  %v5740_v10 = vsel %vm12042_vm5, %v5738_v39, %v5739_v5  ;;  %v5749_v5 = vrot.slane %v10038_v35, 5 }
 0x6fd   : > { %6944 = vmatmul.bf16.gmra.mxu3 %v12556_v36  ;;  %v5743_v30 = vsel %vm12042_vm5, %v5741_v59, %v5742_v24 }
 0x6fe   : > { %7488 = vmatmul.bf16.gmra.mxu0 %v12587_v28  ;;  %v9559_v47 = vpack.c.bf16 %v7705_v56, %v7704_v40  ;;  %v8088_v26 = vadd.f32 %v8087_v63, %v7705_v56  ;;  %v8222_v37 = vmul.f32 %v7705_v56, %v7705_v56  ;;  %v12603_v63 = vpack.c.b16 %v6012_v29, %v6011_v27 }
 0x6ff   : > { %v6361_v17 = vpop.f32.mrf.mxu2 }
 0x700   : > { %9795 = vst [vmem:[%s12280_s29 + $0xa0] sm:$0xff] %v9559_v47   ;;  %v8349_v9 = vadd.f32 %v8348_v43, %v8222_v37  ;;  %v6618_v60 = vadd.f32 %v6361_v17, %v5389_v61  ;;  %v6905_v12 = vpop.f32.mrf.mxu3  ;;  %v6013_v17 = vunpack.c.l.b16 %v5740_v10 }
 0x701   : > { %v5134_v0 = vpop.f32.mrf.mxu1 }
 0x702   : > { %v7162_v7 = vadd.f32 %v6905_v12, %v6618_v60  ;;  %v5390_v15 = vadd.f32 %v5134_v0, %v13620_v4  ;;  %v13623_v0 = vld [vmem:[#allocation131_spill] sm:$0xff] }
 0x703   : > { %v7451_v53 = vpop.f32.mrf.mxu0 }
 0x704   : > { %v7706_v23 = vadd.f32 %v7449_v50, %v7162_v7 }
 0x706   : > { %v8089_v38 = vadd.f32 %v8088_v26, %v7706_v23  ;;  %v8223_v57 = vmul.f32 %v7706_v23, %v7706_v23 }
 0x707   : > { %v6363_v21 = vpop.f32.mrf.mxu2 }
 0x708   : > { %v8350_v44 = vadd.f32 %v8349_v9, %v8223_v57  ;;  %v6619_v40 = vadd.f32 %v6363_v21, %v5390_v15  ;;  %v6907_v45 = vpop.f32.mrf.mxu3  ;;  %v6014_v9 = vunpack.c.l.b16 %v5743_v30 }
 0x709   : > { %v5137_v3 = vpop.f32.mrf.mxu1 }
 0x70a   : > { %v7163_v49 = vadd.f32 %v6907_v45, %v6619_v40  ;;  %v5391_v42 = vadd.f32 %v5137_v3, %v13622_v16  ;;  %v12618_v29 = vpack.c.b16 %v6014_v9, %v6013_v17  ;;  %v10037_v40 = vld [vmem:[%s10212_s13 + $0x168] sm:$0xf] }
 0x70b   : > { %v7454_v33 = vpop.f32.mrf.mxu0  ;;  %v9154_v45 = vrot.slane %v10037_v40, 9 }
 0x70c   : > { %v7707_v43 = vadd.f32 %v7451_v53, %v7163_v49  ;;  %5176 = vmatmul.bf16.gmra.mxu1 %v13621_v8  ;;  %6405 = vmatmul.bf16.gmra.mxu2 %v12541_v14  ;;  %v13625_v8 = vld [vmem:[#allocation43_spill] sm:$0xff] }
 0x70d   : > { %6949 = vmatmul.bf16.gmra.mxu3 %v12572_v18 }
 0x70e   : > { %7493 = vmatmul.bf16.gmra.mxu0 %v12603_v63  ;;  %v9564_v1 = vpack.c.bf16 %v7707_v43, %v7706_v23  ;;  %v8090_v50 = vadd.f32 %v8089_v38, %v7707_v43  ;;  %v8224_v56 = vmul.f32 %v7707_v43, %v7707_v43  ;;  %v10036_v38 = vld [vmem:[%s10212_s13 + $0x16c] sm:$0xf] }
 0x70f   : > { %v6366_v52 = vpop.f32.mrf.mxu2  ;;  %v5746_v57 = vrot.slane %v10036_v38, 5  ;;  %v10040_v38 = vld [vmem:[%s10212_s13 + $0x178] sm:$0x1] }
 0x710   : > { %9796 = vst [vmem:[%s12280_s29 + $0xa8] sm:$0xff] %v9564_v1   ;;  %v8351_v31 = vadd.f32 %v8350_v44, %v8224_v56  ;;  %v6620_v19 = vadd.f32 %v6366_v52, %v5391_v42  ;;  %v6910_v47 = vpop.f32.mrf.mxu3  ;;  %v13624_v44 = vld [vmem:[#allocation53_spill] sm:$0xff] }
 0x711   : > { %v5139_v26 = vpop.f32.mrf.mxu1  ;;  %v5748_v3 = vrot.slane %v5746_v57, 4  ;;  %v5747_v16 = vsel %vm12042_vm5, %v9154_v45, %v5746_v57  ;;  %v5755_v57 = vrot.slane %v10040_v38, 5 }
 0x712   : > { %v7164_v14 = vadd.f32 %v6910_v47, %v6620_v19  ;;  %v5392_v7 = vadd.f32 %v5139_v26, %v13623_v0 }
 0x713   : > { %v7456_v37 = vpop.f32.mrf.mxu0  ;;  %v5750_v42 = vsel %vm12042_vm5, %v5748_v3, %v5749_v5 }
 0x714   : > { %v7708_v61 = vadd.f32 %v7454_v33, %v7164_v14  ;;  %v6016_v19 = vunpack.c.l.b16 %v5750_v42  ;;  %v13626_v14 = vld [vmem:[#allocation132_spill] sm:$0xff] }
 0x716   : > { %v8091_v60 = vadd.f32 %v8090_v50, %v7708_v61  ;;  %v8225_v12 = vmul.f32 %v7708_v61, %v7708_v61 }
 0x717   : > { %v6368_v53 = vpop.f32.mrf.mxu2 }
 0x718   : > { %v8352_v51 = vadd.f32 %v8351_v31, %v8225_v12  ;;  %v6621_v2 = vadd.f32 %v6368_v53, %v5392_v7  ;;  %v6912_v23 = vpop.f32.mrf.mxu3  ;;  %v6015_v31 = vunpack.c.l.b16 %v5747_v16  ;;  %v10039_v12 = vld [vmem:[%s10212_s13 + $0x174] sm:$0xf] }
 0x719   : > { %v5142_v27 = vpop.f32.mrf.mxu1  ;;  %v5752_v0 = vrot.slane %v10039_v12, 5  ;;  %v10043_v12 = vld [vmem:[%s10212_s13 + $0x184] sm:$0xf] }
 0x71a   : > { %v7165_v4 = vadd.f32 %v6912_v23, %v6621_v2  ;;  %v5393_v39 = vadd.f32 %v5142_v27, %v13625_v8  ;;  %v13627_v2 = vld [vmem:[#allocation59_spill] sm:$0xff]  ;;  %v5751_v23 = vrot.slane %v5749_v5, 4 }
 0x71b   : > { %v7459_v15 = vpop.f32.mrf.mxu0  ;;  %v5754_v27 = vrot.slane %v5752_v0, 4 }
 0x71c   : > { %v7709_v21 = vadd.f32 %v7456_v37, %v7165_v4  ;;  %5181 = vmatmul.bf16.gmra.mxu1 %v13624_v44  ;;  %6410 = vmatmul.bf16.gmra.mxu2 %v12556_v36  ;;  %v13628_v44 = vld [vmem:[#allocation50_spill] sm:$0xff]  ;;  %v5753_v5 = vsel %vm12042_vm5, %v5751_v23, %v5752_v0  ;;  %v5762_v0 = vrot.slane %v10043_v12, 5 }
 0x71d   : > { %6954 = vmatmul.bf16.gmra.mxu3 %v12587_v28  ;;  %v5756_v8 = vsel %vm12042_vm5, %v5754_v27, %v5755_v57 }
 0x71e   : > { %7498 = vmatmul.bf16.gmra.mxu0 %v12618_v29  ;;  %v9569_v49 = vpack.c.bf16 %v7709_v21, %v7708_v61  ;;  %v8092_v33 = vadd.f32 %v8091_v60, %v7709_v21  ;;  %v8226_v43 = vmul.f32 %v7709_v21, %v7709_v21  ;;  %v12634_v60 = vpack.c.b16 %v6016_v19, %v6015_v31 }
 0x71f   : > { %v6371_v59 = vpop.f32.mrf.mxu2 }
 0x720   : > { %9797 = vst [vmem:[%s12280_s29 + $0xb0] sm:$0xff] %v9569_v49   ;;  %v8353_v22 = vadd.f32 %v8352_v51, %v8226_v43  ;;  %v6622_v24 = vadd.f32 %v6371_v59, %v5393_v39  ;;  %v6915_v1 = vpop.f32.mrf.mxu3  ;;  %v6017_v59 = vunpack.c.l.b16 %v5753_v5 }
 0x721   : > { %v5144_v36 = vpop.f32.mrf.mxu1 }
 0x722   : > { %v7166_v50 = vadd.f32 %v6915_v1, %v6622_v24  ;;  %v5394_v37 = vadd.f32 %v5144_v36, %v13626_v14  ;;  %v13629_v36 = vld [vmem:[#allocation133_spill] sm:$0xff] }
 0x723   : > { %v7461_v56 = vpop.f32.mrf.mxu0 }
 0x724   : > { %v7710_v52 = vadd.f32 %v7459_v15, %v7166_v50 }
 0x726   : > { %v8093_v47 = vadd.f32 %v8092_v33, %v7710_v52  ;;  %v8227_v26 = vmul.f32 %v7710_v52, %v7710_v52 }
 0x727   : > { %v6373_v10 = vpop.f32.mrf.mxu2 }
 0x728   : > { %v8354_v30 = vadd.f32 %v8353_v22, %v8227_v26  ;;  %v6623_v61 = vadd.f32 %v6373_v10, %v5394_v37  ;;  %v6917_v17 = vpop.f32.mrf.mxu3  ;;  %v6018_v22 = vunpack.c.l.b16 %v5756_v8 }
 0x729   : > { %v5147_v9 = vpop.f32.mrf.mxu1 }
 0x72a   : > { %v7167_v7 = vadd.f32 %v6917_v17, %v6623_v61  ;;  %v5395_v40 = vadd.f32 %v5147_v9, %v13628_v44  ;;  %v12649_v19 = vpack.c.b16 %v6018_v22, %v6017_v59  ;;  %v10042_v61 = vld [vmem:[%s10212_s13 + $0x17c] sm:$0xf] }
 0x72b   : > { %v7464_v53 = vpop.f32.mrf.mxu0  ;;  %v9155_v17 = vrot.slane %v10042_v61, 9 }
 0x72c   : > { %v7711_v51 = vadd.f32 %v7461_v56, %v7167_v7  ;;  %5186 = vmatmul.bf16.gmra.mxu1 %v13627_v2  ;;  %6415 = vmatmul.bf16.gmra.mxu2 %v12572_v18  ;;  %v13631_v2 = vld [vmem:[#allocation56_spill] sm:$0xff] }
 0x72d   : > { %6959 = vmatmul.bf16.gmra.mxu3 %v12603_v63 }
 0x72e   : > { %7503 = vmatmul.bf16.gmra.mxu0 %v12634_v60  ;;  %v9574_v4 = vpack.c.bf16 %v7711_v51, %v7710_v52  ;;  %v8094_v15 = vadd.f32 %v8093_v47, %v7711_v51  ;;  %v8228_v21 = vmul.f32 %v7711_v51, %v7711_v51  ;;  %v10041_v47 = vld [vmem:[%s10212_s13 + $0x180] sm:$0xf] }
 0x72f   : > { %v6376_v45 = vpop.f32.mrf.mxu2  ;;  %v5759_v26 = vrot.slane %v10041_v47, 5  ;;  %v10045_v47 = vld [vmem:[%s10212_s13 + $0x18c] sm:$0x1] }
 0x730   : > { %9798 = vst [vmem:[%s12280_s29 + $0xb8] sm:$0xff] %v9574_v4   ;;  %v8355_v3 = vadd.f32 %v8354_v30, %v8228_v21  ;;  %v6624_v35 = vadd.f32 %v6376_v45, %v5395_v40  ;;  %v6920_v49 = vpop.f32.mrf.mxu3  ;;  %v13630_v30 = vld [vmem:[#allocation66_spill] sm:$0xff] }
 0x731   : > { %v5149_v33 = vpop.f32.mrf.mxu1  ;;  %v5761_v9 = vrot.slane %v5759_v26, 4  ;;  %v5760_v44 = vsel %vm12042_vm5, %v9155_v17, %v5759_v26  ;;  %v5768_v26 = vrot.slane %v10045_v47, 5 }
 0x732   : > { %v7168_v18 = vadd.f32 %v6920_v49, %v6624_v35  ;;  %v5396_v50 = vadd.f32 %v5149_v33, %v13629_v36 }
 0x733   : > { %v7466_v43 = vpop.f32.mrf.mxu0  ;;  %v5763_v40 = vsel %vm12042_vm5, %v5761_v9, %v5762_v0 }
 0x734   : > { %v7712_v39 = vadd.f32 %v7464_v53, %v7168_v18  ;;  %v6020_v35 = vunpack.c.l.b16 %v5763_v40  ;;  %v13632_v18 = vld [vmem:[#allocation134_spill] sm:$0xff] }
 0x736   : > { %v8095_v24 = vadd.f32 %v8094_v15, %v7712_v39  ;;  %v8229_v1 = vmul.f32 %v7712_v39, %v7712_v39 }
 0x737   : > { %v6378_v56 = vpop.f32.mrf.mxu2 }
 0x738   : > { %v8356_v16 = vadd.f32 %v8355_v3, %v8229_v1  ;;  %v6625_v42 = vadd.f32 %v6378_v56, %v5396_v50  ;;  %v6922_v52 = vpop.f32.mrf.mxu3  ;;  %v6019_v3 = vunpack.c.l.b16 %v5760_v44  ;;  %v10044_v1 = vld [vmem:[%s10212_s13 + $0x188] sm:$0xf] }
 0x739   : > { %v5152_v31 = vpop.f32.mrf.mxu1  ;;  %v5765_v36 = vrot.slane %v10044_v1, 5  ;;  %v10048_v1 = vld [vmem:[%s10212_s13 + $0x198] sm:$0xf] }
 0x73a   : > { %v7169_v14 = vadd.f32 %v6922_v52, %v6625_v42  ;;  %v5397_v23 = vadd.f32 %v5152_v31, %v13631_v2  ;;  %v13633_v42 = vld [vmem:[#allocation73_spill] sm:$0xff]  ;;  %v5764_v52 = vrot.slane %v5762_v0, 4 }
 0x73b   : > { %v7469_v37 = vpop.f32.mrf.mxu0  ;;  %v5767_v31 = vrot.slane %v5765_v36, 4 }
 0x73c   : > { %v7713_v10 = vadd.f32 %v7466_v43, %v7169_v14  ;;  %5191 = vmatmul.bf16.gmra.mxu1 %v13630_v30  ;;  %6420 = vmatmul.bf16.gmra.mxu2 %v12587_v28  ;;  %v13634_v30 = vld [vmem:[#allocation62_spill] sm:$0xff]  ;;  %v5766_v0 = vsel %vm12042_vm5, %v5764_v52, %v5765_v36  ;;  %v5775_v36 = vrot.slane %v10048_v1, 5 }
 0x73d   : > { %6964 = vmatmul.bf16.gmra.mxu3 %v12618_v29  ;;  %v5769_v2 = vsel %vm12042_vm5, %v5767_v31, %v5768_v26 }
 0x73e   : > { %7508 = vmatmul.bf16.gmra.mxu0 %v12649_v19  ;;  %v9579_v7 = vpack.c.bf16 %v7713_v10, %v7712_v39  ;;  %v8096_v53 = vadd.f32 %v8095_v24, %v7713_v10  ;;  %v8230_v51 = vmul.f32 %v7713_v10, %v7713_v10  ;;  %v12665_v24 = vpack.c.b16 %v6020_v35, %v6019_v3 }
 0x73f   : > { %v6381_v27 = vpop.f32.mrf.mxu2 }
 0x740   : > { %9799 = vst [vmem:[%s12280_s29 + $0xc0] sm:$0xff] %v9579_v7   ;;  %v8357_v38 = vadd.f32 %v8356_v16, %v8230_v51  ;;  %v6626_v57 = vadd.f32 %v6381_v27, %v5397_v23  ;;  %v6925_v4 = vpop.f32.mrf.mxu3  ;;  %v6021_v27 = vunpack.c.l.b16 %v5766_v0 }
 0x741   : > { %v5154_v28 = vpop.f32.mrf.mxu1 }
 0x742   : > { %v7170_v15 = vadd.f32 %v6925_v4, %v6626_v57  ;;  %v5398_v43 = vadd.f32 %v5154_v28, %v13632_v18  ;;  %v13635_v28 = vld [vmem:[#allocation135_spill] sm:$0xff] }
 0x743   : > { %v7471_v21 = vpop.f32.mrf.mxu0 }
 0x744   : > { %v7714_v45 = vadd.f32 %v7469_v37, %v7170_v15 }
 0x746   : > { %v8097_v49 = vadd.f32 %v8096_v53, %v7714_v45  ;;  %v8231_v33 = vmul.f32 %v7714_v45, %v7714_v45 }
 0x747   : > { %v6383_v5 = vpop.f32.mrf.mxu2 }
 0x748   : > { %v8358_v8 = vadd.f32 %v8357_v38, %v8231_v33  ;;  %v6627_v39 = vadd.f32 %v6383_v5, %v5398_v43  ;;  %v6927_v59 = vpop.f32.mrf.mxu3  ;;  %v6022_v38 = vunpack.c.l.b16 %v5769_v2 }
 0x749   : > { %v5157_v22 = vpop.f32.mrf.mxu1 }
 0x74a   : > { %v7171_v50 = vadd.f32 %v6927_v59, %v6627_v39  ;;  %v5399_v61 = vadd.f32 %v5157_v22, %v13634_v30  ;;  %v12680_v35 = vpack.c.b16 %v6022_v38, %v6021_v27  ;;  %v10047_v39 = vld [vmem:[%s10212_s13 + $0x190] sm:$0xf] }
 0x74b   : > { %v7474_v56 = vpop.f32.mrf.mxu0  ;;  %v9156_v59 = vrot.slane %v10047_v39, 9 }
 0x74c   : > { %v7715_v16 = vadd.f32 %v7471_v21, %v7171_v50  ;;  %5196 = vmatmul.bf16.gmra.mxu1 %v13633_v42  ;;  %6425 = vmatmul.bf16.gmra.mxu2 %v12603_v63  ;;  %v13637_v42 = vld [vmem:[#allocation69_spill] sm:$0xff] }
 0x74d   : > { %6969 = vmatmul.bf16.gmra.mxu3 %v12634_v60 }
 0x74e   : > { %7513 = vmatmul.bf16.gmra.mxu0 %v12665_v24  ;;  %v9584_v14 = vpack.c.bf16 %v7715_v16, %v7714_v45  ;;  %v8098_v37 = vadd.f32 %v8097_v49, %v7715_v16  ;;  %v8232_v10 = vmul.f32 %v7715_v16, %v7715_v16  ;;  %v10046_v49 = vld [vmem:[%s10212_s13 + $0x194] sm:$0xf] }
 0x74f   : > { %v6386_v17 = vpop.f32.mrf.mxu2  ;;  %v5772_v33 = vrot.slane %v10046_v49, 5  ;;  %v10050_v49 = vld [vmem:[%s10212_s13 + $0x1a0] sm:$0x1] }
 0x750   : > { %9800 = vst [vmem:[%s12280_s29 + $0xc8] sm:$0xff] %v9584_v14   ;;  %v8359_v9 = vadd.f32 %v8358_v8, %v8232_v10  ;;  %v6628_v12 = vadd.f32 %v6386_v17, %v5399_v61  ;;  %v6930_v7 = vpop.f32.mrf.mxu3  ;;  %v13636_v8 = vld [vmem:[#allocation80_spill] sm:$0xff] }
 0x751   : > { %v5159_v53 = vpop.f32.mrf.mxu1  ;;  %v5774_v22 = vrot.slane %v5772_v33, 4  ;;  %v5773_v30 = vsel %vm12042_vm5, %v9156_v59, %v5772_v33  ;;  %v5781_v33 = vrot.slane %v10050_v49, 5 }
 0x752   : > { %v7172_v63 = vadd.f32 %v6930_v7, %v6628_v12  ;;  %v5400_v15 = vadd.f32 %v5159_v53, %v13635_v28 }
 0x753   : > { %v7476_v51 = vpop.f32.mrf.mxu0  ;;  %v5776_v61 = vsel %vm12042_vm5, %v5774_v22, %v5775_v36 }
 0x754   : > { %v7716_v23 = vadd.f32 %v7474_v56, %v7172_v63  ;;  %v6024_v12 = vunpack.c.l.b16 %v5776_v61  ;;  %v13638_v63 = vld [vmem:[#allocation136_spill] sm:$0xff] }
 0x756   : > { %v8099_v57 = vadd.f32 %v8098_v37, %v7716_v23  ;;  %v8233_v4 = vmul.f32 %v7716_v23, %v7716_v23 }
 0x757   : > { %v6388_v21 = vpop.f32.mrf.mxu2 }
 0x758   : > { %v8360_v44 = vadd.f32 %v8359_v9, %v8233_v4  ;;  %v6629_v40 = vadd.f32 %v6388_v21, %v5400_v15  ;;  %v6932_v45 = vpop.f32.mrf.mxu3  ;;  %v6023_v9 = vunpack.c.l.b16 %v5773_v30  ;;  %v10049_v4 = vld [vmem:[%s10212_s13 + $0x19c] sm:$0xf] }
 0x759   : > { %v5162_v3 = vpop.f32.mrf.mxu1  ;;  %v5778_v28 = vrot.slane %v10049_v4, 5  ;;  %v10053_v4 = vld [vmem:[%s10212_s13 + $0x1ac] sm:$0xf] }
 0x75a   : > { %v7173_v18 = vadd.f32 %v6932_v45, %v6629_v40  ;;  %v5401_v52 = vadd.f32 %v5162_v3, %v13637_v42  ;;  %v13639_v40 = vld [vmem:[#allocation87_spill] sm:$0xff]  ;;  %v5777_v45 = vrot.slane %v5775_v36, 4 }
 0x75b   : > { %v7479_v43 = vpop.f32.mrf.mxu0  ;;  %v5780_v3 = vrot.slane %v5778_v28, 4 }
 0x75c   : > { %v7717_v5 = vadd.f32 %v7476_v51, %v7173_v18  ;;  %5201 = vmatmul.bf16.gmra.mxu1 %v13636_v8  ;;  %6430 = vmatmul.bf16.gmra.mxu2 %v12618_v29  ;;  %v13640_v8 = vld [vmem:[#allocation76_spill] sm:$0xff]  ;;  %v5779_v36 = vsel %vm12042_vm5, %v5777_v45, %v5778_v28  ;;  %v5788_v28 = vrot.slane %v10053_v4, 5 }
 0x75d   : > { %6974 = vmatmul.bf16.gmra.mxu3 %v12649_v19  ;;  %v5782_v42 = vsel %vm12042_vm5, %v5780_v3, %v5781_v33 }
 0x75e   : > { %7518 = vmatmul.bf16.gmra.mxu0 %v12680_v35  ;;  %v9589_v50 = vpack.c.bf16 %v7717_v5, %v7716_v23  ;;  %v8100_v56 = vadd.f32 %v8099_v57, %v7717_v5  ;;  %v8234_v16 = vmul.f32 %v7717_v5, %v7717_v5  ;;  %v12696_v57 = vpack.c.b16 %v6024_v12, %v6023_v9 }
 0x75f   : > { %v6391_v31 = vpop.f32.mrf.mxu2 }
 0x760   : > { %9801 = vst [vmem:[%s12280_s29 + $0xd0] sm:$0xff] %v9589_v50   ;;  %v8361_v47 = vadd.f32 %v8360_v44, %v8234_v16  ;;  %v6630_v26 = vadd.f32 %v6391_v31, %v5401_v52  ;;  %v6935_v14 = vpop.f32.mrf.mxu3  ;;  %v6025_v31 = vunpack.c.l.b16 %v5779_v36 }
 0x761   : > { %v5164_v29 = vpop.f32.mrf.mxu1 }
 0x762   : > { %v7174_v37 = vadd.f32 %v6935_v14, %v6630_v26  ;;  %v5402_v51 = vadd.f32 %v5164_v29, %v13638_v63  ;;  %v13641_v29 = vld [vmem:[#allocation137_spill] sm:$0xff] }
 0x763   : > { %v7481_v10 = vpop.f32.mrf.mxu0 }
 0x764   : > { %v7718_v17 = vadd.f32 %v7479_v43, %v7174_v37 }
 0x766   : > { %v8101_v7 = vadd.f32 %v8100_v56, %v7718_v17  ;;  %v8235_v53 = vmul.f32 %v7718_v17, %v7718_v17 }
 0x767   : > { %v6393_v0 = vpop.f32.mrf.mxu2 }
 0x768   : > { %v8362_v2 = vadd.f32 %v8361_v47, %v8235_v53  ;;  %v6631_v23 = vadd.f32 %v6393_v0, %v5402_v51  ;;  %v6937_v27 = vpop.f32.mrf.mxu3  ;;  %v6026_v47 = vunpack.c.l.b16 %v5782_v42 }
 0x769   : > { %v5167_v38 = vpop.f32.mrf.mxu1 }
 0x76a   : > { %v7175_v15 = vadd.f32 %v6937_v27, %v6631_v23  ;;  %v5403_v39 = vadd.f32 %v5167_v38, %v13640_v8  ;;  %v12711_v12 = vpack.c.b16 %v6026_v47, %v6025_v31  ;;  %v10052_v23 = vld [vmem:[%s10212_s13 + $0x1a4] sm:$0xf] }
 0x76b   : > { %v7484_v21 = vpop.f32.mrf.mxu0  ;;  %v9157_v27 = vrot.slane %v10052_v23, 9 }
 0x76c   : > { %v7719_v44 = vadd.f32 %v7481_v10, %v7175_v15  ;;  %5206 = vmatmul.bf16.gmra.mxu1 %v13639_v40  ;;  %6435 = vmatmul.bf16.gmra.mxu2 %v12634_v60  ;;  %v13643_v40 = vld [vmem:[#allocation83_spill] sm:$0xff] }
 0x76d   : > { %6979 = vmatmul.bf16.gmra.mxu3 %v12665_v24 }
 0x76e   : > { %7523 = vmatmul.bf16.gmra.mxu0 %v12696_v57  ;;  %v9594_v18 = vpack.c.bf16 %v7719_v44, %v7718_v17  ;;  %v8102_v43 = vadd.f32 %v8101_v7, %v7719_v44  ;;  %v8236_v5 = vmul.f32 %v7719_v44, %v7719_v44  ;;  %v10051_v7 = vld [vmem:[%s10212_s13 + $0x1a8] sm:$0xf] }
 0x76f   : > { %v6396_v59 = vpop.f32.mrf.mxu2  ;;  %v5785_v53 = vrot.slane %v10051_v7, 5  ;;  %v10055_v7 = vld [vmem:[%s10212_s13 + $0x1b4] sm:$0x1] }
 0x770   : > { %9802 = vst [vmem:[%s12280_s29 + $0xd8] sm:$0xff] %v9594_v18   ;;  %v8363_v22 = vadd.f32 %v8362_v2, %v8236_v5  ;;  %v6632_v1 = vadd.f32 %v6396_v59, %v5403_v39  ;;  %v6940_v50 = vpop.f32.mrf.mxu3  ;;  %v13642_v2 = vld [vmem:[#allocation94_spill] sm:$0xff] }
 0x771   : > { %v5169_v56 = vpop.f32.mrf.mxu1  ;;  %v5787_v38 = vrot.slane %v5785_v53, 4  ;;  %v5786_v8 = vsel %vm12042_vm5, %v9157_v27, %v5785_v53  ;;  %v5794_v53 = vrot.slane %v10055_v7, 5 }
 0x772   : > { %v7176_v60 = vadd.f32 %v6940_v50, %v6632_v1  ;;  %v5404_v37 = vadd.f32 %v5169_v56, %v13641_v29 }
 0x773   : > { %v7486_v16 = vpop.f32.mrf.mxu0  ;;  %v5789_v39 = vsel %vm12042_vm5, %v5787_v38, %v5788_v28 }
 0x774   : > { %v7720_v52 = vadd.f32 %v7484_v21, %v7176_v60  ;;  %v6028_v1 = vunpack.c.l.b16 %v5789_v39  ;;  %v13644_v60 = vld [vmem:[#allocation138_spill] sm:$0xff] }
 0x776   : > { %v8103_v26 = vadd.f32 %v8102_v43, %v7720_v52  ;;  %v8237_v14 = vmul.f32 %v7720_v52, %v7720_v52 }
 0x777   : > { %v6398_v10 = vpop.f32.mrf.mxu2 }
 0x778   : > { %v8364_v30 = vadd.f32 %v8363_v22, %v8237_v14  ;;  %v6633_v61 = vadd.f32 %v6398_v10, %v5404_v37  ;;  %v6942_v17 = vpop.f32.mrf.mxu3  ;;  %v6027_v22 = vunpack.c.l.b16 %v5786_v8  ;;  %v10054_v14 = vld [vmem:[%s10212_s13 + $0x1b0] sm:$0xf] }
 0x779   : > { %v5172_v9 = vpop.f32.mrf.mxu1  ;;  %v5791_v29 = vrot.slane %v10054_v14, 5  ;;  %v10058_v14 = vld [vmem:[%s10212_s13 + $0x1c0] sm:$0xf] }
 0x77a   : > { %v7177_v63 = vadd.f32 %v6942_v17, %v6633_v61  ;;  %v5405_v45 = vadd.f32 %v5172_v9, %v13643_v40  ;;  %v13645_v61 = vld [vmem:[#allocation100_spill] sm:$0xff]  ;;  %v5790_v17 = vrot.slane %v5788_v28, 4 }
 0x77b   : > { %v7489_v51 = vpop.f32.mrf.mxu0  ;;  %v5793_v9 = vrot.slane %v5791_v29, 4 }
 0x77c   : > { %v7721_v0 = vadd.f32 %v7486_v16, %v7177_v63  ;;  %5211 = vmatmul.bf16.gmra.mxu1 %v13642_v2  ;;  %6440 = vmatmul.bf16.gmra.mxu2 %v12649_v19  ;;  %v13646_v2 = vld [vmem:[#allocation90_spill] sm:$0xff]  ;;  %v5792_v28 = vsel %vm12042_vm5, %v5790_v17, %v5791_v29  ;;  %v5801_v29 = vrot.slane %v10058_v14, 5 }
 0x77d   : > { %6984 = vmatmul.bf16.gmra.mxu3 %v12680_v35  ;;  %v5795_v40 = vsel %vm12042_vm5, %v5793_v9, %v5794_v53 }
 0x77e   : > { %7528 = vmatmul.bf16.gmra.mxu0 %v12711_v12  ;;  %v9599_v15 = vpack.c.bf16 %v7721_v0, %v7720_v52  ;;  %v8104_v21 = vadd.f32 %v8103_v26, %v7721_v0  ;;  %v8238_v44 = vmul.f32 %v7721_v0, %v7721_v0  ;;  %v12727_v26 = vpack.c.b16 %v6028_v1, %v6027_v22 }
 0x77f   : > { %v6401_v3 = vpop.f32.mrf.mxu2 }
 0x780   : > { %9803 = vst [vmem:[%s12280_s29 + $0xe0] sm:$0xff] %v9599_v15   ;;  %v8365_v49 = vadd.f32 %v8364_v30, %v8238_v44  ;;  %v6634_v33 = vadd.f32 %v6401_v3, %v5405_v45  ;;  %v6945_v18 = vpop.f32.mrf.mxu3  ;;  %v6029_v3 = vunpack.c.l.b16 %v5792_v28 }
 0x781   : > { %v5174_v19 = vpop.f32.mrf.mxu1 }
 0x782   : > { %v7178_v43 = vadd.f32 %v6945_v18, %v6634_v33  ;;  %v5406_v16 = vadd.f32 %v5174_v19, %v13644_v60  ;;  %v13647_v19 = vld [vmem:[#allocation139_spill] sm:$0xff] }
 0x783   : > { %v7491_v5 = vpop.f32.mrf.mxu0 }
 0x784   : > { %v7722_v59 = vadd.f32 %v7489_v51, %v7178_v43 }
 0x786   : > { %v8105_v50 = vadd.f32 %v8104_v21, %v7722_v59  ;;  %v8239_v56 = vmul.f32 %v7722_v59, %v7722_v59 }
 0x787   : > { %v6403_v36 = vpop.f32.mrf.mxu2 }
 0x788   : > { %v8366_v42 = vadd.f32 %v8365_v49, %v8239_v56  ;;  %v6635_v52 = vadd.f32 %v6403_v36, %v5406_v16  ;;  %v6947_v31 = vpop.f32.mrf.mxu3  ;;  %v6030_v49 = vunpack.c.l.b16 %v5795_v40 }
 0x789   : > { %v5177_v47 = vpop.f32.mrf.mxu1 }
 0x78a   : > { %v7179_v37 = vadd.f32 %v6947_v31, %v6635_v52  ;;  %v5407_v23 = vadd.f32 %v5177_v47, %v13646_v2  ;;  %v12742_v1 = vpack.c.b16 %v6030_v49, %v6029_v3  ;;  %v10057_v52 = vld [vmem:[%s10212_s13 + $0x1b8] sm:$0xf] }
 0x78b   : > { %v7494_v10 = vpop.f32.mrf.mxu0  ;;  %v9158_v31 = vrot.slane %v10057_v52, 9 }
 0x78c   : > { %v7723_v30 = vadd.f32 %v7491_v5, %v7179_v37  ;;  %5216 = vmatmul.bf16.gmra.mxu1 %v13645_v61  ;;  %6445 = vmatmul.bf16.gmra.mxu2 %v12665_v24  ;;  %v13649_v61 = vld [vmem:[#allocation97_spill] sm:$0xff] }
 0x78d   : > { %6989 = vmatmul.bf16.gmra.mxu3 %v12696_v57 }
 0x78e   : > { %7533 = vmatmul.bf16.gmra.mxu0 %v12727_v26  ;;  %v9604_v63 = vpack.c.bf16 %v7723_v30, %v7722_v59  ;;  %v8106_v51 = vadd.f32 %v8105_v50, %v7723_v30  ;;  %v8240_v0 = vmul.f32 %v7723_v30, %v7723_v30  ;;  %v10056_v50 = vld [vmem:[%s10212_s13 + $0x1bc] sm:$0xf] }
 0x78f   : > { %v6406_v27 = vpop.f32.mrf.mxu2  ;;  %v5798_v56 = vrot.slane %v10056_v50, 5  ;;  %v10060_v50 = vld [vmem:[%s10212_s13 + $0x1c8] sm:$0x1] }
 0x790   : > { %9804 = vst [vmem:[%s12280_s29 + $0xe8] sm:$0xff] %v9604_v63   ;;  %v8367_v38 = vadd.f32 %v8366_v42, %v8240_v0  ;;  %v6636_v4 = vadd.f32 %v6406_v27, %v5407_v23  ;;  %v6950_v15 = vpop.f32.mrf.mxu3  ;;  %v13648_v42 = vld [vmem:[#allocation5_spill] sm:$0xff] }
 0x791   : > { %v5179_v21 = vpop.f32.mrf.mxu1  ;;  %v5800_v47 = vrot.slane %v5798_v56, 4  ;;  %v5799_v2 = vsel %vm12042_vm5, %v9158_v31, %v5798_v56  ;;  %v5807_v56 = vrot.slane %v10060_v50, 5 }
 0x792   : > { %v7180_v24 = vadd.f32 %v6950_v15, %v6636_v4  ;;  %v5408_v43 = vadd.f32 %v5179_v21, %v13647_v19 }
 0x793   : > { %v7496_v44 = vpop.f32.mrf.mxu0  ;;  %v5802_v23 = vsel %vm12042_vm5, %v5800_v47, %v5801_v29 }
 0x794   : > { %v7724_v45 = vadd.f32 %v7494_v10, %v7180_v24  ;;  %v6032_v4 = vunpack.c.l.b16 %v5802_v23  ;;  %v13650_v24 = vld [vmem:[#allocation140_spill] sm:$0xff] }
 0x796   : > { %v8107_v33 = vadd.f32 %v8106_v51, %v7724_v45  ;;  %v8241_v18 = vmul.f32 %v7724_v45, %v7724_v45 }
 0x797   : > { %v6408_v5 = vpop.f32.mrf.mxu2 }
 0x798   : > { %v8368_v8 = vadd.f32 %v8367_v38, %v8241_v18  ;;  %v6637_v39 = vadd.f32 %v6408_v5, %v5408_v43  ;;  %v6952_v59 = vpop.f32.mrf.mxu3  ;;  %v6031_v38 = vunpack.c.l.b16 %v5799_v2  ;;  %v10059_v18 = vld [vmem:[%s10212_s13 + $0x1c4] sm:$0xf] }
 0x799   : > { %v5182_v22 = vpop.f32.mrf.mxu1  ;;  %v5804_v19 = vrot.slane %v10059_v18, 5  ;;  %v10063_v18 = vld [vmem:[%s10212_s13 + $0x1d4] sm:$0xf] }
 0x79a   : > { %v7181_v60 = vadd.f32 %v6952_v59, %v6637_v39  ;;  %v5409_v17 = vadd.f32 %v5182_v22, %v13649_v61  ;;  %v13651_v39 = vld [vmem:[#allocation11_spill] sm:$0xff]  ;;  %v5803_v59 = vrot.slane %v5801_v29, 4 }
 0x79b   : > { %v7499_v16 = vpop.f32.mrf.mxu0  ;;  %v5806_v22 = vrot.slane %v5804_v19, 4 }
 0x79c   : > { %v7725_v36 = vadd.f32 %v7496_v44, %v7181_v60  ;;  %5221 = vmatmul.bf16.gmra.mxu1 %v13648_v42  ;;  %6450 = vmatmul.bf16.gmra.mxu2 %v12680_v35  ;;  %v13652_v42 = vld [vmem:[#allocation2_spill] sm:$0xff]  ;;  %v5805_v29 = vsel %vm12042_vm5, %v5803_v59, %v5804_v19  ;;  %v5814_v19 = vrot.slane %v10063_v18, 5 }
 0x79d   : > { %6994 = vmatmul.bf16.gmra.mxu3 %v12711_v12  ;;  %v5808_v61 = vsel %vm12042_vm5, %v5806_v22, %v5807_v56 }
 0x79e   : > { %7538 = vmatmul.bf16.gmra.mxu0 %v12742_v1  ;;  %v9609_v37 = vpack.c.bf16 %v7725_v36, %v7724_v45  ;;  %v8108_v10 = vadd.f32 %v8107_v33, %v7725_v36  ;;  %v8242_v30 = vmul.f32 %v7725_v36, %v7725_v36  ;;  %v12758_v33 = vpack.c.b16 %v6032_v4, %v6031_v38 }
 0x79f   : > { %v6411_v9 = vpop.f32.mrf.mxu2 }
 0x7a0   : > { %9805 = vst [vmem:[%s12280_s29 + $0xf0] sm:$0xff] %v9609_v37   ;;  %v8369_v7 = vadd.f32 %v8368_v8, %v8242_v30  ;;  %v6638_v53 = vadd.f32 %v6411_v9, %v5409_v17  ;;  %v6955_v63 = vpop.f32.mrf.mxu3  ;;  %v6033_v9 = vunpack.c.l.b16 %v5805_v29 }
 0x7a1   : > { %v5184_v35 = vpop.f32.mrf.mxu1 }
 0x7a2   : > { %v7182_v51 = vadd.f32 %v6955_v63, %v6638_v53  ;;  %v5410_v44 = vadd.f32 %v5184_v35, %v13650_v24  ;;  %v13653_v35 = vld [vmem:[#allocation141_spill] sm:$0xff] }
 0x7a3   : > { %v7501_v0 = vpop.f32.mrf.mxu0 }
 0x7a4   : > { %v7726_v27 = vadd.f32 %v7499_v16, %v7182_v51 }
 0x7a6   : > { %v8109_v15 = vadd.f32 %v8108_v10, %v7726_v27  ;;  %v8243_v21 = vmul.f32 %v7726_v27, %v7726_v27 }
 0x7a7   : > { %v6413_v28 = vpop.f32.mrf.mxu2 }
 0x7a8   : > { %v8370_v40 = vadd.f32 %v8369_v7, %v8243_v21  ;;  %v6639_v45 = vadd.f32 %v6413_v28, %v5410_v44  ;;  %v6957_v3 = vpop.f32.mrf.mxu3  ;;  %v6034_v7 = vunpack.c.l.b16 %v5808_v61 }
 0x7a9   : > { %v5187_v49 = vpop.f32.mrf.mxu1 }
 0x7aa   : > { %v7183_v43 = vadd.f32 %v6957_v3, %v6639_v45  ;;  %v5411_v52 = vadd.f32 %v5187_v49, %v13652_v42  ;;  %v12773_v4 = vpack.c.b16 %v6034_v7, %v6033_v9  ;;  %v10062_v45 = vld [vmem:[%s10212_s13 + $0x1cc] sm:$0xf] }
 0x7ab   : > { %v7504_v5 = vpop.f32.mrf.mxu0  ;;  %v9159_v3 = vrot.slane %v10062_v45, 9 }
 0x7ac   : > { %v7727_v8 = vadd.f32 %v7501_v0, %v7183_v43  ;;  %5226 = vmatmul.bf16.gmra.mxu1 %v13651_v39  ;;  %6455 = vmatmul.bf16.gmra.mxu2 %v12696_v57  ;;  %v13655_v39 = vld [vmem:[#allocation8_spill] sm:$0xff] }
 0x7ad   : > { %6999 = vmatmul.bf16.gmra.mxu3 %v12727_v26 }
 0x7ae   : > { %7543 = vmatmul.bf16.gmra.mxu0 %v12758_v33  ;;  %v9614_v60 = vpack.c.bf16 %v7727_v8, %v7726_v27  ;;  %v8110_v16 = vadd.f32 %v8109_v15, %v7727_v8  ;;  %v8244_v36 = vmul.f32 %v7727_v8, %v7727_v8  ;;  %v10061_v15 = vld [vmem:[%s10212_s13 + $0x1d0] sm:$0xf] }
 0x7af   : > { %v6416_v31 = vpop.f32.mrf.mxu2  ;;  %v5811_v21 = vrot.slane %v10061_v15, 5  ;;  %v10065_v15 = vld [vmem:[%s10212_s13 + $0x1dc] sm:$0x1] }
 0x7b0   : > { %9806 = vst [vmem:[%s12280_s29 + $0xf8] sm:$0xff] %v9614_v60   ;;  %v8371_v47 = vadd.f32 %v8370_v40, %v8244_v36  ;;  %v6640_v14 = vadd.f32 %v6416_v31, %v5411_v52  ;;  %v6960_v37 = vpop.f32.mrf.mxu3  ;;  %v13654_v40 = vld [vmem:[#allocation17_spill] sm:$0xff] }
 0x7b1   : > { %v5189_v10 = vpop.f32.mrf.mxu1  ;;  %v5813_v49 = vrot.slane %v5811_v21, 4  ;;  %v5812_v42 = vsel %vm12042_vm5, %v9159_v3, %v5811_v21  ;;  %v5820_v21 = vrot.slane %v10065_v15, 5 }
 0x7b2   : > { %v7184_v57 = vadd.f32 %v6960_v37, %v6640_v14  ;;  %v5412_v51 = vadd.f32 %v5189_v10, %v13653_v35 }
 0x7b3   : > { %v7506_v30 = vpop.f32.mrf.mxu0  ;;  %v5815_v52 = vsel %vm12042_vm5, %v5813_v49, %v5814_v19 }
 0x7b4   : > { %v7728_v17 = vadd.f32 %v7504_v5, %v7184_v57  ;;  %v6036_v14 = vunpack.c.l.b16 %v5815_v52  ;;  %v13656_v57 = vld [vmem:[#allocation142_spill] sm:$0xff] }
 0x7b6   : > { %v8111_v53 = vadd.f32 %v8110_v16, %v7728_v17  ;;  %v8245_v63 = vmul.f32 %v7728_v17, %v7728_v17 }
 0x7b7   : > { %v6418_v0 = vpop.f32.mrf.mxu2 }
 0x7b8   : > { %v8372_v2 = vadd.f32 %v8371_v47, %v8245_v63  ;;  %v6641_v23 = vadd.f32 %v6418_v0, %v5412_v51  ;;  %v6962_v27 = vpop.f32.mrf.mxu3  ;;  %v6035_v47 = vunpack.c.l.b16 %v5812_v42  ;;  %v10064_v63 = vld [vmem:[%s10212_s13 + $0x1d8] sm:$0xf] }
 0x7b9   : > { %v5192_v38 = vpop.f32.mrf.mxu1  ;;  %v5817_v35 = vrot.slane %v10064_v63, 5  ;;  %v10068_v63 = vld [vmem:[%s10212_s13 + $0x1e8] sm:$0xf] }
 0x7ba   : > { %v7185_v24 = vadd.f32 %v6962_v27, %v6641_v23  ;;  %v5413_v59 = vadd.f32 %v5192_v38, %v13655_v39  ;;  %v13657_v23 = vld [vmem:[#allocation23_spill] sm:$0xff]  ;;  %v5816_v27 = vrot.slane %v5814_v19, 4 }
 0x7bb   : > { %v7509_v44 = vpop.f32.mrf.mxu0  ;;  %v5819_v38 = vrot.slane %v5817_v35, 4 }
 0x7bc   : > { %v7729_v28 = vadd.f32 %v7506_v30, %v7185_v24  ;;  %5231 = vmatmul.bf16.gmra.mxu1 %v13654_v40  ;;  %6460 = vmatmul.bf16.gmra.mxu2 %v12711_v12  ;;  %v13658_v40 = vld [vmem:[#allocation14_spill] sm:$0xff]  ;;  %v5818_v19 = vsel %vm12042_vm5, %v5816_v27, %v5817_v35  ;;  %v5827_v35 = vrot.slane %v10068_v63, 5 }
 0x7bd   : > { %7004 = vmatmul.bf16.gmra.mxu3 %v12742_v1  ;;  %v5821_v39 = vsel %vm12042_vm5, %v5819_v38, %v5820_v21 }
 0x7be   : > { %7548 = vmatmul.bf16.gmra.mxu0 %v12773_v4  ;;  %v9619_v43 = vpack.c.bf16 %v7729_v28, %v7728_v17  ;;  %v8112_v5 = vadd.f32 %v8111_v53, %v7729_v28  ;;  %v8246_v8 = vmul.f32 %v7729_v28, %v7729_v28  ;;  %v12789_v53 = vpack.c.b16 %v6036_v14, %v6035_v47 }
 0x7bf   : > { %v6421_v22 = vpop.f32.mrf.mxu2 }
 0x7c0   : > { %9807 = vst [vmem:[%s12280_s29 + $0x100] sm:$0xff] %v9619_v43   ;;  %v8373_v50 = vadd.f32 %v8372_v2, %v8246_v8  ;;  %v6642_v56 = vadd.f32 %v6421_v22, %v5413_v59  ;;  %v6965_v60 = vpop.f32.mrf.mxu3  ;;  %v6037_v22 = vunpack.c.l.b16 %v5818_v19 }
 0x7c1   : > { %v5194_v12 = vpop.f32.mrf.mxu1 }
 0x7c2   : > { %v7186_v16 = vadd.f32 %v6965_v60, %v6642_v56  ;;  %v5414_v30 = vadd.f32 %v5194_v12, %v13656_v57  ;;  %v13659_v12 = vld [vmem:[#allocation143_spill] sm:$0xff] }
 0x7c3   : > { %v7511_v36 = vpop.f32.mrf.mxu0 }
 0x7c4   : > { %v7730_v31 = vadd.f32 %v7509_v44, %v7186_v16 }
 0x7c6   : > { %v8113_v37 = vadd.f32 %v8112_v5, %v7730_v31  ;;  %v8247_v10 = vmul.f32 %v7730_v31, %v7730_v31 }
 0x7c7   : > { %v6423_v29 = vpop.f32.mrf.mxu2 }
 0x7c8   : > { %v8374_v61 = vadd.f32 %v8373_v50, %v8247_v10  ;;  %v6643_v17 = vadd.f32 %v6423_v29, %v5414_v30  ;;  %v6967_v9 = vpop.f32.mrf.mxu3  ;;  %v6038_v50 = vunpack.c.l.b16 %v5821_v39 }
 0x7c9   : > { %v5197_v7 = vpop.f32.mrf.mxu1 }
 0x7ca   : > { %v7187_v51 = vadd.f32 %v6967_v9, %v6643_v17  ;;  %v5415_v45 = vadd.f32 %v5197_v7, %v13658_v40  ;;  %v12804_v14 = vpack.c.b16 %v6038_v50, %v6037_v22  ;;  %v10067_v17 = vld [vmem:[%s10212_s13 + $0x1e0] sm:$0xf] }
 0x7cb   : > { %v7514_v0 = vpop.f32.mrf.mxu0  ;;  %v9160_v9 = vrot.slane %v10067_v17, 9 }
 0x7cc   : > { %v7731_v2 = vadd.f32 %v7511_v36, %v7187_v51  ;;  %5236 = vmatmul.bf16.gmra.mxu1 %v13657_v23  ;;  %6465 = vmatmul.bf16.gmra.mxu2 %v12727_v26  ;;  %v13661_v23 = vld [vmem:[#allocation20_spill] sm:$0xff] }
 0x7cd   : > { %7009 = vmatmul.bf16.gmra.mxu3 %v12758_v33 }
 0x7ce   : > { %7553 = vmatmul.bf16.gmra.mxu0 %v12789_v53  ;;  %v9624_v24 = vpack.c.bf16 %v7731_v2, %v7730_v31  ;;  %v8114_v44 = vadd.f32 %v8113_v37, %v7731_v2  ;;  %v8248_v28 = vmul.f32 %v7731_v2, %v7731_v2  ;;  %v10066_v37 = vld [vmem:[%s10212_s13 + $0x1e4] sm:$0xf] }
 0x7cf   : > { %v6426_v3 = vpop.f32.mrf.mxu2  ;;  %v5824_v10 = vrot.slane %v10066_v37, 5  ;;  %v10070_v37 = vld [vmem:[%s10212_s13 + $0x1f0] sm:$0x1] }
 0x7d0   : > { %9808 = vst [vmem:[%s12280_s29 + $0x108] sm:$0xff] %v9624_v24   ;;  %v8375_v49 = vadd.f32 %v8374_v61, %v8248_v28  ;;  %v6644_v18 = vadd.f32 %v6426_v3, %v5415_v45  ;;  %v6970_v43 = vpop.f32.mrf.mxu3  ;;  %v13660_v61 = vld [vmem:[#allocation29_spill] sm:$0xff] }
 0x7d1   : > { %v5199_v5 = vpop.f32.mrf.mxu1  ;;  %v5826_v7 = vrot.slane %v5824_v10, 4  ;;  %v5825_v40 = vsel %vm12042_vm5, %v9160_v9, %v5824_v10  ;;  %v5833_v10 = vrot.slane %v10070_v37, 5 }
 0x7d2   : > { %v7188_v26 = vadd.f32 %v6970_v43, %v6644_v18  ;;  %v5416_v16 = vadd.f32 %v5199_v5, %v13659_v12 }
 0x7d3   : > { %v7516_v8 = vpop.f32.mrf.mxu0  ;;  %v5828_v45 = vsel %vm12042_vm5, %v5826_v7, %v5827_v35 }
 0x7d4   : > { %v7732_v59 = vadd.f32 %v7514_v0, %v7188_v26  ;;  %v6040_v18 = vunpack.c.l.b16 %v5828_v45  ;;  %v13662_v26 = vld [vmem:[#allocation144_spill] sm:$0xff] }
 0x7d6   : > { %v8115_v56 = vadd.f32 %v8114_v44, %v7732_v59  ;;  %v8249_v60 = vmul.f32 %v7732_v59, %v7732_v59 }
 0x7d7   : > { %v6428_v36 = vpop.f32.mrf.mxu2 }
 0x7d8   : > { %v8376_v42 = vadd.f32 %v8375_v49, %v8249_v60  ;;  %v6645_v52 = vadd.f32 %v6428_v36, %v5416_v16  ;;  %v6972_v31 = vpop.f32.mrf.mxu3  ;;  %v6039_v49 = vunpack.c.l.b16 %v5825_v40  ;;  %v10069_v60 = vld [vmem:[%s10212_s13 + $0x1ec] sm:$0xf] }
 0x7d9   : > { %v5202_v47 = vpop.f32.mrf.mxu1  ;;  %v5830_v12 = vrot.slane %v10069_v60, 5  ;;  %v10073_v60 = vld [vmem:[%s10212_s13 + $0x1fc] sm:$0xf] }
 0x7da   : > { %v7189_v57 = vadd.f32 %v6972_v31, %v6645_v52  ;;  %v5417_v27 = vadd.f32 %v5202_v47, %v13661_v23  ;;  %v13663_v52 = vld [vmem:[#allocation35_spill] sm:$0xff]  ;;  %v5829_v31 = vrot.slane %v5827_v35, 4 }
 0x7db   : > { %v7519_v30 = vpop.f32.mrf.mxu0  ;;  %v5832_v47 = vrot.slane %v5830_v12, 4 }
 0x7dc   : > { %v7733_v29 = vadd.f32 %v7516_v8, %v7189_v57  ;;  %5241 = vmatmul.bf16.gmra.mxu1 %v13660_v61  ;;  %6470 = vmatmul.bf16.gmra.mxu2 %v12742_v1  ;;  %v13664_v61 = vld [vmem:[#allocation26_spill] sm:$0xff]  ;;  %v5831_v35 = vsel %vm12042_vm5, %v5829_v31, %v5830_v12  ;;  %v5840_v12 = vrot.slane %v10073_v60, 5 }
 0x7dd   : > { %7014 = vmatmul.bf16.gmra.mxu3 %v12773_v4  ;;  %v5834_v23 = vsel %vm12042_vm5, %v5832_v47, %v5833_v10 }
 0x7de   : > { %7558 = vmatmul.bf16.gmra.mxu0 %v12804_v14  ;;  %v9629_v51 = vpack.c.bf16 %v7733_v29, %v7732_v59  ;;  %v8116_v0 = vadd.f32 %v8115_v56, %v7733_v29  ;;  %v8250_v2 = vmul.f32 %v7733_v29, %v7733_v29  ;;  %v12820_v56 = vpack.c.b16 %v6040_v18, %v6039_v49 }
 0x7df   : > { %v6431_v38 = vpop.f32.mrf.mxu2 }
 0x7e0   : > { %9809 = vst [vmem:[%s12280_s29 + $0x110] sm:$0xff] %v9629_v51   ;;  %v8377_v15 = vadd.f32 %v8376_v42, %v8250_v2  ;;  %v6646_v21 = vadd.f32 %v6431_v38, %v5417_v27  ;;  %v6975_v24 = vpop.f32.mrf.mxu3  ;;  %v6041_v38 = vunpack.c.l.b16 %v5831_v35 }
 0x7e1   : > { %v5204_v1 = vpop.f32.mrf.mxu1 }
 0x7e2   : > { %v7190_v44 = vadd.f32 %v6975_v24, %v6646_v21  ;;  %v5418_v8 = vadd.f32 %v5204_v1, %v13662_v26  ;;  %v13665_v1 = vld [vmem:[#allocation145_spill] sm:$0xff] }
 0x7e3   : > { %v7521_v28 = vpop.f32.mrf.mxu0 }
 0x7e4   : > { %v7734_v3 = vadd.f32 %v7519_v30, %v7190_v44 }
 0x7e6   : > { %v8117_v43 = vadd.f32 %v8116_v0, %v7734_v3  ;;  %v8251_v5 = vmul.f32 %v7734_v3, %v7734_v3 }
 0x7e7   : > { %v6433_v19 = vpop.f32.mrf.mxu2 }
 0x7e8   : > { %v8378_v39 = vadd.f32 %v8377_v15, %v8251_v5  ;;  %v6647_v59 = vadd.f32 %v6433_v19, %v5418_v8  ;;  %v6977_v22 = vpop.f32.mrf.mxu3  ;;  %v6042_v15 = vunpack.c.l.b16 %v5834_v23 }
 0x7e9   : > { %v5207_v50 = vpop.f32.mrf.mxu1 }
 0x7ea   : > { %v7191_v16 = vadd.f32 %v6977_v22, %v6647_v59  ;;  %v5419_v17 = vadd.f32 %v5207_v50, %v13664_v61  ;;  %v12835_v18 = vpack.c.b16 %v6042_v15, %v6041_v38  ;;  %v10072_v59 = vld [vmem:[%s10212_s13 + $0x1f4] sm:$0xf] }
 0x7eb   : > { %v7524_v36 = vpop.f32.mrf.mxu0  ;;  %v9161_v22 = vrot.slane %v10072_v59, 9 }
 0x7ec   : > { %v7735_v42 = vadd.f32 %v7521_v28, %v7191_v16  ;;  %5246 = vmatmul.bf16.gmra.mxu1 %v13663_v52  ;;  %6475 = vmatmul.bf16.gmra.mxu2 %v12758_v33  ;;  %v13667_v52 = vld [vmem:[#allocation32_spill] sm:$0xff] }
 0x7ed   : > { %7019 = vmatmul.bf16.gmra.mxu3 %v12789_v53 }
 0x7ee   : > { %7563 = vmatmul.bf16.gmra.mxu0 %v12820_v56  ;;  %v9634_v57 = vpack.c.bf16 %v7735_v42, %v7734_v3  ;;  %v8118_v30 = vadd.f32 %v8117_v43, %v7735_v42  ;;  %v8252_v29 = vmul.f32 %v7735_v42, %v7735_v42  ;;  %v10071_v43 = vld [vmem:[%s10212_s13 + $0x1f8] sm:$0xf] }
 0x7ef   : > { %v6436_v9 = vpop.f32.mrf.mxu2  ;;  %v5837_v5 = vrot.slane %v10071_v43, 5  ;;  %v10075_v43 = vld [vmem:[%s10212_s13 + $0x204] sm:$0x1] }
 0x7f0   : > { %9810 = vst [vmem:[%s12280_s29 + $0x118] sm:$0xff] %v9634_v57   ;;  %v8379_v7 = vadd.f32 %v8378_v39, %v8252_v29  ;;  %v6648_v63 = vadd.f32 %v6436_v9, %v5419_v17  ;;  %v6980_v51 = vpop.f32.mrf.mxu3  ;;  %v13666_v39 = vld [vmem:[#allocation41_spill] sm:$0xff] }
 0x7f1   : > { %v5209_v0 = vpop.f32.mrf.mxu1  ;;  %v5839_v50 = vrot.slane %v5837_v5, 4  ;;  %v5838_v61 = vsel %vm12042_vm5, %v9161_v22, %v5837_v5  ;;  %v5846_v5 = vrot.slane %v10075_v43, 5 }
 0x7f2   : > { %v7192_v33 = vadd.f32 %v6980_v51, %v6648_v63  ;;  %v5420_v44 = vadd.f32 %v5209_v0, %v13665_v1 }
 0x7f3   : > { %v7526_v2 = vpop.f32.mrf.mxu0  ;;  %v5841_v17 = vsel %vm12042_vm5, %v5839_v50, %v5840_v12 }
 0x7f4   : > { %v7736_v27 = vadd.f32 %v7524_v36, %v7192_v33  ;;  %v6044_v63 = vunpack.c.l.b16 %v5841_v17  ;;  %v13668_v33 = vld [vmem:[#allocation146_spill] sm:$0xff] }
 0x7f6   : > { %v8119_v21 = vadd.f32 %v8118_v30, %v7736_v27  ;;  %v8253_v24 = vmul.f32 %v7736_v27, %v7736_v27 }
 0x7f7   : > { %v6438_v28 = vpop.f32.mrf.mxu2 }
 0x7f8   : > { %v8380_v40 = vadd.f32 %v8379_v7, %v8253_v24  ;;  %v6649_v45 = vadd.f32 %v6438_v28, %v5420_v44  ;;  %v6982_v3 = vpop.f32.mrf.mxu3  ;;  %v6043_v7 = vunpack.c.l.b16 %v5838_v61  ;;  %v10074_v24 = vld [vmem:[%s10212_s13 + $0x200] sm:$0xf] }
 0x7f9   : > { %v5212_v49 = vpop.f32.mrf.mxu1  ;;  %v5843_v1 = vrot.slane %v10074_v24, 5  ;;  %v10078_v24 = vld [vmem:[%s10212_s13 + $0x210] sm:$0xf] }
 0x7fa   : > { %v7193_v26 = vadd.f32 %v6982_v3, %v6649_v45  ;;  %v5421_v31 = vadd.f32 %v5212_v49, %v13667_v52  ;;  %v13669_v45 = vld [vmem:[#allocation48_spill] sm:$0xff]  ;;  %v5842_v3 = vrot.slane %v5840_v12, 4 }
 0x7fb   : > { %v7529_v8 = vpop.f32.mrf.mxu0  ;;  %v5845_v49 = vrot.slane %v5843_v1, 4 }
 0x7fc   : > { %v7737_v19 = vadd.f32 %v7526_v2, %v7193_v26  ;;  %5251 = vmatmul.bf16.gmra.mxu1 %v13666_v39  ;;  %6480 = vmatmul.bf16.gmra.mxu2 %v12773_v4  ;;  %v13670_v39 = vld [vmem:[#allocation38_spill] sm:$0xff]  ;;  %v5844_v12 = vsel %vm12042_vm5, %v5842_v3, %v5843_v1  ;;  %v5853_v1 = vrot.slane %v10078_v24, 5 }
 0x7fd   : > { %7024 = vmatmul.bf16.gmra.mxu3 %v12804_v14  ;;  %v5847_v52 = vsel %vm12042_vm5, %v5845_v49, %v5846_v5 }
 0x7fe   : > { %7568 = vmatmul.bf16.gmra.mxu0 %v12835_v18  ;;  %v9639_v16 = vpack.c.bf16 %v7737_v19, %v7736_v27  ;;  %v8120_v36 = vadd.f32 %v8119_v21, %v7737_v19  ;;  %v8254_v42 = vmul.f32 %v7737_v19, %v7737_v19  ;;  %v12851_v21 = vpack.c.b16 %v6044_v63, %v6043_v7 }
 0x7ff   : > { %v6441_v47 = vpop.f32.mrf.mxu2 }
 0x800   : > { %9811 = vst [vmem:[%s12280_s29 + $0x120] sm:$0xff] %v9639_v16   ;;  %v8381_v37 = vadd.f32 %v8380_v40, %v8254_v42  ;;  %v6650_v10 = vadd.f32 %v6441_v47, %v5421_v31  ;;  %v6985_v57 = vpop.f32.mrf.mxu3  ;;  %v6045_v47 = vunpack.c.l.b16 %v5844_v12 }
 0x801   : > { %v5214_v4 = vpop.f32.mrf.mxu1 }
 0x802   : > { %v7194_v30 = vadd.f32 %v6985_v57, %v6650_v10  ;;  %v5422_v2 = vadd.f32 %v5214_v4, %v13668_v33  ;;  %v13671_v4 = vld [vmem:[#allocation147_spill] sm:$0xff] }
 0x803   : > { %v7531_v29 = vpop.f32.mrf.mxu0 }
 0x804   : > { %v7738_v9 = vadd.f32 %v7529_v8, %v7194_v30 }
 0x806   : > { %v8121_v51 = vadd.f32 %v8120_v36, %v7738_v9  ;;  %v8255_v0 = vmul.f32 %v7738_v9, %v7738_v9 }
 0x807   : > { %v6443_v35 = vpop.f32.mrf.mxu2 }
 0x808   : > { %v8382_v23 = vadd.f32 %v8381_v37, %v8255_v0  ;;  %v6651_v27 = vadd.f32 %v6443_v35, %v5422_v2  ;;  %v6987_v38 = vpop.f32.mrf.mxu3  ;;  %v6046_v37 = vunpack.c.l.b16 %v5847_v52 }
 0x809   : > { %v5217_v15 = vpop.f32.mrf.mxu1 }
 0x80a   : > { %v7195_v44 = vadd.f32 %v6987_v38, %v6651_v27  ;;  %v5423_v59 = vadd.f32 %v5217_v15, %v13670_v39  ;;  %v12866_v63 = vpack.c.b16 %v6046_v37, %v6045_v47  ;;  %v10077_v27 = vld [vmem:[%s10212_s13 + $0x208] sm:$0xf] }
 0x80b   : > { %v7534_v28 = vpop.f32.mrf.mxu0  ;;  %v9162_v38 = vrot.slane %v10077_v27, 9 }
 0x80c   : > { %v7739_v40 = vadd.f32 %v7531_v29, %v7195_v44  ;;  %5256 = vmatmul.bf16.gmra.mxu1 %v13669_v45  ;;  %6485 = vmatmul.bf16.gmra.mxu2 %v12789_v53  ;;  %v13673_v45 = vld [vmem:[#allocation45_spill] sm:$0xff] }
 0x80d   : > { %7029 = vmatmul.bf16.gmra.mxu3 %v12820_v56 }
 0x80e   : > { %7573 = vmatmul.bf16.gmra.mxu0 %v12851_v21  ;;  %v9644_v26 = vpack.c.bf16 %v7739_v40, %v7738_v9  ;;  %v8122_v8 = vadd.f32 %v8121_v51, %v7739_v40  ;;  %v8256_v19 = vmul.f32 %v7739_v40, %v7739_v40  ;;  %v10076_v51 = vld [vmem:[%s10212_s13 + $0x20c] sm:$0xf] }
 0x80f   : > { %v6446_v22 = vpop.f32.mrf.mxu2  ;;  %v5850_v0 = vrot.slane %v10076_v51, 5  ;;  %v10080_v51 = vld [vmem:[%s10212_s13 + $0x218] sm:$0x1] }
 0x810   : > { %9812 = vst [vmem:[%s12280_s29 + $0x128] sm:$0xff] %v9644_v26   ;;  %v8383_v50 = vadd.f32 %v8382_v23, %v8256_v19  ;;  %v6652_v60 = vadd.f32 %v6446_v22, %v5423_v59  ;;  %v6990_v16 = vpop.f32.mrf.mxu3  ;;  %v13672_v23 = vld [vmem:[#allocation54_spill] sm:$0xff] }
 0x811   : > { %v5219_v36 = vpop.f32.mrf.mxu1  ;;  %v5852_v15 = vrot.slane %v5850_v0, 4  ;;  %v5851_v39 = vsel %vm12042_vm5, %v9162_v38, %v5850_v0  ;;  %v5859_v0 = vrot.slane %v10080_v51, 5 }
 0x812   : > { %v7196_v53 = vadd.f32 %v6990_v16, %v6652_v60  ;;  %v5424_v30 = vadd.f32 %v5219_v36, %v13671_v4 }
 0x813   : > { %v7536_v42 = vpop.f32.mrf.mxu0  ;;  %v5854_v59 = vsel %vm12042_vm5, %v5852_v15, %v5853_v1 }
 0x814   : > { %v7740_v31 = vadd.f32 %v7534_v28, %v7196_v53  ;;  %v6048_v60 = vunpack.c.l.b16 %v5854_v59  ;;  %v13674_v53 = vld [vmem:[#allocation148_spill] sm:$0xff] }
 0x816   : > { %v8123_v10 = vadd.f32 %v8122_v8, %v7740_v31  ;;  %v8257_v57 = vmul.f32 %v7740_v31, %v7740_v31 }
 0x817   : > { %v6448_v29 = vpop.f32.mrf.mxu2 }
 0x818   : > { %v8384_v61 = vadd.f32 %v8383_v50, %v8257_v57  ;;  %v6653_v17 = vadd.f32 %v6448_v29, %v5424_v30  ;;  %v6992_v9 = vpop.f32.mrf.mxu3  ;;  %v6047_v50 = vunpack.c.l.b16 %v5851_v39  ;;  %v10079_v57 = vld [vmem:[%s10212_s13 + $0x214] sm:$0xf] }
 0x819   : > { %v5222_v7 = vpop.f32.mrf.mxu1  ;;  %v5856_v4 = vrot.slane %v10079_v57, 5  ;;  %v10083_v57 = vld [vmem:[%s10212_s13 + $0x224] sm:$0xf] }
 0x81a   : > { %v7197_v33 = vadd.f32 %v6992_v9, %v6653_v17  ;;  %v5425_v3 = vadd.f32 %v5222_v7, %v13673_v45  ;;  %v13675_v17 = vld [vmem:[#allocation60_spill] sm:$0xff]  ;;  %v5855_v9 = vrot.slane %v5853_v1, 4 }
 0x81b   : > { %v7539_v2 = vpop.f32.mrf.mxu0  ;;  %v5858_v7 = vrot.slane %v5856_v4, 4 }
 0x81c   : > { %v7741_v35 = vadd.f32 %v7536_v42, %v7197_v33  ;;  %5261 = vmatmul.bf16.gmra.mxu1 %v13672_v23  ;;  %6490 = vmatmul.bf16.gmra.mxu2 %v12804_v14  ;;  %v13676_v23 = vld [vmem:[#allocation51_spill] sm:$0xff]  ;;  %v5857_v1 = vsel %vm12042_vm5, %v5855_v9, %v5856_v4  ;;  %v5866_v4 = vrot.slane %v10083_v57, 5 }
 0x81d   : > { %7034 = vmatmul.bf16.gmra.mxu3 %v12835_v18  ;;  %v5860_v45 = vsel %vm12042_vm5, %v5858_v7, %v5859_v0 }
 0x81e   : > { %7578 = vmatmul.bf16.gmra.mxu0 %v12866_v63  ;;  %v9649_v44 = vpack.c.bf16 %v7741_v35, %v7740_v31  ;;  %v8124_v28 = vadd.f32 %v8123_v10, %v7741_v35  ;;  %v8258_v40 = vmul.f32 %v7741_v35, %v7741_v35  ;;  %v12882_v10 = vpack.c.b16 %v6048_v60, %v6047_v50 }
 0x81f   : > { %v6451_v49 = vpop.f32.mrf.mxu2 }
 0x820   : > { %9813 = vst [vmem:[%s12280_s29 + $0x130] sm:$0xff] %v9649_v44   ;;  %v8385_v43 = vadd.f32 %v8384_v61, %v8258_v40  ;;  %v6654_v5 = vadd.f32 %v6451_v49, %v5425_v3  ;;  %v6995_v26 = vpop.f32.mrf.mxu3  ;;  %v6049_v49 = vunpack.c.l.b16 %v5857_v1 }
 0x821   : > { %v5224_v14 = vpop.f32.mrf.mxu1 }
 0x822   : > { %v7198_v8 = vadd.f32 %v6995_v26, %v6654_v5  ;;  %v5426_v42 = vadd.f32 %v5224_v14, %v13674_v53  ;;  %v13677_v14 = vld [vmem:[#allocation149_spill] sm:$0xff] }
 0x823   : > { %v7541_v19 = vpop.f32.mrf.mxu0 }
 0x824   : > { %v7742_v22 = vadd.f32 %v7539_v2, %v7198_v8 }
 0x826   : > { %v8125_v16 = vadd.f32 %v8124_v28, %v7742_v22  ;;  %v8259_v36 = vmul.f32 %v7742_v22, %v7742_v22 }
 0x827   : > { %v6453_v12 = vpop.f32.mrf.mxu2 }
 0x828   : > { %v8386_v52 = vadd.f32 %v8385_v43, %v8259_v36  ;;  %v6655_v31 = vadd.f32 %v6453_v12, %v5426_v42  ;;  %v6997_v47 = vpop.f32.mrf.mxu3  ;;  %v6050_v43 = vunpack.c.l.b16 %v5860_v45 }
 0x829   : > { %v5227_v37 = vpop.f32.mrf.mxu1 }
 0x82a   : > { %v7199_v30 = vadd.f32 %v6997_v47, %v6655_v31  ;;  %v5427_v27 = vadd.f32 %v5227_v37, %v13676_v23  ;;  %v12897_v60 = vpack.c.b16 %v6050_v43, %v6049_v49  ;;  %v10082_v31 = vld [vmem:[%s10212_s13 + $0x21c] sm:$0xf] }
 0x82b   : > { %v7544_v29 = vpop.f32.mrf.mxu0  ;;  %v9163_v47 = vrot.slane %v10082_v31, 9 }
 0x82c   : > { %v7743_v61 = vadd.f32 %v7541_v19, %v7199_v30  ;;  %5266 = vmatmul.bf16.gmra.mxu1 %v13675_v17  ;;  %6495 = vmatmul.bf16.gmra.mxu2 %v12820_v56  ;;  %v13679_v17 = vld [vmem:[#allocation57_spill] sm:$0xff] }
 0x82d   : > { %7039 = vmatmul.bf16.gmra.mxu3 %v12851_v21 }
 0x82e   : > { %7583 = vmatmul.bf16.gmra.mxu0 %v12882_v10  ;;  %v9654_v33 = vpack.c.bf16 %v7743_v61, %v7742_v22  ;;  %v8126_v2 = vadd.f32 %v8125_v16, %v7743_v61  ;;  %v8260_v35 = vmul.f32 %v7743_v61, %v7743_v61  ;;  %v10081_v16 = vld [vmem:[%s10212_s13 + $0x220] sm:$0xf] }
 0x82f   : > { %v6456_v38 = vpop.f32.mrf.mxu2  ;;  %v5863_v36 = vrot.slane %v10081_v16, 5  ;;  %v10085_v16 = vld [vmem:[%s10212_s13 + $0x22c] sm:$0x1] }
 0x830   : > { %9814 = vst [vmem:[%s12280_s29 + $0x138] sm:$0xff] %v9654_v33   ;;  %v8387_v15 = vadd.f32 %v8386_v52, %v8260_v35  ;;  %v6656_v24 = vadd.f32 %v6456_v38, %v5427_v27  ;;  %v7000_v44 = vpop.f32.mrf.mxu3  ;;  %v13678_v52 = vld [vmem:[#allocation67_spill] sm:$0xff] }
 0x831   : > { %v5229_v28 = vpop.f32.mrf.mxu1  ;;  %v5865_v37 = vrot.slane %v5863_v36, 4  ;;  %v5864_v23 = vsel %vm12042_vm5, %v9163_v47, %v5863_v36  ;;  %v5872_v36 = vrot.slane %v10085_v16, 5 }
 0x832   : > { %v7200_v56 = vadd.f32 %v7000_v44, %v6656_v24  ;;  %v5428_v8 = vadd.f32 %v5229_v28, %v13677_v14 }
 0x833   : > { %v7546_v40 = vpop.f32.mrf.mxu0  ;;  %v5867_v27 = vsel %vm12042_vm5, %v5865_v37, %v5866_v4 }
 0x834   : > { %v7744_v3 = vadd.f32 %v7544_v29, %v7200_v56  ;;  %v6052_v24 = vunpack.c.l.b16 %v5867_v27  ;;  %v13680_v56 = vld [vmem:[#allocation150_spill] sm:$0xff] }
 0x836   : > { %v8127_v5 = vadd.f32 %v8126_v2, %v7744_v3  ;;  %v8261_v26 = vmul.f32 %v7744_v3, %v7744_v3 }
 0x837   : > { %v6458_v19 = vpop.f32.mrf.mxu2 }
 0x838   : > { %v8388_v39 = vadd.f32 %v8387_v15, %v8261_v26  ;;  %v6657_v59 = vadd.f32 %v6458_v19, %v5428_v8  ;;  %v7002_v22 = vpop.f32.mrf.mxu3  ;;  %v6051_v15 = vunpack.c.l.b16 %v5864_v23  ;;  %v10084_v26 = vld [vmem:[%s10212_s13 + $0x228] sm:$0xf] }
 0x839   : > { %v5232_v50 = vpop.f32.mrf.mxu1  ;;  %v5869_v14 = vrot.slane %v10084_v26, 5  ;;  %v10088_v26 = vld [vmem:[%s10212_s13 + $0x238] sm:$0xf] }
 0x83a   : > { %v7201_v53 = vadd.f32 %v7002_v22, %v6657_v59  ;;  %v5429_v9 = vadd.f32 %v5232_v50, %v13679_v17  ;;  %v13681_v59 = vld [vmem:[#allocation74_spill] sm:$0xff]  ;;  %v5868_v22 = vrot.slane %v5866_v4, 4 }
 0x83b   : > { %v7549_v42 = vpop.f32.mrf.mxu0  ;;  %v5871_v50 = vrot.slane %v5869_v14, 4 }
 0x83c   : > { %v7745_v12 = vadd.f32 %v7546_v40, %v7201_v53  ;;  %5271 = vmatmul.bf16.gmra.mxu1 %v13678_v52  ;;  %6500 = vmatmul.bf16.gmra.mxu2 %v12835_v18  ;;  %v13682_v52 = vld [vmem:[#allocation64_spill] sm:$0xff]  ;;  %v5870_v4 = vsel %vm12042_vm5, %v5868_v22, %v5869_v14  ;;  %v5879_v14 = vrot.slane %v10088_v26, 5 }
 0x83d   : > { %7044 = vmatmul.bf16.gmra.mxu3 %v12866_v63  ;;  %v5873_v17 = vsel %vm12042_vm5, %v5871_v50, %v5872_v36 }
 0x83e   : > { %7588 = vmatmul.bf16.gmra.mxu0 %v12897_v60  ;;  %v9659_v30 = vpack.c.bf16 %v7745_v12, %v7744_v3  ;;  %v8128_v29 = vadd.f32 %v8127_v5, %v7745_v12  ;;  %v8262_v61 = vmul.f32 %v7745_v12, %v7745_v12  ;;  %v12913_v5 = vpack.c.b16 %v6052_v24, %v6051_v15 }
 0x83f   : > { %v6461_v7 = vpop.f32.mrf.mxu2 }
 0x840   : > { %9815 = vst [vmem:[%s12280_s29 + $0x140] sm:$0xff] %v9659_v30   ;;  %v8389_v51 = vadd.f32 %v8388_v39, %v8262_v61  ;;  %v6658_v0 = vadd.f32 %v6461_v7, %v5429_v9  ;;  %v7005_v33 = vpop.f32.mrf.mxu3  ;;  %v6053_v7 = vunpack.c.l.b16 %v5870_v4 }
 0x841   : > { %v5234_v18 = vpop.f32.mrf.mxu1 }
 0x842   : > { %v7202_v2 = vadd.f32 %v7005_v33, %v6658_v0  ;;  %v5430_v40 = vadd.f32 %v5234_v18, %v13680_v56  ;;  %v13683_v18 = vld [vmem:[#allocation151_spill] sm:$0xff] }
 0x843   : > { %v7551_v35 = vpop.f32.mrf.mxu0 }
 0x844   : > { %v7746_v38 = vadd.f32 %v7549_v42, %v7202_v2 }
 0x846   : > { %v8129_v44 = vadd.f32 %v8128_v29, %v7746_v38  ;;  %v8263_v28 = vmul.f32 %v7746_v38, %v7746_v38 }
 0x847   : > { %v6463_v1 = vpop.f32.mrf.mxu2 }
 0x848   : > { %v8390_v45 = vadd.f32 %v8389_v51, %v8263_v28  ;;  %v6659_v3 = vadd.f32 %v6463_v1, %v5430_v40  ;;  %v7007_v49 = vpop.f32.mrf.mxu3  ;;  %v6054_v51 = vunpack.c.l.b16 %v5873_v17 }
 0x849   : > { %v5237_v43 = vpop.f32.mrf.mxu1 }
 0x84a   : > { %v7203_v8 = vadd.f32 %v7007_v49, %v6659_v3  ;;  %v5431_v31 = vadd.f32 %v5237_v43, %v13682_v52  ;;  %v12928_v24 = vpack.c.b16 %v6054_v51, %v6053_v7  ;;  %v10087_v3 = vld [vmem:[%s10212_s13 + $0x230] sm:$0xf] }
 0x84b   : > { %v7554_v19 = vpop.f32.mrf.mxu0  ;;  %v9164_v49 = vrot.slane %v10087_v3, 9 }
 0x84c   : > { %v7747_v39 = vadd.f32 %v7551_v35, %v7203_v8  ;;  %5276 = vmatmul.bf16.gmra.mxu1 %v13681_v59  ;;  %6505 = vmatmul.bf16.gmra.mxu2 %v12851_v21  ;;  %v13685_v59 = vld [vmem:[#allocation71_spill] sm:$0xff] }
 0x84d   : > { %7049 = vmatmul.bf16.gmra.mxu3 %v12882_v10 }
 0x84e   : > { %7593 = vmatmul.bf16.gmra.mxu0 %v12913_v5  ;;  %v9664_v53 = vpack.c.bf16 %v7747_v39, %v7746_v38  ;;  %v8130_v42 = vadd.f32 %v8129_v44, %v7747_v39  ;;  %v8264_v12 = vmul.f32 %v7747_v39, %v7747_v39  ;;  %v10086_v44 = vld [vmem:[%s10212_s13 + $0x234] sm:$0xf] }
 0x84f   : > { %v6466_v47 = vpop.f32.mrf.mxu2  ;;  %v5876_v28 = vrot.slane %v10086_v44, 5  ;;  %v10090_v44 = vld [vmem:[%s10212_s13 + $0x240] sm:$0x1] }
 0x850   : > { %9816 = vst [vmem:[%s12280_s29 + $0x148] sm:$0xff] %v9664_v53   ;;  %v8391_v37 = vadd.f32 %v8390_v45, %v8264_v12  ;;  %v6660_v57 = vadd.f32 %v6466_v47, %v5431_v31  ;;  %v7010_v30 = vpop.f32.mrf.mxu3  ;;  %v13684_v45 = vld [vmem:[#allocation81_spill] sm:$0xff] }
 0x851   : > { %v5239_v29 = vpop.f32.mrf.mxu1  ;;  %v5878_v43 = vrot.slane %v5876_v28, 4  ;;  %v5877_v52 = vsel %vm12042_vm5, %v9164_v49, %v5876_v28  ;;  %v5885_v28 = vrot.slane %v10090_v44, 5 }
 0x852   : > { %v7204_v21 = vadd.f32 %v7010_v30, %v6660_v57  ;;  %v5432_v2 = vadd.f32 %v5239_v29, %v13683_v18 }
 0x853   : > { %v7556_v61 = vpop.f32.mrf.mxu0  ;;  %v5880_v31 = vsel %vm12042_vm5, %v5878_v43, %v5879_v14 }
 0x854   : > { %v7748_v9 = vadd.f32 %v7554_v19, %v7204_v21  ;;  %v6056_v57 = vunpack.c.l.b16 %v5880_v31  ;;  %v13686_v21 = vld [vmem:[#allocation152_spill] sm:$0xff] }
 0x856   : > { %v8131_v0 = vadd.f32 %v8130_v42, %v7748_v9  ;;  %v8265_v33 = vmul.f32 %v7748_v9, %v7748_v9 }
 0x857   : > { %v6468_v35 = vpop.f32.mrf.mxu2 }
 0x858   : > { %v8392_v23 = vadd.f32 %v8391_v37, %v8265_v33  ;;  %v6661_v27 = vadd.f32 %v6468_v35, %v5432_v2  ;;  %v7012_v38 = vpop.f32.mrf.mxu3  ;;  %v6055_v37 = vunpack.c.l.b16 %v5877_v52  ;;  %v10089_v33 = vld [vmem:[%s10212_s13 + $0x23c] sm:$0xf] }
 0x859   : > { %v5242_v15 = vpop.f32.mrf.mxu1  ;;  %v5882_v18 = vrot.slane %v10089_v33, 5  ;;  %v10093_v33 = vld [vmem:[%s10212_s13 + $0x24c] sm:$0xf] }
 0x85a   : > { %v7205_v56 = vadd.f32 %v7012_v38, %v6661_v27  ;;  %v5433_v22 = vadd.f32 %v5242_v15, %v13685_v59  ;;  %v13687_v27 = vld [vmem:[#allocation88_spill] sm:$0xff]  ;;  %v5881_v38 = vrot.slane %v5879_v14, 4 }
 0x85b   : > { %v7559_v40 = vpop.f32.mrf.mxu0  ;;  %v5884_v15 = vrot.slane %v5882_v18, 4 }
 0x85c   : > { %v7749_v1 = vadd.f32 %v7556_v61, %v7205_v56  ;;  %5281 = vmatmul.bf16.gmra.mxu1 %v13684_v45  ;;  %6510 = vmatmul.bf16.gmra.mxu2 %v12866_v63  ;;  %v13688_v45 = vld [vmem:[#allocation78_spill] sm:$0xff]  ;;  %v5883_v14 = vsel %vm12042_vm5, %v5881_v38, %v5882_v18  ;;  %v5892_v18 = vrot.slane %v10093_v33, 5 }
 0x85d   : > { %7054 = vmatmul.bf16.gmra.mxu3 %v12897_v60  ;;  %v5886_v59 = vsel %vm12042_vm5, %v5884_v15, %v5885_v28 }
 0x85e   : > { %7598 = vmatmul.bf16.gmra.mxu0 %v12928_v24  ;;  %v9669_v8 = vpack.c.bf16 %v7749_v1, %v7748_v9  ;;  %v8132_v19 = vadd.f32 %v8131_v0, %v7749_v1  ;;  %v8266_v39 = vmul.f32 %v7749_v1, %v7749_v1  ;;  %v12944_v0 = vpack.c.b16 %v6056_v57, %v6055_v37 }
 0x85f   : > { %v6471_v50 = vpop.f32.mrf.mxu2 }
 0x860   : > { %9817 = vst [vmem:[%s12280_s29 + $0x150] sm:$0xff] %v9669_v8   ;;  %v8393_v16 = vadd.f32 %v8392_v23, %v8266_v39  ;;  %v6662_v36 = vadd.f32 %v6471_v50, %v5433_v22  ;;  %v7015_v53 = vpop.f32.mrf.mxu3  ;;  %v6057_v50 = vunpack.c.l.b16 %v5883_v14 }
 0x861   : > { %v5244_v63 = vpop.f32.mrf.mxu1 }
 0x862   : > { %v7206_v42 = vadd.f32 %v7015_v53, %v6662_v36  ;;  %v5434_v61 = vadd.f32 %v5244_v63, %v13686_v21  ;;  %v13689_v63 = vld [vmem:[#allocation153_spill] sm:$0xff] }
 0x863   : > { %v7561_v12 = vpop.f32.mrf.mxu0 }
 0x864   : > { %v7750_v47 = vadd.f32 %v7559_v40, %v7206_v42 }
 0x866   : > { %v8133_v30 = vadd.f32 %v8132_v19, %v7750_v47  ;;  %v8267_v29 = vmul.f32 %v7750_v47, %v7750_v47 }
 0x867   : > { %v6473_v4 = vpop.f32.mrf.mxu2 }
 0x868   : > { %v8394_v17 = vadd.f32 %v8393_v16, %v8267_v29  ;;  %v6663_v9 = vadd.f32 %v6473_v4, %v5434_v61  ;;  %v7017_v7 = vpop.f32.mrf.mxu3  ;;  %v6058_v16 = vunpack.c.l.b16 %v5886_v59 }
 0x869   : > { %v5247_v51 = vpop.f32.mrf.mxu1 }
 0x86a   : > { %v7207_v2 = vadd.f32 %v7017_v7, %v6663_v9  ;;  %v5435_v3 = vadd.f32 %v5247_v51, %v13688_v45  ;;  %v12959_v57 = vpack.c.b16 %v6058_v16, %v6057_v50  ;;  %v10092_v9 = vld [vmem:[%s10212_s13 + $0x244] sm:$0xf] }
 0x86b   : > { %v7564_v35 = vpop.f32.mrf.mxu0  ;;  %v9165_v7 = vrot.slane %v10092_v9, 9 }
 0x86c   : > { %v7751_v23 = vadd.f32 %v7561_v12, %v7207_v2  ;;  %5286 = vmatmul.bf16.gmra.mxu1 %v13687_v27  ;;  %6515 = vmatmul.bf16.gmra.mxu2 %v12882_v10  ;;  %v13691_v27 = vld [vmem:[#allocation85_spill] sm:$0xff] }
 0x86d   : > { %7059 = vmatmul.bf16.gmra.mxu3 %v12913_v5 }
 0x86e   : > { %7603 = vmatmul.bf16.gmra.mxu0 %v12944_v0  ;;  %v9674_v56 = vpack.c.bf16 %v7751_v23, %v7750_v47  ;;  %v8134_v40 = vadd.f32 %v8133_v30, %v7751_v23  ;;  %v8268_v1 = vmul.f32 %v7751_v23, %v7751_v23  ;;  %v10091_v30 = vld [vmem:[%s10212_s13 + $0x248] sm:$0xf] }
 0x86f   : > { %v6476_v49 = vpop.f32.mrf.mxu2  ;;  %v5889_v29 = vrot.slane %v10091_v30, 5  ;;  %v10095_v30 = vld [vmem:[%s10212_s13 + $0x254] sm:$0x1] }
 0x870   : > { %9818 = vst [vmem:[%s12280_s29 + $0x158] sm:$0xff] %v9674_v56   ;;  %v8395_v43 = vadd.f32 %v8394_v17, %v8268_v1  ;;  %v6664_v26 = vadd.f32 %v6476_v49, %v5435_v3  ;;  %v7020_v8 = vpop.f32.mrf.mxu3  ;;  %v13690_v17 = vld [vmem:[#allocation95_spill] sm:$0xff] }
 0x871   : > { %v5249_v19 = vpop.f32.mrf.mxu1  ;;  %v5891_v51 = vrot.slane %v5889_v29, 4  ;;  %v5890_v45 = vsel %vm12042_vm5, %v9165_v7, %v5889_v29  ;;  %v5898_v29 = vrot.slane %v10095_v30, 5 }
 0x872   : > { %v7208_v10 = vadd.f32 %v7020_v8, %v6664_v26  ;;  %v5436_v42 = vadd.f32 %v5249_v19, %v13689_v63 }
 0x873   : > { %v7566_v39 = vpop.f32.mrf.mxu0  ;;  %v5893_v3 = vsel %vm12042_vm5, %v5891_v51, %v5892_v18 }
 0x874   : > { %v7752_v22 = vadd.f32 %v7564_v35, %v7208_v10  ;;  %v6060_v26 = vunpack.c.l.b16 %v5893_v3  ;;  %v13692_v10 = vld [vmem:[#allocation154_spill] sm:$0xff] }
 0x876   : > { %v8135_v36 = vadd.f32 %v8134_v40, %v7752_v22  ;;  %v8269_v53 = vmul.f32 %v7752_v22, %v7752_v22 }
 0x877   : > { %v6478_v12 = vpop.f32.mrf.mxu2 }
 0x878   : > { %v8396_v52 = vadd.f32 %v8395_v43, %v8269_v53  ;;  %v6665_v31 = vadd.f32 %v6478_v12, %v5436_v42  ;;  %v7022_v47 = vpop.f32.mrf.mxu3  ;;  %v6059_v43 = vunpack.c.l.b16 %v5890_v45  ;;  %v10094_v53 = vld [vmem:[%s10212_s13 + $0x250] sm:$0xf] }
 0x879   : > { %v5252_v37 = vpop.f32.mrf.mxu1  ;;  %v5895_v63 = vrot.slane %v10094_v53, 5 }
 0x87a   : > { %v7209_v21 = vadd.f32 %v7022_v47, %v6665_v31  ;;  %v5437_v38 = vadd.f32 %v5252_v37, %v13691_v27  ;;  %v13693_v31 = vld [vmem:[#allocation101_spill] sm:$0xff]  ;;  %v5894_v47 = vrot.slane %v5892_v18, 4 }
 0x87b   : > { %v7569_v61 = vpop.f32.mrf.mxu0  ;;  %v5897_v37 = vrot.slane %v5895_v63, 4 }
 0x87c   : > { %v7753_v4 = vadd.f32 %v7566_v39, %v7209_v21  ;;  %5291 = vmatmul.bf16.gmra.mxu1 %v13690_v17  ;;  %6520 = vmatmul.bf16.gmra.mxu2 %v12897_v60  ;;  %v13694_v17 = vld [vmem:[#allocation92_spill] sm:$0xff]  ;;  %v5896_v18 = vsel %vm12042_vm5, %v5894_v47, %v5895_v63 }
 0x87d   : > { %7064 = vmatmul.bf16.gmra.mxu3 %v12928_v24  ;;  %v5899_v27 = vsel %vm12042_vm5, %v5897_v37, %v5898_v29 }
 0x87e   : > { %7608 = vmatmul.bf16.gmra.mxu0 %v12959_v57  ;;  %v9679_v2 = vpack.c.bf16 %v7753_v4, %v7752_v22  ;;  %v8136_v35 = vadd.f32 %v8135_v36, %v7753_v4  ;;  %v8270_v23 = vmul.f32 %v7753_v4, %v7753_v4  ;;  %v12975_v36 = vpack.c.b16 %v6060_v26, %v6059_v43 }
 0x87f   : > { %v6481_v15 = vpop.f32.mrf.mxu2 }
 0x880   : > { %9819 = vst [vmem:[%s12280_s29 + $0x160] sm:$0xff] %v9679_v2   ;;  %v8397_v44 = vadd.f32 %v8396_v52, %v8270_v23  ;;  %v6666_v28 = vadd.f32 %v6481_v15, %v5437_v38  ;;  %v7025_v56 = vpop.f32.mrf.mxu3  ;;  %v6061_v15 = vunpack.c.l.b16 %v5896_v18 }
 0x881   : > { %v5254_v60 = vpop.f32.mrf.mxu1 }
 0x882   : > { %v7210_v40 = vadd.f32 %v7025_v56, %v6666_v28  ;;  %v5438_v39 = vadd.f32 %v5254_v60, %v13692_v10  ;;  %v13695_v60 = vld [vmem:[#allocation155_spill] sm:$0xff] }
 0x883   : > { %v7571_v1 = vpop.f32.mrf.mxu0 }
 0x884   : > { %v7754_v49 = vadd.f32 %v7569_v61, %v7210_v40 }
 0x886   : > { %v8137_v8 = vadd.f32 %v8136_v35, %v7754_v49  ;;  %v8271_v19 = vmul.f32 %v7754_v49, %v7754_v49 }
 0x887   : > { %v6483_v14 = vpop.f32.mrf.mxu2 }
 0x888   : > { %v8398_v59 = vadd.f32 %v8397_v44, %v8271_v19  ;;  %v6667_v22 = vadd.f32 %v6483_v14, %v5438_v39  ;;  %v7027_v50 = vpop.f32.mrf.mxu3  ;;  %v6062_v44 = vunpack.c.l.b16 %v5899_v27 }
 0x889   : > { %v5257_v16 = vpop.f32.mrf.mxu1 }
 0x88a   : > { %v7211_v42 = vadd.f32 %v7027_v50, %v6667_v22  ;;  %v5439_v9 = vadd.f32 %v5257_v16, %v13694_v17  ;;  %v12990_v26 = vpack.c.b16 %v6062_v44, %v6061_v15  ;;  %v10098_v16 = vld [vmem:[%s10212_s13 + $0x260] sm:$0xf]  ;;  %v10099_v44 = vld [vmem:[%s10212_s13 + $0x264] sm:$0xf] }
 0x88b   : > { %v7574_v12 = vpop.f32.mrf.mxu0  ;;  %v5905_v53 = vrot.slane %v10098_v16, 5 }
 0x88c   : > { %v7755_v52 = vadd.f32 %v7571_v1, %v7211_v42  ;;  %5296 = vmatmul.bf16.gmra.mxu1 %v13693_v31  ;;  %6525 = vmatmul.bf16.gmra.mxu2 %v12913_v5 }
 0x88d   : > { %7069 = vmatmul.bf16.gmra.mxu3 %v12944_v0 }
 0x88e   : > { %7613 = vmatmul.bf16.gmra.mxu0 %v12975_v36  ;;  %v9684_v21 = vpack.c.bf16 %v7755_v52, %v7754_v49  ;;  %v8138_v61 = vadd.f32 %v8137_v8, %v7755_v52  ;;  %v8272_v4 = vmul.f32 %v7755_v52, %v7755_v52  ;;  %v10096_v8 = vld [vmem:[%s10212_s13 + $0x25c] sm:$0xf]  ;;  %v13696_v52 = vld [vmem:[#allocation98_spill] sm:$0xff] }
 0x88f   : > { %v6486_v7 = vpop.f32.mrf.mxu2  ;;  %v5902_v19 = vrot.slane %v10096_v8, 5 }
 0x890   : > { %9820 = vst [vmem:[%s12280_s29 + $0x168] sm:$0xff] %v9684_v21   ;;  %v8399_v51 = vadd.f32 %v8398_v59, %v8272_v4  ;;  %v6668_v33 = vadd.f32 %v6486_v7, %v5439_v9  ;;  %v7030_v2 = vpop.f32.mrf.mxu3  ;;  %v10097_v59 = vld [vmem:[%s10212_s13 + $0x258] sm:$0xf] }
 0x891   : > { %v5259_v35 = vpop.f32.mrf.mxu1  ;;  %v9166_v22 = vrot.slane %v10097_v59, 9  ;;  %v5904_v50 = vrot.slane %v5902_v19, 4 }
 0x892   : > { %v7212_v5 = vadd.f32 %v7030_v2, %v6668_v33  ;;  %v5440_v40 = vadd.f32 %v5259_v35, %v13695_v60  ;;  %v13697_v2 = vld [vmem:[#allocation156_spill] sm:$0xff] }
 0x893   : > { %v7576_v23 = vpop.f32.mrf.mxu0  ;;  %v5906_v4 = vsel %vm12042_vm5, %v5904_v50, %v5905_v53 }
 0x894   : > { %v7756_v38 = vadd.f32 %v7574_v12, %v7212_v5  ;;  %v6064_v7 = vunpack.c.l.b16 %v5906_v4 }
 0x896   : > { %v8139_v28 = vadd.f32 %v8138_v61, %v7756_v38  ;;  %v8273_v56 = vmul.f32 %v7756_v38, %v7756_v38  ;;  %v5903_v61 = vsel %vm12042_vm5, %v9166_v22, %v5902_v19 }
 0x897   : > { %v6488_v1 = vpop.f32.mrf.mxu2  ;;  %v6063_v9 = vunpack.c.l.b16 %v5903_v61 }
 0x898   : > { %v8400_v45 = vadd.f32 %v8399_v51, %v8273_v56  ;;  %v6669_v3 = vadd.f32 %v6488_v1, %v5440_v40  ;;  %v7032_v49 = vpop.f32.mrf.mxu3  ;;  %v13698_v1 = vld [vmem:[#allocation12_spill] sm:$0xff] }
 0x899   : > { %v5262_v43 = vpop.f32.mrf.mxu1  ;;  %v13006_v15 = vpack.c.b16 %v6064_v7, %v6063_v9  ;;  %v10101_v7 = vld [vmem:[%s10212_s13 + $0x270] sm:$0xf] }
 0x89a   : > { %v7213_v10 = vadd.f32 %v7032_v49, %v6669_v3  ;;  %v5441_v31 = vadd.f32 %v5262_v43, %v13696_v52  ;;  %v10100_v49 = vld [vmem:[%s10212_s13 + $0x268] sm:$0x1] }
 0x89b   : > { %v7579_v39 = vpop.f32.mrf.mxu0  ;;  %v5911_v43 = vrot.slane %v10100_v49, 5 }
 0x89c   : > { %v7757_v14 = vadd.f32 %v7576_v23, %v7213_v10  ;;  %5301 = vmatmul.bf16.gmra.mxu1 %v11932_v32  ;;  %6530 = vmatmul.bf16.gmra.mxu2 %v12928_v24 }
 0x89d   : > { %7074 = vmatmul.bf16.gmra.mxu3 %v12959_v57 }
 0x89e   : > { %7618 = vmatmul.bf16.gmra.mxu0 %v12990_v26  ;;  %v9689_v63 = vpack.c.bf16 %v7757_v14, %v7756_v38  ;;  %v8140_v42 = vadd.f32 %v8139_v28, %v7757_v14  ;;  %v8274_v12 = vmul.f32 %v7757_v14, %v7757_v14  ;;  %v5908_v28 = vrot.slane %v10099_v44, 5 }
 0x89f   : > { %v6491_v47 = vpop.f32.mrf.mxu2 }
 0x8a0   : > { %9821 = vst [vmem:[%s12280_s29 + $0x170] sm:$0xff] %v9689_v63   ;;  %v8401_v37 = vadd.f32 %v8400_v45, %v8274_v12  ;;  %v6670_v32 = vadd.f32 %v6491_v47, %v5441_v31  ;;  %v7035_v30 = vpop.f32.mrf.mxu3  ;;  %v5907_v45 = vrot.slane %v5905_v53, 4  ;;  %v5910_v3 = vrot.slane %v5908_v28, 4 }
 0x8a1   : > { %v5264_v24 = vpop.f32.mrf.mxu1 }
 0x8a2   : > { %v7214_v29 = vadd.f32 %v7035_v30, %v6670_v32  ;;  %v5442_v35 = vadd.f32 %v5264_v24, %v13697_v2  ;;  %v5909_v53 = vsel %vm12042_vm5, %v5907_v45, %v5908_v28  ;;  %v5912_v12 = vsel %vm12042_vm5, %v5910_v3, %v5911_v43  ;;  %v13700_v30 = vld [vmem:[#allocation6_spill] sm:$0xff] }
 0x8a3   : > { %v7581_v21 = vpop.f32.mrf.mxu0  ;;  %v6065_v31 = vunpack.c.l.b16 %v5909_v53  ;;  %v6066_v47 = vunpack.c.l.b16 %v5912_v12 }
 0x8a4   : > { %v7758_v17 = vadd.f32 %v7579_v39, %v7214_v29  ;;  %v13699_v39 = vld [vmem:[#allocation3_spill] sm:$0xff] }
 0x8a5   : > { %v13021_v9 = vpack.c.b16 %v6066_v47, %v6065_v31  ;;  %v10104_v31 = vld [vmem:[%s10212_s13 + $0x278] sm:$0xf] }
 0x8a6   : > { %v8141_v51 = vadd.f32 %v8140_v42, %v7758_v17  ;;  %v8275_v33 = vmul.f32 %v7758_v17, %v7758_v17  ;;  %v5921_v47 = vrot.slane %v10104_v31, 5  ;;  %v13705_v31 = vld [vmem:[#allocation21_spill] sm:$0xff] }
 0x8a7   : > { %v6493_v5 = vpop.f32.mrf.mxu2 }
 0x8a8   : > { %v8402_v23 = vadd.f32 %v8401_v37, %v8275_v33  ;;  %v6671_v18 = vadd.f32 %v6493_v5, %v5442_v35  ;;  %v7037_v27 = vpop.f32.mrf.mxu3  ;;  %v10102_v5 = vld [vmem:[%s10212_s13 + $0x26c] sm:$0xf] }
 0x8a9   : > { %v5267_v38 = vpop.f32.mrf.mxu1 }
 0x8aa   : > { %v7215_v56 = vadd.f32 %v7037_v27, %v6671_v18  ;;  %v5443_v14 = vadd.f32 %v5267_v38, %v13699_v39  ;;  %v10103_v27 = vld [vmem:[%s10212_s13 + $0x274] sm:$0xf] }
 0x8ab   : > { %v7584_v60 = vpop.f32.mrf.mxu0  ;;  %v5918_v38 = vrot.slane %v10103_v27, 5 }
 0x8ac   : > { %v7759_v40 = vadd.f32 %v7581_v21, %v7215_v56  ;;  %5306 = vmatmul.bf16.gmra.mxu1 %v13698_v1  ;;  %6535 = vmatmul.bf16.gmra.mxu2 %v12944_v0 }
 0x8ad   : > { %7079 = vmatmul.bf16.gmra.mxu3 %v12975_v36 }
 0x8ae   : > { %7623 = vmatmul.bf16.gmra.mxu0 %v13006_v15  ;;  %v9694_v8 = vpack.c.bf16 %v7759_v40, %v7758_v17  ;;  %v8142_v19 = vadd.f32 %v8141_v51, %v7759_v40  ;;  %v8276_v10 = vmul.f32 %v7759_v40, %v7759_v40  ;;  %v5915_v51 = vrot.slane %v10101_v7, 5 }
 0x8af   : > { %v6496_v59 = vpop.f32.mrf.mxu2 }
 0x8b0   : > { %9822 = vst [vmem:[%s12280_s29 + $0x178] sm:$0xff] %v9694_v8   ;;  %v8403_v22 = vadd.f32 %v8402_v23, %v8276_v10  ;;  %v6672_v50 = vadd.f32 %v6496_v59, %v5443_v14  ;;  %v7040_v16 = vpop.f32.mrf.mxu3  ;;  %v9167_v23 = vrot.slane %v10102_v5, 9  ;;  %v5917_v18 = vrot.slane %v5915_v51, 4 }
 0x8b1   : > { %v5269_v63 = vpop.f32.mrf.mxu1 }
 0x8b2   : > { %v7216_v0 = vadd.f32 %v7040_v16, %v6672_v50  ;;  %v5444_v24 = vadd.f32 %v5269_v63, %v13700_v30  ;;  %v5916_v8 = vsel %vm12042_vm5, %v9167_v23, %v5915_v51  ;;  %v13702_v50 = vld [vmem:[#allocation157_spill] sm:$0xff]  ;;  %v13703_v51 = vld [vmem:[#allocation15_spill] sm:$0xff] }
 0x8b3   : > { %v7586_v42 = vpop.f32.mrf.mxu0  ;;  %v6067_v39 = vunpack.c.l.b16 %v5916_v8 }
 0x8b4   : > { %v7760_v52 = vadd.f32 %v7584_v60, %v7216_v0  ;;  %v13701_v60 = vld [vmem:[#allocation9_spill] sm:$0xff] }
 0x8b6   : > { %v8143_v37 = vadd.f32 %v8142_v19, %v7760_v52  ;;  %v8277_v32 = vmul.f32 %v7760_v52, %v7760_v52  ;;  %v5919_v19 = vsel %vm12042_vm5, %v5917_v18, %v5918_v38 }
 0x8b7   : > { %v6498_v29 = vpop.f32.mrf.mxu2  ;;  %v6068_v14 = vunpack.c.l.b16 %v5919_v19  ;;  %v10106_v19 = vld [vmem:[%s10212_s13 + $0x284] sm:$0xf] }
 0x8b8   : > { %v8404_v21 = vadd.f32 %v8403_v22, %v8277_v32  ;;  %v6673_v61 = vadd.f32 %v6498_v29, %v5444_v24  ;;  %v7042_v4 = vpop.f32.mrf.mxu3  ;;  %v5920_v24 = vrot.slane %v5918_v38, 4  ;;  %v5923_v29 = vrot.slane %v5921_v47, 4 }
 0x8b9   : > { %v5272_v17 = vpop.f32.mrf.mxu1 }
 0x8ba   : > { %v7217_v33 = vadd.f32 %v7042_v4, %v6673_v61  ;;  %v5445_v40 = vadd.f32 %v5272_v17, %v13701_v60  ;;  %v5922_v27 = vsel %vm12042_vm5, %v5920_v24, %v5921_v47 }
 0x8bb   : > { %v7589_v2 = vpop.f32.mrf.mxu0 }
 0x8bc   : > { %v7761_v35 = vadd.f32 %v7586_v42, %v7217_v33  ;;  %5311 = vmatmul.bf16.gmra.mxu1 %v11975_v11  ;;  %6540 = vmatmul.bf16.gmra.mxu2 %v12959_v57 }
 0x8bd   : > { %7084 = vmatmul.bf16.gmra.mxu3 %v12990_v26 }
 0x8be   : > { %7628 = vmatmul.bf16.gmra.mxu0 %v13021_v9  ;;  %v9699_v44 = vpack.c.bf16 %v7761_v35, %v7760_v52  ;;  %v8144_v28 = vadd.f32 %v8143_v37, %v7761_v35  ;;  %v8278_v56 = vmul.f32 %v7761_v35, %v7761_v35  ;;  %v13037_v52 = vpack.c.b16 %v6068_v14, %v6067_v39 }
 0x8bf   : > { %v6501_v1 = vpop.f32.mrf.mxu2 }
 0x8c0   : > { %9823 = vst [vmem:[%s12280_s29 + $0x180] sm:$0xff] %v9699_v44   ;;  %v8405_v45 = vadd.f32 %v8404_v21, %v8278_v56  ;;  %v6674_v11 = vadd.f32 %v6501_v1, %v5445_v40  ;;  %v7045_v3 = vpop.f32.mrf.mxu3  ;;  %v10105_v21 = vld [vmem:[%s10212_s13 + $0x27c] sm:$0x1]  ;;  %v13704_v1 = vld [vmem:[#allocation18_spill] sm:$0xff] }
 0x8c1   : > { %v5274_v57 = vpop.f32.mrf.mxu1  ;;  %v5924_v61 = vrot.slane %v10105_v21, 5 }
 0x8c2   : > { %v7218_v49 = vadd.f32 %v7045_v3, %v6674_v11  ;;  %v5446_v16 = vadd.f32 %v5274_v57, %v13702_v50 }
 0x8c3   : > { %v7591_v43 = vpop.f32.mrf.mxu0  ;;  %v5925_v38 = vsel %vm12042_vm5, %v5923_v29, %v5924_v61 }
 0x8c4   : > { %v7762_v10 = vadd.f32 %v7589_v2, %v7218_v49  ;;  %v6070_v56 = vunpack.c.l.b16 %v5925_v38  ;;  %v10109_v38 = vld [vmem:[%s10212_s13 + $0x28c] sm:$0xf] }
 0x8c6   : > { %v8145_v59 = vadd.f32 %v8144_v28, %v7762_v10  ;;  %v8279_v22 = vmul.f32 %v7762_v10, %v7762_v10  ;;  %v6069_v28 = vunpack.c.l.b16 %v5922_v27 }
 0x8c7   : > { %v6503_v63 = vpop.f32.mrf.mxu2 }
 0x8c8   : > { %v8406_v0 = vadd.f32 %v8405_v45, %v8279_v22  ;;  %v6675_v42 = vadd.f32 %v6503_v63, %v5446_v16  ;;  %v7047_v53 = vpop.f32.mrf.mxu3  ;;  %v13052_v8 = vpack.c.b16 %v6070_v56, %v6069_v28  ;;  %v10107_v22 = vld [vmem:[%s10212_s13 + $0x280] sm:$0xf]  ;;  %v10108_v63 = vld [vmem:[%s10212_s13 + $0x288] sm:$0xf] }
 0x8c9   : > { %v5277_v12 = vpop.f32.mrf.mxu1  ;;  %v9216_v50 = vrot.slane %v10107_v22, 9 }
 0x8ca   : > { %v7219_v37 = vadd.f32 %v7047_v53, %v6675_v42  ;;  %v5447_v33 = vadd.f32 %v5277_v12, %v13703_v51 }
 0x8cb   : > { %v7594_v32 = vpop.f32.mrf.mxu0 }
 0x8cc   : > { %v7763_v30 = vadd.f32 %v7591_v43, %v7219_v37  ;;  %5316 = vmatmul.bf16.gmra.mxu1 %v11996_v55  ;;  %6545 = vmatmul.bf16.gmra.mxu2 %v12975_v36 }
 0x8cd   : > { %7089 = vmatmul.bf16.gmra.mxu3 %v13006_v15 }
 0x8ce   : > { %7633 = vmatmul.bf16.gmra.mxu0 %v13037_v52  ;;  %v9704_v4 = vpack.c.bf16 %v7763_v30, %v7762_v10  ;;  %v8146_v17 = vadd.f32 %v8145_v59, %v7763_v30  ;;  %v8280_v7 = vmul.f32 %v7763_v30, %v7763_v30  ;;  %v6707_v10 = vrot.slane %v10106_v19, 5 }
 0x8cf   : > { %v6506_v2 = vpop.f32.mrf.mxu2 }
 0x8d0   : > { %9824 = vst [vmem:[%s12280_s29 + $0x188] sm:$0xff] %v9704_v4   ;;  %v8407_v35 = vadd.f32 %v8406_v0, %v8280_v7  ;;  %v6676_v5 = vadd.f32 %v6506_v2, %v5447_v33  ;;  %v7050_v55 = vpop.f32.mrf.mxu3  ;;  %v6709_v16 = vrot.slane %v6707_v10, 4  ;;  %v6710_v0 = vrot.slane %v10108_v63, 5  ;;  %v13706_v2 = vld [vmem:[#allocation24_spill] sm:$0xff] }
 0x8d1   : > { %v5279_v23 = vpop.f32.mrf.mxu1  ;;  %v6708_v21 = vsel %vm12042_vm5, %v9216_v50, %v6707_v10  ;;  %v13707_v10 = vld [vmem:[#allocation27_spill] sm:$0xff] }
 0x8d2   : > { %v7220_v36 = vadd.f32 %v7050_v55, %v6676_v5  ;;  %v5448_v45 = vadd.f32 %v5279_v23, %v13704_v1  ;;  %v6711_v61 = vsel %vm12042_vm5, %v6709_v16, %v6710_v0  ;;  %v6712_v1 = vrot.slane %v6710_v0, 4 }
 0x8d3   : > { %v7596_v18 = vpop.f32.mrf.mxu0  ;;  %v6736_v7 = vunpack.c.l.b16 %v6711_v61 }
 0x8d4   : > { %v7764_v44 = vadd.f32 %v7594_v32, %v7220_v36 }
 0x8d6   : > { %v8147_v60 = vadd.f32 %v8146_v17, %v7764_v44  ;;  %v8281_v40 = vmul.f32 %v7764_v44, %v7764_v44  ;;  %v6735_v17 = vunpack.c.l.b16 %v6708_v21 }
 0x8d7   : > { %v6508_v11 = vpop.f32.mrf.mxu2 }
 0x8d8   : > { %v8408_v3 = vadd.f32 %v8407_v35, %v8281_v40  ;;  %v6677_v57 = vadd.f32 %v6508_v11, %v5448_v45  ;;  %v7052_v49 = vpop.f32.mrf.mxu3  ;;  %v13068_v27 = vpack.c.b16 %v6736_v7, %v6735_v17  ;;  %v13074_v40 = vld [vmem:[%s10212_s13 + $0x294] sm:$0xf]  ;;  %v10110_v11 = vld [vmem:[%s10212_s13 + $0x290] sm:$0x1] }
 0x8d9   : > { %v5282_v43 = vpop.f32.mrf.mxu1 }
 0x8da   : > { %v7221_v39 = vadd.f32 %v7052_v49, %v6677_v57  ;;  %v5449_v47 = vadd.f32 %v5282_v43, %v13705_v31  ;;  %v13080_v57 = vld [vmem:[%s10212_s13 + $0x298] sm:$0xf] }
 0x8db   : > { %v7599_v14 = vpop.f32.mrf.mxu0  ;;  %v4911_v16 = vshll.u32 %v13080_v57, 16  ;;  %v4915_v63 = vshrl.u32 %v13080_v57, 16 }
 0x8dc   : > { %v7765_v59 = vadd.f32 %v7596_v18, %v7221_v39  ;;  %5321 = vmatmul.bf16.gmra.mxu1 %v12015_v48  ;;  %6550 = vmatmul.bf16.gmra.mxu2 %v12990_v26 }
 0x8dd   : > { %7094 = vmatmul.bf16.gmra.mxu3 %v13021_v9 }
 0x8de   : > { %7638 = vmatmul.bf16.gmra.mxu0 %v13052_v8  ;;  %v9709_v42 = vpack.c.bf16 %v7765_v59, %v7764_v44  ;;  %v8148_v53 = vadd.f32 %v8147_v60, %v7765_v59  ;;  %v8282_v12 = vmul.f32 %v7765_v59, %v7765_v59  ;;  %v6713_v44 = vrot.slane %v10109_v38, 5 }
 0x8df   : > { %v6511_v37 = vpop.f32.mrf.mxu2 }
 0x8e0   : > { %9825 = vst [vmem:[%s12280_s29 + $0x190] sm:$0xff] %v9709_v42   ;;  %v8409_v32 = vadd.f32 %v8408_v3, %v8282_v12  ;;  %v6678_v48 = vadd.f32 %v6511_v37, %v5449_v47  ;;  %v7055_v30 = vpop.f32.mrf.mxu3  ;;  %v6715_v45 = vrot.slane %v6713_v44, 4  ;;  %v6716_v3 = vrot.slane %v10110_v11, 5 }
 0x8e1   : > { %v5284_v26 = vpop.f32.mrf.mxu1  ;;  %v6714_v12 = vsel %vm12042_vm5, %v6712_v1, %v6713_v44  ;;  %v9265_v11 = vrot.slane %v13074_v40, 9 }
 0x8e2   : > { %v7222_v24 = vadd.f32 %v7055_v30, %v6678_v48  ;;  %v5450_v35 = vadd.f32 %v5284_v26, %v13706_v2  ;;  %v6717_v31 = vsel %vm12042_vm5, %v6715_v45, %v6716_v3  ;;  %v4913_v48 = vrot.slane %v4911_v16, 5 }
 0x8e3   : > { %v7601_v29 = vpop.f32.mrf.mxu0  ;;  %v4917_v30 = vrot.slane %v4915_v63, 4  ;;  %v6737_v26 = vunpack.c.l.b16 %v6714_v12 }
 0x8e4   : > { %v7766_v4 = vadd.f32 %v7599_v14, %v7222_v24  ;;  %v4905_v14 = vshll.u32 %v13074_v40, 16  ;;  %v6738_v24 = vunpack.c.l.b16 %v6717_v31 }
 0x8e6   : > { %v8149_v51 = vadd.f32 %v8148_v53, %v7766_v4  ;;  %v8283_v33 = vmul.f32 %v7766_v4, %v7766_v4  ;;  %v4907_v37 = vrot.slane %v4905_v14, 5 }
 0x8e7   : > { %v6513_v5 = vpop.f32.mrf.mxu2 }
 0x8e8   : > { %v8410_v55 = vadd.f32 %v8409_v32, %v8283_v33  ;;  %v6679_v23 = vadd.f32 %v6513_v5, %v5450_v35  ;;  %v7057_v36 = vpop.f32.mrf.mxu3  ;;  %v4918_v5 = vor.u32 %v4917_v30, %v4913_v48 }
 0x8e9   : > { %v5287_v18 = vpop.f32.mrf.mxu1 }
 0x8ea   : > { %v7223_v28 = vadd.f32 %v7057_v36, %v6679_v23  ;;  %v13097_v36 = vpack.c.b16 %v6738_v24, %v6737_v26  ;;  %v4919_v1 = vrot.slane %v4918_v5, 4 }
 0x8eb   : > { %v7604_v56 = vpop.f32.mrf.mxu0 }
 0x8ec   : > { %v7767_v60 = vadd.f32 %v7601_v29, %v7223_v28  ;;  %5326 = vmatmul.bf16.gmra.mxu1 %v12040_v41  ;;  %6555 = vmatmul.bf16.gmra.mxu2 %v13006_v15  ;;  %v5451_v41 = vadd.f32 %v5287_v18, %v13707_v10  ;;  %v4902_v15 = vshrl.u32 %v13074_v40, 16  ;;  %v13093_v29 = vld [vmem:[%s10212_s13 + $0x29c] sm:$0xf]  ;;  %v7251_v18 = vrot.slane %v13080_v57, 5 }
 0x8ed   : > { %7099 = vmatmul.bf16.gmra.mxu3 %v13037_v52  ;;  %v7254_v57 = vrot.slane %v13093_v29, 5  ;;  %v13710_v10 = vld [vmem:[#allocation33_spill] sm:$0xff]  ;;  %v4925_v16 = vshrl.u32 %v13093_v29, 16 }
 0x8ee   : > { %7643 = vmatmul.bf16.gmra.mxu0 %v13068_v27  ;;  %v9714_v49 = vpack.c.bf16 %v7767_v60, %v7766_v4  ;;  %v8150_v43 = vadd.f32 %v8149_v51, %v7767_v60  ;;  %v8284_v19 = vmul.f32 %v7767_v60, %v7767_v60  ;;  %v4904_v47 = vrot.slane %v4902_v15, 4  ;;  %v13708_v4 = vld [vmem:[#allocation30_spill] sm:$0xff] }
 0x8ef   : > { %v6516_v39 = vpop.f32.mrf.mxu2  ;;  %v13709_v60 = vld [vmem:[#allocation42_spill] sm:$0xff]  ;;  %v7253_v3 = vrot.slane %v7251_v18, 4  ;;  %v7252_v31 = vsel %vm12042_vm5, %v9265_v11, %v7251_v18  ;;  %v4927_v30 = vrot.slane %v4925_v16, 4 }
 0x8f0   : > { %9826 = vst [vmem:[%s12280_s29 + $0x198] sm:$0xff] %v9714_v49   ;;  %v8411_v59 = vadd.f32 %v8410_v55, %v8284_v19  ;;  %v6680_v22 = vadd.f32 %v6516_v39, %v5451_v41  ;;  %v7060_v50 = vpop.f32.mrf.mxu3  ;;  %v4908_v51 = vor.u32 %v4907_v37, %v4904_v47  ;;  %v4921_v55 = vshll.u32 %v13093_v29, 16  ;;  %v13108_v39 = vld [vmem:[%s10212_s13 + $0x2a0] sm:$0xf]  ;;  %v420_v29 = vld [vmem:[%s10212_s13 + $0x2a4] sm:$0x1] }
 0x8f1   : > { %v5289_v0 = vpop.f32.mrf.mxu1  ;;  %v7255_v47 = vsel %vm12042_vm5, %v7253_v3, %v7254_v57  ;;  %v7279_v26 = vunpack.c.l.b16 %v7252_v31  ;;  %v4941_v18 = vshll.u32 %v420_v29, 16  ;;  %s8590_s13 = sshll.u32 %s10200_s5, 3 }
 0x8f2   : > { %v7224_v42 = vadd.f32 %v7060_v50, %v6680_v22  ;;  %v5452_v17 = vadd.f32 %v5289_v0, %v13708_v4  ;;  %v4909_v28 = vrot.slane %v4908_v51, 4  ;;  %v4923_v45 = vrot.slane %v4921_v55, 5  ;;  %s239_s7 = scalar_lea.vmem %s13187_s3, %s8590_s13  ;;  %s245_s10 = scalar_lea.vmem %s13188_s4, %s8590_s13 }
 0x8f3   : > { %v7606_v53 = vpop.f32.mrf.mxu0  ;;  %v4931_v0 = vshll.u32 %v13108_v39, 16  ;;  %v7280_v24 = vunpack.c.l.b16 %v7255_v47 }
 0x8f4   : > { %v7768_v32 = vadd.f32 %v7604_v56, %v7224_v42  ;;  %v4914_v14 = vsel %vm10547_vm2, %v4909_v28, %v4913_v48  ;;  %v4924_v40 = vsel %vm10547_vm2, %v4919_v1, %v4923_v45  ;;  %v4935_v42 = vshrl.u32 %v13108_v39, 16 }
 0x8f5   : > { %v4962_v37 = vunpack.c.l.b16 %v4914_v14  ;;  %v7283_v28 = vpack.c.b16 %v7280_v24, %v7279_v26  ;;  %v13714_v26 = vld [vmem:[#allocation158_spill] sm:$0xff] }
 0x8f6   : > { %v8151_v21 = vadd.f32 %v8150_v43, %v7768_v32  ;;  %v8285_v61 = vmul.f32 %v7768_v32, %v7768_v32 }
 0x8f7   : > { %v6518_v7 = vpop.f32.mrf.mxu2 }
 0x8f8   : > { %v8412_v33 = vadd.f32 %v8411_v59, %v8285_v61  ;;  %v6681_v2 = vadd.f32 %v6518_v7, %v5452_v17  ;;  %v7062_v35 = vpop.f32.mrf.mxu3  ;;  %v4937_v61 = vrot.slane %v4935_v42, 4  ;;  %v13712_v7 = vld [vmem:[#allocation36_spill] sm:$0xff] }
 0x8f9   : > { %v5292_v23 = vpop.f32.mrf.mxu1 }
 0x8fa   : > { %v7225_v38 = vadd.f32 %v7062_v35, %v6681_v2  ;;  %v5453_v41 = vadd.f32 %v5292_v23, %v13710_v10  ;;  %v4928_v23 = vor.u32 %v4927_v30, %v4923_v45  ;;  %v7256_v45 = vrot.slane %v7254_v57, 4 }
 0x8fb   : > { %v7609_v44 = vpop.f32.mrf.mxu0  ;;  %v7260_v10 = vrot.slane %v420_v29, 5 }
 0x8fc   : > { %v7769_v56 = vadd.f32 %v7606_v53, %v7225_v38  ;;  %5331 = vmatmul.bf16.gmra.mxu1 %v13709_v60  ;;  %6560 = vmatmul.bf16.gmra.mxu2 %v13021_v9  ;;  %v4929_v3 = vrot.slane %v4928_v23, 4 }
 0x8fd   : > { %7104 = vmatmul.bf16.gmra.mxu3 %v13052_v8 }
 0x8fe   : > { %7648 = vmatmul.bf16.gmra.mxu0 %v13097_v36  ;;  %v9719_v49 = vpack.c.bf16 %v7769_v56, %v7768_v32  ;;  %v8152_v43 = vadd.f32 %v8151_v21, %v7769_v56  ;;  %v8286_v19 = vmul.f32 %v7769_v56, %v7769_v56  ;;  %v4963_v32 = vunpack.c.l.b16 %v4924_v40 }
 0x8ff   : > { %v6521_v15 = vpop.f32.mrf.mxu2  ;;  %v4933_v21 = vrot.slane %v4931_v0, 5  ;;  %v7257_v56 = vrot.slane %v13108_v39, 5  ;;  %v13713_v39 = vld [vmem:[#allocation39_spill] sm:$0xff] }
 0x900   : > { %9827 = vst [vmem:[%s12280_s29 + $0x1a0] sm:$0xff] %v9719_v49   ;;  %v8413_v59 = vadd.f32 %v8412_v33, %v8286_v19  ;;  %v6682_v22 = vadd.f32 %v6521_v15, %v5453_v41  ;;  %v7065_v50 = vpop.f32.mrf.mxu3  ;;  %v4966_v2 = vpack.c.b16 %v4963_v32, %v4962_v37  ;;  %v4943_v49 = vrot.slane %v4941_v18, 5 }
 0x901   : > { %v5294_v63 = vpop.f32.mrf.mxu1  ;;  %v7259_v19 = vrot.slane %v7257_v56, 4  ;;  %v7258_v42 = vsel %vm12042_vm5, %v7256_v45, %v7257_v56 }
 0x902   : > { %v7226_v53 = vadd.f32 %v7065_v50, %v6682_v22  ;;  %v5454_v51 = vadd.f32 %v5294_v63, %v13712_v7  ;;  %v4934_v63 = vsel %vm10547_vm2, %v4929_v3, %v4933_v21  ;;  %v7281_v37 = vunpack.c.l.b16 %v7258_v42 }
 0x903   : > { %v7611_v12 = vpop.f32.mrf.mxu0  ;;  %v4964_v31 = vunpack.c.l.b16 %v4934_v63 }
 0x904   : > { %v7770_v48 = vadd.f32 %v7609_v44, %v7226_v53  ;;  %v4938_v44 = vor.u32 %v4937_v61, %v4933_v21  ;;  %v7261_v53 = vsel %vm12042_vm5, %v7259_v19, %v7260_v10 }
 0x905   : > { %v7282_v32 = vunpack.c.l.b16 %v7261_v53 }
 0x906   : > { %v8153_v4 = vadd.f32 %v8152_v43, %v7770_v48  ;;  %v8287_v17 = vmul.f32 %v7770_v48, %v7770_v48  ;;  %v4939_v43 = vrot.slane %v4938_v44, 4 }
 0x907   : > { %v6523_v33 = vpop.f32.mrf.mxu2  ;;  %v7284_v7 = vpack.c.b16 %v7282_v32, %v7281_v37 }
 0x908   : > { %v8414_v35 = vadd.f32 %v8413_v59, %v8287_v17  ;;  %v6683_v5 = vadd.f32 %v6523_v33, %v5454_v51  ;;  %v7067_v55 = vpop.f32.mrf.mxu3 }
 0x909   : > { %v5297_v38 = vpop.f32.mrf.mxu1 }
 0x90a   : > { %v7227_v60 = vadd.f32 %v7067_v55, %v6683_v5  ;;  %v5455_v59 = vadd.f32 %v5297_v38, %v13713_v39  ;;  %v13715_v55 = vld [vmem:[#allocation46_spill] sm:$0xff] }
 0x90b   : > { %v7614_v1 = vpop.f32.mrf.mxu0 }
 0x90c   : > { %v7771_v11 = vadd.f32 %v7611_v12, %v7227_v60  ;;  %5336 = vmatmul.bf16.gmra.mxu1 %v4966_v2  ;;  %6565 = vmatmul.bf16.gmra.mxu2 %v13037_v52 }
 0x90d   : > { %7109 = vmatmul.bf16.gmra.mxu3 %v13068_v27  ;;  %v4944_v27 = vsel %vm10547_vm2, %v4939_v43, %v4943_v49  ;;  %v13716_v49 = vld [vmem:[#allocation49_spill] sm:$0xff] }
 0x90e   : > { %7653 = vmatmul.bf16.gmra.mxu0 %v7283_v28  ;;  %v9724_v41 = vpack.c.bf16 %v7771_v11, %v7770_v48  ;;  %v8154_v15 = vadd.f32 %v8153_v4, %v7771_v11  ;;  %v8288_v14 = vmul.f32 %v7771_v11, %v7771_v11  ;;  %v4965_v47 = vunpack.c.l.b16 %v4944_v27 }
 0x90f   : > { %v6526_v22 = vpop.f32.mrf.mxu2 }
 0x910   : > { %9828 = vst [vmem:[%s12280_s29 + $0x1a8] sm:$0xff] %v9724_v41   ;;  %v8415_v50 = vadd.f32 %v8414_v35, %v8288_v14  ;;  %v6684_v40 = vadd.f32 %v6526_v22, %v5455_v59  ;;  %v7070_v16 = vpop.f32.mrf.mxu3  ;;  %v4967_v4 = vpack.c.b16 %v4965_v47, %v4964_v31 }
 0x911   : > { %v5299_v52 = vpop.f32.mrf.mxu1 }
 0x912   : > { %v7228_v57 = vadd.f32 %v7070_v16, %v6684_v40  ;;  %v5456_v24 = vadd.f32 %v5299_v52, %v13714_v26 }
 0x913   : > { %v7616_v0 = vpop.f32.mrf.mxu0 }
 0x914   : > { %v7772_v12 = vadd.f32 %v7614_v1, %v7228_v57 }
 0x916   : > { %v8155_v48 = vadd.f32 %v8154_v15, %v7772_v12  ;;  %v8289_v30 = vmul.f32 %v7772_v12, %v7772_v12 }
 0x917   : > { %v6528_v29 = vpop.f32.mrf.mxu2 }
 0x918   : > { %v8416_v9 = vadd.f32 %v8415_v50, %v8289_v30  ;;  %v6685_v21 = vadd.f32 %v6528_v29, %v5456_v24  ;;  %v7072_v61 = vpop.f32.mrf.mxu3 }
 0x919   : > { %v5302_v17 = vpop.f32.mrf.mxu1 }
 0x91a   : > { %v7229_v51 = vadd.f32 %v7072_v61, %v6685_v21  ;;  %v5457_v23 = vadd.f32 %v5302_v17, %v13715_v55 }
 0x91b   : > { %v7619_v13 = vpop.f32.mrf.mxu0 }
 0x91c   : > { %v7773_v33 = vadd.f32 %v7616_v0, %v7229_v51  ;;  %5341 = vmatmul.bf16.gmra.mxu1 %v4967_v4  ;;  %6570 = vmatmul.bf16.gmra.mxu2 %v13052_v8  ;;  %v13717_v4 = vld [vmem:[#allocation63_spill] sm:$0xff] }
 0x91d   : > { %7114 = vmatmul.bf16.gmra.mxu3 %v13097_v36 }
 0x91e   : > { %7658 = vmatmul.bf16.gmra.mxu0 %v7284_v7  ;;  %v9729_v2 = vpack.c.bf16 %v7773_v33, %v7772_v12  ;;  %v8156_v35 = vadd.f32 %v8155_v48, %v7773_v33  ;;  %v8290_v5 = vmul.f32 %v7773_v33, %v7773_v33 }
 0x91f   : > { %v6531_v18 = vpop.f32.mrf.mxu2 }
 0x920   : > { %9829 = vst [vmem:[%s12280_s29 + $0x1b0] sm:$0xff] %v9729_v2   ;;  %v8417_v38 = vadd.f32 %v8416_v9, %v8290_v5  ;;  %v6686_v28 = vadd.f32 %v6531_v18, %v5457_v23  ;;  %v7075_v44 = vpop.f32.mrf.mxu3  ;;  %v13718_v18 = vld [vmem:[#allocation52_spill] sm:$0xff] }
 0x921   : > { %v5304_v56 = vpop.f32.mrf.mxu1 }
 0x922   : > { %v7230_v60 = vadd.f32 %v7075_v44, %v6686_v28  ;;  %v5458_v36 = vadd.f32 %v5304_v56, %v13716_v49 }
 0x923   : > { %v7621_v1 = vpop.f32.mrf.mxu0 }
 0x924   : > { %v7774_v11 = vadd.f32 %v7619_v13, %v7230_v60 }
 0x926   : > { %v8157_v3 = vadd.f32 %v8156_v35, %v7774_v11  ;;  %v8291_v8 = vmul.f32 %v7774_v11, %v7774_v11 }
 0x927   : > { %v6533_v43 = vpop.f32.mrf.mxu2 }
 0x928   : > { %v8418_v45 = vadd.f32 %v8417_v38, %v8291_v8  ;;  %v6687_v19 = vadd.f32 %v6533_v43, %v5458_v36  ;;  %v7077_v10 = vpop.f32.mrf.mxu3 }
 0x929   : > { %v5307_v41 = vpop.f32.mrf.mxu1 }
 0x92a   : > { %v7231_v15 = vadd.f32 %v7077_v10, %v6687_v19  ;;  %v5459_v40 = vadd.f32 %v5307_v41, %v12121_v25 }
 0x92b   : > { %v7624_v14 = vpop.f32.mrf.mxu0 }
 0x92c   : > { %v7775_v39 = vadd.f32 %v7621_v1, %v7231_v15 }
 0x92e   : > { %v9734_v59 = vpack.c.bf16 %v7775_v39, %v7774_v11  ;;  %v8158_v22 = vadd.f32 %v8157_v3, %v7775_v39  ;;  %v8292_v50 = vmul.f32 %v7775_v39, %v7775_v39 }
 0x92f   : > { %v6536_v16 = vpop.f32.mrf.mxu2 }
 0x930   : > { %9830 = vst [vmem:[%s12280_s29 + $0x1b8] sm:$0xff] %v9734_v59   ;;  %v8419_v52 = vadd.f32 %v8418_v45, %v8292_v50  ;;  %v6688_v63 = vadd.f32 %v6536_v16, %v5459_v40  ;;  %v7080_v27 = vpop.f32.mrf.mxu3  ;;  %v13719_v45 = vld [vmem:[#allocation55_spill] sm:$0xff] }
 0x931   : > { %v5309_v57 = vpop.f32.mrf.mxu1 }
 0x932   : > { %v7232_v0 = vadd.f32 %v7080_v27, %v6688_v63  ;;  %v5460_v47 = vadd.f32 %v5309_v57, %v12130_v20 }
 0x933   : > { %v7626_v42 = vpop.f32.mrf.mxu0 }
 0x934   : > { %v7776_v53 = vadd.f32 %v7624_v14, %v7232_v0 }
 0x936   : > { %v8159_v12 = vadd.f32 %v8158_v22, %v7776_v53  ;;  %v8293_v31 = vmul.f32 %v7776_v53, %v7776_v53 }
 0x937   : > { %v6538_v37 = vpop.f32.mrf.mxu2 }
 0x938   : > { %v8420_v32 = vadd.f32 %v8419_v52, %v8293_v31  ;;  %v6689_v48 = vadd.f32 %v6538_v37, %v5460_v47  ;;  %v7082_v30 = vpop.f32.mrf.mxu3  ;;  %v13720_v52 = vld [vmem:[#allocation70_spill] sm:$0xff] }
 0x939   : > { %v5312_v26 = vpop.f32.mrf.mxu1 }
 0x93a   : > { %v7233_v25 = vadd.f32 %v7082_v30, %v6689_v48  ;;  %v5461_v17 = vadd.f32 %v5312_v26, %v13717_v4 }
 0x93b   : > { %v7629_v24 = vpop.f32.mrf.mxu0 }
 0x93c   : > { %v7777_v29 = vadd.f32 %v7626_v42, %v7233_v25 }
 0x93e   : > { %v9739_v9 = vpack.c.bf16 %v7777_v29, %v7776_v53  ;;  %v8160_v21 = vadd.f32 %v8159_v12, %v7777_v29  ;;  %v8294_v61 = vmul.f32 %v7777_v29, %v7777_v29 }
 0x93f   : > { %v6541_v7 = vpop.f32.mrf.mxu2 }
 0x940   : > { %9831 = vst [vmem:[%s12280_s29 + $0x1c0] sm:$0xff] %v9739_v9   ;;  %v8421_v51 = vadd.f32 %v8420_v32, %v8294_v61  ;;  %v6690_v13 = vadd.f32 %v6541_v7, %v5461_v17  ;;  %v7085_v33 = vpop.f32.mrf.mxu3 }
 0x941   : > { %v5314_v2 = vpop.f32.mrf.mxu1 }
 0x942   : > { %v7234_v20 = vadd.f32 %v7085_v33, %v6690_v13  ;;  %v5462_v38 = vadd.f32 %v5314_v2, %v13718_v18 }
 0x943   : > { %v7631_v35 = vpop.f32.mrf.mxu0 }
 0x944   : > { %v7778_v5 = vadd.f32 %v7629_v24, %v7234_v20 }
 0x946   : > { %v8161_v55 = vadd.f32 %v8160_v21, %v7778_v5  ;;  %v8295_v23 = vmul.f32 %v7778_v5, %v7778_v5 }
 0x947   : > { %v6543_v28 = vpop.f32.mrf.mxu2 }
 0x948   : > { %v8422_v44 = vadd.f32 %v8421_v51, %v8295_v23  ;;  %v6691_v56 = vadd.f32 %v6543_v28, %v5462_v38  ;;  %v7087_v60 = vpop.f32.mrf.mxu3  ;;  %v13721_v51 = vld [vmem:[#allocation58_spill] sm:$0xff] }
 0x949   : > { %v5317_v1 = vpop.f32.mrf.mxu1 }
 0x94a   : > { %v7235_v11 = vadd.f32 %v7087_v60, %v6691_v56  ;;  %v5463_v19 = vadd.f32 %v5317_v1, %v13719_v45 }
 0x94b   : > { %v7634_v3 = vpop.f32.mrf.mxu0 }
 0x94c   : > { %v7779_v8 = vadd.f32 %v7631_v35, %v7235_v11 }
 0x94e   : > { %v9744_v49 = vpack.c.bf16 %v7779_v8, %v7778_v5  ;;  %v8162_v36 = vadd.f32 %v8161_v55, %v7779_v8  ;;  %v8296_v43 = vmul.f32 %v7779_v8, %v7779_v8 }
 0x94f   : > { %v6546_v10 = vpop.f32.mrf.mxu2 }
 0x950   : > { %9832 = vst [vmem:[%s12280_s29 + $0x1c8] sm:$0xff] %v9744_v49   ;;  %v8423_v41 = vadd.f32 %v8422_v44, %v8296_v43  ;;  %v6692_v15 = vadd.f32 %v6546_v10, %v5463_v19  ;;  %v7090_v14 = vpop.f32.mrf.mxu3  ;;  %v13722_v44 = vld [vmem:[#allocation61_spill] sm:$0xff] }
 0x951   : > { %v5319_v39 = vpop.f32.mrf.mxu1  ;;  %v13723_v10 = vld [vmem:[#allocation77_spill] sm:$0xff] }
 0x952   : > { %v7236_v59 = vadd.f32 %v7090_v14, %v6692_v15  ;;  %v5464_v63 = vadd.f32 %v5319_v39, %v13720_v52 }
 0x953   : > { %v7636_v22 = vpop.f32.mrf.mxu0 }
 0x954   : > { %v7780_v50 = vadd.f32 %v7634_v3, %v7236_v59 }
 0x956   : > { %v8163_v40 = vadd.f32 %v8162_v36, %v7780_v50  ;;  %v8297_v16 = vmul.f32 %v7780_v50, %v7780_v50 }
 0x957   : > { %v6548_v27 = vpop.f32.mrf.mxu2 }
 0x958   : > { %v8424_v57 = vadd.f32 %v8423_v41, %v8297_v16  ;;  %v6693_v0 = vadd.f32 %v6548_v27, %v5464_v63  ;;  %v7092_v42 = vpop.f32.mrf.mxu3 }
 0x959   : > { %v5322_v53 = vpop.f32.mrf.mxu1 }
 0x95a   : > { %v7237_v12 = vadd.f32 %v7092_v42, %v6693_v0  ;;  %v5465_v30 = vadd.f32 %v5322_v53, %v12178_v54 }
 0x95b   : > { %v7639_v31 = vpop.f32.mrf.mxu0 }
 0x95c   : > { %v7781_v47 = vadd.f32 %v7636_v22, %v7237_v12 }
 0x95e   : > { %v9749_v37 = vpack.c.bf16 %v7781_v47, %v7780_v50  ;;  %v8164_v32 = vadd.f32 %v8163_v40, %v7781_v47  ;;  %v8298_v48 = vmul.f32 %v7781_v47, %v7781_v47 }
 0x95f   : > { %v6551_v26 = vpop.f32.mrf.mxu2 }
 0x960   : > { %9833 = vst [vmem:[%s12280_s29 + $0x1d0] sm:$0xff] %v9749_v37   ;;  %v8425_v25 = vadd.f32 %v8424_v57, %v8298_v48  ;;  %v6694_v24 = vadd.f32 %v6551_v26, %v5465_v30  ;;  %v7095_v29 = vpop.f32.mrf.mxu3 }
 0x961   : > { %v5324_v9 = vpop.f32.mrf.mxu1 }
 0x962   : > { %v7238_v21 = vadd.f32 %v7095_v29, %v6694_v24  ;;  %v5466_v13 = vadd.f32 %v5324_v9, %v13721_v51 }
 0x963   : > { %v7641_v61 = vpop.f32.mrf.mxu0 }
 0x964   : > { %v7782_v4 = vadd.f32 %v7639_v31, %v7238_v21 }
 0x966   : > { %v8165_v17 = vadd.f32 %v8164_v32, %v7782_v4  ;;  %v8299_v7 = vmul.f32 %v7782_v4, %v7782_v4 }
 0x967   : > { %v6553_v33 = vpop.f32.mrf.mxu2 }
 0x968   : > { %v8426_v2 = vadd.f32 %v8425_v25, %v8299_v7  ;;  %v6695_v20 = vadd.f32 %v6553_v33, %v5466_v13  ;;  %v7097_v35 = vpop.f32.mrf.mxu3 }
 0x969   : > { %v5327_v5 = vpop.f32.mrf.mxu1 }
 0x96a   : > { %v7239_v54 = vadd.f32 %v7097_v35, %v6695_v20  ;;  %v5467_v56 = vadd.f32 %v5327_v5, %v13722_v44 }
 0x96b   : > { %v7644_v55 = vpop.f32.mrf.mxu0 }
 0x96c   : > { %v7783_v23 = vadd.f32 %v7641_v61, %v7239_v54 }
 0x96e   : > { %v9754_v18 = vpack.c.bf16 %v7783_v23, %v7782_v4  ;;  %v8166_v38 = vadd.f32 %v8165_v17, %v7783_v23  ;;  %v8300_v28 = vmul.f32 %v7783_v23, %v7783_v23 }
 0x96f   : > { %v6556_v60 = vpop.f32.mrf.mxu2 }
 0x970   : > { %9834 = vst [vmem:[%s12280_s29 + $0x1d8] sm:$0xff] %v9754_v18   ;;  %v8427_v1 = vadd.f32 %v8426_v2, %v8300_v28  ;;  %v6696_v11 = vadd.f32 %v6556_v60, %v5467_v56  ;;  %v7100_v3 = vpop.f32.mrf.mxu3  ;;  %v13724_v18 = vld [vmem:[#allocation65_spill] sm:$0xff] }
 0x971   : > { %v5329_v8 = vpop.f32.mrf.mxu1 }
 0x972   : > { %v7240_v49 = vadd.f32 %v7100_v3, %v6696_v11  ;;  %v5468_v41 = vadd.f32 %v5329_v8, %v13723_v10 }
 0x973   : > { %v7646_v36 = vpop.f32.mrf.mxu0 }
 0x974   : > { %v7784_v43 = vadd.f32 %v7644_v55, %v7240_v49 }
 0x976   : > { %v8167_v45 = vadd.f32 %v8166_v38, %v7784_v43  ;;  %v8301_v19 = vmul.f32 %v7784_v43, %v7784_v43 }
 0x977   : > { %v6558_v15 = vpop.f32.mrf.mxu2 }
 0x978   : > { %v8428_v14 = vadd.f32 %v8427_v1, %v8301_v19  ;;  %v6697_v39 = vadd.f32 %v6558_v15, %v5468_v41  ;;  %v7102_v59 = vpop.f32.mrf.mxu3 }
 0x979   : > { %v5332_v22 = vpop.f32.mrf.mxu1 }
 0x97a   : > { %v7241_v50 = vadd.f32 %v7102_v59, %v6697_v39  ;;  %v5469_v57 = vadd.f32 %v5332_v22, %v12215_v58 }
 0x97b   : > { %v7649_v40 = vpop.f32.mrf.mxu0 }
 0x97c   : > { %v7785_v16 = vadd.f32 %v7646_v36, %v7241_v50 }
 0x97e   : > { %v9759_v52 = vpack.c.bf16 %v7785_v16, %v7784_v43  ;;  %v8168_v63 = vadd.f32 %v8167_v45, %v7785_v16  ;;  %v8302_v27 = vmul.f32 %v7785_v16, %v7785_v16 }
 0x97f   : > { %v6561_v0 = vpop.f32.mrf.mxu2 }
 0x980   : > { %9835 = vst [vmem:[%s12280_s29 + $0x1e0] sm:$0xff] %v9759_v52   ;;  %v8429_v42 = vadd.f32 %v8428_v14, %v8302_v27  ;;  %v6698_v53 = vadd.f32 %v6561_v0, %v5469_v57  ;;  %v7105_v12 = vpop.f32.mrf.mxu3 }
 0x981   : > { %v5334_v31 = vpop.f32.mrf.mxu1 }
 0x982   : > { %v7242_v47 = vadd.f32 %v7105_v12, %v6698_v53  ;;  %v5470_v26 = vadd.f32 %v5334_v31, %v12223_v6 }
 0x983   : > { %v7651_v37 = vpop.f32.mrf.mxu0 }
 0x984   : > { %v7786_v32 = vadd.f32 %v7649_v40, %v7242_v47 }
 0x986   : > { %v8169_v48 = vadd.f32 %v8168_v63, %v7786_v32  ;;  %v8303_v30 = vmul.f32 %v7786_v32, %v7786_v32 }
 0x987   : > { %v6563_v25 = vpop.f32.mrf.mxu2 }
 0x988   : > { %v8430_v24 = vadd.f32 %v8429_v42, %v8303_v30  ;;  %v6699_v29 = vadd.f32 %v6563_v25, %v5470_v26  ;;  %v7107_v9 = vpop.f32.mrf.mxu3 }
 0x989   : > { %v5337_v21 = vpop.f32.mrf.mxu1 }
 0x98a   : > { %v7243_v58 = vadd.f32 %v7107_v9, %v6699_v29  ;;  %v5471_v13 = vadd.f32 %v5337_v21, %v12233_v46 }
 0x98b   : > { %v7654_v4 = vpop.f32.mrf.mxu0 }
 0x98c   : > { %v7787_v61 = vadd.f32 %v7651_v37, %v7243_v58 }
 0x98e   : > { %v9764_v17 = vpack.c.bf16 %v7787_v61, %v7786_v32  ;;  %v8170_v7 = vadd.f32 %v8169_v48, %v7787_v61  ;;  %v8304_v51 = vmul.f32 %v7787_v61, %v7787_v61 }
 0x98f   : > { %v6566_v33 = vpop.f32.mrf.mxu2 }
 0x990   : > { %9836 = vst [vmem:[%s12280_s29 + $0x1e8] sm:$0xff] %v9764_v17   ;;  %v8431_v2 = vadd.f32 %v8430_v24, %v8304_v51  ;;  %v6700_v20 = vadd.f32 %v6566_v33, %v5471_v13  ;;  %v7110_v35 = vpop.f32.mrf.mxu3 }
 0x991   : > { %v5339_v5 = vpop.f32.mrf.mxu1 }
 0x992   : > { %v7244_v6 = vadd.f32 %v7110_v35, %v6700_v20  ;;  %v5472_v38 = vadd.f32 %v5339_v5, %v13724_v18 }
 0x993   : > { %v7656_v28 = vpop.f32.mrf.mxu0 }
 0x994   : > { %v7788_v54 = vadd.f32 %v7654_v4, %v7244_v6 }
 0x996   : > { %v8171_v55 = vadd.f32 %v8170_v7, %v7788_v54  ;;  %v8305_v23 = vmul.f32 %v7788_v54, %v7788_v54 }
 0x997   : > { %v6568_v44 = vpop.f32.mrf.mxu2 }
 0x998   : > { %v8432_v56 = vadd.f32 %v8431_v2, %v8305_v23  ;;  %v6701_v60 = vadd.f32 %v6568_v44, %v5472_v38  ;;  %v7112_v1 = vpop.f32.mrf.mxu3 }
 0x999   : > { %v5342_v11 = vpop.f32.mrf.mxu1 }
 0x99a   : > { %v7245_v46 = vadd.f32 %v7112_v1, %v6701_v60  ;;  %v5473_v43 = vadd.f32 %v5342_v11, %v12252_v62 }
 0x99b   : > { %v7659_v15 = vpop.f32.mrf.mxu0 }
 0x99c   : > { %v7789_v3 = vadd.f32 %v7656_v28, %v7245_v46 }
 0x99e   : > { %v9769_v8 = vpack.c.bf16 %v7789_v3, %v7788_v54  ;;  %v8172_v49 = vadd.f32 %v8171_v55, %v7789_v3  ;;  %v8306_v36 = vmul.f32 %v7789_v3, %v7789_v3 }
 0x99f   : > { %v6571_v45 = vpop.f32.mrf.mxu2 }
 0x9a0   : > { %9837 = vst [vmem:[%s12280_s29 + $0x1f0] sm:$0xff] %v9769_v8   ;;  %v8433_v19 = vadd.f32 %v8432_v56, %v8306_v36  ;;  %v6702_v10 = vadd.f32 %v6571_v45, %v5473_v43  ;;  %v7115_v41 = vpop.f32.mrf.mxu3 }
 0x9a1   : > { %v5344_v39 = vpop.f32.mrf.mxu1 }
 0x9a2   : > { %v7246_v14 = vadd.f32 %v7115_v41, %v6702_v10  ;;  %v5474_v40 = vadd.f32 %v5344_v39, %v12260_v34 }
 0x9a3   : > { %v7661_v57 = vpop.f32.mrf.mxu0 }
 0x9a4   : > { %v7790_v59 = vadd.f32 %v7659_v15, %v7246_v14 }
 0x9a6   : > { %v8173_v22 = vadd.f32 %v8172_v49, %v7790_v59  ;;  %v8307_v50 = vmul.f32 %v7790_v59, %v7790_v59 }
 0x9a7   : > { %v6573_v16 = vpop.f32.mrf.mxu2 }
 0x9a8   : > { %v8434_v52 = vadd.f32 %v8433_v19, %v8307_v50  ;;  %v6703_v63 = vadd.f32 %v6573_v16, %v5474_v40  ;;  %v7117_v27 = vpop.f32.mrf.mxu3 }
 0x9aa   : > { %v7247_v62 = vadd.f32 %v7117_v27, %v6703_v63 }
 0x9ac   : > { %v7791_v0 = vadd.f32 %v7661_v57, %v7247_v62 }
 0x9ae   : > { %v9774_v42 = vpack.c.bf16 %v7791_v0, %v7790_v59  ;;  %v8174_v53 = vadd.f32 %v8173_v22, %v7791_v0  ;;  %v8308_v12 = vmul.f32 %v7791_v0, %v7791_v0 }
 0x9b0   : > { %9838 = vst [vmem:[%s12280_s29 + $0x1f8] sm:$0xff] %v9774_v42   ;;  %v8175_v31 = vrot.slane %v8174_v53, 4  ;;  %v8435_v47 = vadd.f32 %v8434_v52, %v8308_v12 }
 0x9b2   : > { %v8176_v37 = vadd.f32 %v8175_v31, %v8174_v53  ;;  %v8436_v32 = vrot.slane %v8435_v47, 4 }
 0x9b4   : > { %v8177_v48 = vrot.slane %v8176_v37, 2  ;;  %v8437_v30 = vadd.f32 %v8436_v32, %v8435_v47 }
 0x9b6   : > { %v8178_v34 = vadd.f32 %v8177_v48, %v8176_v37  ;;  %v8438_v26 = vrot.slane %v8437_v30, 2 }
 0x9b8   : > { %v8179_v25 = vrot.slane %v8178_v34, 1  ;;  %v8439_v24 = vadd.f32 %v8438_v26, %v8437_v30 }
 0x9ba   : > { %v8180_v29 = vadd.f32 %v8179_v25, %v8178_v34  ;;  %v8440_v9 = vrot.slane %v8439_v24, 1 }
 0x9bc   : > { %v8441_v21 = vadd.f32 %v8440_v9, %v8439_v24  ;;  %8442 = vst [vmem:[%s239_s7] sm:$0xff] %v8180_v29 }
 0x9be   : > { %8443 = vst [vmem:[%s245_s10] sm:$0xff] %v8441_v21 }
 0x9bf PF: > { %s15_s17 = sadd.s32 1, %s10133_s17   ;;  %s13725_s15 = smov %s10129_s16 }
 0x9c0   : > { %p12_p6 = scmp.ge.s32.totalorder %s15_s17, 4   ;;  %s13726_s16 = smov %s13728_s18 }
 0x9c2   :  { %14 = sbr.rel (!%p12_p6) target bundleno = 2 (0x2), region = 91 }

</bundles_post_ra>
